<compile_context>
chip_gen: v7x
topology: tpu7x:2x2x1
jax: 0.10.0
libtpu: 0.0.40
codegen_flags: <defaults>
</compile_context>

<pallas_src>
import jax
import jax.numpy as jnp
import numpy as np
from jax.experimental import pallas as pl
from jax.experimental.pallas import tpu as pltpu

EPS = 1e-5
LANES = 128    # MXU / vreg lane width
SUB = 16       # bf16 sublane tile height -> keep all row offsets 16-aligned


def _round_up(x, m):
    return (x + m - 1) // m * m


# ------------------------------ Pallas kernel -------------------------------

def _make_resn_kernel(CP, npad, margin, Wp):
    """Fused ResN forward; static geometry baked in via closure.

    Activation slabs use a flat "zero-framed" layout: rows [margin, margin+npad)
    hold the zero-padded (Hp x Wp) image flattened row-major.  Wp and margin are
    multiples of 16, so every +-Wp row shift is bf16-tile aligned.
    """

    def silu(y):                                                   # EUP slots
        return y * pl.reciprocal(1.0 + jnp.exp(-y), approx=True)

    def kernel(xp_ref, w1_ref, s1_ref, w2_ref, s2_ref, w3_ref, s3_ref, mask_ref,
               o_ref, h_buf, p_scr):
        # Zero the scratch margins (tiny) so nothing below can observe
        # uninitialised VMEM, even for the discarded frame rows.
        zh = jnp.zeros((margin, CP), h_buf.dtype)
        zp = jnp.zeros((margin, CP), p_scr.dtype)
        h_buf[pl.ds(0, margin), :] = zh
        h_buf[pl.ds(margin + npad, margin), :] = zh
        p_scr[0, pl.ds(0, margin), :] = zp
        p_scr[0, pl.ds(margin + npad, margin), :] = zp
        p_scr[1, pl.ds(0, margin), :] = zp
        p_scr[1, pl.ds(margin + npad, margin), :] = zp

        # ---- stem: 3x3 Conv(C->C)+BN+SiLU as ONE matmul over tap-packed K ----
        y0 = silu(jnp.dot(xp_ref[...], w1_ref[...],
                          preferred_element_type=jnp.float32) + s1_ref[...])
        o_ref[...] = y0.astype(o_ref.dtype)        # park y0 in the output block

        # ---- cv1: 1x1 Conv(C->C//2)+BN+SiLU (reads y0 back from o_ref) ----
        h = silu(jnp.dot(o_ref[...], w2_ref[...],
                         preferred_element_type=jnp.float32) + s2_ref[...])
        # zero the frame: it is cv2's zero padding (single mask in the kernel)
        h_buf[pl.ds(margin, npad), :] = (h * mask_ref[...]).astype(h_buf.dtype)

        # ---- cv2: 3x3 Conv(C//2->C)+BN+SiLU ----
        # dy packed into the contraction (K = 3*CP, accumulated in the MXU);
        # all three operand loads are 16-row aligned.
        lhs = jnp.concatenate(
            [h_buf[pl.ds(margin + (ky - 1) * Wp, npad), :] for ky in range(3)],
            axis=1)                                              # (npad, 3*CP)
        # dx = -1 / +1 are +-1-row shifts of the f32 partial sums through
        # p_scr — the only two misaligned slices in the whole kernel.
        p0 = jnp.dot(lhs, w3_ref[0], preferred_element_type=jnp.float32)
        p_scr[0, pl.ds(margin, npad), :] = p0
        p2 = jnp.dot(lhs, w3_ref[2], preferred_element_type=jnp.float32)
        p_scr[1, pl.ds(margin, npad), :] = p2
        p1 = jnp.dot(lhs, w3_ref[1], preferred_element_type=jnp.float32)
        acc = (p1
               + p_scr[0, pl.ds(margin - 1, npad), :]     # P_dx=-1 at row r-1
               + p_scr[1, pl.ds(margin + 1, npad), :])    # P_dx=+1 at row r+1
        y2 = silu(acc + s3_ref[...])

        # residual: reuse the bf16 copy already parked in o_ref
        o_ref[...] = (o_ref[...] + y2).astype(o_ref.dtype)

    return kernel


# ------------------------------ JAX wrapper ---------------------------------

def _fold_conv_bn(p):
    """Fold conv bias + BN(eval) affine into per-cout scaled weights + shift."""
    scale = p["gamma"] / jnp.sqrt(p["var"] + EPS)
    shift = p["b"] * scale + p["beta"] - p["mean"] * scale
    w = p["w"] * scale[:, None, None, None]          # OIHW, scaled per-cout
    return w, shift


def resn_forward(x_nchw, params):
    """ResN(cin, n=1): y = y0 + cv2(cv1(y0)), y0 = SiLU(BN(Conv3x3(x)))."""
    N, C, H, W = x_nchw.shape
    c_ = params["cv1"]["w"].shape[0]
    CP = LANES
    assert 9 * C <= CP, "packed-tap stem needs cin*9 <= 128"
    assert C <= CP and c_ <= CP

    Hp = H + 2
    Wp = _round_up(W + 2, SUB)            # bf16-tile aligned row stride
    npad = Hp * Wp                        # flattened zero-padded image
    margin = _round_up(Wp + 1, SUB)       # frame margin >= max |tap row shift|
    tot = npad + 2 * margin

    # ---- layout plumbing (XLA): NCHW -> zero-padded NHWC -> flat slab ----
    x = jnp.transpose(x_nchw, (0, 2, 3, 1))
    x = jnp.pad(x, ((0, 0), (1, 1), (1, Wp - W - 1), (0, 0)))     # (N, Hp, Wp, C)
    x_flat = x.reshape(N, npad, C)

    # pack the stem's 9 taps into the contraction lanes (wrapper-side im2col):
    # lane t*C + c of row r holds x_flat[r + off_t, c].  Same HBM bytes as a
    # plain 128-lane channel-padded slab, but the stem becomes ONE matmul.
    def shift_rows(a, off):
        if off == 0:
            return a
        if off > 0:
            return jnp.pad(a[:, off:, :], ((0, 0), (0, off), (0, 0)))
        return jnp.pad(a[:, :off, :], ((0, 0), (-off, 0), (0, 0)))

    offs = [(ky - 1) * Wp + (kx - 1) for ky in range(3) for kx in range(3)]
    xp = jnp.concatenate([shift_rows(x_flat, o) for o in offs], axis=-1)
    xp = jnp.pad(xp, ((0, 0), (0, 0), (0, CP - 9 * C))).astype(jnp.bfloat16)

    # interior mask: 1 on real pixels, 0 on the zero-padding frame
    idx = jnp.arange(npad)
    rr, cc = idx // Wp, idx % Wp
    mask = (((rr >= 1) & (rr <= H) & (cc >= 1) & (cc <= W))
            .astype(jnp.float32)[:, None])                        # (npad, 1)

    # ---- fold conv bias + BN(eval); pack/pad weights for the MXU ----
    w1s, sh1 = _fold_conv_bn(params["conv"])          # (C, C, 3, 3)
    w1p = jnp.transpose(w1s, (2, 3, 1, 0)).reshape(9 * C, C)
    w1_pad = (jnp.zeros((CP, CP), jnp.float32)
              .at[:9 * C, :C].set(w1p).astype(jnp.bfloat16))
    s1_pad = jnp.zeros((1, CP), jnp.float32).at[0, :C].set(sh1)

    w2s, sh2 = _fold_conv_bn(params["cv1"])           # (c_, C, 1, 1)
    w2_pad = (jnp.zeros((CP, CP), jnp.float32)
              .at[:C, :c_].set(w2s[:, :, 0, 0].T).astype(jnp.bfloat16))
    s2_pad = jnp.zeros((1, CP), jnp.float32).at[0, :c_].set(sh2)

    w3s, sh3 = _fold_conv_bn(params["cv2"])           # (C, c_, 3, 3)
    w3_pad = jnp.zeros((3, 3 * CP, CP), jnp.float32)
    for kx in range(3):
        for ky in range(3):
            w3_pad = w3_pad.at[kx, ky * CP:ky * CP + c_, :C].set(
                w3s[:, :, ky, kx].T)
    w3_pad = w3_pad.astype(jnp.bfloat16)
    s3_pad = jnp.zeros((1, CP), jnp.float32).at[0, :C].set(sh3)

    kernel = _make_resn_kernel(CP, npad, margin, Wp)

    # VMEM budget from the actual working set (not a hard-coded 32 MiB)
    work_bytes = (4 * npad * CP * 2                       # in + out, double-buffered
                  + tot * CP * 2 + 2 * tot * CP * 4       # h_buf + p_scr scratch
                  + 2 * 2 * (w1_pad.size + w2_pad.size + w3_pad.size)
                  + 2 * 4 * (s1_pad.size + s2_pad.size + s3_pad.size + mask.size)
                  + 8 * npad * CP * 4)                    # f32 temporaries headroom
    vmem_limit = int(min(64 << 20, max(16 << 20, 2 * work_bytes)))

    out_pad = pl.pallas_call(
        kernel,
        out_shape=jax.ShapeDtypeStruct((N, npad, CP), jnp.bfloat16),
        grid=(N,),
        in_specs=[
            pl.BlockSpec((None, npad, CP), lambda n: (n, 0, 0)),   # packed x
            pl.BlockSpec(w1_pad.shape, lambda n: (0, 0)),
            pl.BlockSpec(s1_pad.shape, lambda n: (0, 0)),
            pl.BlockSpec(w2_pad.shape, lambda n: (0, 0)),
            pl.BlockSpec(s2_pad.shape, lambda n: (0, 0)),
            pl.BlockSpec(w3_pad.shape, lambda n: (0, 0, 0)),
            pl.BlockSpec(s3_pad.shape, lambda n: (0, 0)),
            pl.BlockSpec(mask.shape, lambda n: (0, 0)),
        ],
        out_specs=pl.BlockSpec((None, npad, CP), lambda n: (n, 0, 0)),
        scratch_shapes=[pltpu.VMEM((tot, CP), jnp.bfloat16),       # h (cv1 out)
                        pltpu.VMEM((2, tot, CP), jnp.float32)],    # dx partials
        compiler_params=pltpu.CompilerParams(
            dimension_semantics=("parallel",),      # batch across megacore TCs
            vmem_limit_bytes=vmem_limit),
    )(xp, w1_pad, s1_pad, w2_pad, s2_pad, w3_pad, s3_pad, mask)

    # ---- un-pad: (N, npad, CP) -> NCHW with the real channel count, f32 ----
    out = out_pad.reshape(N, Hp, Wp, CP)[:, 1:H + 1, 1:W + 1, :C]
    return jnp.transpose(out.astype(jnp.float32), (0, 3, 1, 2))


# ------------------------- parameter construction ---------------------------

def make_conv_params(key, cin, cout, k):
    kw_, kb_, kg, kbe, km, kv = jax.random.split(key, 6)
    return {
        "w": jax.random.normal(kw_, (cout, cin, k, k), jnp.float32) * 0.1,  # OIHW
        "b": jax.random.normal(kb_, (cout,), jnp.float32) * 0.1,
        # non-trivial BatchNorm (eval-mode) statistics to exercise the folding
        "gamma": 1.0 + 0.2 * jax.random.normal(kg, (cout,), jnp.float32),
        "beta": 0.1 * jax.random.normal(kbe, (cout,), jnp.float32),
        "mean": 0.1 * jax.random.normal(km, (cout,), jnp.float32),
        "var": 1.0 + 0.2 * jax.random.uniform(kv, (cout,), jnp.float32),
    }


# ----------------------------- pure-JAX reference ---------------------------

def _ref_conv_block(x_nhwc, p):
    w_hwio = jnp.transpose(p["w"], (2, 3, 1, 0))
    y = jax.lax.conv_general_dilated(
        x_nhwc, w_hwio, window_strides=(1, 1), padding="SAME",
        dimension_numbers=("NHWC", "HWIO", "NHWC"),
        precision=jax.lax.Precision.HIGHEST)
    y = y + p["b"]
    scale = p["gamma"] / jnp.sqrt(p["var"] + EPS)
    y = y * scale + (p["beta"] - p["mean"] * scale)
    return y * jax.nn.sigmoid(y)


def resn_reference(x_nchw, params):
    x = jnp.transpose(x_nchw, (0, 2, 3, 1))
    y0 = _ref_conv_block(x, params["conv"])
    y1 = y0 + _ref_conv_block(_ref_conv_block(y0, params["cv1"]), params["cv2"])
    return jnp.transpose(y1, (0, 3, 1, 2))


# --------------------------------- main --------------------------------------

if __name__ == "__main__":
    N, CIN, H, W = 2, 8, 16, 16
    C_ = int(CIN * 0.5)                  # ResBlock hidden channels

    key = jax.random.PRNGKey(0)
    kx, k0, k1, k2 = jax.random.split(key, 4)

    params = {
        "conv": make_conv_params(k0, CIN, CIN, 3),   # ResN.conv : 3x3
        "cv1":  make_conv_params(k1, CIN, C_, 1),    # ResBlock.cv1 : 1x1
        "cv2":  make_conv_params(k2, C_, CIN, 3),    # ResBlock.cv2 : 3x3
    }

    x = jax.random.normal(kx, (N, CIN, H, W), jnp.float32)  # NCHW, like PyTorch

    out = jax.block_until_ready(jax.jit(resn_forward)(x, params))
    ref = jax.block_until_ready(resn_reference(x, params))

    assert out.shape == (N, CIN, H, W), out.shape
    # bf16 MXU operands / bf16 activation slabs + approx-EUP sigmoid vs. a
    # pure-f32 reference -> compare at bf16-level tolerance.
    np.testing.assert_allclose(np.asarray(out), np.asarray(ref),
                               rtol=3e-2, atol=3e-2)
    print("KERNEL_OK")
</pallas_src>

<mosaic_0001>
module attributes {stable_mosaic.version = 11 : i64} {
  func.func @kernel(%arg0: i32, %arg1: memref<1x576x128xbf16, #tpu.memory_space<vmem>>, %arg2: memref<128x128xbf16, #tpu.memory_space<vmem>>, %arg3: memref<1x128xf32, #tpu.memory_space<vmem>>, %arg4: memref<128x128xbf16, #tpu.memory_space<vmem>>, %arg5: memref<1x128xf32, #tpu.memory_space<vmem>>, %arg6: memref<3x384x128xbf16, #tpu.memory_space<vmem>>, %arg7: memref<1x128xf32, #tpu.memory_space<vmem>>, %arg8: memref<576x1xf32, #tpu.memory_space<vmem>>, %arg9: memref<1x576x128xbf16, #tpu.memory_space<vmem>>, %arg10: memref<672x128xbf16, #tpu.memory_space<vmem>>, %arg11: memref<2x672x128xf32, #tpu.memory_space<vmem>>) attributes {dimension_semantics = [#tpu.dimension_semantics<parallel>], iteration_bounds = array<i64: 2>, scalar_prefetch = 0 : i64, scratch_operands = 2 : i64, tpu.core_type = #tpu.core_type<tc>, window_params = [{transform_indices = @transform_0, window_bounds = array<i64: 1, 576, 128>}, {pipeline_mode = #tpu.pipeline_mode<synchronous>, transform_indices = @transform_1, window_bounds = array<i64: 128, 128>}, {pipeline_mode = #tpu.pipeline_mode<synchronous>, transform_indices = @transform_2, window_bounds = array<i64: 1, 128>}, {pipeline_mode = #tpu.pipeline_mode<synchronous>, transform_indices = @transform_3, window_bounds = array<i64: 128, 128>}, {pipeline_mode = #tpu.pipeline_mode<synchronous>, transform_indices = @transform_4, window_bounds = array<i64: 1, 128>}, {pipeline_mode = #tpu.pipeline_mode<synchronous>, transform_indices = @transform_5, window_bounds = array<i64: 3, 384, 128>}, {pipeline_mode = #tpu.pipeline_mode<synchronous>, transform_indices = @transform_6, window_bounds = array<i64: 1, 128>}, {pipeline_mode = #tpu.pipeline_mode<synchronous>, transform_indices = @transform_7, window_bounds = array<i64: 576, 1>}, {transform_indices = @transform_8, window_bounds = array<i64: 1, 576, 128>}]} {
    %cst = arith.constant 0.000000e+00 : bf16
    %0 = vector.broadcast %cst : bf16 to vector<48x128xbf16>
    %cst_0 = arith.constant 0.000000e+00 : f32
    %1 = vector.broadcast %cst_0 : f32 to vector<48x128xf32>
    %c0 = arith.constant 0 : index
    %c0_1 = arith.constant 0 : index
    %2 = vector.load %arg10[%c0, %c0_1] : memref<672x128xbf16, #tpu.memory_space<vmem>>, vector<48x128xbf16>
    tpu.vector_store %arg10[%c0, %c0_1], %0 {strides = array<i32>} : memref<672x128xbf16, #tpu.memory_space<vmem>>, vector<48x128xbf16>,
    %c624 = arith.constant 624 : index
    %c0_2 = arith.constant 0 : index
    %3 = vector.load %arg10[%c624, %c0_2] : memref<672x128xbf16, #tpu.memory_space<vmem>>, vector<48x128xbf16>
    tpu.vector_store %arg10[%c624, %c0_2], %0 {strides = array<i32>} : memref<672x128xbf16, #tpu.memory_space<vmem>>, vector<48x128xbf16>,
    %c0_3 = arith.constant 0 : index
    %c0_4 = arith.constant 0 : index
    %c0_5 = arith.constant 0 : index
    %4 = vector.load %arg11[%c0_3, %c0_4, %c0_5] : memref<2x672x128xf32, #tpu.memory_space<vmem>>, vector<1x48x128xf32>
    %5 = vector.shape_cast %4 : vector<1x48x128xf32> to vector<48x128xf32>
    %6 = vector.shape_cast %1 : vector<48x128xf32> to vector<1x48x128xf32>
    tpu.vector_store %arg11[%c0_3, %c0_4, %c0_5], %6 {strides = array<i32>} : memref<2x672x128xf32, #tpu.memory_space<vmem>>, vector<1x48x128xf32>,
    %c0_6 = arith.constant 0 : index
    %c624_7 = arith.constant 624 : index
    %c0_8 = arith.constant 0 : index
    %7 = vector.load %arg11[%c0_6, %c624_7, %c0_8] : memref<2x672x128xf32, #tpu.memory_space<vmem>>, vector<1x48x128xf32>
    %8 = vector.shape_cast %7 : vector<1x48x128xf32> to vector<48x128xf32>
    %9 = vector.shape_cast %1 : vector<48x128xf32> to vector<1x48x128xf32>
    tpu.vector_store %arg11[%c0_6, %c624_7, %c0_8], %9 {strides = array<i32>} : memref<2x672x128xf32, #tpu.memory_space<vmem>>, vector<1x48x128xf32>,
    %c1 = arith.constant 1 : index
    %c0_9 = arith.constant 0 : index
    %c0_10 = arith.constant 0 : index
    %10 = vector.load %arg11[%c1, %c0_9, %c0_10] : memref<2x672x128xf32, #tpu.memory_space<vmem>>, vector<1x48x128xf32>
    %11 = vector.shape_cast %10 : vector<1x48x128xf32> to vector<48x128xf32>
    %12 = vector.shape_cast %1 : vector<48x128xf32> to vector<1x48x128xf32>
    tpu.vector_store %arg11[%c1, %c0_9, %c0_10], %12 {strides = array<i32>} : memref<2x672x128xf32, #tpu.memory_space<vmem>>, vector<1x48x128xf32>,
    %c1_11 = arith.constant 1 : index
    %c624_12 = arith.constant 624 : index
    %c0_13 = arith.constant 0 : index
    %13 = vector.load %arg11[%c1_11, %c624_12, %c0_13] : memref<2x672x128xf32, #tpu.memory_space<vmem>>, vector<1x48x128xf32>
    %14 = vector.shape_cast %13 : vector<1x48x128xf32> to vector<48x128xf32>
    %15 = vector.shape_cast %1 : vector<48x128xf32> to vector<1x48x128xf32>
    tpu.vector_store %arg11[%c1_11, %c624_12, %c0_13], %15 {strides = array<i32>} : memref<2x672x128xf32, #tpu.memory_space<vmem>>, vector<1x48x128xf32>,
    %c0_14 = arith.constant 0 : index
    %c0_15 = arith.constant 0 : index
    %c0_16 = arith.constant 0 : index
    %16 = vector.load %arg1[%c0_14, %c0_15, %c0_16] : memref<1x576x128xbf16, #tpu.memory_space<vmem>>, vector<1x576x128xbf16>
    %17 = vector.shape_cast %16 : vector<1x576x128xbf16> to vector<576x128xbf16>
    %c0_17 = arith.constant 0 : index
    %c0_18 = arith.constant 0 : index
    %18 = vector.load %arg2[%c0_17, %c0_18] : memref<128x128xbf16, #tpu.memory_space<vmem>>, vector<128x128xbf16>
    %cst_19 = arith.constant dense<0.000000e+00> : vector<576x128xf32>
    %19 = tpu.matmul %17, %18, %cst_19 {dimension_numbers = #tpu.dot_dimension_numbers<[1], [0], [0], [1], [0, 0, 1, 1], [], []>} : vector<576x128xbf16>, vector<128x128xbf16>, vector<576x128xf32> -> vector<576x128xf32>
    %c0_20 = arith.constant 0 : index
    %c0_21 = arith.constant 0 : index
    %20 = vector.load %arg3[%c0_20, %c0_21] : memref<1x128xf32, #tpu.memory_space<vmem>>, vector<1x128xf32>
    %21 = vector.broadcast %20 : vector<1x128xf32> to vector<576x128xf32>
    %22 = arith.addf %19, %21 : vector<576x128xf32>
    %cst_22 = arith.constant 0.000000e+00 : f32
    %23 = vector.broadcast %cst_22 : f32 to vector<576x128xf32>
    %24 = arith.subf %23, %22 : vector<576x128xf32>
    %25 = math.exp %24 : vector<576x128xf32>
    %cst_23 = arith.constant 1.000000e+00 : f32
    %26 = vector.broadcast %cst_23 : f32 to vector<576x128xf32>
    %27 = arith.addf %26, %25 : vector<576x128xf32>
    %28 = tpu.reciprocal %27 {approx = true} : vector<576x128xf32> -> vector<576x128xf32>
    %29 = arith.mulf %22, %28 : vector<576x128xf32>
    %30 = arith.truncf %29 : vector<576x128xf32> to vector<576x128xbf16>
    %c0_24 = arith.constant 0 : index
    %c0_25 = arith.constant 0 : index
    %c0_26 = arith.constant 0 : index
    %31 = vector.load %arg9[%c0_24, %c0_25, %c0_26] : memref<1x576x128xbf16, #tpu.memory_space<vmem>>, vector<1x576x128xbf16>
    %32 = vector.shape_cast %31 : vector<1x576x128xbf16> to vector<576x128xbf16>
    %33 = vector.shape_cast %30 : vector<576x128xbf16> to vector<1x576x128xbf16>
    tpu.vector_store %arg9[%c0_24, %c0_25, %c0_26], %33 {strides = array<i32>} : memref<1x576x128xbf16, #tpu.memory_space<vmem>>, vector<1x576x128xbf16>,
    %c0_27 = arith.constant 0 : index
    %c0_28 = arith.constant 0 : index
    %c0_29 = arith.constant 0 : index
    %34 = vector.load %arg9[%c0_27, %c0_28, %c0_29] : memref<1x576x128xbf16, #tpu.memory_space<vmem>>, vector<1x576x128xbf16>
    %35 = vector.shape_cast %34 : vector<1x576x128xbf16> to vector<576x128xbf16>
    %c0_30 = arith.constant 0 : index
    %c0_31 = arith.constant 0 : index
    %36 = vector.load %arg4[%c0_30, %c0_31] : memref<128x128xbf16, #tpu.memory_space<vmem>>, vector<128x128xbf16>
    %cst_32 = arith.constant dense<0.000000e+00> : vector<576x128xf32>
    %37 = tpu.matmul %35, %36, %cst_32 {dimension_numbers = #tpu.dot_dimension_numbers<[1], [0], [0], [1], [0, 0, 1, 1], [], []>} : vector<576x128xbf16>, vector<128x128xbf16>, vector<576x128xf32> -> vector<576x128xf32>
    %c0_33 = arith.constant 0 : index
    %c0_34 = arith.constant 0 : index
    %38 = vector.load %arg5[%c0_33, %c0_34] : memref<1x128xf32, #tpu.memory_space<vmem>>, vector<1x128xf32>
    %39 = vector.broadcast %38 : vector<1x128xf32> to vector<576x128xf32>
    %40 = arith.addf %37, %39 : vector<576x128xf32>
    %cst_35 = arith.constant 0.000000e+00 : f32
    %41 = vector.broadcast %cst_35 : f32 to vector<576x128xf32>
    %42 = arith.subf %41, %40 : vector<576x128xf32>
    %43 = math.exp %42 : vector<576x128xf32>
    %cst_36 = arith.constant 1.000000e+00 : f32
    %44 = vector.broadcast %cst_36 : f32 to vector<576x128xf32>
    %45 = arith.addf %44, %43 : vector<576x128xf32>
    %46 = tpu.reciprocal %45 {approx = true} : vector<576x128xf32> -> vector<576x128xf32>
    %47 = arith.mulf %40, %46 : vector<576x128xf32>
    %c0_37 = arith.constant 0 : index
    %c0_38 = arith.constant 0 : index
    %48 = vector.load %arg8[%c0_37, %c0_38] : memref<576x1xf32, #tpu.memory_space<vmem>>, vector<576x1xf32>
    %49 = vector.broadcast %48 : vector<576x1xf32> to vector<576x128xf32>
    %50 = arith.mulf %47, %49 : vector<576x128xf32>
    %51 = arith.truncf %50 : vector<576x128xf32> to vector<576x128xbf16>
    %c48 = arith.constant 48 : index
    %c0_39 = arith.constant 0 : index
    %52 = vector.load %arg10[%c48, %c0_39] : memref<672x128xbf16, #tpu.memory_space<vmem>>, vector<576x128xbf16>
    tpu.vector_store %arg10[%c48, %c0_39], %51 {strides = array<i32>} : memref<672x128xbf16, #tpu.memory_space<vmem>>, vector<576x128xbf16>,
    %c16 = arith.constant 16 : index
    %c0_40 = arith.constant 0 : index
    %53 = vector.load %arg10[%c16, %c0_40] : memref<672x128xbf16, #tpu.memory_space<vmem>>, vector<576x128xbf16>
    %c48_41 = arith.constant 48 : index
    %c0_42 = arith.constant 0 : index
    %54 = vector.load %arg10[%c48_41, %c0_42] : memref<672x128xbf16, #tpu.memory_space<vmem>>, vector<576x128xbf16>
    %c80 = arith.constant 80 : index
    %c0_43 = arith.constant 0 : index
    %55 = vector.load %arg10[%c80, %c0_43] : memref<672x128xbf16, #tpu.memory_space<vmem>>, vector<576x128xbf16>
    %56 = tpu.concatenate %53, %54, %55 in 1 : vector<576x128xbf16>, vector<576x128xbf16>, vector<576x128xbf16> -> vector<576x384xbf16>
    %c0_44 = arith.constant 0 : index
    %c0_45 = arith.constant 0 : index
    %c0_46 = arith.constant 0 : index
    %57 = vector.load %arg6[%c0_44, %c0_45, %c0_46] : memref<3x384x128xbf16, #tpu.memory_space<vmem>>, vector<1x384x128xbf16>
    %58 = vector.shape_cast %57 : vector<1x384x128xbf16> to vector<384x128xbf16>
    %cst_47 = arith.constant dense<0.000000e+00> : vector<576x128xf32>
    %59 = tpu.matmul %56, %58, %cst_47 {dimension_numbers = #tpu.dot_dimension_numbers<[1], [0], [0], [1], [0, 0, 1, 1], [], []>} : vector<576x384xbf16>, vector<384x128xbf16>, vector<576x128xf32> -> vector<576x128xf32>
    %c0_48 = arith.constant 0 : index
    %c48_49 = arith.constant 48 : index
    %c0_50 = arith.constant 0 : index
    %60 = vector.load %arg11[%c0_48, %c48_49, %c0_50] : memref<2x672x128xf32, #tpu.memory_space<vmem>>, vector<1x576x128xf32>
    %61 = vector.shape_cast %60 : vector<1x576x128xf32> to vector<576x128xf32>
    %62 = vector.shape_cast %59 : vector<576x128xf32> to vector<1x576x128xf32>
    tpu.vector_store %arg11[%c0_48, %c48_49, %c0_50], %62 {strides = array<i32>} : memref<2x672x128xf32, #tpu.memory_space<vmem>>, vector<1x576x128xf32>,
    %c2 = arith.constant 2 : index
    %c0_51 = arith.constant 0 : index
    %c0_52 = arith.constant 0 : index
    %63 = vector.load %arg6[%c2, %c0_51, %c0_52] : memref<3x384x128xbf16, #tpu.memory_space<vmem>>, vector<1x384x128xbf16>
    %64 = vector.shape_cast %63 : vector<1x384x128xbf16> to vector<384x128xbf16>
    %cst_53 = arith.constant dense<0.000000e+00> : vector<576x128xf32>
    %65 = tpu.matmul %56, %64, %cst_53 {dimension_numbers = #tpu.dot_dimension_numbers<[1], [0], [0], [1], [0, 0, 1, 1], [], []>} : vector<576x384xbf16>, vector<384x128xbf16>, vector<576x128xf32> -> vector<576x128xf32>
    %c1_54 = arith.constant 1 : index
    %c48_55 = arith.constant 48 : index
    %c0_56 = arith.constant 0 : index
    %66 = vector.load %arg11[%c1_54, %c48_55, %c0_56] : memref<2x672x128xf32, #tpu.memory_space<vmem>>, vector<1x576x128xf32>
    %67 = vector.shape_cast %66 : vector<1x576x128xf32> to vector<576x128xf32>
    %68 = vector.shape_cast %65 : vector<576x128xf32> to vector<1x576x128xf32>
    tpu.vector_store %arg11[%c1_54, %c48_55, %c0_56], %68 {strides = array<i32>} : memref<2x672x128xf32, #tpu.memory_space<vmem>>, vector<1x576x128xf32>,
    %c1_57 = arith.constant 1 : index
    %c0_58 = arith.constant 0 : index
    %c0_59 = arith.constant 0 : index
    %69 = vector.load %arg6[%c1_57, %c0_58, %c0_59] : memref<3x384x128xbf16, #tpu.memory_space<vmem>>, vector<1x384x128xbf16>
    %70 = vector.shape_cast %69 : vector<1x384x128xbf16> to vector<384x128xbf16>
    %cst_60 = arith.constant dense<0.000000e+00> : vector<576x128xf32>
    %71 = tpu.matmul %56, %70, %cst_60 {dimension_numbers = #tpu.dot_dimension_numbers<[1], [0], [0], [1], [0, 0, 1, 1], [], []>} : vector<576x384xbf16>, vector<384x128xbf16>, vector<576x128xf32> -> vector<576x128xf32>
    %c0_61 = arith.constant 0 : index
    %c47 = arith.constant 47 : index
    %c0_62 = arith.constant 0 : index
    %72 = vector.load %arg11[%c0_61, %c47, %c0_62] : memref<2x672x128xf32, #tpu.memory_space<vmem>>, vector<1x576x128xf32>
    %73 = vector.shape_cast %72 : vector<1x576x128xf32> to vector<576x128xf32>
    %74 = arith.addf %71, %73 : vector<576x128xf32>
    %c1_63 = arith.constant 1 : index
    %c49 = arith.constant 49 : index
    %c0_64 = arith.constant 0 : index
    %75 = vector.load %arg11[%c1_63, %c49, %c0_64] : memref<2x672x128xf32, #tpu.memory_space<vmem>>, vector<1x576x128xf32>
    %76 = vector.shape_cast %75 : vector<1x576x128xf32> to vector<576x128xf32>
    %77 = arith.addf %74, %76 : vector<576x128xf32>
    %c0_65 = arith.constant 0 : index
    %c0_66 = arith.constant 0 : index
    %78 = vector.load %arg7[%c0_65, %c0_66] : memref<1x128xf32, #tpu.memory_space<vmem>>, vector<1x128xf32>
    %79 = vector.broadcast %78 : vector<1x128xf32> to vector<576x128xf32>
    %80 = arith.addf %77, %79 : vector<576x128xf32>
    %cst_67 = arith.constant 0.000000e+00 : f32
    %81 = vector.broadcast %cst_67 : f32 to vector<576x128xf32>
    %82 = arith.subf %81, %80 : vector<576x128xf32>
    %83 = math.exp %82 : vector<576x128xf32>
    %cst_68 = arith.constant 1.000000e+00 : f32
    %84 = vector.broadcast %cst_68 : f32 to vector<576x128xf32>
    %85 = arith.addf %84, %83 : vector<576x128xf32>
    %86 = tpu.reciprocal %85 {approx = true} : vector<576x128xf32> -> vector<576x128xf32>
    %87 = arith.mulf %80, %86 : vector<576x128xf32>
    %c0_69 = arith.constant 0 : index
    %c0_70 = arith.constant 0 : index
    %c0_71 = arith.constant 0 : index
    %88 = vector.load %arg9[%c0_69, %c0_70, %c0_71] : memref<1x576x128xbf16, #tpu.memory_space<vmem>>, vector<1x576x128xbf16>
    %89 = vector.shape_cast %88 : vector<1x576x128xbf16> to vector<576x128xbf16>
    %90 = arith.extf %89 : vector<576x128xbf16> to vector<576x128xf32>
    %91 = arith.addf %90, %87 : vector<576x128xf32>
    %92 = arith.truncf %91 : vector<576x128xf32> to vector<576x128xbf16>
    %c0_72 = arith.constant 0 : index
    %c0_73 = arith.constant 0 : index
    %c0_74 = arith.constant 0 : index
    %93 = vector.load %arg9[%c0_72, %c0_73, %c0_74] : memref<1x576x128xbf16, #tpu.memory_space<vmem>>, vector<1x576x128xbf16>
    %94 = vector.shape_cast %93 : vector<1x576x128xbf16> to vector<576x128xbf16>
    %95 = vector.shape_cast %92 : vector<576x128xbf16> to vector<1x576x128xbf16>
    tpu.vector_store %arg9[%c0_72, %c0_73, %c0_74], %95 {strides = array<i32>} : memref<1x576x128xbf16, #tpu.memory_space<vmem>>, vector<1x576x128xbf16>,
    return
  }
  func.func @transform_0(%arg0: i32) -> (i32, i32, i32) {
    %c0_i32 = arith.constant 0 : i32
    %c0_i32_0 = arith.constant 0 : i32
    %c0_i32_1 = arith.constant 0 : i32
    return %arg0, %c0_i32, %c0_i32_0 : i32, i32, i32
  }
  func.func @transform_1(%arg0: i32) -> (i32, i32) {
    %c0_i32 = arith.constant 0 : i32
    %c0_i32_0 = arith.constant 0 : i32
    %c0_i32_1 = arith.constant 0 : i32
    return %c0_i32, %c0_i32_0 : i32, i32
  }
  func.func @transform_2(%arg0: i32) -> (i32, i32) {
    %c0_i32 = arith.constant 0 : i32
    %c0_i32_0 = arith.constant 0 : i32
    %c0_i32_1 = arith.constant 0 : i32
    return %c0_i32, %c0_i32_0 : i32, i32
  }
  func.func @transform_3(%arg0: i32) -> (i32, i32) {
    %c0_i32 = arith.constant 0 : i32
    %c0_i32_0 = arith.constant 0 : i32
    %c0_i32_1 = arith.constant 0 : i32
    return %c0_i32, %c0_i32_0 : i32, i32
  }
  func.func @transform_4(%arg0: i32) -> (i32, i32) {
    %c0_i32 = arith.constant 0 : i32
    %c0_i32_0 = arith.constant 0 : i32
    %c0_i32_1 = arith.constant 0 : i32
    return %c0_i32, %c0_i32_0 : i32, i32
  }
  func.func @transform_5(%arg0: i32) -> (i32, i32, i32) {
    %c0_i32 = arith.constant 0 : i32
    %c0_i32_0 = arith.constant 0 : i32
    %c0_i32_1 = arith.constant 0 : i32
    %c0_i32_2 = arith.constant 0 : i32
    return %c0_i32, %c0_i32_0, %c0_i32_1 : i32, i32, i32
  }
  func.func @transform_6(%arg0: i32) -> (i32, i32) {
    %c0_i32 = arith.constant 0 : i32
    %c0_i32_0 = arith.constant 0 : i32
    %c0_i32_1 = arith.constant 0 : i32
    return %c0_i32, %c0_i32_0 : i32, i32
  }
  func.func @transform_7(%arg0: i32) -> (i32, i32) {
    %c0_i32 = arith.constant 0 : i32
    %c0_i32_0 = arith.constant 0 : i32
    %c0_i32_1 = arith.constant 0 : i32
    return %c0_i32, %c0_i32_0 : i32, i32
  }
  func.func @transform_8(%arg0: i32) -> (i32, i32, i32) {
    %c0_i32 = arith.constant 0 : i32
    %c0_i32_0 = arith.constant 0 : i32
    %c0_i32_1 = arith.constant 0 : i32
    return %arg0, %c0_i32, %c0_i32_0 : i32, i32, i32
  }
}

</mosaic_0001>

<bundles_post_ra>
// kernel: resn_forward.1
= control target key start
LH: loop header
LB: loop body
LE: loop exit
PB: predicated region body
PF: predicated region fallthrough
CT: control target
= control target key end

     0   :  { %s10481_s27 = smov 0   ;;  %s13528_s0 = inlined_call_operand.vmem [shape: bf16[2,576,128], index: 0, kind: input, shape index: {}]   ;;  %s13529_s1 = inlined_call_operand.vmem [shape: bf16[128,128], index: 1, kind: input, shape index: {}]   ;;  %s13530_s2 = inlined_call_operand.vmem [shape: f32[1,128], index: 2, kind: input, shape index: {}]   ;;  %s13531_s3 = inlined_call_operand.vmem [shape: bf16[128,128], index: 3, kind: input, shape index: {}]   ;;  %s13532_s4 = inlined_call_operand.vmem [shape: f32[1,128], index: 4, kind: input, shape index: {}]   ;;  %s13533_s5 = inlined_call_operand.vmem [shape: bf16[3,384,128], index: 5, kind: input, shape index: {}]   ;;  %s13534_s6 = inlined_call_operand.vmem [shape: f32[1,128], index: 6, kind: input, shape index: {}]   ;;  %s13535_s7 = inlined_call_operand.vmem [shape: f32[576,1], index: 7, kind: input, shape index: {}]   ;;  %s13536_s8 = inlined_call_operand.vmem [shape: bf16[2,576,128], index: 8, kind: output, shape index: {}]  }
   0x1 LB: > { %s7544_s28 = sadd.s32 4294967295, %s10432_s27   ;;  %p7548_p0 = scmp.ge.s32.totalorder %s10432_s27, 1  ;;  %s10432_s27 = sphi %s10481_s27, %s18_s27  }
   0x2   : > { %p262_p1 = scmp.lt.s32.totalorder %s10432_s27, 3 }
   0x4   : > { %p263_p2 = pnand %p7548_p0, %p262_p1 }
   0x6   : > { %266 = sbr.rel (%p263_p2) target bundleno = 1527 (0x5f7), region = 52 }
   0xd   : > { %v9398_v0 = vld [vmem:[%s13529_s1] sm:$0xff]   ;;  %p296_p3 = scmp.lt.s32.totalorder %s7544_s28, 1  ;;  %v9399_v1 = vld [vmem:[%s13529_s1 + $0x8] sm:$0xff]   ;;  %v9400_v2 = vld [vmem:[%s13529_s1 + $0x10] sm:$0xff]   ;;  %v13537_v47 = vmov 0  }
   0xe   : > { %8929 = vmatprep.subr.bf16.mxu0 %v9398_v0  ;;  %9369 = vmatprep.subr.bf16.mxu1 %v9398_v0  ;;  %v9401_v3 = vld [vmem:[%s13529_s1 + $0x18] sm:$0xff]   ;;  %v9402_v5 = vld [vmem:[%s13529_s1 + $0x20] sm:$0xff]   ;;  %v9403_v6 = vld [vmem:[%s13529_s1 + $0x28] sm:$0xff]  }
   0xf   : > { %s13665_s28 = smov (!%p296_p3, %s7544_s28), 1  ;;  %8930 = vmatpush3.bf16.msra.mxu0 %v9398_v0  ;;  %9377 = vmatpush3.bf16.msra.mxu1 %v9398_v0  ;;  %v9404_v7 = vld [vmem:[%s13529_s1 + $0x30] sm:$0xff]   ;;  %v9405_v8 = vld [vmem:[%s13529_s1 + $0x38] sm:$0xff]   ;;  %v9442_v20 = vld [vmem:[%s13531_s3] sm:$0xff]  }
  0x10   : > { %8931 = vmatprep.subr.bf16.mxu0 %v9399_v1  ;;  %s9385_s13 = smul.u32 288, %s13665_s28  ;;  %9370 = vmatprep.subr.bf16.mxu1 %v9399_v1  ;;  %v9443_v22 = vld [vmem:[%s13531_s3 + $0x8] sm:$0xff]   ;;  %v9444_v24 = vld [vmem:[%s13531_s3 + $0x10] sm:$0xff]   ;;  %v2922_v48 = vld [vmem:[%s13535_s7] sm:$0xff] }
  0x11   : > { %9396 = vset.pattern.permute.xlu0 %v13537_v47  ;;  %9397 = vset.pattern.permute.xlu1 %v13537_v47  ;;  %v9445_v49 = vld [vmem:[%s13531_s3 + $0x18] sm:$0xff]   ;;  %v2923_v50 = vld [vmem:[%s13535_s7 + $0x8] sm:$0xff]  ;;  %v9446_v51 = vld [vmem:[%s13531_s3 + $0x20] sm:$0xff]  }
  0x12   : > { %s10506_s16 = scalar_lea.vmem %s13528_s0, %s9385_s13  ;;  %2996 = vperm.xlu0 %9396, %v2922_v48   ;;  %v2924_v52 = vld [vmem:[%s13535_s7 + $0x10] sm:$0xff]  ;;  %v2926_v53 = vld [vmem:[%s13535_s7 + $0x20] sm:$0xff]  ;;  %v9447_v54 = vld [vmem:[%s13531_s3 + $0x28] sm:$0xff]   ;;  %s10919_s29 = scalar_lea.vmem %s13536_s8, %s9385_s13 }
  0x13   : > { %8932 = vmatpush3.bf16.msra.mxu0 %v9399_v1  ;;  %9378 = vmatpush3.bf16.msra.mxu1 %v9399_v1  ;;  %v9406_v4 = vld [vmem:[%s10506_s16] sm:$0xff]   ;;  %v9424_v9 = vld [vmem:[%s10506_s16 + $0x90] sm:$0xff]   ;;  %v9407_v10 = vld [vmem:[%s10506_s16 + $0x8] sm:$0xff]  }
  0x14   : > { %8933 = vmatprep.subr.bf16.mxu0 %v9400_v2  ;;  %9371 = vmatprep.subr.bf16.mxu1 %v9400_v2  ;;  %v9408_v11 = vld [vmem:[%s10506_s16 + $0x10] sm:$0xff]   ;;  %v9425_v12 = vld [vmem:[%s10506_s16 + $0x98] sm:$0xff]   ;;  %v9426_v13 = vld [vmem:[%s10506_s16 + $0xa0] sm:$0xff]  }
  0x15   : > { %8945 = vmatprep.mubr.bf16.mxu0 %v9406_v4  ;;  %8981 = vmatprep.mubr.bf16.mxu1 %v9424_v9  ;;  %v9409_v14 = vld [vmem:[%s10506_s16 + $0x18] sm:$0xff]   ;;  %v9410_v15 = vld [vmem:[%s10506_s16 + $0x20] sm:$0xff]   ;;  %v9427_v16 = vld [vmem:[%s10506_s16 + $0xa8] sm:$0xff]  }
  0x16   : > { %v9428_v17 = vld [vmem:[%s10506_s16 + $0xb0] sm:$0xff]   ;;  %v9411_v18 = vld [vmem:[%s10506_s16 + $0x28] sm:$0xff]   ;;  %v9429_v19 = vld [vmem:[%s10506_s16 + $0xb8] sm:$0xff]   ;;  %3001 = vperm.xlu0 %9396, %v2923_v50   ;;  %3006 = vperm.xlu1 %9397, %v2924_v52  }
  0x17   : > { %8934 = vmatpush3.bf16.msra.mxu0 %v9400_v2  ;;  %9379 = vmatpush3.bf16.msra.mxu1 %v9400_v2  ;;  %v9412_v21 = vld [vmem:[%s10506_s16 + $0x30] sm:$0xff]   ;;  %v9430_v23 = vld [vmem:[%s10506_s16 + $0xc0] sm:$0xff]   ;;  %v9413_v25 = vld [vmem:[%s10506_s16 + $0x38] sm:$0xff]  }
  0x18   : > { %8935 = vmatprep.subr.bf16.mxu0 %v9401_v3  ;;  %9372 = vmatprep.subr.bf16.mxu1 %v9401_v3  ;;  %v9431_v26 = vld [vmem:[%s10506_s16 + $0xc8] sm:$0xff]   ;;  %v9414_v27 = vld [vmem:[%s10506_s16 + $0x40] sm:$0xff]   ;;  %v9432_v28 = vld [vmem:[%s10506_s16 + $0xd0] sm:$0xff]  }
  0x19   : > { %v9415_v29 = vld [vmem:[%s10506_s16 + $0x48] sm:$0xff]   ;;  %v9433_v30 = vld [vmem:[%s10506_s16 + $0xd8] sm:$0xff]   ;;  %v9416_v31 = vld [vmem:[%s10506_s16 + $0x50] sm:$0xff]  }
  0x1a   : > { %v9434_v32 = vld [vmem:[%s10506_s16 + $0xe0] sm:$0xff]   ;;  %v9417_v33 = vld [vmem:[%s10506_s16 + $0x58] sm:$0xff]   ;;  %v9435_v34 = vld [vmem:[%s10506_s16 + $0xe8] sm:$0xff]   ;;  %3016 = vperm.xlu0 %9396, %v2926_v53  }
  0x1b   : > { %8936 = vmatpush3.bf16.msra.mxu0 %v9401_v3  ;;  %9380 = vmatpush3.bf16.msra.mxu1 %v9401_v3  ;;  %v9418_v35 = vld [vmem:[%s10506_s16 + $0x60] sm:$0xff]   ;;  %v9436_v36 = vld [vmem:[%s10506_s16 + $0xf0] sm:$0xff]   ;;  %v9419_v37 = vld [vmem:[%s10506_s16 + $0x68] sm:$0xff]  }
  0x1c   : > { %8937 = vmatprep.subr.bf16.mxu0 %v9402_v5  ;;  %9373 = vmatprep.subr.bf16.mxu1 %v9402_v5  ;;  %v9437_v38 = vld [vmem:[%s10506_s16 + $0xf8] sm:$0xff]   ;;  %v9420_v39 = vld [vmem:[%s10506_s16 + $0x70] sm:$0xff]   ;;  %v9438_v40 = vld [vmem:[%s10506_s16 + $0x100] sm:$0xff]  }
  0x1d   : > { %v9421_v41 = vld [vmem:[%s10506_s16 + $0x78] sm:$0xff]   ;;  %v9439_v42 = vld [vmem:[%s10506_s16 + $0x108] sm:$0xff]   ;;  %v9422_v43 = vld [vmem:[%s10506_s16 + $0x80] sm:$0xff]  }
  0x1e   : > { %v9440_v44 = vld [vmem:[%s10506_s16 + $0x110] sm:$0xff]   ;;  %v9423_v45 = vld [vmem:[%s10506_s16 + $0x88] sm:$0xff]   ;;  %v9441_v46 = vld [vmem:[%s10506_s16 + $0x118] sm:$0xff]  }
  0x1f   : > { %8938 = vmatpush3.bf16.msra.mxu0 %v9402_v5  ;;  %9381 = vmatpush3.bf16.msra.mxu1 %v9402_v5  ;;  %v2925_v55 = vld [vmem:[%s13535_s7 + $0x18] sm:$0xff]  ;;  %v2928_v56 = vld [vmem:[%s13535_s7 + $0x30] sm:$0xff]  ;;  %v2927_v58 = vld [vmem:[%s13535_s7 + $0x28] sm:$0xff] }
  0x20   : > { %8939 = vmatprep.subr.bf16.mxu0 %v9403_v6  ;;  %9374 = vmatprep.subr.bf16.mxu1 %v9403_v6  ;;  %v9448_v57 = vld [vmem:[%s13531_s3 + $0x30] sm:$0xff]   ;;  %v2930_v59 = vld [vmem:[%s13535_s7 + $0x40] sm:$0xff]  ;;  %v9449_v60 = vld [vmem:[%s13531_s3 + $0x38] sm:$0xff]  }
  0x21   : > { %3011 = vperm.xlu1 %9397, %v2925_v55   ;;  %3026 = vperm.xlu0 %9396, %v2928_v56   ;;  %v2929_v61 = vld [vmem:[%s13535_s7 + $0x38] sm:$0xff]  ;;  %v2932_v62 = vld [vmem:[%s13535_s7 + $0x50] sm:$0xff]  ;;  %v2931_v63 = vld [vmem:[%s13535_s7 + $0x48] sm:$0xff] }
  0x22   : > { %v2934_v0 = vld [vmem:[%s13535_s7 + $0x60] sm:$0xff]  ;;  %v2933_v1 = vld [vmem:[%s13535_s7 + $0x58] sm:$0xff]  ;;  %v2936_v2 = vld [vmem:[%s13535_s7 + $0x70] sm:$0xff] }
  0x23   : > { %8940 = vmatpush3.bf16.msra.mxu0 %v9403_v6  ;;  %9382 = vmatpush3.bf16.msra.mxu1 %v9403_v6  ;;  %v2935_v3 = vld [vmem:[%s13535_s7 + $0x68] sm:$0xff]  ;;  %v2938_v4 = vld [vmem:[%s13535_s7 + $0x80] sm:$0xff]  ;;  %v2937_v5 = vld [vmem:[%s13535_s7 + $0x78] sm:$0xff] }
  0x24   : > { %8941 = vmatprep.subr.bf16.mxu0 %v9404_v7  ;;  %9375 = vmatprep.subr.bf16.mxu1 %v9404_v7  ;;  %v2940_v6 = vld [vmem:[%s13535_s7 + $0x90] sm:$0xff]  ;;  %v2941_v9 = vld [vmem:[%s13535_s7 + $0x98] sm:$0xff]  ;;  %v2971_v56 = vld [vmem:[%s13535_s7 + $0x188] sm:$0xff] }
  0x25   : > { %3021 = vperm.xlu1 %9397, %v2927_v58   ;;  %3036 = vperm.xlu0 %9396, %v2930_v59  }
  0x27   : > { %8942 = vmatpush3.bf16.msra.mxu0 %v9404_v7  ;;  %9383 = vmatpush3.bf16.msra.mxu1 %v9404_v7  ;;  %v2939_v7 = vld [vmem:[%s13535_s7 + $0x88] sm:$0xff] }
  0x28   : > { %8943 = vmatprep.subr.bf16.mxu0 %v9405_v8  ;;  %9376 = vmatprep.subr.bf16.mxu1 %v9405_v8 }
  0x29   : > { %3031 = vperm.xlu1 %9397, %v2929_v61   ;;  %3046 = vperm.xlu0 %9396, %v2932_v62  }
  0x2b   : > { %8944 = vmatpush3.bf16.msra.mxu0 %v9405_v8  ;;  %9384 = vmatpush3.bf16.msra.mxu1 %v9405_v8  ;;  %v2942_v8 = vld [vmem:[%s13535_s7 + $0xa0] sm:$0xff] }
  0x2c   : > { %9017 = vmatprep.subr.bf16.mxu1 %v9442_v20  ;;  %3730 = vmatprep.subr.bf16.mxu0 %v13537_v47 }
  0x2d   : > { %3041 = vperm.xlu1 %9397, %v2931_v63   ;;  %3056 = vperm.xlu0 %9396, %v2934_v0  }
  0x2e   : > { %8946 = vmatmul.mubr.bf16.vlgmr.msra.gmra.mrb[0].mxu0 %v9407_v10  ;;  %8982 = vmatmul.mubr.bf16.vlgmr.msra.gmra.mrb[0].mxu1 %v9425_v12  ;;  %v2944_v10 = vld [vmem:[%s13535_s7 + $0xb0] sm:$0xff]  ;;  %v2946_v12 = vld [vmem:[%s13535_s7 + $0xc0] sm:$0xff] }
  0x2f   : > { %8949 = vmatprep.mubr.bf16.mxu0 %v9408_v11  ;;  %8985 = vmatprep.mubr.bf16.mxu1 %v9426_v13  ;;  %v2943_v11 = vld [vmem:[%s13535_s7 + $0xa8] sm:$0xff]  ;;  %v2945_v13 = vld [vmem:[%s13535_s7 + $0xb8] sm:$0xff] }
  0x30   : > { %9018 = vmatpush3.bf16.msra.mxu1 %v9442_v20  ;;  %v2954_v20 = vld [vmem:[%s13535_s7 + $0x100] sm:$0xff] }
  0x31   : > { %9019 = vmatprep.subr.bf16.mxu1 %v9443_v22  ;;  %3051 = vperm.xlu1 %9397, %v2933_v1  }
  0x32   : > { %3066 = vperm.xlu0 %9396, %v2936_v2  }
  0x34   : > { %9020 = vmatpush3.bf16.msra.mxu1 %v9443_v22  ;;  %v2956_v22 = vld [vmem:[%s13535_s7 + $0x110] sm:$0xff] }
  0x35   : > { %9021 = vmatprep.subr.bf16.mxu1 %v9444_v24  ;;  %3061 = vperm.xlu1 %9397, %v2935_v3  }
  0x36   : > { %8950 = vmatmul.mubr.bf16.gmra.mrb[4].mxu0 %v9409_v14  ;;  %8986 = vmatmul.mubr.bf16.gmra.mrb[4].mxu1 %v9427_v16  ;;  %v2948_v14 = vld [vmem:[%s13535_s7 + $0xd0] sm:$0xff]  ;;  %v2950_v16 = vld [vmem:[%s13535_s7 + $0xe0] sm:$0xff] }
  0x37   : > { %8953 = vmatprep.mubr.bf16.mxu0 %v9410_v15  ;;  %8989 = vmatprep.mubr.bf16.mxu1 %v9428_v17  ;;  %v2947_v15 = vld [vmem:[%s13535_s7 + $0xc8] sm:$0xff]  ;;  %v2949_v17 = vld [vmem:[%s13535_s7 + $0xd8] sm:$0xff] }
  0x38   : > { %9022 = vmatpush3.bf16.msra.mxu1 %v9444_v24  ;;  %3076 = vperm.xlu0 %9396, %v2938_v4   ;;  %v2958_v24 = vld [vmem:[%s13535_s7 + $0x120] sm:$0xff] }
  0x39   : > { %9023 = vmatprep.subr.bf16.mxu1 %v9445_v49  ;;  %3071 = vperm.xlu1 %9397, %v2937_v5  }
  0x3c   : > { %9024 = vmatpush3.bf16.msra.mxu1 %v9445_v49  ;;  %3086 = vperm.xlu0 %9396, %v2940_v6  }
  0x3d   : > { %9025 = vmatprep.subr.bf16.mxu1 %v9446_v51  ;;  %3081 = vperm.xlu1 %9397, %v2939_v7  }
  0x3e   : > { %8954 = vmatmul.mubr.bf16.gmra.mrb[8].mxu0 %v9411_v18  ;;  %8990 = vmatmul.mubr.bf16.gmra.mrb[8].mxu1 %v9429_v19  ;;  %v2952_v18 = vld [vmem:[%s13535_s7 + $0xf0] sm:$0xff]  ;;  %v2951_v19 = vld [vmem:[%s13535_s7 + $0xe8] sm:$0xff] }
  0x3f   : > { %8957 = vmatprep.mubr.bf16.mxu0 %v9412_v21  ;;  %8993 = vmatprep.mubr.bf16.mxu1 %v9430_v23  ;;  %v2953_v21 = vld [vmem:[%s13535_s7 + $0xf8] sm:$0xff]  ;;  %v2955_v23 = vld [vmem:[%s13535_s7 + $0x108] sm:$0xff] }
  0x40   : > { %9026 = vmatpush3.bf16.msra.mxu1 %v9446_v51  ;;  %3096 = vperm.xlu0 %9396, %v2942_v8  }
  0x41   : > { %9027 = vmatprep.subr.bf16.mxu1 %v9447_v54  ;;  %3091 = vperm.xlu1 %9397, %v2941_v9  }
  0x44   : > { %9028 = vmatpush3.bf16.msra.mxu1 %v9447_v54  ;;  %3106 = vperm.xlu0 %9396, %v2944_v10  }
  0x45   : > { %9029 = vmatprep.subr.bf16.mxu1 %v9448_v57  ;;  %3101 = vperm.xlu1 %9397, %v2943_v11  }
  0x46   : > { %8958 = vmatmul.mubr.bf16.gmra.mrb[12].mxu0 %v9413_v25  ;;  %8994 = vmatmul.mubr.bf16.gmra.mrb[12].mxu1 %v9431_v26  ;;  %v2957_v25 = vld [vmem:[%s13535_s7 + $0x118] sm:$0xff]  ;;  %v2960_v26 = vld [vmem:[%s13535_s7 + $0x130] sm:$0xff] }
  0x47   : > { %8961 = vmatprep.mubr.bf16.mxu0 %v9414_v27  ;;  %8997 = vmatprep.mubr.bf16.mxu1 %v9432_v28  ;;  %v2959_v27 = vld [vmem:[%s13535_s7 + $0x128] sm:$0xff]  ;;  %v2962_v28 = vld [vmem:[%s13535_s7 + $0x140] sm:$0xff] }
  0x48   : > { %9030 = vmatpush3.bf16.msra.mxu1 %v9448_v57  ;;  %3116 = vperm.xlu0 %9396, %v2946_v12   ;;  %v2974_v57 = vld [vmem:[%s13535_s7 + $0x1a0] sm:$0xff] }
  0x49   : > { %9031 = vmatprep.subr.bf16.mxu1 %v9449_v60  ;;  %3111 = vperm.xlu1 %9397, %v2945_v13   ;;  %v2973_v13 = vld [vmem:[%s13535_s7 + $0x198] sm:$0xff] }
  0x4c   : > { %9032 = vmatpush3.bf16.msra.mxu1 %v9449_v60  ;;  %3126 = vperm.xlu0 %9396, %v2948_v14   ;;  %v2976_v14 = vld [vmem:[%s13535_s7 + $0x1b0] sm:$0xff] }
  0x4d   : > { %3121 = vperm.xlu1 %9397, %v2947_v15  }
  0x4e   : > { %8962 = vmatmul.mubr.bf16.gmra.mrb[16].mxu0 %v9415_v29  ;;  %8998 = vmatmul.mubr.bf16.gmra.mrb[16].mxu1 %v9433_v30  ;;  %v2961_v29 = vld [vmem:[%s13535_s7 + $0x138] sm:$0xff]  ;;  %v2964_v30 = vld [vmem:[%s13535_s7 + $0x150] sm:$0xff] }
  0x4f   : > { %8965 = vmatprep.mubr.bf16.mxu0 %v9416_v31  ;;  %9001 = vmatprep.mubr.bf16.mxu1 %v9434_v32  ;;  %v2963_v31 = vld [vmem:[%s13535_s7 + $0x148] sm:$0xff]  ;;  %v2966_v32 = vld [vmem:[%s13535_s7 + $0x160] sm:$0xff] }
  0x50   : > { %3136 = vperm.xlu0 %9396, %v2950_v16  }
  0x51   : > { %3131 = vperm.xlu1 %9397, %v2949_v17  }
  0x54   : > { %3146 = vperm.xlu0 %9396, %v2952_v18  }
  0x55   : > { %3141 = vperm.xlu1 %9397, %v2951_v19  }
  0x56   : > { %8966 = vmatmul.mubr.bf16.gmra.mrb[20].mxu0 %v9417_v33  ;;  %9002 = vmatmul.mubr.bf16.gmra.mrb[20].mxu1 %v9435_v34  ;;  %v2965_v33 = vld [vmem:[%s13535_s7 + $0x158] sm:$0xff]  ;;  %v2968_v34 = vld [vmem:[%s13535_s7 + $0x170] sm:$0xff] }
  0x57   : > { %8969 = vmatprep.mubr.bf16.mxu0 %v9418_v35  ;;  %9005 = vmatprep.mubr.bf16.mxu1 %v9436_v36  ;;  %v2967_v35 = vld [vmem:[%s13535_s7 + $0x168] sm:$0xff]  ;;  %v2970_v36 = vld [vmem:[%s13535_s7 + $0x180] sm:$0xff] }
  0x58   : > { %3156 = vperm.xlu0 %9396, %v2954_v20  }
  0x59   : > { %3151 = vperm.xlu1 %9397, %v2953_v21  }
  0x5c   : > { %3166 = vperm.xlu0 %9396, %v2956_v22  }
  0x5d   : > { %3161 = vperm.xlu1 %9397, %v2955_v23  }
  0x5e   : > { %8970 = vmatmul.mubr.bf16.gmra.mrb[24].mxu0 %v9419_v37  ;;  %9006 = vmatmul.mubr.bf16.gmra.mrb[24].mxu1 %v9437_v38  ;;  %v10733_v37 = vld [vmem:[%s13530_s2] ss:$0 sm:$0xff]  ;;  %v2969_v38 = vld [vmem:[%s13535_s7 + $0x178] sm:$0xff] }
  0x5f   : > { %8973 = vmatprep.mubr.bf16.mxu0 %v9420_v39  ;;  %9009 = vmatprep.mubr.bf16.mxu1 %v9438_v40  ;;  %v2972_v39 = vld [vmem:[%s13535_s7 + $0x190] sm:$0xff] }
  0x60   : > { %3176 = vperm.xlu0 %9396, %v2958_v24  }
  0x61   : > { %3171 = vperm.xlu1 %9397, %v2957_v25  }
  0x64   : > { %3186 = vperm.xlu0 %9396, %v2960_v26   ;;  %v2975_v26 = vld [vmem:[%s13535_s7 + $0x1a8] sm:$0xff] }
  0x65   : > { %3181 = vperm.xlu1 %9397, %v2959_v27   ;;  %v2978_v27 = vld [vmem:[%s13535_s7 + $0x1c0] sm:$0xff] }
  0x66   : > { %8974 = vmatmul.mubr.bf16.gmra.mrb[28].mxu0 %v9421_v41  ;;  %9010 = vmatmul.mubr.bf16.gmra.mrb[28].mxu1 %v9439_v42 }
  0x67   : > { %8977 = vmatprep.mubr.bf16.mxu0 %v9422_v43  ;;  %9013 = vmatprep.mubr.bf16.mxu1 %v9440_v44 }
  0x68   : > { %3196 = vperm.xlu0 %9396, %v2962_v28  }
  0x69   : > { %3191 = vperm.xlu1 %9397, %v2961_v29  }
  0x6c   : > { %3206 = vperm.xlu0 %9396, %v2964_v30  }
  0x6d   : > { %3201 = vperm.xlu1 %9397, %v2963_v31  }
  0x6e   : > { %8978 = vmatmul.mubr.bf16.gmra.mrb[32].mxu0 %v9423_v45  ;;  %9014 = vmatmul.mubr.bf16.gmra.mrb[32].mxu1 %v9441_v46 }
  0x70   : > { %3216 = vperm.xlu0 %9396, %v2966_v32  }
  0x71   : > { %3211 = vperm.xlu1 %9397, %v2965_v33  }
  0x74   : > { %3226 = vperm.xlu0 %9396, %v2968_v34  }
  0x75   : > { %3221 = vperm.xlu1 %9397, %v2967_v35  }
  0x78   : > { %3236 = vperm.xlu0 %9396, %v2970_v36  }
  0x79   : > { %3231 = vperm.xlu1 %9397, %v2969_v38   ;;  %v2977_v38 = vld [vmem:[%s13535_s7 + $0x1b8] sm:$0xff] }
  0x7c   : > { %3246 = vperm.xlu0 %9396, %v2972_v39   ;;  %v2980_v39 = vld [vmem:[%s13535_s7 + $0x1d0] sm:$0xff] }
  0x7d   : > { %3241 = vperm.xlu1 %9397, %v2971_v56  }
  0x80   : > { %3256 = vperm.xlu0 %9396, %v2974_v57  }
  0x81   : > { %3251 = vperm.xlu1 %9397, %v2973_v13  }
  0x84   : > { %3266 = vperm.xlu0 %9396, %v2976_v14  }
  0x85   : > { %3261 = vperm.xlu1 %9397, %v2975_v26  }
  0x88   : > { %3276 = vperm.xlu0 %9396, %v2978_v27  }
  0x89   : > { %3271 = vperm.xlu1 %9397, %v2977_v38  }
  0x8c   : > { %3286 = vperm.xlu0 %9396, %v2980_v39  }
 0x101   : > { %v8947_v40 = vpop.f32.mrb[0].mxu0  ;;  %v8983_v41 = vpop.f32.mrb[0].mxu1 }
 0x102   : > { %v10742_v42 = vadd.f32 %v8947_v40, %v10733_v37  ;;  %v731_v43 = vpop.f32.mrb[1].mxu0  ;;  %v10745_v44 = vadd.f32 %v8983_v41, %v10733_v37  ;;  %v875_v45 = vpop.f32.mrb[1].mxu1 }
 0x103   : > { %v10748_v46 = vadd.f32 %v10733_v37, %v731_v43  ;;  %v8948_v48 = vpop.f32.mrb[2].mxu0  ;;  %v10751_v49 = vadd.f32 %v10733_v37, %v875_v45  ;;  %v8984_v50 = vpop.f32.mrb[2].mxu1 }
 0x104   : > { %v1020_v51 = vsub.f32 0.0, %v10742_v42  ;;  %v10755_v52 = vadd.f32 %v8948_v48, %v10733_v37  ;;  %v734_v53 = vpop.f32.mrb[3].mxu0  ;;  %v10758_v54 = vadd.f32 %v8984_v50, %v10733_v37  ;;  %v878_v55 = vpop.f32.mrb[3].mxu1  ;;  %v1056_v60 = vsub.f32 0.0, %v10745_v44 }
 0x105   : > { %v1018_v58 = vsub.f32 0.0, %v10748_v46  ;;  %v10768_v59 = vadd.f32 %v10733_v37, %v734_v53  ;;  %v1054_v63 = vsub.f32 0.0, %v10751_v49  ;;  %v10776_v4 = vadd.f32 %v10733_v37, %v878_v55 }
 0x106   : > { %v1094_v61 = vmul.f32 1.442695, %v1020_v51  ;;  %v1021_v62 = vsub.f32 0.0, %v10755_v52  ;;  %v1057_v2 = vsub.f32 0.0, %v10758_v54  ;;  %v1166_v7 = vmul.f32 1.442695, %v1056_v60 }
 0x107   : > { %v1090_v0 = vmul.f32 1.442695, %v1018_v58  ;;  %v1019_v1 = vsub.f32 0.0, %v10768_v59  ;;  %v1162_v11 = vmul.f32 1.442695, %v1054_v63  ;;  %v1055_v22 = vsub.f32 0.0, %v10776_v4 }
 0x108   : > { %9558 = vpow2.f32 %v1094_v61  ;;  %v1096_v3 = vmul.f32 1.442695, %v1021_v62  ;;  %v1168_v17 = vmul.f32 1.442695, %v1057_v2 }
 0x109   : > { %9560 = vpow2.f32 %v1090_v0  ;;  %v1092_v5 = vmul.f32 1.442695, %v1019_v1  ;;  %v8951_v6 = vpop.f32.mrb[4].mxu0  ;;  %v10778_v8 = vpop.f32.mrb[4].mxu1  ;;  %v1164_v33 = vmul.f32 1.442695, %v1055_v22 }
 0x10a   : > { %9562 = vpow2.f32 %v1096_v3  ;;  %v10781_v9 = vadd.f32 %v8951_v6, %v10733_v37  ;;  %v747_v10 = vpop.f32.mrb[5].mxu0  ;;  %v10783_v12 = vpop.f32.mrb[5].mxu1  ;;  %v2979_v3 = vld [vmem:[%s13535_s7 + $0x1c8] sm:$0xff] }
 0x10b   : > { %9564 = vpow2.f32 %v1092_v5  ;;  %v10792_v15 = vadd.f32 %v10733_v37, %v747_v10  ;;  %v8952_v16 = vpop.f32.mrb[6].mxu0  ;;  %v10794_v18 = vpop.f32.mrb[6].mxu1  ;;  %v2982_v5 = vld [vmem:[%s13535_s7 + $0x1e0] sm:$0xff]  ;;  %3281 = vperm.xlu1 %9397, %v2979_v3  }
 0x10c   : > { %v1024_v19 = vsub.f32 0.0, %v10781_v9  ;;  %v10798_v20 = vadd.f32 %v8952_v16, %v10733_v37  ;;  %v750_v21 = vpop.f32.mrb[7].mxu0  ;;  %v10801_v23 = vpop.f32.mrb[7].mxu1  ;;  %9566 = vpow2.f32 %v1166_v7  ;;  %3296 = vperm.xlu0 %9396, %v2982_v5  }
 0x10d   : > { %v1022_v24 = vsub.f32 0.0, %v10792_v15  ;;  %v10805_v25 = vadd.f32 %v10733_v37, %v750_v21  ;;  %9568 = vpow2.f32 %v1162_v11 }
 0x10e   : > { %v1102_v28 = vmul.f32 1.442695, %v1024_v19  ;;  %v1025_v29 = vsub.f32 0.0, %v10798_v20  ;;  %9570 = vpow2.f32 %v1168_v17 }
 0x10f   : > { %v1098_v30 = vmul.f32 1.442695, %v1022_v24  ;;  %v1023_v31 = vsub.f32 0.0, %v10805_v25 }
 0x110   : > { %9572 = vpow2.f32 %v1102_v28  ;;  %v1104_v32 = vmul.f32 1.442695, %v1025_v29  ;;  %v2981_v29 = vld [vmem:[%s13535_s7 + $0x1d8] sm:$0xff] }
 0x111   : > { %9574 = vpow2.f32 %v1098_v30  ;;  %v1100_v34 = vmul.f32 1.442695, %v1023_v31  ;;  %v8955_v35 = vpop.f32.mrb[8].mxu0  ;;  %v10815_v36 = vpop.f32.mrb[8].mxu1  ;;  %v2984_v30 = vld [vmem:[%s13535_s7 + $0x1f0] sm:$0xff]  ;;  %3291 = vperm.xlu1 %9397, %v2981_v29  }
 0x112   : > { %v9559_v40 = vpop.eup %9558  ;;  %9576 = vpow2.f32 %v1104_v32  ;;  %v10824_v41 = vadd.f32 %v8955_v35, %v10733_v37  ;;  %v763_v43 = vpop.f32.mrb[9].mxu0  ;;  %3306 = vperm.xlu0 %9396, %v2984_v30   ;;  %v2985_v30 = vld [vmem:[%s13535_s7 + $0x1f8] sm:$0xff] }
 0x113   : > { %v10826_v45 = vpop.f32.mrb[9].mxu1  ;;  %v9561_v48 = vpop.eup %9560  ;;  %v1236_v50 = vadd.f32 1.0, %v9559_v40  ;;  %9578 = vpow2.f32 %v1100_v34  ;;  %v10829_v51 = vadd.f32 %v10733_v37, %v763_v43 }
 0x114   : > { %v8956_v53 = vpop.f32.mrb[10].mxu0  ;;  %v10831_v55 = vpop.f32.mrb[10].mxu1  ;;  %v1234_v57 = vadd.f32 1.0, %v9561_v48  ;;  %v1028_v58 = vsub.f32 0.0, %v10824_v41  ;;  %9580 = vpow2.f32 %v1164_v33 }
 0x115   : > { %v9563_v56 = vpop.eup %9562  ;;  %v10835_v60 = vadd.f32 %v8956_v53, %v10733_v37  ;;  %v766_v61 = vpop.f32.mrb[11].mxu0  ;;  %9582 = vrcp.f32 %v1236_v50  ;;  %v1026_v1 = vsub.f32 0.0, %v10829_v51 }
 0x116   : > { %v10837_v62 = vpop.f32.mrb[11].mxu1  ;;  %v9565_v63 = vpop.eup %9564  ;;  %v1237_v0 = vadd.f32 1.0, %v9563_v56  ;;  %v10841_v2 = vadd.f32 %v10733_v37, %v766_v61  ;;  %9584 = vrcp.f32 %v1234_v57  ;;  %v1110_v7 = vmul.f32 1.442695, %v1028_v58 }
 0x117   : > { %v1235_v6 = vadd.f32 1.0, %v9565_v63  ;;  %v1029_v10 = vsub.f32 0.0, %v10835_v60  ;;  %v10850_v11 = vpop.eup %9566  ;;  %v1106_v13 = vmul.f32 1.442695, %v1026_v1  ;;  %v2983_v63 = vld [vmem:[%s13535_s7 + $0x1e8] sm:$0xff] }
 0x118   : > { %9586 = vrcp.f32 %v1237_v0  ;;  %v1027_v14 = vsub.f32 0.0, %v10841_v2  ;;  %v10853_v16 = vpop.eup %9568  ;;  %v2986_v0 = vld [vmem:[%s13535_s7 + $0x200] sm:$0xff]  ;;  %3301 = vperm.xlu1 %9397, %v2983_v63  }
 0x119   : > { %9588 = vrcp.f32 %v1235_v6  ;;  %v1112_v17 = vmul.f32 1.442695, %v1029_v10  ;;  %v10855_v19 = vpop.eup %9570  ;;  %v8959_v22 = vpop.f32.mrb[12].mxu0  ;;  %3316 = vperm.xlu0 %9396, %v2986_v0  }
 0x11a   : > { %9590 = vpow2.f32 %v1110_v7  ;;  %v1108_v21 = vmul.f32 1.442695, %v1027_v14  ;;  %v9573_v24 = vpop.eup %9572  ;;  %v10858_v26 = vadd.f32 %v8959_v22, %v10733_v37  ;;  %v779_v27 = vpop.f32.mrb[13].mxu0 }
 0x11b   : > { %9592 = vpow2.f32 %v1106_v13  ;;  %v10860_v28 = vpop.f32.mrb[12].mxu1  ;;  %v9575_v31 = vpop.eup %9574  ;;  %v1240_v32 = vadd.f32 1.0, %v9573_v24  ;;  %v10869_v33 = vadd.f32 %v10733_v37, %v779_v27  ;;  %v10897_v27 = vadd.f32 %v10778_v8, %v10733_v37  ;;  %v2988_v8 = vld [vmem:[%s13535_s7 + $0x210] sm:$0xff] }
 0x11c   : > { %9594 = vpow2.f32 %v1112_v17  ;;  %v8960_v34 = vpop.f32.mrb[14].mxu0  ;;  %v10871_v35 = vpop.f32.mrb[13].mxu1  ;;  %v1238_v39 = vadd.f32 1.0, %v9575_v31  ;;  %v1032_v40 = vsub.f32 0.0, %v10858_v26  ;;  %3311 = vperm.xlu1 %9397, %v2985_v30  }
 0x11d   : > { %v9577_v38 = vpop.eup %9576  ;;  %9596 = vpow2.f32 %v1108_v21  ;;  %v10875_v43 = vadd.f32 %v8960_v34, %v10733_v37  ;;  %v782_v48 = vpop.f32.mrb[15].mxu0  ;;  %v1030_v57 = vsub.f32 0.0, %v10869_v33  ;;  %13586 = vst [vmem:[#allocation4_spill] sm:$0xff] %v10897_v27  ;;  %3326 = vperm.xlu0 %9396, %v2988_v8  }
 0x11e   : > { %v10877_v50 = vpop.f32.mrb[14].mxu1  ;;  %v9579_v53 = vpop.eup %9578  ;;  %9598 = vrcp.f32 %v1240_v32  ;;  %v1241_v56 = vadd.f32 1.0, %v9577_v38  ;;  %v10881_v58 = vadd.f32 %v10733_v37, %v782_v48  ;;  %v1118_v5 = vmul.f32 1.442695, %v1032_v40 }
 0x11f   : > { %v10883_v61 = vpop.f32.mrb[15].mxu1  ;;  %v10891_v1 = vpop.eup %9580  ;;  %9600 = vrcp.f32 %v1238_v39  ;;  %v1239_v3 = vadd.f32 1.0, %v9579_v53  ;;  %v1033_v6 = vsub.f32 0.0, %v10875_v43  ;;  %v1114_v10 = vmul.f32 1.442695, %v1030_v57 }
 0x120   : > { %v9583_v7 = vpop.eup %9582  ;;  %9602 = vrcp.f32 %v1241_v56  ;;  %v1031_v13 = vsub.f32 0.0, %v10881_v58 }
 0x121   : > { %v9585_v14 = vpop.eup %9584  ;;  %9604 = vrcp.f32 %v1239_v3  ;;  %v1120_v17 = vmul.f32 1.442695, %v1033_v6  ;;  %v8963_v24 = vpop.f32.mrb[16].mxu0  ;;  %v1380_v32 = vmul.f32 %v9583_v7, %v10742_v42 }
 0x122   : > { %v9587_v21 = vpop.eup %9586  ;;  %9606 = vpow2.f32 %v1118_v5  ;;  %v1116_v22 = vmul.f32 1.442695, %v1031_v13  ;;  %v10899_v29 = vpop.f32.mrb[16].mxu1  ;;  %v10907_v38 = vadd.f32 %v8963_v24, %v10733_v37  ;;  %v1378_v42 = vmul.f32 %v9585_v14, %v10748_v46 }
 0x123   : > { %v9589_v31 = vpop.eup %9588  ;;  %v1381_v34 = vmul.f32 %v9587_v21, %v10755_v52  ;;  %9608 = vpow2.f32 %v1114_v10  ;;  %v795_v39 = vpop.f32.mrb[17].mxu0  ;;  %v2990_v21 = vld [vmem:[%s13535_s7 + $0x220] sm:$0xff] }
 0x124   : > { %v10909_v40 = vpop.f32.mrb[17].mxu1  ;;  %v9591_v48 = vpop.eup %9590  ;;  %v1379_v52 = vmul.f32 %v9589_v31, %v10768_v59  ;;  %9610 = vpow2.f32 %v1120_v17  ;;  %v10924_v53 = vadd.f32 %v10733_v37, %v795_v39  ;;  %v1036_v5 = vsub.f32 0.0, %v10907_v38  ;;  %v2987_v17 = vld [vmem:[%s13535_s7 + $0x208] sm:$0xff]  ;;  %3336 = vperm.xlu0 %9396, %v2990_v21  }
 0x125   : > { %v8964_v56 = vpop.f32.mrb[18].mxu0  ;;  %v10926_v57 = vpop.f32.mrb[18].mxu1  ;;  %v8108_v0 = vpack.c.bf16 %v1381_v34, %v1380_v32  ;;  %v1244_v3 = vadd.f32 1.0, %v9591_v48  ;;  %9612 = vpow2.f32 %v1116_v22  ;;  %3321 = vperm.xlu1 %9397, %v2987_v17  }
 0x126   : > { %v9593_v63 = vpop.eup %9592  ;;  %v798_v6 = vpop.f32.mrb[19].mxu0  ;;  %v8103_v7 = vpack.c.bf16 %v1379_v52, %v1378_v42  ;;  %v1034_v13 = vsub.f32 0.0, %v10924_v53  ;;  %v10933_v14 = vadd.f32 %v8964_v56, %v10733_v37  ;;  %v1126_v30 = vmul.f32 1.442695, %v1036_v5 }
 0x127   : > { %v10929_v46 = vpop.f32.mrb[19].mxu1  ;;  %v9595_v59 = vpop.eup %9594  ;;  %v1242_v10 = vadd.f32 1.0, %v9593_v63  ;;  %8604 = vst [vmem:[%s10919_s29 + $0x8] sm:$0xff] %v8108_v0   ;;  %9614 = vrcp.f32 %v1244_v3  ;;  %v10943_v31 = vadd.f32 %v10733_v37, %v798_v6  ;;  %v1060_v52 = vsub.f32 0.0, %v10897_v27  ;;  %v2989_v6 = vld [vmem:[%s13535_s7 + $0x218] sm:$0xff] }
 0x128   : > { %v9597_v22 = vpop.eup %9596  ;;  %v1245_v24 = vadd.f32 1.0, %v9595_v59  ;;  %8104 = vst [vmem:[%s10919_s29] sm:$0xff] %v8103_v7   ;;  %v1122_v39 = vmul.f32 1.442695, %v1034_v13  ;;  %v1037_v8 = vsub.f32 0.0, %v10933_v14  ;;  %v2992_v59 = vld [vmem:[%s13535_s7 + $0x230] sm:$0xff] }
 0x129   : > { %v9599_v32 = vpop.eup %9598  ;;  %9616 = vrcp.f32 %v1242_v10  ;;  %v1243_v34 = vadd.f32 1.0, %v9597_v22  ;;  %v1035_v42 = vsub.f32 0.0, %v10943_v31  ;;  %v8967_v3 = vpop.f32.mrb[20].mxu0  ;;  %3331 = vperm.xlu1 %9397, %v2989_v6   ;;  %3346 = vperm.xlu0 %9396, %v2992_v59  }
 0x12a   : > { %v9601_v48 = vpop.eup %9600  ;;  %9618 = vrcp.f32 %v1245_v24  ;;  %v1384_v63 = vmul.f32 %v9599_v32, %v10781_v9  ;;  %v1128_v0 = vmul.f32 1.442695, %v1037_v8  ;;  %v10950_v5 = vpop.f32.mrb[20].mxu1  ;;  %v10960_v9 = vadd.f32 %v8967_v3, %v10733_v37 }
 0x12b   : > { %v9603_v56 = vpop.eup %9602  ;;  %9620 = vrcp.f32 %v1243_v34  ;;  %v1124_v13 = vmul.f32 1.442695, %v1035_v42  ;;  %v811_v17 = vpop.f32.mrb[21].mxu0  ;;  %v1382_v24 = vmul.f32 %v9601_v48, %v10792_v15 }
 0x12c   : > { %v9605_v7 = vpop.eup %9604  ;;  %v1385_v10 = vmul.f32 %v9603_v56, %v10798_v20  ;;  %9622 = vpow2.f32 %v1126_v30  ;;  %v10962_v21 = vpop.f32.mrb[21].mxu1  ;;  %v10967_v34 = vadd.f32 %v10733_v37, %v811_v17  ;;  %v1040_v15 = vsub.f32 0.0, %v10960_v9 }
 0x12d   : > { %v9607_v22 = vpop.eup %9606  ;;  %v1383_v32 = vmul.f32 %v9605_v7, %v10805_v25  ;;  %9624 = vpow2.f32 %v1122_v39  ;;  %v8968_v8 = vpop.f32.mrb[22].mxu0 }
 0x12e   : > { %v10969_v47 = vpop.f32.mrb[22].mxu1  ;;  %v9609_v20 = vpop.eup %9608  ;;  %v8118_v30 = vpack.c.bf16 %v1385_v10, %v1384_v63  ;;  %v1248_v42 = vadd.f32 1.0, %v9607_v22  ;;  %9626 = vpow2.f32 %v1128_v0  ;;  %v1038_v7 = vsub.f32 0.0, %v10967_v34 }
 0x12f   : > { %13587 = vst [vmem:[#allocation5_spill] sm:$0xff] %v10969_v47  ;;  %v814_v48 = vpop.f32.mrb[23].mxu0  ;;  %v10972_v25 = vpop.f32.mrb[23].mxu1  ;;  %v8113_v56 = vpack.c.bf16 %v1383_v32, %v1382_v24  ;;  %v1246_v3 = vadd.f32 1.0, %v9609_v20  ;;  %9628 = vpow2.f32 %v1124_v13  ;;  %v1134_v59 = vmul.f32 1.442695, %v1040_v15 }
 0x130   : > { %13588 = vst [vmem:[#allocation6_spill] sm:$0xff] %v10972_v25  ;;  %v9611_v39 = vpop.eup %9610  ;;  %8606 = vst [vmem:[%s10919_s29 + $0x18] sm:$0xff] %v8118_v30   ;;  %9630 = vrcp.f32 %v1248_v42  ;;  %v10977_v0 = vadd.f32 %v8968_v8, %v10733_v37  ;;  %v9450_v10 = vld [vmem:[%s10919_s29] sm:$0xff]   ;;  %v1130_v22 = vmul.f32 1.442695, %v1038_v7  ;;  %v10982_v24 = vadd.f32 %v10733_v37, %v814_v48  ;;  %v9451_v32 = vld [vmem:[%s10919_s29 + $0x8] sm:$0xff]  }
 0x131   : > { %v9613_v6 = vpop.eup %9612  ;;  %v1249_v63 = vadd.f32 1.0, %v9611_v39  ;;  %8605 = vst [vmem:[%s10919_s29 + $0x10] sm:$0xff] %v8113_v56   ;;  %9632 = vrcp.f32 %v1246_v3  ;;  %9033 = vmatprep.mubr.bf16.mxu1 %v9450_v10  ;;  %v2991_v30 = vld [vmem:[%s13535_s7 + $0x228] sm:$0xff]  ;;  %v8971_v39 = vpop.f32.mrb[24].mxu0  ;;  %v1174_v48 = vmul.f32 1.442695, %v1060_v52 }
 0x132   : > { %v1247_v17 = vadd.f32 1.0, %v9613_v6  ;;  %v9615_v13 = vpop.eup %9614  ;;  %v1041_v20 = vsub.f32 0.0, %v10977_v0  ;;  %v1039_v15 = vsub.f32 0.0, %v10982_v24  ;;  %9034 = vmatmul.mubr.bf16.vlgmr.msra.gmra.mrb[36].mxu1 %v9451_v32  ;;  %v10991_v56 = vpop.f32.mrb[24].mxu1  ;;  %3341 = vperm.xlu1 %9397, %v2991_v30  }
 0x133   : > { %9634 = vrcp.f32 %v1249_v63  ;;  %v9617_v8 = vpop.eup %9616  ;;  %v1388_v42 = vmul.f32 %v9615_v13, %v10824_v41  ;;  %13589 = vst [vmem:[#allocation7_spill] sm:$0xff] %v10991_v56  ;;  %v10995_v63 = vadd.f32 %v8971_v39, %v10733_v37  ;;  %v827_v10 = vpop.f32.mrb[25].mxu0  ;;  %v2993_v41 = vld [vmem:[%s13535_s7 + $0x238] sm:$0xff] }
 0x134   : > { %9636 = vrcp.f32 %v1247_v17  ;;  %v9619_v3 = vpop.eup %9618  ;;  %v1386_v7 = vmul.f32 %v9617_v8, %v10829_v51  ;;  %v1136_v6 = vmul.f32 1.442695, %v1041_v20  ;;  %v10997_v27 = vpop.f32.mrb[25].mxu1  ;;  %v1132_v32 = vmul.f32 1.442695, %v1039_v15 }
 0x135   : > { %9638 = vpow2.f32 %v1134_v59  ;;  %13590 = vst [vmem:[#allocation8_spill] sm:$0xff] %v10997_v27  ;;  %v9621_v17 = vpop.eup %9620  ;;  %v1389_v52 = vmul.f32 %v9619_v3, %v10835_v60  ;;  %v11004_v13 = vadd.f32 %v10733_v37, %v827_v10  ;;  %v8972_v51 = vpop.f32.mrb[26].mxu0  ;;  %v1044_v8 = vsub.f32 0.0, %v10995_v63 }
 0x136   : > { %9640 = vpow2.f32 %v1130_v22  ;;  %v11006_v59 = vpop.f32.mrb[26].mxu1  ;;  %v9623_v20 = vpop.eup %9622  ;;  %v1387_v30 = vmul.f32 %v9621_v17, %v10841_v2  ;;  %v11011_v39 = vadd.f32 %v8972_v51, %v10733_v37  ;;  %3351 = vperm.xlu1 %9397, %v2993_v41  }
 0x137   : > { %13591 = vst [vmem:[#allocation9_spill] sm:$0xff] %v11006_v59  ;;  %9642 = vpow2.f32 %v1136_v6  ;;  %v830_v27 = vpop.f32.mrb[27].mxu0  ;;  %v11013_v60 = vpop.f32.mrb[27].mxu1  ;;  %v8128_v15 = vpack.c.bf16 %v1389_v52, %v1388_v42  ;;  %v1252_v3 = vadd.f32 1.0, %v9623_v20  ;;  %v1042_v10 = vsub.f32 0.0, %v11004_v13 }
 0x138   : > { %13592 = vst [vmem:[#allocation10_spill] sm:$0xff] %v11013_v60  ;;  %v9625_v22 = vpop.eup %9624  ;;  %9644 = vpow2.f32 %v1132_v32  ;;  %v8123_v6 = vpack.c.bf16 %v1387_v30, %v1386_v7  ;;  %v1045_v59 = vsub.f32 0.0, %v11011_v39  ;;  %v1142_v56 = vmul.f32 1.442695, %v1044_v8  ;;  %v9452_v52 = vld [vmem:[%s10919_s29 + $0x10] sm:$0xff]   ;;  %v9453_v7 = vld [vmem:[%s10919_s29 + $0x18] sm:$0xff]  }
 0x139   : > { %v9627_v2 = vpop.eup %9626  ;;  %v1250_v17 = vadd.f32 1.0, %v9625_v22  ;;  %9646 = vpow2.f32 %v1174_v48  ;;  %8608 = vst [vmem:[%s10919_s29 + $0x28] sm:$0xff] %v8128_v15   ;;  %v11019_v42 = vadd.f32 %v10733_v37, %v830_v27  ;;  %v1138_v20 = vmul.f32 1.442695, %v1042_v10  ;;  %v8975_v25 = vpop.f32.mrb[28].mxu0  ;;  %9037 = vmatprep.mubr.bf16.mxu1 %v9452_v52 }
 0x13a   : > { %v9629_v51 = vpop.eup %9628  ;;  %9648 = vrcp.f32 %v1252_v3  ;;  %v1253_v60 = vadd.f32 1.0, %v9627_v2  ;;  %8607 = vst [vmem:[%s10919_s29 + $0x20] sm:$0xff] %v8123_v6   ;;  %v1144_v22 = vmul.f32 1.442695, %v1045_v59  ;;  %v11027_v8 = vadd.f32 %v10733_v37, %v10783_v12  ;;  %v11029_v27 = vpop.f32.mrb[28].mxu1  ;;  %9038 = vmatmul.mubr.bf16.gmra.mrb[40].mxu1 %v9453_v7 }
 0x13b   : > { %v9631_v32 = vpop.eup %9630  ;;  %9650 = vrcp.f32 %v1250_v17  ;;  %v1251_v41 = vadd.f32 1.0, %v9629_v51  ;;  %v1043_v48 = vsub.f32 0.0, %v11019_v42  ;;  %13594 = vst [vmem:[#allocation12_spill] sm:$0xff] %v11029_v27  ;;  %v11034_v10 = vadd.f32 %v8975_v25, %v10733_v37  ;;  %v843_v59 = vpop.f32.mrb[29].mxu0 }
 0x13c   : > { %v9633_v30 = vpop.eup %9632  ;;  %9652 = vrcp.f32 %v1253_v60  ;;  %13593 = vst [vmem:[#allocation11_spill] sm:$0xff] %v11027_v8  ;;  %v1392_v3 = vmul.f32 %v9631_v32, %v10858_v26  ;;  %v11036_v60 = vpop.f32.mrb[29].mxu1  ;;  %v11040_v51 = vadd.f32 %v10733_v37, %v843_v59 }
 0x13d   : > { %v9635_v15 = vpop.eup %9634  ;;  %v1390_v2 = vmul.f32 %v9633_v30, %v10869_v33  ;;  %9654 = vrcp.f32 %v1251_v41  ;;  %13595 = vst [vmem:[#allocation13_spill] sm:$0xff] %v11036_v60  ;;  %v1140_v12 = vmul.f32 1.442695, %v1043_v48  ;;  %v8976_v52 = vpop.f32.mrb[30].mxu0  ;;  %v1048_v25 = vsub.f32 0.0, %v11034_v10 }
 0x13e   : > { %v9637_v6 = vpop.eup %9636  ;;  %v1393_v17 = vmul.f32 %v9635_v15, %v10875_v43  ;;  %9656 = vpow2.f32 %v1142_v56  ;;  %v11042_v26 = vpop.f32.mrb[30].mxu1  ;;  %v11047_v41 = vadd.f32 %v8976_v52, %v10733_v37  ;;  %v1046_v15 = vsub.f32 0.0, %v11040_v51 }
 0x13f   : > { %13596 = vst [vmem:[#allocation14_spill] sm:$0xff] %v11042_v26  ;;  %v9639_v33 = vpop.eup %9638  ;;  %v1391_v32 = vmul.f32 %v9637_v6, %v10881_v58  ;;  %9658 = vpow2.f32 %v1138_v20  ;;  %v846_v7 = vpop.f32.mrb[31].mxu0  ;;  %v1150_v6 = vmul.f32 1.442695, %v1048_v25 }
 0x140   : > { %v11049_v43 = vpop.f32.mrb[31].mxu1  ;;  %v9641_v56 = vpop.eup %9640  ;;  %v8138_v30 = vpack.c.bf16 %v1393_v17, %v1392_v3  ;;  %v1256_v48 = vadd.f32 1.0, %v9639_v33  ;;  %9660 = vpow2.f32 %v1144_v22  ;;  %v1146_v60 = vmul.f32 1.442695, %v1046_v15  ;;  %v9455_v25 = vld [vmem:[%s10919_s29 + $0x28] sm:$0xff]  }
 0x141   : > { %13597 = vst [vmem:[#allocation15_spill] sm:$0xff] %v11049_v43  ;;  %v9643_v59 = vpop.eup %9642  ;;  %v8133_v58 = vpack.c.bf16 %v1391_v32, %v1390_v2  ;;  %v1254_v20 = vadd.f32 1.0, %v9641_v56  ;;  %9662 = vpow2.f32 %v1140_v12  ;;  %v1049_v43 = vsub.f32 0.0, %v11047_v41  ;;  %v9454_v2 = vld [vmem:[%s10919_s29 + $0x20] sm:$0xff]   ;;  %v8979_v32 = vpop.f32.mrb[32].mxu0 }
 0x142   : > { %v9645_v26 = vpop.eup %9644  ;;  %8610 = vst [vmem:[%s10919_s29 + $0x38] sm:$0xff] %v8138_v30   ;;  %9664 = vrcp.f32 %v1256_v48  ;;  %v1257_v52 = vadd.f32 1.0, %v9643_v59  ;;  %v11058_v17 = vadd.f32 %v10733_v37, %v846_v7  ;;  %v11062_v56 = vpop.f32.mrb[32].mxu1  ;;  %v11067_v59 = vadd.f32 %v8979_v32, %v10733_v37  ;;  %9041 = vmatprep.mubr.bf16.mxu1 %v9454_v2 }
 0x143   : > { %v11054_v3 = vpop.eup %9646  ;;  %8609 = vst [vmem:[%s10919_s29 + $0x30] sm:$0xff] %v8133_v58   ;;  %9666 = vrcp.f32 %v1254_v20  ;;  %v1255_v22 = vadd.f32 1.0, %v9645_v26  ;;  %v1152_v12 = vmul.f32 1.442695, %v1049_v43  ;;  %13598 = vst [vmem:[#allocation16_spill] sm:$0xff] %v11062_v56  ;;  %v859_v26 = vpop.f32.mrb[33].mxu0  ;;  %9042 = vmatmul.mubr.bf16.gmra.mrb[44].mxu1 %v9455_v25 }
 0x144   : > { %v9649_v33 = vpop.eup %9648  ;;  %9668 = vrcp.f32 %v1257_v52  ;;  %v1047_v15 = vsub.f32 0.0, %v11058_v17  ;;  %v11069_v7 = vpop.f32.mrb[33].mxu1  ;;  %v9486_v43 = vld [vmem:[%s13533_s5] sm:$0xff]   ;;  %v1052_v56 = vsub.f32 0.0, %v11067_v59 }
 0x145   : > { %v9651_v30 = vpop.eup %9650  ;;  %v1396_v48 = vmul.f32 %v9649_v33, %v10907_v38  ;;  %9670 = vrcp.f32 %v1255_v22  ;;  %13599 = vst [vmem:[#allocation17_spill] sm:$0xff] %v11069_v7  ;;  %v11076_v38 = vadd.f32 %v10733_v37, %v859_v26  ;;  %v8980_v52 = vpop.f32.mrb[34].mxu0  ;;  %v1058_v22 = vsub.f32 0.0, %v11027_v8  ;;  %3731 = vmatpush1.bf16.msra.mxu0 %v9486_v43 }
 0x146   : > { %v9653_v58 = vpop.eup %9652  ;;  %v1394_v20 = vmul.f32 %v9651_v30, %v10924_v53  ;;  %9672 = vpow2.f32 %v1150_v6  ;;  %v11079_v33 = vpop.f32.mrb[34].mxu1  ;;  %v1148_v7 = vmul.f32 1.442695, %v1047_v15  ;;  %v9487_v53 = vld [vmem:[%s13533_s5 + $0x8] sm:$0xff]  }
 0x147   : > { %13600 = vst [vmem:[#allocation18_spill] sm:$0xff] %v11079_v33  ;;  %v9655_v2 = vpop.eup %9654  ;;  %v1397_v32 = vmul.f32 %v9653_v58, %v10933_v14  ;;  %9674 = vpow2.f32 %v1146_v60  ;;  %v862_v27 = vpop.f32.mrb[35].mxu0  ;;  %v1050_v30 = vsub.f32 0.0, %v11076_v38  ;;  %v11091_v14 = vadd.f32 %v8980_v52, %v10733_v37 }
 0x148   : > { %v11083_v47 = vpop.f32.mrb[35].mxu1  ;;  %v9657_v6 = vpop.eup %9656  ;;  %v1395_v25 = vmul.f32 %v9655_v2, %v10943_v31  ;;  %9676 = vpow2.f32 %v1152_v12  ;;  %v13602_v60 = vmov 0   ;;  %v11096_v58 = vadd.f32 %v10794_v18, %v10733_v37  ;;  %v9488_v31 = vld [vmem:[%s13533_s5 + $0x10] sm:$0xff]  }
 0x149   : > { %13601 = vst [vmem:[#allocation19_spill] sm:$0xff] %v11083_v47  ;;  %3732 = vmatprep.subr.bf16.mxu0 %v13602_v60  ;;  %v9659_v15 = vpop.eup %9658  ;;  %v8148_v26 = vpack.c.bf16 %v1397_v32, %v1396_v48  ;;  %v1260_v43 = vadd.f32 1.0, %v9657_v6  ;;  %9678 = vpow2.f32 %v1148_v7  ;;  %v1158_v47 = vmul.f32 1.442695, %v1052_v56 }
 0x14a   : > { %v9661_v12 = vpop.eup %9660  ;;  %v8143_v2 = vpack.c.bf16 %v1395_v25, %v1394_v20  ;;  %v1258_v52 = vadd.f32 1.0, %v9659_v15  ;;  %v1053_v33 = vsub.f32 0.0, %v11091_v14  ;;  %v11104_v7 = vadd.f32 %v10733_v37, %v862_v27  ;;  %v9456_v18 = vld [vmem:[%s10919_s29 + $0x30] sm:$0xff]   ;;  %3733 = vmatpush1.bf16.msra.mxu0 %v9487_v53  ;;  %v9457_v25 = vld [vmem:[%s10919_s29 + $0x38] sm:$0xff]  }
 0x14b   : > { %v9663_v8 = vpop.eup %9662  ;;  %8612 = vst [vmem:[%s10919_s29 + $0x48] sm:$0xff] %v8148_v26   ;;  %9680 = vrcp.f32 %v1260_v43  ;;  %v1261_v48 = vadd.f32 1.0, %v9661_v12  ;;  %v11109_v32 = vadd.f32 %v10733_v37, %v10801_v23  ;;  %v1154_v56 = vmul.f32 1.442695, %v1050_v30  ;;  %3734 = vmatprep.subr.bf16.mxu0 %v13602_v60  ;;  %9045 = vmatprep.mubr.bf16.mxu1 %v9456_v18 }
 0x14c   : > { %v9665_v6 = vpop.eup %9664  ;;  %8611 = vst [vmem:[%s10919_s29 + $0x40] sm:$0xff] %v8143_v2   ;;  %9682 = vrcp.f32 %v1258_v52  ;;  %v1259_v20 = vadd.f32 1.0, %v9663_v8  ;;  %v11115_v15 = vadd.f32 %v10815_v36, %v10733_v37  ;;  %v1160_v43 = vmul.f32 1.442695, %v1053_v33  ;;  %9046 = vmatmul.mubr.bf16.gmra.mrb[48].mxu1 %v9457_v25  ;;  %v9489_v33 = vld [vmem:[%s13533_s5 + $0x18] sm:$0xff]  }
 0x14d   : > { %v9667_v27 = vpop.eup %9666  ;;  %v1400_v26 = vmul.f32 %v9665_v6, %v10960_v9  ;;  %9684 = vrcp.f32 %v1261_v48  ;;  %v1051_v23 = vsub.f32 0.0, %v11104_v7  ;;  %v11121_v8 = vmul.f32 1.442695, %v1058_v22 }
 0x14e   : > { %v9669_v53 = vpop.eup %9668  ;;  %v1398_v12 = vmul.f32 %v9667_v27, %v10967_v34  ;;  %9686 = vrcp.f32 %v1259_v20  ;;  %v1061_v37 = vsub.f32 0.0, %v11096_v58  ;;  %v1059_v9 = vsub.f32 0.0, %v11109_v32  ;;  %3735 = vmatpush1.bf16.msra.mxu0 %v9488_v31 }
 0x14f   : > { %v9671_v36 = vpop.eup %9670  ;;  %v1401_v30 = vmul.f32 %v9669_v53, %v10977_v0  ;;  %9688 = vpow2.f32 %v1158_v47  ;;  %v1156_v2 = vmul.f32 1.442695, %v1051_v23  ;;  %v1272_v22 = vadd.f32 1.0, %v10850_v11  ;;  %3736 = vmatprep.subr.bf16.mxu0 %v13602_v60 }
 0x150   : > { %v9673_v52 = vpop.eup %9672  ;;  %v1399_v34 = vmul.f32 %v9671_v36, %v10982_v24  ;;  %9690 = vpow2.f32 %v1154_v56  ;;  %v1270_v48 = vadd.f32 1.0, %v10853_v16  ;;  %v1064_v18 = vsub.f32 0.0, %v11115_v15  ;;  %v9490_v24 = vld [vmem:[%s13533_s5 + $0x20] sm:$0xff]  }
 0x151   : > { %v9675_v47 = vpop.eup %9674  ;;  %v8158_v0 = vpack.c.bf16 %v1401_v30, %v1400_v26  ;;  %v1264_v31 = vadd.f32 1.0, %v9673_v52  ;;  %9692 = vpow2.f32 %v1160_v43  ;;  %v11143_v26 = vld [vmem:[%s13530_s2] ss:$0 sm:$0xff]  ;;  %v11150_v53 = vmul.f32 1.442695, %v1061_v37 }
 0x152   : > { %v9677_v6 = vpop.eup %9676  ;;  %v8153_v20 = vpack.c.bf16 %v1399_v34, %v1398_v12  ;;  %v1262_v56 = vadd.f32 1.0, %v9675_v47  ;;  %9694 = vpow2.f32 %v1156_v2  ;;  %v9459_v11 = vld [vmem:[%s10919_s29 + $0x48] sm:$0xff]   ;;  %v11147_v43 = vadd.f32 %v11143_v26, %v10826_v45  ;;  %3737 = vmatpush1.bf16.msra.mxu0 %v9489_v33 }
 0x153   : > { %v9679_v16 = vpop.eup %9678  ;;  %8614 = vst [vmem:[%s10919_s29 + $0x58] sm:$0xff] %v8158_v0   ;;  %9696 = vrcp.f32 %v1264_v31  ;;  %v1265_v25 = vadd.f32 1.0, %v9677_v6  ;;  %v9458_v27 = vld [vmem:[%s10919_s29 + $0x40] sm:$0xff]   ;;  %v11154_v12 = vadd.f32 %v11143_v26, %v10831_v55  ;;  %3738 = vmatprep.subr.bf16.mxu0 %v13602_v60  ;;  %v1273_v30 = vadd.f32 1.0, %v10855_v19 }
 0x154   : > { %8613 = vst [vmem:[%s10919_s29 + $0x50] sm:$0xff] %v8153_v20   ;;  %9698 = vrcp.f32 %v1262_v56  ;;  %v1263_v23 = vadd.f32 1.0, %v9679_v16  ;;  %9049 = vmatprep.mubr.bf16.mxu1 %v9458_v27  ;;  %v11158_v2 = vmul.f32 1.442695, %v1059_v9  ;;  %v11162_v45 = vadd.f32 %v11143_v26, %v10837_v62  ;;  %v9491_v62 = vld [vmem:[%s13533_s5 + $0x28] sm:$0xff]  }
 0x155   : > { %v9681_v36 = vpop.eup %9680  ;;  %9700 = vrcp.f32 %v1265_v25  ;;  %v1271_v55 = vadd.f32 1.0, %v10891_v1  ;;  %v1276_v52 = vadd.f32 1.0, %v11054_v3  ;;  %9050 = vmatmul.mubr.bf16.gmra.mrb[52].mxu1 %v9459_v11  ;;  %v11168_v19 = vmul.f32 1.442695, %v1064_v18 }
 0x156   : > { %v9683_v33 = vpop.eup %9682  ;;  %v1404_v37 = vmul.f32 %v9681_v36, %v10995_v63  ;;  %9702 = vrcp.f32 %v1263_v23  ;;  %v1062_v9 = vsub.f32 0.0, %v11147_v43  ;;  %3739 = vmatpush1.bf16.msra.mxu0 %v9490_v24  ;;  %v1065_v3 = vsub.f32 0.0, %v11154_v12 }
 0x157   : > { %v9685_v34 = vpop.eup %9684  ;;  %v1402_v47 = vmul.f32 %v9683_v33, %v11004_v13  ;;  %9704 = vrcp.f32 %v1272_v22  ;;  %v11178_v13 = vadd.f32 %v11143_v26, %v10860_v28  ;;  %3740 = vmatprep.subr.bf16.mxu0 %v13602_v60  ;;  %v1063_v31 = vsub.f32 0.0, %v11162_v45 }
 0x158   : > { %v9687_v63 = vpop.eup %9686  ;;  %v1405_v1 = vmul.f32 %v9685_v34, %v11011_v39  ;;  %9706 = vrcp.f32 %v1270_v48  ;;  %v11185_v39 = vadd.f32 %v11143_v26, %v10871_v35  ;;  %v9492_v48 = vld [vmem:[%s13533_s5 + $0x30] sm:$0xff]   ;;  %v1178_v27 = vmul.f32 1.442695, %v1062_v9 }
 0x159   : > { %v9689_v22 = vpop.eup %9688  ;;  %v1403_v0 = vmul.f32 %v9687_v63, %v11019_v42  ;;  %9708 = vrcp.f32 %v1273_v30  ;;  %v11193_v42 = vadd.f32 %v11143_v26, %v10877_v50  ;;  %v1068_v23 = vsub.f32 0.0, %v11178_v13 }
 0x15a   : > { %v9691_v28 = vpop.eup %9690  ;;  %v8168_v18 = vpack.c.bf16 %v1405_v1, %v1404_v37  ;;  %v1268_v24 = vadd.f32 1.0, %v9689_v22  ;;  %9710 = vrcp.f32 %v1271_v55  ;;  %v9461_v6 = vld [vmem:[%s10919_s29 + $0x58] sm:$0xff]   ;;  %3741 = vmatpush1.bf16.msra.mxu0 %v9491_v62  ;;  %v1066_v30 = vsub.f32 0.0, %v11185_v39 }
 0x15b   : > { %v9693_v20 = vpop.eup %9692  ;;  %v8163_v56 = vpack.c.bf16 %v1403_v0, %v1402_v47  ;;  %v1266_v11 = vadd.f32 1.0, %v9691_v28  ;;  %9712 = vrcp.f32 %v1276_v52  ;;  %v9460_v35 = vld [vmem:[%s10919_s29 + $0x50] sm:$0xff]   ;;  %3742 = vmatprep.subr.bf16.mxu0 %v13602_v60  ;;  %v11203_v33 = vadd.f32 %v11143_v26, %v10883_v61 }
 0x15c   : > { %v9695_v16 = vpop.eup %9694  ;;  %8616 = vst [vmem:[%s10919_s29 + $0x68] sm:$0xff] %v8168_v18   ;;  %9714 = vrcp.f32 %v1268_v24  ;;  %v1269_v25 = vadd.f32 1.0, %v9693_v20  ;;  %9053 = vmatprep.mubr.bf16.mxu1 %v9460_v35  ;;  %v1184_v52 = vmul.f32 1.442695, %v1065_v3  ;;  %v1069_v34 = vsub.f32 0.0, %v11193_v42 }
 0x15d   : > { %v9697_v36 = vpop.eup %9696  ;;  %8615 = vst [vmem:[%s10919_s29 + $0x60] sm:$0xff] %v8163_v56   ;;  %9716 = vrcp.f32 %v1266_v11  ;;  %v1267_v50 = vadd.f32 1.0, %v9695_v16  ;;  %9054 = vmatmul.mubr.bf16.gmra.mrb[56].mxu1 %v9461_v6  ;;  %v1180_v62 = vmul.f32 1.442695, %v1063_v31  ;;  %v11210_v63 = vadd.f32 %v11143_v26, %v10899_v29 }
 0x15e   : > { %v9699_v37 = vpop.eup %9698  ;;  %v1408_v55 = vmul.f32 %v9697_v36, %v11034_v10  ;;  %9718 = vrcp.f32 %v1269_v25  ;;  %3743 = vmatpush1.bf16.msra.mxu0 %v9492_v48  ;;  %v1190_v10 = vmul.f32 1.442695, %v1068_v23  ;;  %v11216_v3 = vadd.f32 %v11143_v26, %v10909_v40 }
 0x15f   : > { %v9701_v47 = vpop.eup %9700  ;;  %v1406_v9 = vmul.f32 %v9699_v37, %v11040_v51  ;;  %9720 = vrcp.f32 %v1267_v50  ;;  %3744 = vmatprep.subr.bf16.mxu0 %v13602_v60  ;;  %v1186_v29 = vmul.f32 1.442695, %v1066_v30  ;;  %v1067_v0 = vsub.f32 0.0, %v11203_v33 }
 0x160   : > { %v9703_v61 = vpop.eup %9702  ;;  %v1409_v1 = vmul.f32 %v9701_v47, %v11047_v41  ;;  %9722 = vpow2.f32 %v11121_v8  ;;  %v1192_v40 = vmul.f32 1.442695, %v1069_v34  ;;  %v11246_v16 = vadd.f32 %v11143_v26, %v10950_v5 }
 0x161   : > { %v9705_v51 = vpop.eup %9704  ;;  %v1407_v22 = vmul.f32 %v9703_v61, %v11058_v17  ;;  %9724 = vpow2.f32 %v11150_v53  ;;  %v1072_v53 = vsub.f32 0.0, %v11210_v63 }
 0x162   : > { %v9707_v41 = vpop.eup %9706  ;;  %v8178_v8 = vpack.c.bf16 %v1409_v1, %v1408_v55  ;;  %v1416_v31 = vmul.f32 %v9705_v51, %v10745_v44  ;;  %9726 = vpow2.f32 %v11158_v2  ;;  %v1070_v44 = vsub.f32 0.0, %v11216_v3 }
 0x163   : > { %v9709_v48 = vpop.eup %9708  ;;  %v8173_v28 = vpack.c.bf16 %v1407_v22, %v1406_v9  ;;  %v1414_v18 = vmul.f32 %v9707_v41, %v10751_v49  ;;  %9728 = vpow2.f32 %v11168_v19  ;;  %v9463_v17 = vld [vmem:[%s10919_s29 + $0x68] sm:$0xff]   ;;  %v1188_v49 = vmul.f32 1.442695, %v1067_v0 }
 0x164   : > { %v9711_v24 = vpop.eup %9710  ;;  %8618 = vst [vmem:[%s10919_s29 + $0x78] sm:$0xff] %v8178_v8   ;;  %v1417_v6 = vmul.f32 %v9709_v48, %v10758_v54  ;;  %9730 = vpow2.f32 %v1178_v27  ;;  %v9462_v20 = vld [vmem:[%s10919_s29 + $0x60] sm:$0xff]   ;;  %v11238_v19 = vadd.f32 %v11143_v26, %v10926_v57  ;;  %v11242_v54 = vadd.f32 %v11143_v26, %v10929_v46  ;;  %v13603_v8 = vld [vmem:[#allocation5_spill] sm:$0xff] }
 0x165   : > { %v11232_v56 = vpop.eup %9712  ;;  %8617 = vst [vmem:[%s10919_s29 + $0x70] sm:$0xff] %v8173_v28   ;;  %v1415_v2 = vmul.f32 %v9711_v24, %v10776_v4  ;;  %9732 = vpow2.f32 %v1184_v52  ;;  %9057 = vmatprep.mubr.bf16.mxu1 %v9462_v20  ;;  %v1198_v57 = vmul.f32 1.442695, %v1072_v53  ;;  %v1194_v50 = vmul.f32 1.442695, %v1070_v44  ;;  %v13604_v28 = vld [vmem:[#allocation6_spill] sm:$0xff] }
 0x166   : > { %v9715_v11 = vpop.eup %9714  ;;  %v8198_v35 = vpack.c.bf16 %v1417_v6, %v1416_v31  ;;  %9734 = vpow2.f32 %v1180_v62  ;;  %9058 = vmatmul.mubr.bf16.gmra.mrb[60].mxu1 %v9463_v17  ;;  %v1073_v5 = vsub.f32 0.0, %v11238_v19  ;;  %v1071_v55 = vsub.f32 0.0, %v11242_v54  ;;  %v13605_v17 = vld [vmem:[#allocation7_spill] sm:$0xff] }
 0x167   : > { %v9717_v4 = vpop.eup %9716  ;;  %v1412_v25 = vmul.f32 %v9715_v11, %v11067_v59  ;;  %v8193_v27 = vpack.c.bf16 %v1415_v2, %v1414_v18  ;;  %9736 = vpow2.f32 %v1190_v10  ;;  %v11256_v59 = vadd.f32 %v11143_v26, %v10962_v21 }
 0x168   : > { %v9719_v23 = vpop.eup %9718  ;;  %v1410_v36 = vmul.f32 %v9717_v4, %v11076_v38  ;;  %8622 = vst [vmem:[%s10919_s29 + $0x98] sm:$0xff] %v8198_v35   ;;  %9738 = vpow2.f32 %v1186_v29  ;;  %v1076_v52 = vsub.f32 0.0, %v11246_v16  ;;  %v11264_v51 = vmul.f32 1.442695, %v1073_v5 }
 0x169   : > { %v9721_v46 = vpop.eup %9720  ;;  %v1413_v30 = vmul.f32 %v9719_v23, %v11091_v14  ;;  %8621 = vst [vmem:[%s10919_s29 + $0x90] sm:$0xff] %v8193_v27   ;;  %9740 = vpow2.f32 %v1192_v40  ;;  %v1074_v22 = vsub.f32 0.0, %v11256_v59  ;;  %v11268_v41 = vmul.f32 1.442695, %v1071_v55 }
 0x16a   : > { %v9723_v37 = vpop.eup %9722  ;;  %v1411_v38 = vmul.f32 %v9721_v46, %v11104_v7  ;;  %9742 = vpow2.f32 %v1188_v49  ;;  %v11272_v31 = vadd.f32 %v11143_v26, %v13603_v8  ;;  %v11276_v18 = vadd.f32 %v11143_v26, %v13604_v28  ;;  %v13610_v8 = vld [vmem:[#allocation11_spill] sm:$0xff]  ;;  %v13611_v28 = vld [vmem:[#allocation12_spill] sm:$0xff] }
 0x16b   : > { %v9725_v34 = vpop.eup %9724  ;;  %v8188_v14 = vpack.c.bf16 %v1413_v30, %v1412_v25  ;;  %v1274_v47 = vadd.f32 1.0, %v9723_v37  ;;  %9744 = vpow2.f32 %v1198_v57  ;;  %v9465_v9 = vld [vmem:[%s10919_s29 + $0x78] sm:$0xff]   ;;  %v11280_v53 = vadd.f32 %v11143_v26, %v13605_v17  ;;  %v13606_v25 = vld [vmem:[#allocation8_spill] sm:$0xff] }
 0x16c   : > { %v9727_v62 = vpop.eup %9726  ;;  %v8183_v61 = vpack.c.bf16 %v1411_v38, %v1410_v36  ;;  %v1277_v1 = vadd.f32 1.0, %v9725_v34  ;;  %v9464_v21 = vld [vmem:[%s10919_s29 + $0x70] sm:$0xff]   ;;  %9746 = vpow2.f32 %v1194_v50  ;;  %v1206_v2 = vmul.f32 1.442695, %v1076_v52  ;;  %v13607_v34 = vld [vmem:[#allocation9_spill] sm:$0xff] }
 0x16d   : > { %v9729_v10 = vpop.eup %9728  ;;  %8620 = vst [vmem:[%s10919_s29 + $0x88] sm:$0xff] %v8188_v14   ;;  %9748 = vrcp.f32 %v1274_v47  ;;  %v1275_v7 = vadd.f32 1.0, %v9727_v62  ;;  %9061 = vmatprep.mubr.bf16.mxu1 %v9464_v21  ;;  %v11282_v49 = vmul.f32 1.442695, %v1074_v22  ;;  %v1077_v4 = vsub.f32 0.0, %v11272_v31  ;;  %v13608_v21 = vld [vmem:[#allocation4_spill] sm:$0xff] }
 0x16e   : > { %v9731_v29 = vpop.eup %9730  ;;  %8619 = vst [vmem:[%s10919_s29 + $0x80] sm:$0xff] %v8183_v61   ;;  %9750 = vrcp.f32 %v1277_v1  ;;  %v1280_v0 = vadd.f32 1.0, %v9729_v10  ;;  %9062 = vmatmul.mubr.bf16.gmra.mrb[64].mxu1 %v9465_v9  ;;  %v11287_v27 = vadd.f32 %v11143_v26, %v13606_v25  ;;  %v1075_v36 = vsub.f32 0.0, %v11276_v18  ;;  %v13609_v22 = vld [vmem:[#allocation10_spill] sm:$0xff] }
 0x16f   : > { %v9733_v40 = vpop.eup %9732  ;;  %9752 = vrcp.f32 %v1275_v7  ;;  %v1278_v48 = vadd.f32 1.0, %v9731_v29  ;;  %v1080_v50 = vsub.f32 0.0, %v11280_v53  ;;  %v11296_v14 = vadd.f32 %v11143_v26, %v13607_v34  ;;  %v13613_v25 = vld [vmem:[#allocation14_spill] sm:$0xff] }
 0x170   : > { %v9735_v24 = vpop.eup %9734  ;;  %9754 = vrcp.f32 %v1280_v0  ;;  %v1281_v6 = vadd.f32 1.0, %v9733_v40  ;;  %v9468_v46 = vld [vmem:[%s10919_s29 + $0x90] sm:$0xff]   ;;  %v1208_v62 = vmul.f32 1.442695, %v1077_v4  ;;  %v1078_v61 = vsub.f32 0.0, %v11287_v27 }
 0x171   : > { %v9737_v20 = vpop.eup %9736  ;;  %9756 = vrcp.f32 %v1278_v48  ;;  %v1279_v44 = vadd.f32 1.0, %v9735_v24  ;;  %v1420_v10 = vmul.f32 %v11232_v56, %v13608_v21  ;;  %v11303_v29 = vadd.f32 %v11143_v26, %v13609_v22 }
 0x172   : > { %v9739_v11 = vpop.eup %9738  ;;  %9758 = vrcp.f32 %v1281_v6  ;;  %v1284_v35 = vadd.f32 1.0, %v9737_v20  ;;  %v1204_v48 = vmul.f32 1.442695, %v1075_v36  ;;  %v11308_v17 = vadd.f32 %v11143_v26, %v13611_v28  ;;  %v13612_v20 = vld [vmem:[#allocation13_spill] sm:$0xff] }
 0x173   : > { %v9741_v57 = vpop.eup %9740  ;;  %9760 = vrcp.f32 %v1279_v44  ;;  %v1282_v23 = vadd.f32 1.0, %v9739_v11  ;;  %v1214_v6 = vmul.f32 1.442695, %v1080_v50  ;;  %v11313_v44 = vadd.f32 %v11143_v26, %v13612_v20 }
 0x174   : > { %v9743_v30 = vpop.eup %9742  ;;  %9762 = vrcp.f32 %v1284_v35  ;;  %v1285_v5 = vadd.f32 1.0, %v9741_v57  ;;  %v9467_v37 = vld [vmem:[%s10919_s29 + $0x88] sm:$0xff]   ;;  %v1081_v4 = vsub.f32 0.0, %v11296_v14  ;;  %v11320_v57 = vadd.f32 %v11143_v26, %v13613_v25 }
 0x175   : > { %v9745_v38 = vpop.eup %9744  ;;  %9764 = vrcp.f32 %v1282_v23  ;;  %v1283_v55 = vadd.f32 1.0, %v9743_v30  ;;  %v9466_v52 = vld [vmem:[%s10919_s29 + $0x80] sm:$0xff]   ;;  %v1079_v50 = vsub.f32 0.0, %v11303_v29 }
 0x176   : > { %v9747_v47 = vpop.eup %9746  ;;  %9766 = vrcp.f32 %v1285_v5  ;;  %v1288_v9 = vadd.f32 1.0, %v9745_v38  ;;  %9065 = vmatprep.mubr.bf16.mxu1 %v9466_v52  ;;  %v1084_v5 = vsub.f32 0.0, %v11308_v17 }
 0x177   : > { %v9749_v1 = vpop.eup %9748  ;;  %9768 = vrcp.f32 %v1283_v55  ;;  %v1286_v7 = vadd.f32 1.0, %v9747_v47  ;;  %9066 = vmatmul.mubr.bf16.gmra.mrb[68].mxu1 %v9467_v37  ;;  %v1082_v55 = vsub.f32 0.0, %v11313_v44 }
 0x178   : > { %v9751_v0 = vpop.eup %9750  ;;  %v1418_v40 = vmul.f32 %v9749_v1, %v13610_v8  ;;  %9770 = vrcp.f32 %v1288_v9  ;;  %9069 = vmatprep.mubr.bf16.mxu1 %v9468_v46  ;;  %v1222_v21 = vmul.f32 1.442695, %v1084_v5  ;;  %v13616_v5 = vld [vmem:[#allocation17_spill] sm:$0xff] }
 0x179   : > { %v9753_v24 = vpop.eup %9752  ;;  %v1421_v56 = vmul.f32 %v9751_v0, %v11096_v58  ;;  %9772 = vrcp.f32 %v1286_v7 }
 0x17a   : > { %v9755_v11 = vpop.eup %9754  ;;  %v1419_v35 = vmul.f32 %v9753_v24, %v11109_v32  ;;  %9774 = vpow2.f32 %v11264_v51  ;;  %v9469_v51 = vld [vmem:[%s10919_s29 + $0x98] sm:$0xff]  }
 0x17b   : > { %v9757_v58 = vpop.eup %9756  ;;  %v8208_v23 = vpack.c.bf16 %v1421_v56, %v1420_v10  ;;  %v1424_v36 = vmul.f32 %v9755_v11, %v11115_v15  ;;  %9776 = vpow2.f32 %v11268_v41  ;;  %v1210_v15 = vmul.f32 1.442695, %v1078_v61 }
 0x17c   : > { %v9759_v46 = vpop.eup %9758  ;;  %v8203_v32 = vpack.c.bf16 %v1419_v35, %v1418_v40  ;;  %v1422_v30 = vmul.f32 %v9757_v58, %v11147_v43  ;;  %9778 = vpow2.f32 %v1206_v2  ;;  %v1216_v43 = vmul.f32 1.442695, %v1081_v4  ;;  %v13615_v4 = vld [vmem:[#allocation16_spill] sm:$0xff] }
 0x17d   : > { %v9761_v37 = vpop.eup %9760  ;;  %8624 = vst [vmem:[%s10919_s29 + $0xa8] sm:$0xff] %v8208_v23   ;;  %v1425_v38 = vmul.f32 %v9759_v46, %v11154_v12  ;;  %9780 = vpow2.f32 %v11282_v49  ;;  %v1085_v2 = vsub.f32 0.0, %v11320_v57  ;;  %v1212_v12 = vmul.f32 1.442695, %v1079_v50 }
 0x17e   : > { %v9763_v41 = vpop.eup %9762  ;;  %8623 = vst [vmem:[%s10919_s29 + $0xa0] sm:$0xff] %v8203_v32   ;;  %v1423_v52 = vmul.f32 %v9761_v37, %v11162_v45  ;;  %9782 = vpow2.f32 %v1208_v62  ;;  %v1218_v10 = vmul.f32 1.442695, %v1082_v55  ;;  %v11355_v25 = vadd.f32 %v11143_v26, %v13615_v4 }
 0x17f   : > { %v9765_v34 = vpop.eup %9764  ;;  %v8218_v47 = vpack.c.bf16 %v1425_v38, %v1424_v36  ;;  %v1428_v9 = vmul.f32 %v9763_v41, %v11178_v13  ;;  %9784 = vpow2.f32 %v1204_v48  ;;  %9070 = vmatmul.mubr.bf16.gmra.mrb[72].mxu1 %v9469_v51  ;;  %v11361_v37 = vadd.f32 %v11143_v26, %v13616_v5  ;;  %v13617_v41 = vld [vmem:[#allocation18_spill] sm:$0xff] }
 0x180   : > { %v9767_v49 = vpop.eup %9766  ;;  %v8213_v61 = vpack.c.bf16 %v1423_v52, %v1422_v30  ;;  %v1426_v1 = vmul.f32 %v9765_v34, %v11185_v39  ;;  %9786 = vpow2.f32 %v1214_v6  ;;  %v1224_v39 = vmul.f32 1.442695, %v1085_v2  ;;  %v13614_v6 = vld [vmem:[#allocation15_spill] sm:$0xff] }
 0x181   : > { %v9769_v45 = vpop.eup %9768  ;;  %8626 = vst [vmem:[%s10919_s29 + $0xb8] sm:$0xff] %v8218_v47   ;;  %v1429_v62 = vmul.f32 %v9767_v49, %v11193_v42  ;;  %9788 = vpow2.f32 %v1210_v15  ;;  %v11351_v20 = vadd.f32 %v11143_v26, %v13614_v6  ;;  %v1088_v55 = vsub.f32 0.0, %v11355_v25  ;;  %v13618_v47 = vld [vmem:[#allocation19_spill] sm:$0xff] }
 0x182   : > { %v11339_v7 = vpop.eup %9770  ;;  %8625 = vst [vmem:[%s10919_s29 + $0xb0] sm:$0xff] %v8213_v61   ;;  %v1427_v13 = vmul.f32 %v9769_v45, %v11203_v33  ;;  %9790 = vpow2.f32 %v1216_v43  ;;  %v11366_v52 = vadd.f32 %v11143_v26, %v13617_v41  ;;  %v1086_v45 = vsub.f32 0.0, %v11361_v37 }
 0x183   : > { %v11343_v22 = vpop.eup %9772  ;;  %v8228_v0 = vpack.c.bf16 %v1429_v62, %v1428_v9  ;;  %9792 = vpow2.f32 %v1212_v12  ;;  %v1083_v51 = vsub.f32 0.0, %v11351_v20  ;;  %v11371_v9 = vadd.f32 %v11143_v26, %v13618_v47 }
 0x184   : > { %v9775_v8 = vpop.eup %9774  ;;  %v8223_v40 = vpack.c.bf16 %v1427_v13, %v1426_v1  ;;  %9794 = vpow2.f32 %v1222_v21  ;;  %v9471_v42 = vld [vmem:[%s10919_s29 + $0xa8] sm:$0xff]   ;;  %v1089_v13 = vsub.f32 0.0, %v11366_v52 }
 0x185   : > { %v9777_v48 = vpop.eup %9776  ;;  %8628 = vst [vmem:[%s10919_s29 + $0xc8] sm:$0xff] %v8228_v0   ;;  %v1289_v28 = vadd.f32 1.0, %v9775_v8  ;;  %v9470_v24 = vld [vmem:[%s10919_s29 + $0xa0] sm:$0xff]   ;;  %9796 = vpow2.f32 %v1218_v10  ;;  %v1432_v0 = vmul.f32 %v11339_v7, %v11210_v63  ;;  %v1220_v26 = vmul.f32 1.442695, %v1083_v51 }
 0x186   : > { %v9779_v56 = vpop.eup %9778  ;;  %8627 = vst [vmem:[%s10919_s29 + $0xc0] sm:$0xff] %v8223_v40   ;;  %v1287_v33 = vadd.f32 1.0, %v9777_v48  ;;  %9798 = vpow2.f32 %v1224_v39  ;;  %9073 = vmatprep.mubr.bf16.mxu1 %v9470_v24  ;;  %v1087_v8 = vsub.f32 0.0, %v11371_v9  ;;  %v9493_v24 = vld [vmem:[%s13533_s5 + $0x38] sm:$0xff]   ;;  %v1226_v7 = vmul.f32 1.442695, %v1086_v45 }
 0x187   : > { %v9781_v11 = vpop.eup %9780  ;;  %9800 = vrcp.f32 %v1289_v28  ;;  %v1292_v35 = vadd.f32 1.0, %v9779_v56  ;;  %9074 = vmatmul.mubr.bf16.gmra.mrb[76].mxu1 %v9471_v42  ;;  %v1430_v42 = vmul.f32 %v11343_v22, %v11216_v3  ;;  %v1230_v28 = vmul.f32 1.442695, %v1088_v55  ;;  %3745 = vmatpush1.bf16.msra.mxu0 %v9493_v24 }
 0x188   : > { %v9783_v58 = vpop.eup %9782  ;;  %9802 = vrcp.f32 %v1287_v33  ;;  %v1290_v23 = vadd.f32 1.0, %v9781_v11  ;;  %v9473_v34 = vld [vmem:[%s10919_s29 + $0xb8] sm:$0xff]   ;;  %v1232_v11 = vmul.f32 1.442695, %v1089_v13  ;;  %v1228_v4 = vmul.f32 1.442695, %v1087_v8  ;;  %3746 = vmatprep.subr.bf16.mxu0 %v13602_v60 }
 0x189   : > { %v9785_v36 = vpop.eup %9784  ;;  %9804 = vrcp.f32 %v1292_v35  ;;  %v1293_v50 = vadd.f32 1.0, %v9783_v58  ;;  %v9472_v46 = vld [vmem:[%s10919_s29 + $0xb0] sm:$0xff]  }
 0x18a   : > { %v9787_v32 = vpop.eup %9786  ;;  %9806 = vrcp.f32 %v1290_v23  ;;  %v1291_v30 = vadd.f32 1.0, %v9785_v36  ;;  %9077 = vmatprep.mubr.bf16.mxu1 %v9472_v46 }
 0x18b   : > { %v9789_v38 = vpop.eup %9788  ;;  %9808 = vrcp.f32 %v1293_v50  ;;  %v1296_v15 = vadd.f32 1.0, %v9787_v32 }
 0x18c   : > { %v9791_v43 = vpop.eup %9790  ;;  %9810 = vrcp.f32 %v1291_v30  ;;  %v1294_v2 = vadd.f32 1.0, %v9789_v38  ;;  %v9475_v58 = vld [vmem:[%s10919_s29 + $0xc8] sm:$0xff]  }
 0x18d   : > { %v9793_v12 = vpop.eup %9792  ;;  %9812 = vrcp.f32 %v1296_v15  ;;  %v1297_v49 = vadd.f32 1.0, %v9791_v43  ;;  %v9474_v61 = vld [vmem:[%s10919_s29 + $0xc0] sm:$0xff]  }
 0x18e   : > { %v9795_v1 = vpop.eup %9794  ;;  %9814 = vrcp.f32 %v1294_v2  ;;  %v1295_v21 = vadd.f32 1.0, %v9793_v12 }
 0x18f   : > { %v9797_v62 = vpop.eup %9796  ;;  %9816 = vrcp.f32 %v1297_v49  ;;  %v1300_v10 = vadd.f32 1.0, %v9795_v1  ;;  %9078 = vmatmul.mubr.bf16.gmra.mrb[80].mxu1 %v9473_v34  ;;  %v9497_v34 = vld [vmem:[%s13533_s5 + $0x80] sm:$0xff]  }
 0x190   : > { %v9799_v39 = vpop.eup %9798  ;;  %9818 = vrcp.f32 %v1295_v21  ;;  %9081 = vmatprep.mubr.bf16.mxu1 %v9474_v61  ;;  %v1298_v15 = vadd.f32 1.0, %v9797_v62  ;;  %9105 = vmatprep.subr.bf16.mxu1 %v9497_v34  ;;  %v9496_v21 = vld [vmem:[%s13533_s5 + $0x50] sm:$0xff]  }
 0x191   : > { %v9801_v40 = vpop.eup %9800  ;;  %9820 = vrcp.f32 %v1300_v10  ;;  %v1301_v48 = vadd.f32 1.0, %v9799_v39  ;;  %9106 = vmatpush3.bf16.msra.mxu1 %v9497_v34  ;;  %v11507_v34 = vld [vmem:[%s13532_s4] ss:$0 sm:$0xff] }
 0x192   : > { %v9803_v56 = vpop.eup %9802  ;;  %v1433_v63 = vmul.f32 %v9801_v40, %v11238_v19 }
 0x193   : > { %v9805_v33 = vpop.eup %9804  ;;  %v1431_v6 = vmul.f32 %v9803_v56, %v11242_v54  ;;  %9822 = vrcp.f32 %v1301_v48  ;;  %v9494_v54 = vld [vmem:[%s13533_s5 + $0x40] sm:$0xff]   ;;  %v9501_v48 = vld [vmem:[%s13533_s5 + $0x90] sm:$0xff]  }
 0x194   : > { %v9807_v3 = vpop.eup %9806  ;;  %v8238_v22 = vpack.c.bf16 %v1433_v63, %v1432_v0  ;;  %v1436_v35 = vmul.f32 %v9805_v33, %v11246_v16  ;;  %9824 = vpow2.f32 %v1220_v26  ;;  %3747 = vmatpush1.bf16.msra.mxu0 %v9494_v54  ;;  %v9500_v63 = vld [vmem:[%s13533_s5 + $0x60] sm:$0xff]  }
 0x195   : > { %v9809_v23 = vpop.eup %9808  ;;  %v8233_v19 = vpack.c.bf16 %v1431_v6, %v1430_v42  ;;  %v1434_v36 = vmul.f32 %v9807_v3, %v11256_v59  ;;  %9826 = vpow2.f32 %v1230_v28  ;;  %3748 = vmatprep.subr.bf16.mxu0 %v13602_v60  ;;  %v9498_v42 = vld [vmem:[%s13533_s5 + $0x58] sm:$0xff]   ;;  %v9502_v6 = vld [vmem:[%s13533_s5 + $0x68] sm:$0xff]  }
 0x196   : > { %v9811_v50 = vpop.eup %9810  ;;  %8630 = vst [vmem:[%s10919_s29 + $0xd8] sm:$0xff] %v8238_v22   ;;  %v1437_v46 = vmul.f32 %v9809_v23, %v11272_v31  ;;  %9828 = vpow2.f32 %v1226_v7  ;;  %v9503_v7 = vld [vmem:[%s13533_s5 + $0x98] sm:$0xff]   ;;  %v9504_v23 = vld [vmem:[%s13533_s5 + $0x70] sm:$0xff]  }
 0x197   : > { %v9813_v16 = vpop.eup %9812  ;;  %8629 = vst [vmem:[%s10919_s29 + $0xd0] sm:$0xff] %v8233_v19   ;;  %v1435_v32 = vmul.f32 %v9811_v50, %v11276_v18  ;;  %9830 = vpow2.f32 %v1232_v11  ;;  %9082 = vmatmul.mubr.bf16.gmra.mrb[84].mxu1 %v9475_v58  ;;  %v9495_v18 = vld [vmem:[%s13533_s5 + $0x48] sm:$0xff]  }
 0x198   : > { %v9815_v30 = vpop.eup %9814  ;;  %v8248_v59 = vpack.c.bf16 %v1437_v46, %v1436_v35  ;;  %v1440_v51 = vmul.f32 %v9813_v16, %v11280_v53  ;;  %9832 = vpow2.f32 %v1228_v4  ;;  %3749 = vmatpush1.bf16.msra.mxu0 %v9495_v18  ;;  %v9505_v35 = vld [vmem:[%s13533_s5 + $0xa0] sm:$0xff]  }
 0x199   : > { %v9817_v5 = vpop.eup %9816  ;;  %v8243_v38 = vpack.c.bf16 %v1435_v32, %v1434_v36  ;;  %v1438_v31 = vmul.f32 %v9815_v30, %v11287_v27  ;;  %3750 = vmatprep.subr.bf16.mxu0 %v13602_v60  ;;  %9834 = vrcp.f32 %v1298_v15  ;;  %v9509_v32 = vld [vmem:[%s13533_s5 + $0xb0] sm:$0xff]   ;;  %v11488_v15 = vpop.permute.xlu1 %3006 }
 0x19a   : > { %v9819_v55 = vpop.eup %9818  ;;  %8632 = vst [vmem:[%s10919_s29 + $0xe8] sm:$0xff] %v8248_v59   ;;  %v1441_v41 = vmul.f32 %v9817_v5, %v11296_v14 }
 0x19b   : > { %v9821_v53 = vpop.eup %9820  ;;  %8631 = vst [vmem:[%s10919_s29 + $0xe0] sm:$0xff] %v8243_v38   ;;  %v1439_v43 = vmul.f32 %v9819_v55, %v11303_v29  ;;  %v11483_v38 = vld [vmem:[%s13533_s5 + $0x200] sm:$0xff]  }
 0x19c   : > { %v8258_v2 = vpack.c.bf16 %v1441_v41, %v1440_v51  ;;  %v1444_v27 = vmul.f32 %v9821_v53, %v11308_v17  ;;  %3751 = vmatpush1.bf16.msra.mxu0 %v9496_v21  ;;  %v9510_v51 = vld [vmem:[%s13533_s5 + $0xb8] sm:$0xff]  }
 0x19d   : > { %v9823_v47 = vpop.eup %9822  ;;  %v8253_v12 = vpack.c.bf16 %v1439_v43, %v1438_v31  ;;  %v9477_v14 = vld [vmem:[%s10919_s29 + $0xd8] sm:$0xff]   ;;  %3752 = vmatprep.subr.bf16.mxu0 %v13602_v60  ;;  %v11486_v31 = vpop.permute.xlu0 %2996 }
 0x19e   : > { %v9825_v49 = vpop.eup %9824  ;;  %8634 = vst [vmem:[%s10919_s29 + $0xf8] sm:$0xff] %v8258_v2   ;;  %v1445_v61 = vmul.f32 %v9823_v47, %v11320_v57  ;;  %v9476_v29 = vld [vmem:[%s10919_s29 + $0xd0] sm:$0xff]   ;;  %v9499_v57 = vld [vmem:[%s13533_s5 + $0x88] sm:$0xff]   ;;  %v11492_v55 = vpop.permute.xlu1 %3011 }
 0x19f   : > { %v9827_v1 = vpop.eup %9826  ;;  %8633 = vst [vmem:[%s10919_s29 + $0xf0] sm:$0xff] %v8253_v12   ;;  %v1299_v17 = vadd.f32 1.0, %v9825_v49  ;;  %9085 = vmatprep.mubr.bf16.mxu1 %v9476_v29  ;;  %9107 = vmatprep.subr.bf16.mxu1 %v9499_v57 }
 0x1a0   : > { %v9829_v45 = vpop.eup %9828  ;;  %v8268_v62 = vpack.c.bf16 %v1445_v61, %v1444_v27  ;;  %v1304_v10 = vadd.f32 1.0, %v9827_v1  ;;  %9086 = vmatmul.mubr.bf16.gmra.mrb[88].mxu1 %v9477_v14  ;;  %3753 = vmatpush1.bf16.msra.mxu0 %v9498_v42 }
 0x1a1   : > { %v9831_v13 = vpop.eup %9830  ;;  %9836 = vrcp.f32 %v1299_v17  ;;  %v1302_v39 = vadd.f32 1.0, %v9829_v45  ;;  %9108 = vmatpush3.bf16.msra.mxu1 %v9499_v57  ;;  %v9479_v28 = vld [vmem:[%s10919_s29 + $0xe8] sm:$0xff]   ;;  %3754 = vmatprep.subr.bf16.mxu0 %v13602_v60  ;;  %v11490_v18 = vpop.permute.xlu0 %3001 }
 0x1a2   : > { %v9833_v0 = vpop.eup %9832  ;;  %8636 = vst [vmem:[%s10919_s29 + $0x108] sm:$0xff] %v8268_v62   ;;  %9838 = vrcp.f32 %v1304_v10  ;;  %v1305_v26 = vadd.f32 1.0, %v9831_v13  ;;  %v9478_v8 = vld [vmem:[%s10919_s29 + $0xe0] sm:$0xff]   ;;  %9109 = vmatprep.subr.bf16.mxu1 %v9501_v48  ;;  %v11496_v53 = vpop.permute.xlu1 %3021 }
 0x1a3   : > { %9840 = vrcp.f32 %v1302_v39  ;;  %v1303_v40 = vadd.f32 1.0, %v9833_v0  ;;  %9089 = vmatprep.mubr.bf16.mxu1 %v9478_v8  ;;  %v9835_v56 = vpop.eup %9834 }
 0x1a4   : > { %9842 = vrcp.f32 %v1305_v26  ;;  %3755 = vmatpush1.bf16.msra.mxu0 %v9500_v63  ;;  %v1442_v33 = vmul.f32 %v9835_v56, %v11313_v44 }
 0x1a5   : > { %9844 = vrcp.f32 %v1303_v40  ;;  %9110 = vmatpush3.bf16.msra.mxu1 %v9501_v48  ;;  %3756 = vmatprep.subr.bf16.mxu0 %v13602_v60  ;;  %v9481_v58 = vld [vmem:[%s10919_s29 + $0xf8] sm:$0xff]   ;;  %v11494_v41 = vpop.permute.xlu0 %3016 }
 0x1a6   : > { %v9480_v24 = vld [vmem:[%s10919_s29 + $0xf0] sm:$0xff]   ;;  %9111 = vmatprep.subr.bf16.mxu1 %v9503_v7  ;;  %v11500_v2 = vpop.permute.xlu1 %3031 }
 0x1a8   : > { %9090 = vmatmul.mubr.bf16.gmra.mrb[92].mxu1 %v9479_v28  ;;  %3757 = vmatpush1.bf16.msra.mxu0 %v9502_v6 }
 0x1a9   : > { %9093 = vmatprep.mubr.bf16.mxu1 %v9480_v24  ;;  %9112 = vmatpush3.bf16.msra.mxu1 %v9503_v7  ;;  %v11498_v43 = vpop.permute.xlu0 %3026 }
 0x1aa   : > { %3758 = vmatprep.subr.bf16.mxu0 %v13602_v60  ;;  %9113 = vmatprep.subr.bf16.mxu1 %v9505_v35  ;;  %v11509_v47 = vpop.permute.xlu1 %3041 }
 0x1ab   : > { %v9837_v11 = vpop.eup %9836 }
 0x1ac   : > { %v9839_v3 = vpop.eup %9838  ;;  %v1443_v22 = vmul.f32 %v9837_v11, %v11351_v20  ;;  %3759 = vmatpush1.bf16.msra.mxu0 %v9504_v23 }
 0x1ad   : > { %v9841_v4 = vpop.eup %9840  ;;  %v1448_v44 = vmul.f32 %v9839_v3, %v11355_v25  ;;  %9114 = vmatpush3.bf16.msra.mxu1 %v9505_v35  ;;  %3760 = vmatprep.subr.bf16.mxu0 %v13602_v60  ;;  %v11502_v27 = vpop.permute.xlu0 %3036 }
 0x1ae   : > { %v9843_v19 = vpop.eup %9842  ;;  %v8263_v36 = vpack.c.bf16 %v1443_v22, %v1442_v33  ;;  %v1446_v54 = vmul.f32 %v9841_v4, %v11361_v37  ;;  %v9507_v37 = vld [vmem:[%s13533_s5 + $0xa8] sm:$0xff]   ;;  %v11527_v57 = vpop.permute.xlu1 %3051 }
 0x1af   : > { %v9845_v20 = vpop.eup %9844  ;;  %v1449_v50 = vmul.f32 %v9843_v19, %v11366_v52  ;;  %v9506_v52 = vld [vmem:[%s13533_s5 + $0x78] sm:$0xff]   ;;  %9115 = vmatprep.subr.bf16.mxu1 %v9507_v37 }
 0x1b0   : > { %8635 = vst [vmem:[%s10919_s29 + $0x100] sm:$0xff] %v8263_v36   ;;  %v1447_v25 = vmul.f32 %v9845_v20, %v11371_v9  ;;  %9094 = vmatmul.mubr.bf16.gmra.mrb[96].mxu1 %v9481_v58  ;;  %3761 = vmatpush1.bf16.msra.mxu0 %v9506_v52  ;;  %v9483_v9 = vld [vmem:[%s10919_s29 + $0x108] sm:$0xff]  }
 0x1b1   : > { %v8278_v46 = vpack.c.bf16 %v1449_v50, %v1448_v44  ;;  %9116 = vmatpush3.bf16.msra.mxu1 %v9507_v37  ;;  %9193 = vmatprep.subr.bf16.mxu0 %v11483_v38  ;;  %v11521_v45 = vpop.permute.xlu0 %3046 }
 0x1b2   : > { %v8273_v16 = vpack.c.bf16 %v1447_v25, %v1446_v54  ;;  %9117 = vmatprep.subr.bf16.mxu1 %v9509_v32  ;;  %v11536_v56 = vpop.permute.xlu1 %3061 }
 0x1b3   : > { %8638 = vst [vmem:[%s10919_s29 + $0x118] sm:$0xff] %v8278_v46  }
 0x1b4   : > { %8637 = vst [vmem:[%s10919_s29 + $0x110] sm:$0xff] %v8273_v16  }
 0x1b5   : > { %9118 = vmatpush3.bf16.msra.mxu1 %v9509_v32  ;;  %v11531_v48 = vpop.permute.xlu0 %3056 }
 0x1b6   : > { %9119 = vmatprep.subr.bf16.mxu1 %v9510_v51  ;;  %v11553_v54 = vpop.permute.xlu1 %3071 }
 0x1b7   : > { %v9482_v30 = vld [vmem:[%s10919_s29 + $0x100] sm:$0xff]  }
 0x1b8   : > { %9097 = vmatprep.mubr.bf16.mxu1 %v9482_v30 }
 0x1b9   : > { %9098 = vmatmul.mubr.bf16.gmra.mrb[100].mxu1 %v9483_v9  ;;  %v11551_v23 = vpop.permute.xlu0 %3066 }
 0x1ba   : > { %v9485_v5 = vld [vmem:[%s10919_s29 + $0x118] sm:$0xff]   ;;  %9120 = vmatpush3.bf16.msra.mxu1 %v9510_v51 }
 0x1bb   : > { %v9484_v59 = vld [vmem:[%s10919_s29 + $0x110] sm:$0xff]   ;;  %4637 = vmatprep.subr.bf16.mxu1 %v13602_v60 }
 0x1bc   : > { %9101 = vmatprep.mubr.bf16.mxu1 %v9484_v59 }
 0x1c1   : > { %9102 = vmatmul.mubr.bf16.gmra.mrb[104].mxu1 %v9485_v5 }
 0x205   : > { %v9035_v12 = vpop.f32.mrb[36].mxu1 }
 0x206   : > { %v11512_v14 = vadd.f32 %v9035_v12, %v11507_v34  ;;  %v2203_v49 = vpop.f32.mrb[37].mxu1 }
 0x207   : > { %v11515_v61 = vadd.f32 %v11507_v34, %v2203_v49  ;;  %v9036_v29 = vpop.f32.mrb[38].mxu1 }
 0x208   : > { %v2492_v1 = vsub.f32 0.0, %v11512_v14  ;;  %v11519_v17 = vadd.f32 %v9036_v29, %v11507_v34  ;;  %v2206_v21 = vpop.f32.mrb[39].mxu1 }
 0x209   : > { %v2490_v62 = vsub.f32 0.0, %v11515_v61  ;;  %v11525_v10 = vadd.f32 %v11507_v34, %v2206_v21 }
 0x20a   : > { %v2566_v13 = vmul.f32 1.442695, %v2492_v1  ;;  %v2493_v39 = vsub.f32 0.0, %v11519_v17  ;;  %v11565_v1 = vpop.permute.xlu0 %3076 }
 0x20b   : > { %v2562_v0 = vmul.f32 1.442695, %v2490_v62  ;;  %v2491_v26 = vsub.f32 0.0, %v11525_v10 }
 0x20c   : > { %9846 = vpow2.f32 %v2566_v13  ;;  %v2568_v8 = vmul.f32 1.442695, %v2493_v39  ;;  %v11571_v13 = vpop.permute.xlu1 %3081 }
 0x20d   : > { %9848 = vpow2.f32 %v2562_v0  ;;  %v2564_v40 = vmul.f32 1.442695, %v2491_v26  ;;  %v9039_v42 = vpop.f32.mrb[40].mxu1 }
 0x20e   : > { %9850 = vpow2.f32 %v2568_v8  ;;  %v11534_v28 = vadd.f32 %v9039_v42, %v11507_v34  ;;  %v2219_v24 = vpop.f32.mrb[41].mxu1 }
 0x20f   : > { %9852 = vpow2.f32 %v2564_v40  ;;  %v11539_v63 = vadd.f32 %v11507_v34, %v2219_v24  ;;  %v9040_v7 = vpop.f32.mrb[42].mxu1 }
 0x210   : > { %v2496_v33 = vsub.f32 0.0, %v11534_v28  ;;  %v11543_v6 = vadd.f32 %v9040_v7, %v11507_v34  ;;  %v2222_v11 = vpop.f32.mrb[43].mxu1 }
 0x211   : > { %v2494_v3 = vsub.f32 0.0, %v11539_v63  ;;  %v11547_v22 = vadd.f32 %v11507_v34, %v2222_v11 }
 0x212   : > { %v2574_v35 = vmul.f32 1.442695, %v2496_v33  ;;  %v2497_v4 = vsub.f32 0.0, %v11543_v6 }
 0x213   : > { %v2570_v44 = vmul.f32 1.442695, %v2494_v3  ;;  %v2495_v58 = vsub.f32 0.0, %v11547_v22 }
 0x214   : > { %9854 = vpow2.f32 %v2574_v35  ;;  %v2576_v19 = vmul.f32 1.442695, %v2497_v4 }
 0x215   : > { %9856 = vpow2.f32 %v2570_v44  ;;  %v2572_v20 = vmul.f32 1.442695, %v2495_v58  ;;  %v11578_v44 = vpop.permute.xlu0 %3086 }
 0x216   : > { %v9847_v36 = vpop.eup %9846  ;;  %9858 = vpow2.f32 %v2576_v19  ;;  %v9043_v46 = vpop.f32.mrb[44].mxu1 }
 0x217   : > { %v9849_v50 = vpop.eup %9848  ;;  %v2708_v25 = vadd.f32 1.0, %v9847_v36  ;;  %9860 = vpow2.f32 %v2572_v20  ;;  %v11556_v52 = vadd.f32 %v9043_v46, %v11507_v34  ;;  %v2235_v9 = vpop.f32.mrb[45].mxu1 }
 0x218   : > { %v9851_v16 = vpop.eup %9850  ;;  %v2706_v37 = vadd.f32 1.0, %v9849_v50  ;;  %v11559_v59 = vadd.f32 %v11507_v34, %v2235_v9  ;;  %v9044_v51 = vpop.f32.mrb[46].mxu1 }
 0x219   : > { %v9853_v32 = vpop.eup %9852  ;;  %9862 = vrcp.f32 %v2708_v25  ;;  %v2709_v30 = vadd.f32 1.0, %v9851_v16  ;;  %v2500_v12 = vsub.f32 0.0, %v11556_v52  ;;  %v11563_v49 = vadd.f32 %v9044_v51, %v11507_v34  ;;  %v2238_v29 = vpop.f32.mrb[47].mxu1 }
 0x21a   : > { %9864 = vrcp.f32 %v2706_v37  ;;  %v2707_v5 = vadd.f32 1.0, %v9853_v32  ;;  %v2498_v21 = vsub.f32 0.0, %v11559_v59  ;;  %v11569_v62 = vadd.f32 %v11507_v34, %v2238_v29  ;;  %v11583_v50 = vpop.permute.xlu1 %3091 }
 0x21b   : > { %9866 = vrcp.f32 %v2709_v30  ;;  %v2582_v39 = vmul.f32 1.442695, %v2500_v12  ;;  %v2501_v0 = vsub.f32 0.0, %v11563_v49 }
 0x21c   : > { %9868 = vrcp.f32 %v2707_v5  ;;  %v2578_v26 = vmul.f32 1.442695, %v2498_v21  ;;  %v2499_v8 = vsub.f32 0.0, %v11569_v62 }
 0x21d   : > { %9870 = vpow2.f32 %v2582_v39  ;;  %v2584_v40 = vmul.f32 1.442695, %v2501_v0 }
 0x21e   : > { %v9855_v42 = vpop.eup %9854  ;;  %9872 = vpow2.f32 %v2578_v26  ;;  %v2580_v24 = vmul.f32 1.442695, %v2499_v8 }
 0x21f   : > { %v9047_v7 = vpop.f32.mrb[48].mxu1  ;;  %v9857_v33 = vpop.eup %9856  ;;  %v2712_v11 = vadd.f32 1.0, %v9855_v42  ;;  %9874 = vpow2.f32 %v2584_v40 }
 0x220   : > { %v11576_v3 = vadd.f32 %v9047_v7, %v11507_v34  ;;  %v2251_v35 = vpop.f32.mrb[49].mxu1  ;;  %v9859_v4 = vpop.eup %9858  ;;  %v2710_v58 = vadd.f32 1.0, %v9857_v33  ;;  %9876 = vpow2.f32 %v2580_v24 }
 0x221   : > { %v11581_v19 = vadd.f32 %v11507_v34, %v2251_v35  ;;  %v9048_v36 = vpop.f32.mrb[50].mxu1  ;;  %v9861_v20 = vpop.eup %9860  ;;  %9878 = vrcp.f32 %v2712_v11  ;;  %v2713_v25 = vadd.f32 1.0, %v9859_v4 }
 0x222   : > { %v2504_v46 = vsub.f32 0.0, %v11576_v3  ;;  %v11587_v16 = vadd.f32 %v9048_v36, %v11507_v34  ;;  %v2254_v37 = vpop.f32.mrb[51].mxu1  ;;  %9880 = vrcp.f32 %v2710_v58  ;;  %v2711_v32 = vadd.f32 1.0, %v9861_v20  ;;  %v11598_v7 = vpop.permute.xlu0 %3096 }
 0x223   : > { %v9863_v9 = vpop.eup %9862  ;;  %v2502_v30 = vsub.f32 0.0, %v11581_v19  ;;  %v11591_v51 = vadd.f32 %v11507_v34, %v2254_v37  ;;  %9882 = vrcp.f32 %v2713_v25 }
 0x224   : > { %v9865_v5 = vpop.eup %9864  ;;  %v2852_v12 = vmul.f32 %v9863_v9, %v11512_v14  ;;  %v2590_v29 = vmul.f32 1.442695, %v2504_v46  ;;  %v2505_v21 = vsub.f32 0.0, %v11587_v16  ;;  %9884 = vrcp.f32 %v2711_v32 }
 0x225   : > { %v9867_v39 = vpop.eup %9866  ;;  %v2850_v0 = vmul.f32 %v9865_v5, %v11515_v61  ;;  %v2586_v26 = vmul.f32 1.442695, %v2502_v30  ;;  %v2503_v8 = vsub.f32 0.0, %v11591_v51  ;;  %v11602_v61 = vpop.permute.xlu1 %3101 }
 0x226   : > { %v9869_v40 = vpop.eup %9868  ;;  %v2853_v42 = vmul.f32 %v9867_v39, %v11519_v17  ;;  %9886 = vpow2.f32 %v2590_v29  ;;  %v2592_v24 = vmul.f32 1.442695, %v2505_v21  ;;  %v3356_v14 = vmul.f32 %v11488_v15, %v2852_v12 }
 0x227   : > { %v2851_v33 = vmul.f32 %v9869_v40, %v11525_v10  ;;  %9888 = vpow2.f32 %v2586_v26  ;;  %v2588_v11 = vmul.f32 1.442695, %v2503_v8  ;;  %v9871_v4 = vpop.eup %9870  ;;  %v3354_v58 = vmul.f32 %v11486_v31, %v2850_v0  ;;  %v9511_v40 = vld [vmem:[%s13533_s5 + $0x208] sm:$0xff]  }
 0x228   : > { %v9051_v35 = vpop.f32.mrb[52].mxu1  ;;  %v3357_v36 = vmul.f32 %v11492_v55, %v2853_v42  ;;  %9890 = vpow2.f32 %v2592_v24  ;;  %v9873_v25 = vpop.eup %9872  ;;  %v2716_v46 = vadd.f32 1.0, %v9871_v4 }
 0x229   : > { %v11607_v17 = vadd.f32 %v9051_v35, %v11507_v34  ;;  %v2267_v20 = vpop.f32.mrb[53].mxu1  ;;  %v3355_v15 = vmul.f32 %v11490_v18, %v2851_v33  ;;  %9892 = vpow2.f32 %v2588_v11  ;;  %v9875_v9 = vpop.eup %9874  ;;  %v2714_v31 = vadd.f32 1.0, %v9873_v25 }
 0x22a   : > { %v11611_v10 = vadd.f32 %v11507_v34, %v2267_v20  ;;  %v9052_v37 = vpop.f32.mrb[54].mxu1  ;;  %v11613_v32 = vpack.c.bf16 %v3357_v36, %v3356_v14  ;;  %v9877_v12 = vpop.eup %9876  ;;  %9894 = vrcp.f32 %v2716_v46  ;;  %v2717_v18 = vadd.f32 1.0, %v9875_v9 }
 0x22b   : > { %v2508_v55 = vsub.f32 0.0, %v11607_v17  ;;  %v11617_v30 = vadd.f32 %v9052_v37, %v11507_v34  ;;  %v2270_v5 = vpop.f32.mrb[55].mxu1  ;;  %v11619_v29 = vpack.c.bf16 %v3355_v15, %v3354_v58  ;;  %v9879_v39 = vpop.eup %9878  ;;  %9896 = vrcp.f32 %v2714_v31 }
 0x22c   : > { %13619 = vst [vmem:[#allocation5_spill] sm:$0xff] %v11613_v32  ;;  %v2506_v21 = vsub.f32 0.0, %v11611_v10  ;;  %v2715_v0 = vadd.f32 1.0, %v9877_v12  ;;  %v9881_v42 = vpop.eup %9880  ;;  %v11626_v24 = vpop.permute.xlu0 %3106  ;;  %v2856_v14 = vmul.f32 %v9879_v39, %v11534_v28  ;;  %9898 = vrcp.f32 %v2717_v18 }
 0x22d   : > { %13620 = vst [vmem:[#allocation6_spill] sm:$0xff] %v11619_v29  ;;  %v2598_v26 = vmul.f32 1.442695, %v2508_v55  ;;  %v2509_v8 = vsub.f32 0.0, %v11617_v30  ;;  %v11630_v11 = vadd.f32 %v11507_v34, %v2270_v5  ;;  %3762 = vmatprep.mubr.bf16.mxu0 %v11619_v29  ;;  %v9883_v35 = vpop.eup %9882  ;;  %v11633_v4 = vpop.permute.xlu1 %3111  ;;  %v2854_v58 = vmul.f32 %v9881_v42, %v11539_v63 }
 0x22e   : > { %v2594_v33 = vmul.f32 1.442695, %v2506_v21  ;;  %9900 = vrcp.f32 %v2715_v0  ;;  %3763 = vmatmul.mubr.bf16.vlgmr.msra.gmra.mrb[36].mxu0 %v13602_v60  ;;  %v9885_v20 = vpop.eup %9884  ;;  %v3360_v25 = vmul.f32 %v11498_v43, %v2856_v14  ;;  %v2857_v28 = vmul.f32 %v9883_v35, %v11543_v6  ;;  %v9512_v6 = vld [vmem:[%s13533_s5 + $0x210] sm:$0xff]  }
 0x22f   : > { %v2600_v36 = vmul.f32 1.442695, %v2509_v8  ;;  %9902 = vpow2.f32 %v2598_v26  ;;  %v2507_v15 = vsub.f32 0.0, %v11630_v11  ;;  %9194 = vmatpush3.bf16.msra.mxu0 %v11483_v38  ;;  %3770 = vmatprep.mubr.bf16.mxu0 %v11613_v32  ;;  %v3358_v63 = vmul.f32 %v11494_v41, %v2854_v58 }
 0x230   : > { %v9055_v46 = vpop.f32.mrb[56].mxu1  ;;  %v9887_v37 = vpop.eup %9886  ;;  %v2855_v9 = vmul.f32 %v9885_v20, %v11547_v22  ;;  %9904 = vpow2.f32 %v2594_v33  ;;  %9195 = vmatprep.subr.bf16.mxu0 %v9511_v40  ;;  %v3361_v38 = vmul.f32 %v11500_v2, %v2857_v28  ;;  %v9513_v20 = vld [vmem:[%s13533_s5 + $0x180] sm:$0xff]  }
 0x231   : > { %v11645_v31 = vadd.f32 %v9055_v46, %v11507_v34  ;;  %v2283_v43 = vpop.f32.mrb[57].mxu1  ;;  %v9889_v55 = vpop.eup %9888  ;;  %v2720_v5 = vadd.f32 1.0, %v9887_v37  ;;  %9906 = vpow2.f32 %v2600_v36  ;;  %v2596_v12 = vmul.f32 1.442695, %v2507_v15 }
 0x232   : > { %v9056_v18 = vpop.f32.mrb[58].mxu1  ;;  %v9891_v41 = vpop.eup %9890  ;;  %v3359_v22 = vmul.f32 %v11496_v53, %v2855_v9  ;;  %v2718_v21 = vadd.f32 1.0, %v9889_v55  ;;  %v11654_v0 = vadd.f32 %v11507_v34, %v2283_v43  ;;  %v11658_v14 = vpack.c.bf16 %v3361_v38, %v3360_v25 }
 0x233   : > { %v2512_v39 = vsub.f32 0.0, %v11645_v31  ;;  %v2286_v26 = vpop.f32.mrb[59].mxu1  ;;  %v9893_v8 = vpop.eup %9892  ;;  %9908 = vrcp.f32 %v2720_v5  ;;  %v2721_v2 = vadd.f32 1.0, %v9891_v41  ;;  %v11661_v33 = vadd.f32 %v9056_v18, %v11507_v34  ;;  %9196 = vmatpush3.bf16.msra.mxu0 %v9511_v40 }
 0x234   : > { %v11656_v42 = vpop.permute.xlu0 %3116  ;;  %13621 = vst [vmem:[#allocation7_spill] sm:$0xff] %v11658_v14  ;;  %v11663_v35 = vpop.permute.xlu1 %3121  ;;  %v11665_v53 = vpack.c.bf16 %v3359_v22, %v3358_v63  ;;  %9910 = vrcp.f32 %v2718_v21  ;;  %v2719_v58 = vadd.f32 1.0, %v9893_v8  ;;  %9197 = vmatprep.subr.bf16.mxu0 %v9512_v6  ;;  %v2510_v28 = vsub.f32 0.0, %v11654_v0 }
 0x235   : > { %v2606_v36 = vmul.f32 1.442695, %v2512_v39  ;;  %v9895_v25 = vpop.eup %9894  ;;  %9912 = vrcp.f32 %v2721_v2  ;;  %v2513_v15 = vsub.f32 0.0, %v11661_v33  ;;  %v11673_v40 = vadd.f32 %v11507_v34, %v2286_v26 }
 0x236   : > { %13622 = vst [vmem:[#allocation8_spill] sm:$0xff] %v11665_v53  ;;  %v9897_v46 = vpop.eup %9896  ;;  %v2860_v37 = vmul.f32 %v9895_v25, %v11556_v52  ;;  %9914 = vrcp.f32 %v2719_v58  ;;  %9121 = vmatprep.mubr.bf16.mxu1 %v11665_v53  ;;  %3771 = vmatmul.mubr.bf16.gmra.mrb[40].mxu0 %v13602_v60  ;;  %v2602_v43 = vmul.f32 1.442695, %v2510_v28 }
 0x237   : > { %v9899_v63 = vpop.eup %9898  ;;  %v2858_v9 = vmul.f32 %v9897_v46, %v11559_v59  ;;  %9916 = vpow2.f32 %v2596_v12  ;;  %v2608_v55 = vmul.f32 1.442695, %v2513_v15  ;;  %9122 = vmatmul.mubr.bf16.vlgmr.msra.gmra.mrb[108].mxu1 %v11658_v14  ;;  %3778 = vmatprep.mubr.bf16.mxu0 %v11665_v53  ;;  %v2511_v18 = vsub.f32 0.0, %v11673_v40  ;;  %v9514_v59 = vld [vmem:[%s13533_s5 + $0x188] sm:$0xff]  }
 0x238   : > { %v9901_v38 = vpop.eup %9900  ;;  %v3364_v5 = vmul.f32 %v11521_v45, %v2860_v37  ;;  %v2861_v52 = vmul.f32 %v9899_v63, %v11563_v49  ;;  %9918 = vpow2.f32 %v2606_v36  ;;  %9198 = vmatpush3.bf16.msra.mxu0 %v9512_v6  ;;  %4638 = vmatpush1.bf16.msra.mxu1 %v9513_v20  ;;  %v11687_v22 = vpop.permute.xlu0 %3126 }
 0x239   : > { %v9059_v41 = vpop.f32.mrb[60].mxu1  ;;  %v9903_v12 = vpop.eup %9902  ;;  %v3362_v21 = vmul.f32 %v11502_v27, %v2858_v9  ;;  %v2859_v39 = vmul.f32 %v9901_v38, %v11569_v62  ;;  %9920 = vpow2.f32 %v2602_v43  ;;  %4639 = vmatprep.subr.bf16.mxu1 %v13602_v60  ;;  %v2604_v58 = vmul.f32 1.442695, %v2511_v18 }
 0x23a   : > { %v11692_v45 = vadd.f32 %v9059_v41, %v11507_v34  ;;  %v2299_v49 = vpop.f32.mrb[61].mxu1  ;;  %v9905_v6 = vpop.eup %9904  ;;  %v3365_v8 = vmul.f32 %v11527_v57, %v2861_v52  ;;  %v2724_v2 = vadd.f32 1.0, %v9903_v12  ;;  %9922 = vpow2.f32 %v2608_v55  ;;  %v9515_v55 = vld [vmem:[%s13533_s5 + $0x190] sm:$0xff]  }
 0x23b   : > { %v11695_v26 = vpop.permute.xlu1 %3131  ;;  %v9060_v36 = vpop.f32.mrb[62].mxu1  ;;  %v3363_v27 = vmul.f32 %v11509_v47, %v2859_v39  ;;  %v2722_v62 = vadd.f32 1.0, %v9905_v6  ;;  %v11701_v28 = vadd.f32 %v11507_v34, %v2299_v49 }
 0x23c   : > { %v9907_v20 = vpop.eup %9906  ;;  %v2516_v25 = vsub.f32 0.0, %v11692_v45  ;;  %v2302_v15 = vpop.f32.mrb[63].mxu1  ;;  %v11703_v46 = vpack.c.bf16 %v3365_v8, %v3364_v5  ;;  %9924 = vrcp.f32 %v2724_v2  ;;  %v11706_v57 = vadd.f32 %v9060_v36, %v11507_v34  ;;  %4640 = vmatpush1.bf16.msra.mxu1 %v9514_v59 }
 0x23d   : > { %v2725_v37 = vadd.f32 1.0, %v9907_v20  ;;  %v9909_v63 = vpop.eup %9908  ;;  %v11708_v9 = vpack.c.bf16 %v3363_v27, %v3362_v21  ;;  %9926 = vrcp.f32 %v2722_v62  ;;  %v2514_v43 = vsub.f32 0.0, %v11701_v28  ;;  %4641 = vmatprep.subr.bf16.mxu1 %v13602_v60  ;;  %v11721_v59 = vpop.permute.xlu0 %3136 }
 0x23e   : > { %13623 = vst [vmem:[#allocation9_spill] sm:$0xff] %v11703_v46  ;;  %v2614_v47 = vmul.f32 1.442695, %v2516_v25  ;;  %v9911_v38 = vpop.eup %9910  ;;  %v2864_v5 = vmul.f32 %v9909_v63, %v11576_v3  ;;  %v2517_v52 = vsub.f32 0.0, %v11706_v57  ;;  %v11718_v18 = vadd.f32 %v11507_v34, %v2302_v15  ;;  %3779 = vmatmul.mubr.bf16.gmra.mrb[44].mxu0 %v11619_v29 }
 0x23f   : > { %13624 = vst [vmem:[#allocation4_spill] sm:$0xff] %v11708_v9  ;;  %9928 = vrcp.f32 %v2725_v37  ;;  %v9913_v41 = vpop.eup %9912  ;;  %v2862_v12 = vmul.f32 %v9911_v38, %v11581_v19  ;;  %v2610_v21 = vmul.f32 1.442695, %v2514_v43  ;;  %9125 = vmatprep.mubr.bf16.mxu1 %v11708_v9  ;;  %3786 = vmatprep.mubr.bf16.mxu0 %v11658_v14  ;;  %v11726_v39 = vpop.permute.xlu1 %3141 }
 0x240   : > { %9930 = vpow2.f32 %v2604_v58  ;;  %v9915_v3 = vpop.eup %9914  ;;  %v3368_v49 = vmul.f32 %v11551_v23, %v2864_v5  ;;  %v2865_v6 = vmul.f32 %v9913_v41, %v11587_v16  ;;  %v2616_v8 = vmul.f32 1.442695, %v2517_v52  ;;  %9126 = vmatmul.mubr.bf16.gmra.mrb[112].mxu1 %v11703_v46  ;;  %v9516_v23 = vld [vmem:[%s13533_s5 + $0x198] sm:$0xff]  }
 0x241   : > { %9932 = vpow2.f32 %v2614_v47  ;;  %v9063_v2 = vpop.f32.mrb[64].mxu1  ;;  %v9917_v36 = vpop.eup %9916  ;;  %v3366_v19 = vmul.f32 %v11531_v48, %v2862_v12  ;;  %v2863_v58 = vmul.f32 %v9915_v3, %v11591_v51  ;;  %v2515_v20 = vsub.f32 0.0, %v11718_v18  ;;  %4642 = vmatpush1.bf16.msra.mxu1 %v9515_v55  ;;  %v9517_v3 = vld [vmem:[%s13533_s5 + $0x1a0] sm:$0xff]  }
 0x242   : > { %9934 = vpow2.f32 %v2610_v21  ;;  %v2315_v27 = vpop.f32.mrb[65].mxu1  ;;  %v9919_v16 = vpop.eup %9918  ;;  %v3369_v62 = vmul.f32 %v11553_v54, %v2865_v6  ;;  %v2723_v25 = vadd.f32 1.0, %v9917_v36  ;;  %v11739_v15 = vadd.f32 %v9063_v2, %v11507_v34  ;;  %4643 = vmatprep.subr.bf16.mxu1 %v13602_v60 }
 0x243   : > { %9936 = vpow2.f32 %v2616_v8  ;;  %v9064_v48 = vpop.f32.mrb[66].mxu1  ;;  %v9921_v51 = vpop.eup %9920  ;;  %v3367_v37 = vmul.f32 %v11536_v56, %v2863_v58  ;;  %v2728_v63 = vadd.f32 1.0, %v9919_v16  ;;  %v2612_v47 = vmul.f32 1.442695, %v2515_v20 }
 0x244   : > { %v11744_v43 = vadd.f32 %v11507_v34, %v2315_v27  ;;  %v2318_v55 = vpop.f32.mrb[67].mxu1  ;;  %v9923_v38 = vpop.eup %9922  ;;  %v11746_v5 = vpack.c.bf16 %v3369_v62, %v3368_v49  ;;  %9938 = vrcp.f32 %v2723_v25  ;;  %v2726_v54 = vadd.f32 1.0, %v9921_v51  ;;  %v9518_v49 = vld [vmem:[%s13533_s5 + $0x218] sm:$0xff]  }
 0x245   : > { %v2520_v52 = vsub.f32 0.0, %v11739_v15  ;;  %v11749_v41 = vpop.permute.xlu0 %3146  ;;  %v11751_v12 = vpack.c.bf16 %v3367_v37, %v3366_v19  ;;  %9940 = vrcp.f32 %v2728_v63  ;;  %v2729_v21 = vadd.f32 1.0, %v9923_v38  ;;  %4644 = vmatpush1.bf16.msra.mxu1 %v9516_v23  ;;  %v11760_v8 = vpop.permute.xlu1 %3151  ;;  %9199 = vmatprep.subr.bf16.mxu0 %v9518_v49  ;;  %v9519_v37 = vld [vmem:[%s13533_s5 + $0x1a8] sm:$0xff]   ;;  %v9528_v63 = vld [vmem:[%s13533_s5 + $0x220] sm:$0xff]  }
 0x246   : > { %13625 = vst [vmem:[#allocation10_spill] sm:$0xff] %v11746_v5  ;;  %v2518_v56 = vsub.f32 0.0, %v11744_v43  ;;  %v9925_v6 = vpop.eup %9924  ;;  %9942 = vrcp.f32 %v2726_v54  ;;  %v11763_v36 = vadd.f32 %v9064_v48, %v11507_v34  ;;  %v11766_v19 = vadd.f32 %v11507_v34, %v2318_v55  ;;  %3787 = vmatmul.mubr.bf16.gmra.mrb[48].mxu0 %v11613_v32  ;;  %4645 = vmatprep.subr.bf16.mxu1 %v13602_v60 }
 0x247   : > { %v2622_v2 = vmul.f32 1.442695, %v2520_v52  ;;  %v9927_v58 = vpop.eup %9926  ;;  %v2868_v20 = vmul.f32 %v9925_v6, %v11607_v17  ;;  %9944 = vrcp.f32 %v2729_v21  ;;  %9129 = vmatprep.mubr.bf16.mxu1 %v11751_v12  ;;  %3794 = vmatprep.mubr.bf16.mxu0 %v11708_v9 }
 0x248   : > { %v2618_v27 = vmul.f32 1.442695, %v2518_v56  ;;  %9946 = vpow2.f32 %v2612_v47  ;;  %v2521_v16 = vsub.f32 0.0, %v11763_v36  ;;  %v2519_v62 = vsub.f32 0.0, %v11766_v19  ;;  %9130 = vmatmul.mubr.bf16.gmra.mrb[116].mxu1 %v11746_v5  ;;  %9200 = vmatpush3.bf16.msra.mxu0 %v9518_v49 }
 0x249   : > { %v9929_v23 = vpop.eup %9928  ;;  %v2866_v48 = vmul.f32 %v9927_v58, %v11611_v10  ;;  %9948 = vpow2.f32 %v2622_v2  ;;  %4646 = vmatpush1.bf16.msra.mxu1 %v9517_v3  ;;  %v3372_v55 = vmul.f32 %v11578_v44, %v2868_v20  ;;  %v11786_v52 = vpop.permute.xlu0 %3156  ;;  %9201 = vmatprep.subr.bf16.mxu0 %v9528_v63 }
 0x24a   : > { %v9931_v25 = vpop.eup %9930  ;;  %v2869_v17 = vmul.f32 %v9929_v23, %v11617_v30  ;;  %v9067_v51 = vpop.f32.mrb[68].mxu1  ;;  %9950 = vpow2.f32 %v2618_v27  ;;  %v2624_v10 = vmul.f32 1.442695, %v2521_v16  ;;  %4647 = vmatprep.subr.bf16.mxu1 %v13602_v60  ;;  %v2620_v3 = vmul.f32 1.442695, %v2519_v62 }
 0x24b   : > { %v9933_v47 = vpop.eup %9932  ;;  %v2727_v38 = vadd.f32 1.0, %v9931_v25  ;;  %v2331_v54 = vpop.f32.mrb[69].mxu1  ;;  %v11790_v49 = vadd.f32 %v9067_v51, %v11507_v34  ;;  %v9520_v25 = vld [vmem:[%s13533_s5 + $0x1b0] sm:$0xff]  }
 0x24c   : > { %v9935_v30 = vpop.eup %9934  ;;  %v3373_v21 = vmul.f32 %v11583_v50, %v2869_v17  ;;  %v2732_v56 = vadd.f32 1.0, %v9933_v47  ;;  %v9068_v6 = vpop.f32.mrb[70].mxu1  ;;  %v11795_v20 = vadd.f32 %v11507_v34, %v2331_v54  ;;  %9202 = vmatpush3.bf16.msra.mxu0 %v9528_v63 }
 0x24d   : > { %v9937_v2 = vpop.eup %9936  ;;  %v11792_v44 = vpop.permute.xlu1 %3161  ;;  %9952 = vrcp.f32 %v2727_v38  ;;  %v2730_v58 = vadd.f32 1.0, %v9935_v30  ;;  %v11798_v27 = vadd.f32 %v9068_v6, %v11507_v34  ;;  %v2524_v62 = vsub.f32 0.0, %v11790_v49  ;;  %4648 = vmatpush1.bf16.msra.mxu1 %v9519_v37 }
 0x24e   : > { %v2334_v23 = vpop.f32.mrb[71].mxu1  ;;  %v11800_v50 = vpack.c.bf16 %v3373_v21, %v3372_v55  ;;  %9954 = vrcp.f32 %v2732_v56  ;;  %v2733_v16 = vadd.f32 1.0, %v9937_v2  ;;  %v9939_v17 = vpop.eup %9938  ;;  %v2522_v51 = vsub.f32 0.0, %v11795_v20  ;;  %3795 = vmatmul.mubr.bf16.gmra.mrb[52].mxu0 %v11665_v53  ;;  %4649 = vmatprep.subr.bf16.mxu1 %v13602_v60 }
 0x24f   : > { %9956 = vrcp.f32 %v2730_v58  ;;  %v2525_v47 = vsub.f32 0.0, %v11798_v27  ;;  %v11809_v38 = vadd.f32 %v11507_v34, %v2334_v23  ;;  %v9941_v55 = vpop.eup %9940  ;;  %v2867_v37 = vmul.f32 %v9939_v17, %v11630_v11  ;;  %3802 = vmatprep.mubr.bf16.mxu0 %v11703_v46  ;;  %v11816_v2 = vpop.permute.xlu0 %3166 }
 0x250   : > { %13626 = vst [vmem:[#allocation11_spill] sm:$0xff] %v11800_v50  ;;  %9958 = vrcp.f32 %v2733_v16  ;;  %v2630_v54 = vmul.f32 1.442695, %v2524_v62  ;;  %v9943_v63 = vpop.eup %9942  ;;  %v2872_v30 = vmul.f32 %v9941_v55, %v11645_v31  ;;  %v2626_v21 = vmul.f32 1.442695, %v2522_v51  ;;  %v9521_v62 = vld [vmem:[%s13533_s5 + $0x1b8] sm:$0xff]  }
 0x251   : > { %9960 = vpow2.f32 %v2624_v10  ;;  %v2632_v56 = vmul.f32 1.442695, %v2525_v47  ;;  %v9945_v6 = vpop.eup %9944  ;;  %v3370_v58 = vmul.f32 %v11565_v1, %v2866_v48  ;;  %v3371_v23 = vmul.f32 %v11571_v13, %v2867_v37  ;;  %4650 = vmatpush1.bf16.msra.mxu1 %v9520_v25  ;;  %v11824_v10 = vpop.permute.xlu1 %3171 }
 0x252   : > { %9962 = vpow2.f32 %v2620_v3  ;;  %v2523_v11 = vsub.f32 0.0, %v11809_v38  ;;  %v9071_v16 = vpop.f32.mrb[72].mxu1  ;;  %v9947_v31 = vpop.eup %9946  ;;  %v2870_v17 = vmul.f32 %v9943_v63, %v11654_v0  ;;  %v2873_v51 = vmul.f32 %v9945_v6, %v11661_v33  ;;  %4651 = vmatprep.subr.bf16.mxu1 %v13602_v60 }
 0x253   : > { %9964 = vpow2.f32 %v2630_v54  ;;  %v11829_v1 = vadd.f32 %v9071_v16, %v11507_v34  ;;  %v2347_v13 = vpop.f32.mrb[73].mxu1  ;;  %v9949_v48 = vpop.eup %9948  ;;  %v11832_v3 = vpack.c.bf16 %v3371_v23, %v3370_v58  ;;  %v3376_v25 = vmul.f32 %v11626_v24, %v2872_v30  ;;  %v9522_v24 = vld [vmem:[%s13533_s5 + $0x1c0] sm:$0xff]  }
 0x254   : > { %v2731_v47 = vadd.f32 1.0, %v9947_v31  ;;  %9966 = vpow2.f32 %v2626_v21  ;;  %v9072_v55 = vpop.f32.mrb[74].mxu1  ;;  %v9951_v37 = vpop.eup %9950  ;;  %v3377_v0 = vmul.f32 %v11633_v4, %v2873_v51  ;;  %v2736_v63 = vadd.f32 1.0, %v9949_v48 }
 0x255   : > { %13627 = vst [vmem:[#allocation12_spill] sm:$0xff] %v11832_v3  ;;  %9968 = vpow2.f32 %v2632_v56  ;;  %v2628_v33 = vmul.f32 1.442695, %v2523_v11  ;;  %v2350_v54 = vpop.f32.mrb[75].mxu1  ;;  %v2734_v6 = vadd.f32 1.0, %v9951_v37  ;;  %v2528_v16 = vsub.f32 0.0, %v11829_v1  ;;  %9133 = vmatprep.mubr.bf16.mxu1 %v11832_v3  ;;  %4652 = vmatpush1.bf16.msra.mxu1 %v9521_v62  ;;  %v11854_v11 = vpop.permute.xlu0 %3176 }
 0x256   : > { %9970 = vrcp.f32 %v2731_v47  ;;  %v11839_v58 = vadd.f32 %v11507_v34, %v2347_v13  ;;  %v11844_v4 = vpack.c.bf16 %v3377_v0, %v3376_v25  ;;  %9134 = vmatmul.mubr.bf16.gmra.mrb[120].mxu1 %v11800_v50  ;;  %v11848_v21 = vadd.f32 %v9072_v55, %v11507_v34  ;;  %3803 = vmatmul.mubr.bf16.gmra.mrb[56].mxu0 %v11658_v14  ;;  %v11860_v48 = vpop.permute.xlu1 %3181 }
 0x257   : > { %v9953_v30 = vpop.eup %9952  ;;  %9972 = vrcp.f32 %v2736_v63  ;;  %v11851_v56 = vadd.f32 %v11507_v34, %v2350_v54  ;;  %v2638_v31 = vmul.f32 1.442695, %v2528_v16  ;;  %3810 = vmatprep.mubr.bf16.mxu0 %v11751_v12  ;;  %4653 = vmatprep.subr.bf16.mxu1 %v13602_v60 }
 0x258   : > { %13628 = vst [vmem:[#allocation13_spill] sm:$0xff] %v11844_v4  ;;  %v9955_v23 = vpop.eup %9954  ;;  %v2871_v62 = vmul.f32 %v9953_v30, %v11673_v40  ;;  %9974 = vrcp.f32 %v2734_v6  ;;  %v2526_v51 = vsub.f32 0.0, %v11839_v58  ;;  %v2529_v47 = vsub.f32 0.0, %v11848_v21  ;;  %v9523_v6 = vld [vmem:[%s13533_s5 + $0x1c8] sm:$0xff]  }
 0x259   : > { %v9957_v13 = vpop.eup %9956  ;;  %v2876_v25 = vmul.f32 %v9955_v23, %v11692_v45  ;;  %9976 = vpow2.f32 %v2628_v33  ;;  %v2527_v55 = vsub.f32 0.0, %v11851_v56  ;;  %v3374_v40 = vmul.f32 %v11598_v7, %v2870_v17  ;;  %4654 = vmatpush1.bf16.msra.mxu1 %v9522_v24 }
 0x25a   : > { %v9959_v37 = vpop.eup %9958  ;;  %v3375_v0 = vmul.f32 %v11602_v61, %v2871_v62  ;;  %9978 = vpow2.f32 %v2638_v31  ;;  %v2634_v63 = vmul.f32 1.442695, %v2526_v51  ;;  %v9075_v54 = vpop.f32.mrb[76].mxu1  ;;  %v2874_v33 = vmul.f32 %v9957_v13, %v11701_v28  ;;  %4655 = vmatprep.subr.bf16.mxu1 %v13602_v60 }
 0x25b   : > { %v9961_v16 = vpop.eup %9960  ;;  %v3380_v45 = vmul.f32 %v11687_v22, %v2876_v25  ;;  %v2877_v30 = vmul.f32 %v9959_v37, %v11706_v57  ;;  %v2640_v23 = vmul.f32 1.442695, %v2529_v47  ;;  %v2363_v14 = vpop.f32.mrb[77].mxu1  ;;  %v2636_v24 = vmul.f32 1.442695, %v2527_v55 }
 0x25c   : > { %v9963_v7 = vpop.eup %9962  ;;  %v11874_v61 = vpack.c.bf16 %v3375_v0, %v3374_v40  ;;  %v2737_v17 = vadd.f32 1.0, %v9961_v16  ;;  %9980 = vpow2.f32 %v2634_v63  ;;  %v9076_v62 = vpop.f32.mrb[78].mxu1  ;;  %v11878_v22 = vadd.f32 %v9075_v54, %v11507_v34 }
 0x25d   : > { %v9965_v31 = vpop.eup %9964  ;;  %v3381_v51 = vmul.f32 %v11695_v26, %v2877_v30  ;;  %v2735_v53 = vadd.f32 1.0, %v9963_v7  ;;  %9982 = vpow2.f32 %v2640_v23  ;;  %v2366_v28 = vpop.f32.mrb[79].mxu1  ;;  %v11884_v47 = vadd.f32 %v11507_v34, %v2363_v14  ;;  %4656 = vmatpush1.bf16.msra.mxu1 %v9523_v6  ;;  %v9524_v26 = vld [vmem:[%s13533_s5 + $0x1d0] sm:$0xff]  }
 0x25e   : > { %13629 = vst [vmem:[#allocation14_spill] sm:$0xff] %v11874_v61  ;;  %v9967_v57 = vpop.eup %9966  ;;  %v11880_v13 = vpop.permute.xlu0 %3186  ;;  %9984 = vrcp.f32 %v2737_v17  ;;  %v2740_v25 = vadd.f32 1.0, %v9965_v31  ;;  %9137 = vmatprep.mubr.bf16.mxu1 %v11874_v61  ;;  %v11887_v55 = vadd.f32 %v9076_v62, %v11507_v34  ;;  %v2532_v54 = vsub.f32 0.0, %v11878_v22  ;;  %3811 = vmatmul.mubr.bf16.gmra.mrb[60].mxu0 %v11708_v9 }
 0x25f   : > { %v9969_v37 = vpop.eup %9968  ;;  %v11892_v40 = vpop.permute.xlu1 %3191  ;;  %v11894_v0 = vpack.c.bf16 %v3381_v51, %v3380_v45  ;;  %9986 = vrcp.f32 %v2735_v53  ;;  %v2738_v63 = vadd.f32 1.0, %v9967_v57  ;;  %9138 = vmatmul.mubr.bf16.gmra.mrb[124].mxu1 %v11844_v4  ;;  %v2530_v16 = vsub.f32 0.0, %v11884_v47  ;;  %3818 = vmatprep.mubr.bf16.mxu0 %v11746_v5 }
 0x260   : > { %v9971_v14 = vpop.eup %9970  ;;  %9988 = vrcp.f32 %v2740_v25  ;;  %v2741_v6 = vadd.f32 1.0, %v9969_v37  ;;  %v2533_v30 = vsub.f32 0.0, %v11887_v55  ;;  %4657 = vmatprep.subr.bf16.mxu1 %v13602_v60  ;;  %v2646_v23 = vmul.f32 1.442695, %v2532_v54  ;;  %v9525_v25 = vld [vmem:[%s13533_s5 + $0x1d8] sm:$0xff]  }
 0x261   : > { %v9973_v45 = vpop.eup %9972  ;;  %v2875_v53 = vmul.f32 %v9971_v14, %v11718_v18  ;;  %9990 = vrcp.f32 %v2738_v63  ;;  %v11905_v7 = vadd.f32 %v11507_v34, %v2366_v28  ;;  %v3378_v62 = vmul.f32 %v11656_v42, %v2874_v33  ;;  %4658 = vmatpush1.bf16.msra.mxu1 %v9524_v26  ;;  %v11921_v54 = vld [vmem:[%s13532_s4] ss:$0 sm:$0xff] }
 0x262   : > { %v9975_v17 = vpop.eup %9974  ;;  %v2880_v31 = vmul.f32 %v9973_v45, %v11739_v15  ;;  %9992 = vrcp.f32 %v2741_v6  ;;  %v2642_v51 = vmul.f32 1.442695, %v2530_v16  ;;  %v9079_v57 = vpop.f32.mrb[80].mxu1  ;;  %v2648_v63 = vmul.f32 1.442695, %v2533_v30  ;;  %4659 = vmatprep.subr.bf16.mxu1 %v13602_v60 }
 0x263   : > { %v9977_v37 = vpop.eup %9976  ;;  %v3379_v18 = vmul.f32 %v11663_v35, %v2875_v53  ;;  %9994 = vpow2.f32 %v2636_v24  ;;  %v2531_v34 = vsub.f32 0.0, %v11905_v7  ;;  %v2379_v28 = vpop.f32.mrb[81].mxu1  ;;  %v2878_v33 = vmul.f32 %v9975_v17, %v11744_v43 }
 0x264   : > { %v9979_v42 = vpop.eup %9978  ;;  %v11915_v15 = vpop.permute.xlu0 %3196  ;;  %v2739_v26 = vadd.f32 1.0, %v9977_v37  ;;  %9996 = vpow2.f32 %v2646_v23  ;;  %v11924_v35 = vadd.f32 %v11921_v54, %v9079_v57  ;;  %v3384_v16 = vmul.f32 %v11749_v41, %v2880_v31  ;;  %v9526_v57 = vld [vmem:[%s13533_s5 + $0x1e0] sm:$0xff]  }
 0x265   : > { %v9080_v24 = vpop.f32.mrb[82].mxu1  ;;  %v11926_v14 = vpop.permute.xlu1 %3201  ;;  %v11928_v6 = vpack.c.bf16 %v3379_v18, %v3378_v62  ;;  %v2744_v30 = vadd.f32 1.0, %v9979_v42  ;;  %9998 = vpow2.f32 %v2642_v51  ;;  %v2644_v53 = vmul.f32 1.442695, %v2531_v34  ;;  %4660 = vmatpush1.bf16.msra.mxu1 %v9525_v25 }
 0x266   : > { %v2382_v43 = vpop.f32.mrb[83].mxu1  ;;  %v9981_v45 = vpop.eup %9980  ;;  %10000 = vrcp.f32 %v2739_v26  ;;  %v2536_v23 = vsub.f32 0.0, %v11924_v35  ;;  %v11933_v17 = vadd.f32 %v11921_v54, %v2379_v28  ;;  %v11940_v41 = vadd.f32 %v11921_v54, %v9080_v24  ;;  %3819 = vmatmul.mubr.bf16.gmra.mrb[64].mxu0 %v11703_v46  ;;  %4661 = vmatprep.subr.bf16.mxu1 %v13602_v60 }
 0x267   : > { %13630 = vst [vmem:[#allocation15_spill] sm:$0xff] %v11928_v6  ;;  %v9983_v62 = vpop.eup %9982  ;;  %10002 = vrcp.f32 %v2744_v30  ;;  %v2742_v37 = vadd.f32 1.0, %v9981_v45  ;;  %9141 = vmatprep.mubr.bf16.mxu1 %v11928_v6  ;;  %v11943_v31 = vadd.f32 %v11921_v54, %v2382_v43  ;;  %3826 = vmatprep.mubr.bf16.mxu0 %v11832_v3 }
 0x268   : > { %v9985_v51 = vpop.eup %9984  ;;  %v2745_v18 = vadd.f32 1.0, %v9983_v62  ;;  %10004 = vpow2.f32 %v2648_v63  ;;  %v2654_v25 = vmul.f32 1.442695, %v2536_v23  ;;  %v2534_v34 = vsub.f32 0.0, %v11933_v17  ;;  %9142 = vmatmul.mubr.bf16.gmra.mrb[128].mxu1 %v11894_v0  ;;  %v11953_v43 = vpop.permute.xlu0 %3206 }
 0x269   : > { %v9987_v28 = vpop.eup %9986  ;;  %v2881_v42 = vmul.f32 %v9985_v51, %v11763_v36  ;;  %10006 = vrcp.f32 %v2742_v37  ;;  %v2537_v26 = vsub.f32 0.0, %v11940_v41  ;;  %v2535_v24 = vsub.f32 0.0, %v11943_v31  ;;  %4662 = vmatpush1.bf16.msra.mxu1 %v9526_v57  ;;  %v9527_v36 = vld [vmem:[%s13533_s5 + $0x1e8] sm:$0xff]   ;;  %v11960_v51 = vpop.permute.xlu1 %3211 }
 0x26a   : > { %v9989_v30 = vpop.eup %9988  ;;  %v3382_v63 = vmul.f32 %v11721_v59, %v2878_v33  ;;  %v2879_v45 = vmul.f32 %v9987_v28, %v11766_v19  ;;  %10008 = vrcp.f32 %v2745_v18  ;;  %v2650_v23 = vmul.f32 1.442695, %v2534_v34  ;;  %v9083_v62 = vpop.f32.mrb[84].mxu1  ;;  %4663 = vmatprep.subr.bf16.mxu1 %v13602_v60 }
 0x26b   : > { %v9991_v37 = vpop.eup %9990  ;;  %v3385_v46 = vmul.f32 %v11760_v8, %v2881_v42  ;;  %v2884_v9 = vmul.f32 %v9989_v30, %v11790_v49  ;;  %10010 = vpow2.f32 %v2644_v53  ;;  %v2656_v32 = vmul.f32 1.442695, %v2537_v26  ;;  %v2395_v59 = vpop.f32.mrb[85].mxu1 }
 0x26c   : > { %v9993_v19 = vpop.eup %9992  ;;  %v3383_v33 = vmul.f32 %v11726_v39, %v2879_v45  ;;  %v2882_v57 = vmul.f32 %v9991_v37, %v11795_v20  ;;  %10012 = vpow2.f32 %v2654_v25  ;;  %v2652_v18 = vmul.f32 1.442695, %v2535_v24  ;;  %v9084_v34 = vpop.f32.mrb[86].mxu1  ;;  %v9529_v20 = vld [vmem:[%s13533_s5 + $0x1f0] sm:$0xff]  }
 0x26d   : > { %v9995_v28 = vpop.eup %9994  ;;  %v11967_v29 = vpack.c.bf16 %v3385_v46, %v3384_v16  ;;  %v3388_v8 = vmul.f32 %v11816_v2, %v2884_v9  ;;  %v2885_v49 = vmul.f32 %v9993_v19, %v11798_v27  ;;  %10014 = vpow2.f32 %v2650_v23  ;;  %v2398_v53 = vpop.f32.mrb[87].mxu1  ;;  %4664 = vmatpush1.bf16.msra.mxu1 %v9527_v36 }
 0x26e   : > { %v9997_v42 = vpop.eup %9996  ;;  %v11971_v26 = vpack.c.bf16 %v3383_v33, %v3382_v63  ;;  %v3386_v30 = vmul.f32 %v11786_v52, %v2882_v57  ;;  %v2743_v39 = vadd.f32 1.0, %v9995_v28  ;;  %10016 = vpow2.f32 %v2656_v32  ;;  %3827 = vmatmul.mubr.bf16.gmra.mrb[68].mxu0 %v11751_v12  ;;  %4665 = vmatprep.subr.bf16.mxu1 %v13602_v60  ;;  %v11983_v2 = vpop.permute.xlu0 %3216  ;;  %v9530_v33 = vld [vmem:[%s13533_s5 + $0x1f8] sm:$0xff]  }
 0x26f   : > { %13631 = vst [vmem:[#allocation16_spill] sm:$0xff] %v11967_v29  ;;  %v9999_v46 = vpop.eup %9998  ;;  %v3389_v16 = vmul.f32 %v11824_v10, %v2885_v49  ;;  %v2748_v9 = vadd.f32 1.0, %v9997_v42  ;;  %10018 = vpow2.f32 %v2652_v18  ;;  %v11979_v27 = vadd.f32 %v11921_v54, %v9083_v62  ;;  %3834 = vmatprep.mubr.bf16.mxu0 %v11800_v50  ;;  %v11993_v63 = vpop.permute.xlu1 %3221 }
 0x270   : > { %13632 = vst [vmem:[#allocation17_spill] sm:$0xff] %v11971_v26  ;;  %v10001_v52 = vpop.eup %10000  ;;  %10020 = vrcp.f32 %v2743_v39  ;;  %v2746_v32 = vadd.f32 1.0, %v9999_v46  ;;  %9145 = vmatprep.mubr.bf16.mxu1 %v11971_v26  ;;  %v11987_v25 = vadd.f32 %v11921_v54, %v2395_v59  ;;  %v11990_v10 = vadd.f32 %v11921_v54, %v9084_v34 }
 0x271   : > { %v10003_v24 = vpop.eup %10002  ;;  %v11995_v45 = vpack.c.bf16 %v3389_v16, %v3388_v8  ;;  %v2883_v23 = vmul.f32 %v10001_v52, %v11809_v38  ;;  %10022 = vrcp.f32 %v2748_v9  ;;  %v2540_v62 = vsub.f32 0.0, %v11979_v27  ;;  %9146 = vmatmul.mubr.bf16.gmra.mrb[132].mxu1 %v11967_v29  ;;  %v9531_v38 = vld [vmem:[%s13533_s5 + $0x228] sm:$0xff]  }
 0x272   : > { %v10005_v36 = vpop.eup %10004  ;;  %v2888_v37 = vmul.f32 %v10003_v24, %v11829_v1  ;;  %10024 = vrcp.f32 %v2746_v32  ;;  %v2538_v59 = vsub.f32 0.0, %v11987_v25  ;;  %v2541_v19 = vsub.f32 0.0, %v11990_v10  ;;  %4666 = vmatpush1.bf16.msra.mxu1 %v9529_v20  ;;  %9203 = vmatprep.subr.bf16.mxu0 %v9531_v38 }
 0x273   : > { %13633 = vst [vmem:[#allocation18_spill] sm:$0xff] %v11995_v45  ;;  %v10007_v57 = vpop.eup %10006  ;;  %v3387_v18 = vmul.f32 %v11792_v44, %v2883_v23  ;;  %v2749_v34 = vadd.f32 1.0, %v10005_v36  ;;  %v2662_v28 = vmul.f32 1.442695, %v2540_v62  ;;  %v12011_v1 = vadd.f32 %v11921_v54, %v2398_v53  ;;  %v9087_v8 = vpop.f32.mrb[88].mxu1  ;;  %4667 = vmatprep.subr.bf16.mxu1 %v13602_v60  ;;  %9204 = vmatpush3.bf16.msra.mxu0 %v9531_v38 }
 0x274   : > { %v10009_v49 = vpop.eup %10008  ;;  %v3392_v42 = vmul.f32 %v11880_v13, %v2888_v37  ;;  %v2886_v39 = vmul.f32 %v10007_v57, %v11839_v58  ;;  %v2658_v20 = vmul.f32 1.442695, %v2538_v59  ;;  %v2664_v46 = vmul.f32 1.442695, %v2541_v19  ;;  %v2411_v16 = vpop.f32.mrb[89].mxu1 }
 0x275   : > { %v10011_v9 = vpop.eup %10010  ;;  %v12016_v52 = vpack.c.bf16 %v3387_v18, %v3386_v30  ;;  %v2889_v44 = vmul.f32 %v10009_v49, %v11848_v21  ;;  %10026 = vrcp.f32 %v2749_v34  ;;  %v2539_v53 = vsub.f32 0.0, %v12011_v1  ;;  %v9088_v32 = vpop.f32.mrb[90].mxu1 }
 0x276   : > { %v10013_v24 = vpop.eup %10012  ;;  %v12020_v23 = vpop.permute.xlu0 %3226  ;;  %v3390_v13 = vmul.f32 %v11854_v11, %v2886_v39  ;;  %v2747_v58 = vadd.f32 1.0, %v10011_v9  ;;  %10028 = vpow2.f32 %v2662_v28  ;;  %v12024_v62 = vadd.f32 %v11921_v54, %v9087_v8  ;;  %4668 = vmatpush1.bf16.msra.mxu1 %v9530_v33  ;;  %3835 = vmatmul.mubr.bf16.gmra.mrb[72].mxu0 %v11746_v5 }
 0x277   : > { %13634 = vst [vmem:[#allocation19_spill] sm:$0xff] %v12016_v52  ;;  %v2414_v36 = vpop.f32.mrb[91].mxu1  ;;  %v10015_v30 = vpop.eup %10014  ;;  %v3393_v21 = vmul.f32 %v11892_v40, %v2889_v44  ;;  %v2752_v59 = vadd.f32 1.0, %v10013_v24  ;;  %10030 = vpow2.f32 %v2658_v20  ;;  %v2660_v19 = vmul.f32 1.442695, %v2539_v53  ;;  %9149 = vmatprep.mubr.bf16.mxu1 %v12016_v52  ;;  %3842 = vmatprep.mubr.bf16.mxu0 %v11874_v61 }
 0x278   : > { %v12026_v37 = vpop.permute.xlu1 %3231  ;;  %v10017_v11 = vpop.eup %10016  ;;  %10032 = vrcp.f32 %v2747_v58  ;;  %v2750_v38 = vadd.f32 1.0, %v10015_v30  ;;  %v2544_v57 = vsub.f32 0.0, %v12024_v62  ;;  %v12033_v18 = vadd.f32 %v11921_v54, %v2411_v16 }
 0x279   : > { %v10019_v33 = vpop.eup %10018  ;;  %v12036_v34 = vpack.c.bf16 %v3393_v21, %v3392_v42  ;;  %10034 = vrcp.f32 %v2752_v59  ;;  %v2753_v40 = vadd.f32 1.0, %v10017_v11  ;;  %9150 = vmatmul.mubr.bf16.gmra.mrb[136].mxu1 %v11995_v45  ;;  %v12040_v28 = vadd.f32 %v11921_v54, %v9088_v32 }
 0x27a   : > { %v10021_v8 = vpop.eup %10020  ;;  %10036 = vrcp.f32 %v2750_v38  ;;  %v2751_v49 = vadd.f32 1.0, %v10019_v33  ;;  %v2670_v39 = vmul.f32 1.442695, %v2544_v57  ;;  %v2542_v20 = vsub.f32 0.0, %v12033_v18  ;;  %v12048_v58 = vpop.permute.xlu0 %3236 }
 0x27b   : > { %13635 = vst [vmem:[#allocation20_spill] sm:$0xff] %v12036_v34  ;;  %v10023_v16 = vpop.eup %10022  ;;  %v2887_v9 = vmul.f32 %v10021_v8, %v11851_v56  ;;  %10038 = vrcp.f32 %v2753_v40  ;;  %v2545_v42 = vsub.f32 0.0, %v12040_v28  ;;  %v12046_v44 = vadd.f32 %v11921_v54, %v2414_v36  ;;  %v9091_v53 = vpop.f32.mrb[92].mxu1 }
 0x27c   : > { %v10025_v24 = vpop.eup %10024  ;;  %v2892_v32 = vmul.f32 %v10023_v16, %v11878_v22  ;;  %10040 = vrcp.f32 %v2751_v49  ;;  %v2666_v30 = vmul.f32 1.442695, %v2542_v20  ;;  %v12052_v21 = vadd.f32 %v11921_v54, %v9091_v53  ;;  %v2427_v59 = vpop.f32.mrb[93].mxu1 }
 0x27d   : > { %v12054_v11 = vpop.permute.xlu1 %3241  ;;  %v3391_v56 = vmul.f32 %v11860_v48, %v2887_v9  ;;  %v2890_v38 = vmul.f32 %v10025_v24, %v11884_v47  ;;  %10042 = vpow2.f32 %v2664_v46  ;;  %v2672_v36 = vmul.f32 1.442695, %v2545_v42  ;;  %v9092_v57 = vpop.f32.mrb[94].mxu1 }
 0x27e   : > { %v3396_v33 = vmul.f32 %v11953_v43, %v2892_v32  ;;  %10044 = vpow2.f32 %v2660_v19  ;;  %v2543_v22 = vsub.f32 0.0, %v12046_v44  ;;  %v2548_v40 = vsub.f32 0.0, %v12052_v21  ;;  %v2430_v8 = vpop.f32.mrb[95].mxu1  ;;  %3843 = vmatmul.mubr.bf16.gmra.mrb[76].mxu0 %v11832_v3  ;;  %v12075_v53 = vpop.permute.xlu0 %3246 }
 0x27f   : > { %v10027_v49 = vpop.eup %10026  ;;  %v12061_v20 = vpack.c.bf16 %v3391_v56, %v3390_v13  ;;  %v3394_v16 = vmul.f32 %v11915_v15, %v2890_v38  ;;  %10046 = vpow2.f32 %v2670_v39  ;;  %v12065_v48 = vadd.f32 %v11921_v54, %v2427_v59  ;;  %3850 = vmatprep.mubr.bf16.mxu0 %v11844_v4 }
 0x280   : > { %v10029_v47 = vpop.eup %10028  ;;  %v2893_v43 = vmul.f32 %v10027_v49, %v11887_v55  ;;  %10048 = vpow2.f32 %v2666_v30  ;;  %v2668_v46 = vmul.f32 1.442695, %v2543_v22  ;;  %v2678_v19 = vmul.f32 1.442695, %v2548_v40 }
 0x281   : > { %13636 = vst [vmem:[#allocation21_spill] sm:$0xff] %v12061_v20  ;;  %v10031_v9 = vpop.eup %10030  ;;  %v2756_v42 = vadd.f32 1.0, %v10029_v47  ;;  %10050 = vpow2.f32 %v2672_v36  ;;  %9153 = vmatprep.mubr.bf16.mxu1 %v12061_v20  ;;  %v2546_v15 = vsub.f32 0.0, %v12065_v48  ;;  %v12073_v13 = vadd.f32 %v11921_v54, %v9092_v57  ;;  %v12082_v59 = vpop.permute.xlu1 %3251 }
 0x282   : > { %v10033_v39 = vpop.eup %10032  ;;  %v3397_v55 = vmul.f32 %v11960_v51, %v2893_v43  ;;  %v2754_v24 = vadd.f32 1.0, %v10031_v9  ;;  %10052 = vpow2.f32 %v2668_v46  ;;  %9154 = vmatmul.mubr.bf16.gmra.mrb[140].mxu1 %v12036_v34  ;;  %v12080_v32 = vadd.f32 %v11921_v54, %v2430_v8 }
 0x283   : > { %v10035_v30 = vpop.eup %10034  ;;  %v2891_v56 = vmul.f32 %v10033_v39, %v11905_v7  ;;  %10054 = vrcp.f32 %v2756_v42  ;;  %v2674_v38 = vmul.f32 1.442695, %v2546_v15  ;;  %v2549_v36 = vsub.f32 0.0, %v12073_v13  ;;  %v9095_v57 = vpop.f32.mrb[96].mxu1 }
 0x284   : > { %v10037_v22 = vpop.eup %10036  ;;  %v12086_v40 = vpack.c.bf16 %v3397_v55, %v3396_v33  ;;  %v2896_v51 = vmul.f32 %v10035_v30, %v11924_v35  ;;  %10056 = vrcp.f32 %v2754_v24  ;;  %v2547_v49 = vsub.f32 0.0, %v12080_v32  ;;  %v2443_v8 = vpop.f32.mrb[97].mxu1 }
 0x285   : > { %v10039_v47 = vpop.eup %10038  ;;  %v3395_v43 = vmul.f32 %v11926_v14, %v2891_v56  ;;  %v2894_v46 = vmul.f32 %v10037_v22, %v11933_v17  ;;  %10058 = vpow2.f32 %v2678_v19  ;;  %v2680_v7 = vmul.f32 1.442695, %v2549_v36  ;;  %v9096_v9 = vpop.f32.mrb[98].mxu1 }
 0x286   : > { %13637 = vst [vmem:[#allocation22_spill] sm:$0xff] %v12086_v40  ;;  %v10041_v42 = vpop.eup %10040  ;;  %v3400_v15 = vmul.f32 %v12020_v23, %v2896_v51  ;;  %v2897_v33 = vmul.f32 %v10039_v47, %v11940_v41  ;;  %10060 = vpow2.f32 %v2674_v38  ;;  %v2676_v39 = vmul.f32 1.442695, %v2547_v49  ;;  %v2446_v35 = vpop.f32.mrb[99].mxu1  ;;  %3851 = vmatmul.mubr.bf16.gmra.mrb[80].mxu0 %v11800_v50 }
 0x287   : > { %v10043_v55 = vpop.eup %10042  ;;  %v12094_v24 = vpack.c.bf16 %v3395_v43, %v3394_v16  ;;  %v3398_v30 = vmul.f32 %v11983_v2, %v2894_v46  ;;  %v2895_v14 = vmul.f32 %v10041_v42, %v11943_v31  ;;  %10062 = vpow2.f32 %v2680_v7  ;;  %v12099_v19 = vpop.permute.xlu0 %3256  ;;  %3858 = vmatprep.mubr.bf16.mxu0 %v11928_v6 }
 0x288   : > { %v10045_v17 = vpop.eup %10044  ;;  %v3401_v23 = vmul.f32 %v12026_v37, %v2897_v33  ;;  %v2757_v56 = vadd.f32 1.0, %v10043_v55  ;;  %10064 = vpow2.f32 %v2676_v39  ;;  %v12103_v41 = vadd.f32 %v11921_v54, %v9095_v57  ;;  %v12106_v38 = vpop.permute.xlu1 %3261 }
 0x289   : > { %13638 = vst [vmem:[#allocation23_spill] sm:$0xff] %v12094_v24  ;;  %v10047_v16 = vpop.eup %10046  ;;  %v3399_v31 = vmul.f32 %v11993_v63, %v2895_v14  ;;  %v2755_v2 = vadd.f32 1.0, %v10045_v17  ;;  %9157 = vmatprep.mubr.bf16.mxu1 %v12094_v24  ;;  %v12111_v36 = vadd.f32 %v11921_v54, %v2443_v8  ;;  %v12114_v37 = vadd.f32 %v11921_v54, %v9096_v9 }
 0x28a   : > { %v10049_v22 = vpop.eup %10048  ;;  %v12116_v51 = vpack.c.bf16 %v3401_v23, %v3400_v15  ;;  %10066 = vrcp.f32 %v2757_v56  ;;  %v2760_v57 = vadd.f32 1.0, %v10047_v16  ;;  %v2552_v49 = vsub.f32 0.0, %v12103_v41  ;;  %9158 = vmatmul.mubr.bf16.gmra.mrb[144].mxu1 %v12086_v40 }
 0x28b   : > { %v10051_v47 = vpop.eup %10050  ;;  %v12120_v63 = vpack.c.bf16 %v3399_v31, %v3398_v30  ;;  %10068 = vrcp.f32 %v2755_v2  ;;  %v2758_v43 = vadd.f32 1.0, %v10049_v22  ;;  %v2550_v8 = vsub.f32 0.0, %v12111_v36  ;;  %v12128_v23 = vpop.permute.xlu0 %3266 }
 0x28c   : > { %13639 = vst [vmem:[#allocation24_spill] sm:$0xff] %v12116_v51  ;;  %v10053_v46 = vpop.eup %10052  ;;  %10070 = vrcp.f32 %v2760_v57  ;;  %v2761_v7 = vadd.f32 1.0, %v10051_v47  ;;  %v2686_v9 = vmul.f32 1.442695, %v2552_v49  ;;  %v2553_v42 = vsub.f32 0.0, %v12114_v37  ;;  %v9099_v15 = vpop.f32.mrb[100].mxu1 }
 0x28d   : > { %13640 = vst [vmem:[#allocation25_spill] sm:$0xff] %v12120_v63  ;;  %v10055_v33 = vpop.eup %10054  ;;  %10072 = vrcp.f32 %v2758_v43  ;;  %v2759_v39 = vadd.f32 1.0, %v10053_v46  ;;  %v2682_v55 = vmul.f32 1.442695, %v2550_v8  ;;  %v12125_v14 = vadd.f32 %v11921_v54, %v2446_v35  ;;  %9161 = vmatprep.mubr.bf16.mxu1 %v12120_v63  ;;  %v2459_v30 = vpop.f32.mrb[101].mxu1 }
 0x28e   : > { %v10057_v17 = vpop.eup %10056  ;;  %v2900_v56 = vmul.f32 %v10055_v33, %v11979_v27  ;;  %10074 = vrcp.f32 %v2761_v7  ;;  %v12132_v16 = vadd.f32 %v11921_v54, %v9099_v15  ;;  %v9100_v31 = vpop.f32.mrb[102].mxu1  ;;  %v12138_v57 = vadd.f32 %v11921_v54, %v2459_v30  ;;  %3859 = vmatmul.mubr.bf16.gmra.mrb[84].mxu0 %v11874_v61 }
 0x28f   : > { %v10059_v2 = vpop.eup %10058  ;;  %v12134_v22 = vpop.permute.xlu1 %3271  ;;  %10076 = vrcp.f32 %v2759_v39  ;;  %v2551_v35 = vsub.f32 0.0, %v12125_v14  ;;  %v2898_v27 = vmul.f32 %v10057_v17, %v11987_v25  ;;  %3866 = vmatprep.mubr.bf16.mxu0 %v11894_v0  ;;  %v2688_v33 = vmul.f32 1.442695, %v2553_v42  ;;  %v9532_v25 = vld [vmem:[%s13533_s5 + $0x230] sm:$0xff]  }
 0x290   : > { %v2462_v49 = vpop.f32.mrb[103].mxu1  ;;  %v10061_v47 = vpop.eup %10060  ;;  %v2764_v43 = vadd.f32 1.0, %v10059_v2  ;;  %10078 = vpow2.f32 %v2686_v9  ;;  %v2556_v8 = vsub.f32 0.0, %v12132_v16  ;;  %v3404_v7 = vmul.f32 %v12075_v53, %v2900_v56  ;;  %9205 = vmatprep.subr.bf16.mxu0 %v9532_v25 }
 0x291   : > { %v10063_v46 = vpop.eup %10062  ;;  %v2762_v15 = vadd.f32 1.0, %v10061_v47  ;;  %10080 = vpow2.f32 %v2682_v55  ;;  %v2684_v50 = vmul.f32 1.442695, %v2551_v35  ;;  %v2554_v61 = vsub.f32 0.0, %v12138_v57  ;;  %v12156_v55 = vpop.permute.xlu0 %3276  ;;  %9206 = vmatpush3.bf16.msra.mxu0 %v9532_v25 }
 0x292   : > { %v10065_v39 = vpop.eup %10064  ;;  %10082 = vrcp.f32 %v2764_v43  ;;  %v2765_v30 = vadd.f32 1.0, %v10063_v46  ;;  %9162 = vmatmul.mubr.bf16.gmra.mrb[148].mxu1 %v12116_v51  ;;  %v12151_v17 = vadd.f32 %v11921_v54, %v9100_v31  ;;  %v12154_v53 = vadd.f32 %v11921_v54, %v2462_v49 }
 0x293   : > { %10084 = vrcp.f32 %v2762_v15  ;;  %v2763_v9 = vadd.f32 1.0, %v10065_v39  ;;  %v3402_v56 = vmul.f32 %v12048_v58, %v2898_v27  ;;  %v2694_v2 = vmul.f32 1.442695, %v2556_v8  ;;  %v12159_v46 = vpop.permute.xlu1 %3281 }
 0x294   : > { %v10067_v42 = vpop.eup %10066  ;;  %10086 = vrcp.f32 %v2765_v30  ;;  %v2690_v35 = vmul.f32 1.442695, %v2554_v61  ;;  %v9103_v47 = vpop.f32.mrb[104].mxu1  ;;  %v2557_v31 = vsub.f32 0.0, %v12151_v17  ;;  %v2555_v49 = vsub.f32 0.0, %v12154_v53 }
 0x295   : > { %v10069_v43 = vpop.eup %10068  ;;  %v2901_v15 = vmul.f32 %v10067_v42, %v11990_v10  ;;  %10088 = vrcp.f32 %v2763_v9  ;;  %v2475_v39 = vpop.f32.mrb[105].mxu1  ;;  %v12166_v61 = vadd.f32 %v11921_v54, %v9103_v47 }
 0x296   : > { %v10071_v3 = vpop.eup %10070  ;;  %v2899_v58 = vmul.f32 %v10069_v43, %v12011_v1  ;;  %10090 = vpow2.f32 %v2688_v33  ;;  %v12169_v27 = vadd.f32 %v11921_v54, %v2475_v39  ;;  %v9104_v8 = vpop.f32.mrb[106].mxu1  ;;  %v2696_v42 = vmul.f32 1.442695, %v2557_v31  ;;  %3867 = vmatmul.mubr.bf16.gmra.mrb[88].mxu0 %v11844_v4 }
 0x297   : > { %v10073_v30 = vpop.eup %10072  ;;  %v3405_v10 = vmul.f32 %v12082_v59, %v2901_v15  ;;  %v2904_v9 = vmul.f32 %v10071_v3, %v12024_v62  ;;  %10092 = vpow2.f32 %v2684_v50  ;;  %v2478_v5 = vpop.f32.mrb[107].mxu1  ;;  %v2692_v47 = vmul.f32 1.442695, %v2555_v49  ;;  %3874 = vmatprep.mubr.bf16.mxu0 %v11971_v26 }
 0x298   : > { %v10075_v25 = vpop.eup %10074  ;;  %v3403_v1 = vmul.f32 %v12054_v11, %v2899_v58  ;;  %v2902_v33 = vmul.f32 %v10073_v30, %v12033_v18  ;;  %10094 = vpow2.f32 %v2694_v2  ;;  %v3287_v2 = vpop.permute.xlu0 %3286 }
 0x299   : > { %v10077_v43 = vpop.eup %10076  ;;  %v12177_v39 = vpack.c.bf16 %v3405_v10, %v3404_v7  ;;  %v3408_v59 = vmul.f32 %v12128_v23, %v2904_v9  ;;  %v2905_v50 = vmul.f32 %v10075_v25, %v12040_v28  ;;  %10096 = vpow2.f32 %v2690_v35  ;;  %v3292_v31 = vpop.permute.xlu1 %3291 }
 0x29a   : > { %v10079_v3 = vpop.eup %10078  ;;  %v12181_v62 = vpack.c.bf16 %v3403_v1, %v3402_v56  ;;  %v3406_v15 = vmul.f32 %v12099_v19, %v2902_v33  ;;  %v2903_v11 = vmul.f32 %v10077_v43, %v12046_v44  ;;  %10098 = vpow2.f32 %v2696_v42 }
 0x29b   : > { %v10081_v18 = vpop.eup %10080  ;;  %v3409_v49 = vmul.f32 %v12134_v22, %v2905_v50  ;;  %v2768_v7 = vadd.f32 1.0, %v10079_v3  ;;  %10100 = vpow2.f32 %v2692_v47  ;;  %v2560_v23 = vsub.f32 0.0, %v12166_v61 }
 0x29c   : > { %v10083_v58 = vpop.eup %10082  ;;  %v3407_v28 = vmul.f32 %v12106_v38, %v2903_v11  ;;  %v2766_v35 = vadd.f32 1.0, %v10081_v18  ;;  %9165 = vmatprep.mubr.bf16.mxu1 %v12181_v62  ;;  %v2558_v19 = vsub.f32 0.0, %v12169_v27  ;;  %v12191_v44 = vadd.f32 %v11921_v54, %v9104_v8  ;;  %v3297_v50 = vpop.permute.xlu0 %3296 }
 0x29d   : > { %v10085_v56 = vpop.eup %10084  ;;  %v12193_v30 = vpack.c.bf16 %v3409_v49, %v3408_v59  ;;  %v2908_v22 = vmul.f32 %v10083_v58, %v12052_v21  ;;  %v2702_v10 = vmul.f32 1.442695, %v2560_v23  ;;  %9166 = vmatmul.mubr.bf16.gmra.mrb[152].mxu1 %v12177_v39  ;;  %10102 = vrcp.f32 %v2768_v7  ;;  %v3302_v3 = vpop.permute.xlu1 %3301 }
 0x29e   : > { %v10087_v9 = vpop.eup %10086  ;;  %v12197_v42 = vpack.c.bf16 %v3407_v28, %v3406_v15  ;;  %v2906_v38 = vmul.f32 %v10085_v56, %v12065_v48  ;;  %v2698_v25 = vmul.f32 1.442695, %v2558_v19  ;;  %10104 = vrcp.f32 %v2766_v35  ;;  %3875 = vmatmul.mubr.bf16.gmra.mrb[92].mxu0 %v11928_v6 }
 0x29f   : > { %v10089_v1 = vpop.eup %10088  ;;  %v3412_v33 = vmul.f32 %v3287_v2, %v2908_v22  ;;  %v2909_v8 = vmul.f32 %v10087_v9, %v12073_v13  ;;  %10106 = vpow2.f32 %v2702_v10  ;;  %v2561_v43 = vsub.f32 0.0, %v12191_v44  ;;  %3882 = vmatprep.mubr.bf16.mxu0 %v11967_v29 }
 0x2a0   : > { %v10091_v47 = vpop.eup %10090  ;;  %v2907_v21 = vmul.f32 %v10089_v1, %v12080_v32  ;;  %v12205_v59 = vadd.f32 %v11921_v54, %v2478_v5  ;;  %9169 = vmatprep.mubr.bf16.mxu1 %v12197_v42  ;;  %v3410_v13 = vmul.f32 %v12156_v55, %v2906_v38  ;;  %10108 = vpow2.f32 %v2698_v25  ;;  %v3307_v22 = vpop.permute.xlu0 %3306 }
 0x2a1   : > { %v10093_v48 = vpop.eup %10092  ;;  %v3413_v15 = vmul.f32 %v3292_v31, %v2909_v8  ;;  %v2769_v11 = vadd.f32 1.0, %v10091_v47  ;;  %v10435_v5 = vmov 0.0   ;;  %v2704_v35 = vmul.f32 1.442695, %v2561_v43  ;;  %v3312_v10 = vpop.permute.xlu1 %3311 }
 0x2a2   : > { %v10095_v18 = vpop.eup %10094  ;;  %v3411_v32 = vmul.f32 %v12159_v46, %v2907_v21  ;;  %v2767_v2 = vadd.f32 1.0, %v10093_v48  ;;  %v2559_v49 = vsub.f32 0.0, %v12205_v59  ;;  %318 = vst [vmem:[#allocation3 + $0x28] sm:$0xff] %v10435_v5  ;;  %332 = vst [vmem:[#allocation3 + $0x510] sm:$0xff] %v10435_v5 }
 0x2a3   : > { %v10097_v54 = vpop.eup %10096  ;;  %v12212_v7 = vpack.c.bf16 %v3413_v15, %v3412_v33  ;;  %10110 = vrcp.f32 %v2769_v11  ;;  %v2772_v23 = vadd.f32 1.0, %v10095_v18 }
 0x2a4   : > { %v10099_v58 = vpop.eup %10098  ;;  %v12214_v28 = vpack.c.bf16 %v3411_v32, %v3410_v13  ;;  %10112 = vrcp.f32 %v2767_v2  ;;  %v2770_v55 = vadd.f32 1.0, %v10097_v54  ;;  %v2700_v56 = vmul.f32 1.442695, %v2559_v49  ;;  %v3317_v47 = vpop.permute.xlu0 %3316 }
 0x2a5   : > { %v10101_v31 = vpop.eup %10100  ;;  %10114 = vrcp.f32 %v2772_v23  ;;  %v2773_v46 = vadd.f32 1.0, %v10099_v58  ;;  %9170 = vmatmul.mubr.bf16.gmra.mrb[156].mxu1 %v12193_v30  ;;  %v3322_v21 = vpop.permute.xlu1 %3321 }
 0x2a6   : > { %10116 = vrcp.f32 %v2770_v55  ;;  %v2771_v19 = vadd.f32 1.0, %v10101_v31  ;;  %9173 = vmatprep.mubr.bf16.mxu1 %v12214_v28  ;;  %3883 = vmatmul.mubr.bf16.gmra.mrb[96].mxu0 %v11894_v0 }
 0x2a7   : > { %10118 = vrcp.f32 %v2773_v46  ;;  %v10103_v9 = vpop.eup %10102  ;;  %3890 = vmatprep.mubr.bf16.mxu0 %v12016_v52 }
 0x2a8   : > { %10120 = vrcp.f32 %v2771_v19  ;;  %v10105_v38 = vpop.eup %10104  ;;  %v2912_v33 = vmul.f32 %v10103_v9, %v12103_v41  ;;  %v3327_v46 = vpop.permute.xlu0 %3326 }
 0x2a9   : > { %10122 = vpow2.f32 %v2704_v35  ;;  %v10107_v25 = vpop.eup %10106  ;;  %v2910_v43 = vmul.f32 %v10105_v38, %v12111_v36  ;;  %v3332_v35 = vpop.permute.xlu1 %3331 }
 0x2aa   : > { %10124 = vpow2.f32 %v2700_v56  ;;  %v10109_v1 = vpop.eup %10108  ;;  %v2776_v15 = vadd.f32 1.0, %v10107_v25  ;;  %v3416_v49 = vmul.f32 %v3307_v22, %v2912_v33 }
 0x2ab   : > { %v2774_v32 = vadd.f32 1.0, %v10109_v1  ;;  %v3414_v54 = vmul.f32 %v3297_v50, %v2910_v43 }
 0x2ac   : > { %10126 = vrcp.f32 %v2776_v15  ;;  %v3337_v1 = vpop.permute.xlu0 %3336 }
 0x2ad   : > { %v10111_v8 = vpop.eup %10110  ;;  %9174 = vmatmul.mubr.bf16.gmra.mrb[160].mxu1 %v12212_v7  ;;  %10128 = vrcp.f32 %v2774_v32  ;;  %v3342_v33 = vpop.permute.xlu1 %3341 }
 0x2ae   : > { %v10113_v48 = vpop.eup %10112  ;;  %v2913_v13 = vmul.f32 %v10111_v8, %v12114_v37  ;;  %3891 = vmatmul.mubr.bf16.gmra.mrb[100].mxu0 %v11971_v26 }
 0x2af   : > { %v10115_v11 = vpop.eup %10114  ;;  %v2911_v18 = vmul.f32 %v10113_v48, %v12125_v14  ;;  %3898 = vmatprep.mubr.bf16.mxu0 %v11995_v45 }
 0x2b0   : > { %v10117_v2 = vpop.eup %10116  ;;  %v3417_v41 = vmul.f32 %v3312_v10, %v2913_v13  ;;  %v2916_v5 = vmul.f32 %v10115_v11, %v12132_v16  ;;  %v3347_v15 = vpop.permute.xlu0 %3346 }
 0x2b1   : > { %v10119_v36 = vpop.eup %10118  ;;  %v3415_v23 = vmul.f32 %v3302_v3, %v2911_v18  ;;  %v2914_v58 = vmul.f32 %v10117_v2, %v12138_v57  ;;  %v3352_v11 = vpop.permute.xlu1 %3351 }
 0x2b2   : > { %v10121_v37 = vpop.eup %10120  ;;  %v12229_v55 = vpack.c.bf16 %v3417_v41, %v3416_v49  ;;  %v2917_v14 = vmul.f32 %v10119_v36, %v12151_v17  ;;  %v3420_v22 = vmul.f32 %v3327_v46, %v2916_v5  ;;  %v13643_v36 = vld [vmem:[#allocation8_spill] sm:$0xff] }
 0x2b3   : > { %v10123_v31 = vpop.eup %10122  ;;  %v12232_v19 = vpack.c.bf16 %v3415_v23, %v3414_v54  ;;  %v2915_v16 = vmul.f32 %v10121_v37, %v12154_v53  ;;  %v3418_v10 = vmul.f32 %v3317_v47, %v2914_v58  ;;  %v9533_v53 = vld [vmem:[%s13533_s5 + $0x238] sm:$0xff]   ;;  %v13645_v23 = vld [vmem:[#allocation4_spill] sm:$0xff]  ;;  %v13646_v58 = vld [vmem:[#allocation9_spill] sm:$0xff] }
 0x2b4   : > { %v10125_v56 = vpop.eup %10124  ;;  %v3421_v50 = vmul.f32 %v3332_v35, %v2917_v14  ;;  %v2777_v3 = vadd.f32 1.0, %v10123_v31  ;;  %9207 = vmatprep.subr.bf16.mxu0 %v9533_v53  ;;  %v13644_v54 = vld [vmem:[#allocation7_spill] sm:$0xff]  ;;  %v9540_v14 = vld [vmem:[%s13533_s5 + $0x148] sm:$0xff]  }
 0x2b5   : > { %v3419_v57 = vmul.f32 %v3322_v21, %v2915_v16  ;;  %v2775_v9 = vadd.f32 1.0, %v10125_v56  ;;  %9177 = vmatprep.mubr.bf16.mxu1 %v12232_v19  ;;  %9208 = vmatpush3.bf16.msra.mxu0 %v9533_v53  ;;  %v13647_v16 = vld [vmem:[#allocation10_spill] sm:$0xff] }
 0x2b6   : > { %v12236_v38 = vpack.c.bf16 %v3421_v50, %v3420_v22  ;;  %10130 = vrcp.f32 %v2777_v3  ;;  %9178 = vmatmul.mubr.bf16.gmra.mrb[164].mxu1 %v12229_v55  ;;  %3899 = vmatmul.mubr.bf16.gmra.mrb[104].mxu0 %v11967_v29  ;;  %v10127_v25 = vpop.eup %10126 }
 0x2b7   : > { %v12239_v17 = vpack.c.bf16 %v3419_v57, %v3418_v10  ;;  %10132 = vrcp.f32 %v2775_v9  ;;  %3906 = vmatprep.mubr.bf16.mxu0 %v12061_v20  ;;  %v10129_v8 = vpop.eup %10128  ;;  %5616 = vmatprep.subr.bf16.mxu0 %v13602_v60  ;;  %v2920_v47 = vmul.f32 %v10127_v25, %v12166_v61 }
 0x2b8   : > { %v2918_v43 = vmul.f32 %v10129_v8, %v12169_v27  ;;  %v13641_v27 = vld [vmem:[#allocation6_spill] sm:$0xff] }
 0x2b9   : > { %9181 = vmatprep.mubr.bf16.mxu1 %v12239_v17  ;;  %v3424_v32 = vmul.f32 %v3347_v15, %v2920_v47  ;;  %v13648_v47 = vld [vmem:[#allocation12_spill] sm:$0xff] }
 0x2ba   : > { %v3422_v49 = vmul.f32 %v3337_v1, %v2918_v43 }
 0x2be   : > { %9182 = vmatmul.mubr.bf16.gmra.mrb[168].mxu1 %v12236_v38  ;;  %3907 = vmatmul.mubr.bf16.gmra.mrb[108].mxu0 %v12016_v52 }
 0x2bf   : > { %3914 = vmatprep.mubr.bf16.mxu0 %v12036_v34 }
 0x2c0   : > { %v10131_v21 = vpop.eup %10130 }
 0x2c1   : > { %v10133_v48 = vpop.eup %10132  ;;  %v2921_v13 = vmul.f32 %v10131_v21, %v12191_v44  ;;  %v13642_v44 = vld [vmem:[#allocation5_spill] sm:$0xff] }
 0x2c2   : > { %v2919_v18 = vmul.f32 %v10133_v48, %v12205_v59  ;;  %v9535_v59 = vld [vmem:[%s13533_s5 + $0x140] sm:$0xff]  }
 0x2c3   : > { %v3425_v2 = vmul.f32 %v3352_v11, %v2921_v13  ;;  %9281 = vmatprep.subr.bf16.mxu1 %v9535_v59 }
 0x2c4   : > { %v3423_v41 = vmul.f32 %v3342_v33, %v2919_v18 }
 0x2c5   : > { %v12255_v5 = vpack.c.bf16 %v3425_v2, %v3424_v32 }
 0x2c6   : > { %v12257_v61 = vpack.c.bf16 %v3423_v41, %v3422_v49  ;;  %3915 = vmatmul.mubr.bf16.gmra.mrb[112].mxu0 %v11995_v45  ;;  %v13649_v41 = vld [vmem:[#allocation11_spill] sm:$0xff] }
 0x2c7   : > { %3922 = vmatprep.mubr.bf16.mxu0 %v12094_v24 }
 0x2c8   : > { %9185 = vmatprep.mubr.bf16.mxu1 %v12257_v61 }
 0x2c9   : > { %9186 = vmatmul.mubr.bf16.gmra.mrb[172].mxu1 %v12255_v5 }
 0x2ca   : > { %9189 = vmatprep.mubr.bf16.mxu1 %v13602_v60 }
 0x2ce   : > { %3923 = vmatmul.mubr.bf16.gmra.mrb[116].mxu0 %v12061_v20 }
 0x2cf   : > { %3930 = vmatprep.mubr.bf16.mxu0 %v12086_v40 }
 0x2d1   : > { %9190 = vmatmul.mubr.bf16.gmra.mrb[176].mxu1 %v13602_v60 }
 0x2d2   : > { %4669 = vmatprep.mubr.bf16.mxu1 %v13641_v27 }
 0x2d6   : > { %3931 = vmatmul.mubr.bf16.gmra.mrb[120].mxu0 %v12036_v34 }
 0x2d7   : > { %3938 = vmatprep.mubr.bf16.mxu0 %v12120_v63 }
 0x2d9   : > { %4670 = vmatmul.mubr.bf16.vlgmr.msra.gmra.mrb[180].mxu1 %v13602_v60 }
 0x2da   : > { %4677 = vmatprep.mubr.bf16.mxu1 %v13642_v44  ;;  %9282 = vmatpush3.bf16.msra.mxu1 %v9535_v59 }
 0x2db   : > { %9283 = vmatprep.subr.bf16.mxu1 %v9540_v14 }
 0x2de   : > { %3939 = vmatmul.mubr.bf16.gmra.mrb[124].mxu0 %v12094_v24  ;;  %9284 = vmatpush3.bf16.msra.mxu1 %v9540_v14 }
 0x2df   : > { %3946 = vmatprep.mubr.bf16.mxu0 %v12116_v51 }
 0x2e1   : > { %4678 = vmatmul.mubr.bf16.gmra.mrb[184].mxu1 %v13602_v60 }
 0x2e2   : > { %4685 = vmatprep.mubr.bf16.mxu1 %v13643_v36 }
 0x2e6   : > { %3947 = vmatmul.mubr.bf16.gmra.mrb[128].mxu0 %v12086_v40 }
 0x2e7   : > { %3954 = vmatprep.mubr.bf16.mxu0 %v12181_v62 }
 0x2e9   : > { %4686 = vmatmul.mubr.bf16.gmra.mrb[188].mxu1 %v13641_v27 }
 0x2ea   : > { %4693 = vmatprep.mubr.bf16.mxu1 %v13644_v54 }
 0x2ee   : > { %3955 = vmatmul.mubr.bf16.gmra.mrb[132].mxu0 %v12120_v63 }
 0x2ef   : > { %3962 = vmatprep.mubr.bf16.mxu0 %v12177_v39 }
 0x2f1   : > { %4694 = vmatmul.mubr.bf16.gmra.mrb[192].mxu1 %v13642_v44 }
 0x2f2   : > { %4701 = vmatprep.mubr.bf16.mxu1 %v13645_v23 }
 0x2f6   : > { %3963 = vmatmul.mubr.bf16.gmra.mrb[136].mxu0 %v12116_v51 }
 0x2f7   : > { %3970 = vmatprep.mubr.bf16.mxu0 %v12197_v42 }
 0x2f9   : > { %4702 = vmatmul.mubr.bf16.gmra.mrb[196].mxu1 %v13643_v36 }
 0x2fa   : > { %4709 = vmatprep.mubr.bf16.mxu1 %v13646_v58 }
 0x2fe   : > { %3971 = vmatmul.mubr.bf16.gmra.mrb[140].mxu0 %v12181_v62 }
 0x2ff   : > { %3978 = vmatprep.mubr.bf16.mxu0 %v12193_v30 }
 0x301   : > { %4710 = vmatmul.mubr.bf16.gmra.mrb[200].mxu1 %v13644_v54  ;;  %v3764_v37 = vpop.f32.mrb[36].mxu0 }
 0x302   : > { %4717 = vmatprep.mubr.bf16.mxu1 %v11751_v12  ;;  %v3766_v31 = vpop.f32.mrb[37].mxu0 }
 0x303   : > { %v3767_v46 = vpop.f32.mrb[38].mxu0 }
 0x304   : > { %v3769_v35 = vpop.f32.mrb[39].mxu0 }
 0x306   : > { %3979 = vmatmul.mubr.bf16.gmra.mrb[144].mxu0 %v12177_v39 }
 0x307   : > { %3986 = vmatprep.mubr.bf16.mxu0 %v12214_v28 }
 0x309   : > { %4718 = vmatmul.mubr.bf16.gmra.mrb[204].mxu1 %v13645_v23  ;;  %v3772_v56 = vpop.f32.mrb[40].mxu0 }
 0x30a   : > { %4725 = vmatprep.mubr.bf16.mxu1 %v13647_v16  ;;  %v9123_v22 = vpop.f32.mrb[108].mxu1  ;;  %v3774_v50 = vpop.f32.mrb[41].mxu0 }
 0x30b   : > { %v4094_v3 = vadd.f32 %v9123_v22, %v3772_v56  ;;  %v4085_v10 = vpop.f32.mrb[109].mxu1  ;;  %v3775_v57 = vpop.f32.mrb[42].mxu0 }
 0x30c   : > { %v4086_v9 = vadd.f32 %v4085_v10, %v3764_v37  ;;  %v9124_v53 = vpop.f32.mrb[110].mxu1  ;;  %v3777_v25 = vpop.f32.mrb[43].mxu0  ;;  %v13650_v10 = vld [vmem:[#allocation14_spill] sm:$0xff] }
 0x30d   : > { %4374 = vst [vmem:[#allocation3 + $0x40] sm:$0xff] %v4094_v3  ;;  %v4097_v1 = vadd.f32 %v9124_v53, %v3775_v57  ;;  %v4088_v33 = vpop.f32.mrb[111].mxu1 }
 0x30e   : > { %4372 = vst [vmem:[#allocation3 + $0x30] sm:$0xff] %v4086_v9  ;;  %v4089_v8 = vadd.f32 %v4088_v33, %v3767_v46  ;;  %3987 = vmatmul.mubr.bf16.gmra.mrb[148].mxu0 %v12197_v42 }
 0x30f   : > { %4375 = vst [vmem:[#allocation3 + $0x48] sm:$0xff] %v4097_v1  ;;  %3994 = vmatprep.mubr.bf16.mxu0 %v12212_v7 }
 0x310   : > { %4373 = vst [vmem:[#allocation3 + $0x38] sm:$0xff] %v4089_v8  ;;  %v9545_v8 = vld [vmem:[%s13533_s5 + $0x150] sm:$0xff]  }
 0x311   : > { %4726 = vmatmul.mubr.bf16.gmra.mrb[208].mxu1 %v13646_v58  ;;  %v3780_v21 = vpop.f32.mrb[44].mxu0  ;;  %9285 = vmatprep.subr.bf16.mxu1 %v9545_v8 }
 0x312   : > { %4733 = vmatprep.mubr.bf16.mxu1 %v13648_v47  ;;  %v3782_v43 = vpop.f32.mrb[45].mxu0  ;;  %9286 = vmatpush3.bf16.msra.mxu1 %v9545_v8 }
 0x313   : > { %v9127_v48 = vpop.f32.mrb[112].mxu1  ;;  %v3783_v13 = vpop.f32.mrb[46].mxu0 }
 0x314   : > { %v4101_v15 = vpop.f32.mrb[113].mxu1  ;;  %v3785_v11 = vpop.f32.mrb[47].mxu0 }
 0x315   : > { %v4102_v18 = vadd.f32 %v4101_v15, %v3780_v21  ;;  %v9128_v32 = vpop.f32.mrb[114].mxu1 }
 0x316   : > { %v4104_v2 = vpop.f32.mrb[115].mxu1  ;;  %3995 = vmatmul.mubr.bf16.gmra.mrb[152].mxu0 %v12193_v30 }
 0x317   : > { %4376 = vst [vmem:[#allocation3 + $0x50] sm:$0xff] %v4102_v18  ;;  %v4105_v49 = vadd.f32 %v4104_v2, %v3783_v13  ;;  %4002 = vmatprep.mubr.bf16.mxu0 %v12232_v19 }
 0x319   : > { %4734 = vmatmul.mubr.bf16.gmra.mrb[212].mxu1 %v11751_v12  ;;  %4377 = vst [vmem:[#allocation3 + $0x58] sm:$0xff] %v4105_v49  ;;  %v3788_v59 = vpop.f32.mrb[48].mxu0 }
 0x31a   : > { %4741 = vmatprep.mubr.bf16.mxu1 %v13649_v41  ;;  %v4110_v37 = vadd.f32 %v9127_v48, %v3788_v59  ;;  %v3790_v14 = vpop.f32.mrb[49].mxu0 }
 0x31b   : > { %v9131_v31 = vpop.f32.mrb[116].mxu1  ;;  %v3791_v46 = vpop.f32.mrb[50].mxu0 }
 0x31c   : > { %4378 = vst [vmem:[#allocation3 + $0x60] sm:$0xff] %v4110_v37  ;;  %v4117_v35 = vpop.f32.mrb[117].mxu1  ;;  %v4113_v56 = vadd.f32 %v9128_v32, %v3791_v46  ;;  %v3793_v22 = vpop.f32.mrb[51].mxu0 }
 0x31d   : > { %v9132_v50 = vpop.f32.mrb[118].mxu1 }
 0x31e   : > { %4379 = vst [vmem:[#allocation3 + $0x68] sm:$0xff] %v4113_v56  ;;  %v4120_v3 = vpop.f32.mrb[119].mxu1  ;;  %4003 = vmatmul.mubr.bf16.gmra.mrb[156].mxu0 %v12214_v28 }
 0x31f   : > { %4010 = vmatprep.mubr.bf16.mxu0 %v12229_v55 }
 0x321   : > { %4742 = vmatmul.mubr.bf16.gmra.mrb[216].mxu1 %v13647_v16  ;;  %v3796_v57 = vpop.f32.mrb[52].mxu0 }
 0x322   : > { %4749 = vmatprep.mubr.bf16.mxu1 %v13650_v10  ;;  %v4118_v9 = vadd.f32 %v4117_v35, %v3796_v57  ;;  %v3798_v53 = vpop.f32.mrb[53].mxu0 }
 0x323   : > { %v3799_v25 = vpop.f32.mrb[54].mxu0 }
 0x324   : > { %4380 = vst [vmem:[#allocation3 + $0x70] sm:$0xff] %v4118_v9  ;;  %v4121_v1 = vadd.f32 %v4120_v3, %v3799_v25  ;;  %v3801_v33 = vpop.f32.mrb[55].mxu0 }
 0x326   : > { %4381 = vst [vmem:[#allocation3 + $0x78] sm:$0xff] %v4121_v1  ;;  %4011 = vmatmul.mubr.bf16.gmra.mrb[160].mxu0 %v12212_v7 }
 0x327   : > { %4018 = vmatprep.mubr.bf16.mxu0 %v12239_v17 }
 0x329   : > { %4750 = vmatmul.mubr.bf16.gmra.mrb[220].mxu1 %v13648_v47  ;;  %v9135_v21 = vpop.f32.mrb[120].mxu1  ;;  %v3804_v43 = vpop.f32.mrb[56].mxu0 }
 0x32a   : > { %4757 = vmatprep.mubr.bf16.mxu1 %v11844_v4  ;;  %v4133_v48 = vpop.f32.mrb[121].mxu1  ;;  %v4126_v13 = vadd.f32 %v9131_v31, %v3804_v43  ;;  %v3806_v15 = vpop.f32.mrb[57].mxu0 }
 0x32b   : > { %v9136_v11 = vpop.f32.mrb[122].mxu1  ;;  %v3807_v18 = vpop.f32.mrb[58].mxu0 }
 0x32c   : > { %v4136_v32 = vpop.f32.mrb[123].mxu1  ;;  %4382 = vst [vmem:[#allocation3 + $0x80] sm:$0xff] %v4126_v13  ;;  %v4129_v2 = vadd.f32 %v9132_v50, %v3807_v18  ;;  %v3809_v49 = vpop.f32.mrb[59].mxu0 }
 0x32e   : > { %4383 = vst [vmem:[#allocation3 + $0x88] sm:$0xff] %v4129_v2  ;;  %4019 = vmatmul.mubr.bf16.gmra.mrb[164].mxu0 %v12232_v19 }
 0x32f   : > { %4026 = vmatprep.mubr.bf16.mxu0 %v12236_v38 }
 0x331   : > { %4758 = vmatmul.mubr.bf16.gmra.mrb[224].mxu1 %v13649_v41  ;;  %v3812_v37 = vpop.f32.mrb[60].mxu0 }
 0x332   : > { %4765 = vmatprep.mubr.bf16.mxu1 %v11928_v6  ;;  %v9139_v59 = vpop.f32.mrb[124].mxu1  ;;  %v4134_v31 = vadd.f32 %v4133_v48, %v3812_v37  ;;  %v3814_v46 = vpop.f32.mrb[61].mxu0 }
 0x333   : > { %v4149_v14 = vpop.f32.mrb[125].mxu1  ;;  %v3815_v56 = vpop.f32.mrb[62].mxu0 }
 0x334   : > { %v9140_v35 = vpop.f32.mrb[126].mxu1  ;;  %4384 = vst [vmem:[#allocation3 + $0x90] sm:$0xff] %v4134_v31  ;;  %v4137_v50 = vadd.f32 %v4136_v32, %v3815_v56  ;;  %v3817_v3 = vpop.f32.mrb[63].mxu0 }
 0x335   : > { %v4152_v22 = vpop.f32.mrb[127].mxu1 }
 0x336   : > { %4385 = vst [vmem:[#allocation3 + $0x98] sm:$0xff] %v4137_v50  ;;  %4027 = vmatmul.mubr.bf16.gmra.mrb[168].mxu0 %v12229_v55 }
 0x337   : > { %4034 = vmatprep.mubr.bf16.mxu0 %v12257_v61 }
 0x339   : > { %4766 = vmatmul.mubr.bf16.gmra.mrb[228].mxu1 %v13650_v10  ;;  %v3820_v57 = vpop.f32.mrb[64].mxu0 }
 0x33a   : > { %4773 = vmatprep.mubr.bf16.mxu1 %v11894_v0  ;;  %v4142_v53 = vadd.f32 %v9135_v21, %v3820_v57  ;;  %v3822_v25 = vpop.f32.mrb[65].mxu0  ;;  %v9534_v57 = vld [vmem:[%s13533_s5 + $0xc0] sm:$0xff]  }
 0x33b   : > { %v12329_v9 = vpop.f32.mrb[128].mxu1  ;;  %v3823_v33 = vpop.f32.mrb[66].mxu0 }
 0x33c   : > { %v4165_v1 = vpop.f32.mrb[129].mxu1  ;;  %4386 = vst [vmem:[#allocation3 + $0xa0] sm:$0xff] %v4142_v53  ;;  %v4145_v43 = vadd.f32 %v9136_v11, %v3823_v33  ;;  %v3825_v48 = vpop.f32.mrb[67].mxu0 }
 0x33d   : > { %v12331_v8 = vpop.f32.mrb[130].mxu1 }
 0x33e   : > { %v4168_v13 = vpop.f32.mrb[131].mxu1  ;;  %4387 = vst [vmem:[#allocation3 + $0xa8] sm:$0xff] %v4145_v43  ;;  %4035 = vmatmul.mubr.bf16.gmra.mrb[172].mxu0 %v12239_v17  ;;  %v9550_v43 = vld [vmem:[%s13533_s5 + $0x158] sm:$0xff]  }
 0x33f   : > { %4042 = vmatprep.mubr.bf16.mxu0 %v12255_v5  ;;  %9287 = vmatprep.subr.bf16.mxu1 %v9550_v43 }
 0x340   : > { %9288 = vmatpush3.bf16.msra.mxu1 %v9550_v43 }
 0x341   : > { %4774 = vmatmul.mubr.bf16.gmra.mrb[232].mxu1 %v11844_v4  ;;  %v3828_v15 = vpop.f32.mrb[68].mxu0 }
 0x342   : > { %4781 = vmatprep.mubr.bf16.mxu1 %v11971_v26  ;;  %v4150_v21 = vadd.f32 %v4149_v14, %v3828_v15  ;;  %v3830_v18 = vpop.f32.mrb[69].mxu0 }
 0x343   : > { %v3831_v2 = vpop.f32.mrb[70].mxu0 }
 0x344   : > { %v12337_v32 = vpop.f32.mrb[132].mxu1  ;;  %4388 = vst [vmem:[#allocation3 + $0xb0] sm:$0xff] %v4150_v21  ;;  %v4153_v11 = vadd.f32 %v4152_v22, %v3831_v2  ;;  %v3833_v37 = vpop.f32.mrb[71].mxu0 }
 0x345   : > { %v12339_v49 = vpop.f32.mrb[133].mxu1 }
 0x346   : > { %v12341_v31 = vpop.f32.mrb[134].mxu1  ;;  %4389 = vst [vmem:[#allocation3 + $0xb8] sm:$0xff] %v4153_v11  ;;  %4043 = vmatmul.mubr.bf16.gmra.mrb[176].mxu0 %v12236_v38  ;;  %v9537_v11 = vld [vmem:[%s13533_s5 + $0xd0] sm:$0xff]  }
 0x347   : > { %v12343_v46 = vpop.f32.mrb[135].mxu1  ;;  %9209 = vmatprep.mubr.bf16.mxu0 %v13643_v36 }
 0x349   : > { %4782 = vmatmul.mubr.bf16.gmra.mrb[236].mxu1 %v11928_v6  ;;  %v3836_v14 = vpop.f32.mrb[72].mxu0 }
 0x34a   : > { %4789 = vmatprep.mubr.bf16.mxu1 %v11967_v29  ;;  %v4158_v56 = vadd.f32 %v9139_v59, %v3836_v14  ;;  %v3838_v50 = vpop.f32.mrb[73].mxu0 }
 0x34b   : > { %v3839_v22 = vpop.f32.mrb[74].mxu0 }
 0x34c   : > { %v12349_v3 = vpop.f32.mrb[136].mxu1  ;;  %4390 = vst [vmem:[#allocation3 + $0xc0] sm:$0xff] %v4158_v56  ;;  %v4161_v25 = vadd.f32 %v9140_v35, %v3839_v22  ;;  %v3841_v33 = vpop.f32.mrb[75].mxu0  ;;  %v9536_v35 = vld [vmem:[%s13533_s5 + $0xc8] sm:$0xff]  }
 0x34d   : > { %v12354_v53 = vpop.f32.mrb[137].mxu1 }
 0x34e   : > { %v12359_v48 = vpop.f32.mrb[138].mxu1  ;;  %4391 = vst [vmem:[#allocation3 + $0xc8] sm:$0xff] %v4161_v25  ;;  %9210 = vmatmul.mubr.bf16.vlgmr.msra.gmra.mrb[180].mxu0 %v13644_v54 }
 0x34f   : > { %v12361_v59 = vpop.f32.mrb[139].mxu1  ;;  %5617 = vmatpush1.bf16.msra.mxu0 %v9534_v57  ;;  %9213 = vmatprep.mubr.bf16.mxu0 %v13645_v23  ;;  %v9538_v57 = vld [vmem:[%s13533_s5 + $0xd8] sm:$0xff]  }
 0x350   : > { %5618 = vmatprep.subr.bf16.mxu0 %v13602_v60 }
 0x351   : > { %4790 = vmatmul.mubr.bf16.gmra.mrb[240].mxu1 %v11894_v0  ;;  %v3844_v15 = vpop.f32.mrb[76].mxu0 }
 0x352   : > { %4797 = vmatprep.mubr.bf16.mxu1 %v12016_v52  ;;  %v4166_v21 = vadd.f32 %v4165_v1, %v3844_v15  ;;  %v3846_v18 = vpop.f32.mrb[77].mxu0 }
 0x353   : > { %v3847_v2 = vpop.f32.mrb[78].mxu0  ;;  %5619 = vmatpush1.bf16.msra.mxu0 %v9536_v35  ;;  %v9539_v35 = vld [vmem:[%s13533_s5 + $0xe0] sm:$0xff]  }
 0x354   : > { %4392 = vst [vmem:[#allocation3 + $0xd0] sm:$0xff] %v4166_v21  ;;  %v4169_v14 = vadd.f32 %v4168_v13, %v3847_v2  ;;  %v3849_v56 = vpop.f32.mrb[79].mxu0  ;;  %5620 = vmatprep.subr.bf16.mxu0 %v13602_v60 }
 0x355   : > { %v12374_v37 = vpop.f32.mrb[140].mxu1 }
 0x356   : > { %v12377_v50 = vpop.f32.mrb[141].mxu1  ;;  %4393 = vst [vmem:[#allocation3 + $0xd8] sm:$0xff] %v4169_v14  ;;  %9214 = vmatmul.mubr.bf16.gmra.mrb[184].mxu0 %v13646_v58  ;;  %v9541_v14 = vld [vmem:[%s13533_s5 + $0xe8] sm:$0xff]  }
 0x357   : > { %v12379_v22 = vpop.f32.mrb[142].mxu1  ;;  %9217 = vmatprep.mubr.bf16.mxu0 %v11751_v12  ;;  %5621 = vmatpush1.bf16.msra.mxu0 %v9537_v11 }
 0x358   : > { %v12382_v1 = vpop.f32.mrb[143].mxu1  ;;  %5622 = vmatprep.subr.bf16.mxu0 %v13602_v60 }
 0x359   : > { %4798 = vmatmul.mubr.bf16.gmra.mrb[244].mxu1 %v11971_v26  ;;  %v3852_v13 = vpop.f32.mrb[80].mxu0 }
 0x35a   : > { %4805 = vmatprep.mubr.bf16.mxu1 %v11995_v45  ;;  %v4174_v25 = vadd.f32 %v12329_v9, %v3852_v13  ;;  %v3854_v33 = vpop.f32.mrb[81].mxu0 }
 0x35b   : > { %v3855_v43 = vpop.f32.mrb[82].mxu0  ;;  %5623 = vmatpush1.bf16.msra.mxu0 %v9538_v57 }
 0x35c   : > { %4394 = vst [vmem:[#allocation3 + $0xe0] sm:$0xff] %v4174_v25  ;;  %v4177_v21 = vadd.f32 %v12331_v8, %v3855_v43  ;;  %v3857_v18 = vpop.f32.mrb[83].mxu0  ;;  %5624 = vmatprep.subr.bf16.mxu0 %v13602_v60  ;;  %v9542_v25 = vld [vmem:[%s13533_s5 + $0xf0] sm:$0xff]  }
 0x35d   : > { %v12395_v15 = vpop.f32.mrb[144].mxu1 }
 0x35e   : > { %v12399_v2 = vpop.f32.mrb[145].mxu1  ;;  %4395 = vst [vmem:[#allocation3 + $0xe8] sm:$0xff] %v4177_v21  ;;  %9218 = vmatmul.mubr.bf16.gmra.mrb[188].mxu0 %v13647_v16 }
 0x35f   : > { %v12401_v11 = vpop.f32.mrb[146].mxu1  ;;  %9221 = vmatprep.mubr.bf16.mxu0 %v13648_v47  ;;  %5625 = vmatpush1.bf16.msra.mxu0 %v9539_v35 }
 0x360   : > { %v12404_v9 = vpop.f32.mrb[147].mxu1  ;;  %5626 = vmatprep.subr.bf16.mxu0 %v13602_v60 }
 0x361   : > { %4806 = vmatmul.mubr.bf16.gmra.mrb[248].mxu1 %v11967_v29  ;;  %v3860_v8 = vpop.f32.mrb[84].mxu0 }
 0x362   : > { %4813 = vmatprep.mubr.bf16.mxu1 %v12061_v20  ;;  %v4182_v56 = vadd.f32 %v12339_v49, %v3860_v8  ;;  %v3862_v57 = vpop.f32.mrb[85].mxu0  ;;  %v9554_v49 = vld [vmem:[%s13533_s5 + $0x160] sm:$0xff]  }
 0x363   : > { %v3863_v13 = vpop.f32.mrb[86].mxu0  ;;  %5627 = vmatpush1.bf16.msra.mxu0 %v9541_v14  ;;  %9289 = vmatprep.subr.bf16.mxu1 %v9554_v49 }
 0x364   : > { %4396 = vst [vmem:[#allocation3 + $0xf0] sm:$0xff] %v4182_v56  ;;  %v4185_v43 = vadd.f32 %v12343_v46, %v3863_v13  ;;  %v3865_v35 = vpop.f32.mrb[87].mxu0  ;;  %5628 = vmatprep.subr.bf16.mxu0 %v13602_v60  ;;  %v9543_v46 = vld [vmem:[%s13533_s5 + $0xf8] sm:$0xff]   ;;  %9290 = vmatpush3.bf16.msra.mxu1 %v9554_v49  ;;  %v9555_v13 = vld [vmem:[%s13533_s5 + $0x168] sm:$0xff]  }
 0x365   : > { %v12417_v33 = vpop.f32.mrb[148].mxu1  ;;  %9291 = vmatprep.subr.bf16.mxu1 %v9555_v13 }
 0x366   : > { %v12421_v21 = vpop.f32.mrb[149].mxu1  ;;  %4397 = vst [vmem:[#allocation3 + $0xf8] sm:$0xff] %v4185_v43  ;;  %9222 = vmatmul.mubr.bf16.gmra.mrb[192].mxu0 %v13649_v41  ;;  %v9544_v43 = vld [vmem:[%s13533_s5 + $0x100] sm:$0xff]  }
 0x367   : > { %v12423_v18 = vpop.f32.mrb[150].mxu1  ;;  %9225 = vmatprep.mubr.bf16.mxu0 %v13650_v10  ;;  %5629 = vmatpush1.bf16.msra.mxu0 %v9542_v25 }
 0x368   : > { %v12429_v14 = vpop.f32.mrb[151].mxu1  ;;  %5630 = vmatprep.subr.bf16.mxu0 %v13602_v60  ;;  %9292 = vmatpush3.bf16.msra.mxu1 %v9555_v13 }
 0x369   : > { %4814 = vmatmul.mubr.bf16.gmra.mrb[252].mxu1 %v12016_v52  ;;  %v3868_v8 = vpop.f32.mrb[88].mxu0 }
 0x36a   : > { %4821 = vmatprep.mubr.bf16.mxu1 %v12036_v34  ;;  %v4190_v56 = vadd.f32 %v12337_v32, %v3868_v8  ;;  %v3870_v57 = vpop.f32.mrb[89].mxu0  ;;  %v9556_v32 = vld [vmem:[%s13533_s5 + $0x170] sm:$0xff]  }
 0x36b   : > { %v3871_v25 = vpop.f32.mrb[90].mxu0  ;;  %5631 = vmatpush1.bf16.msra.mxu0 %v9543_v46  ;;  %9293 = vmatprep.subr.bf16.mxu1 %v9556_v32 }
 0x36c   : > { %4398 = vst [vmem:[#allocation3 + $0x100] sm:$0xff] %v4190_v56  ;;  %v4193_v35 = vadd.f32 %v12341_v31, %v3871_v25  ;;  %v3873_v10 = vpop.f32.mrb[91].mxu0  ;;  %5632 = vmatprep.subr.bf16.mxu0 %v13602_v60  ;;  %9294 = vmatpush3.bf16.msra.mxu1 %v9556_v32  ;;  %v9557_v25 = vld [vmem:[%s13533_s5 + $0x178] sm:$0xff]  }
 0x36d   : > { %v9546_v10 = vld [vmem:[%s13533_s5 + $0x108] sm:$0xff]   ;;  %9295 = vmatprep.subr.bf16.mxu1 %v9557_v25  ;;  %v9548_v32 = vld [vmem:[%s13533_s5 + $0x118] sm:$0xff]  }
 0x36e   : > { %4399 = vst [vmem:[#allocation3 + $0x108] sm:$0xff] %v4193_v35  ;;  %9226 = vmatmul.mubr.bf16.gmra.mrb[196].mxu0 %v11844_v4  ;;  %v9547_v35 = vld [vmem:[%s13533_s5 + $0x110] sm:$0xff]  }
 0x36f   : > { %9229 = vmatprep.mubr.bf16.mxu0 %v11928_v6  ;;  %5633 = vmatpush1.bf16.msra.mxu0 %v9544_v43 }
 0x370   : > { %v12451_v49 = vpop.f32.mrb[152].mxu1  ;;  %5634 = vmatprep.subr.bf16.mxu0 %v13602_v60  ;;  %9296 = vmatpush3.bf16.msra.mxu1 %v9557_v25  ;;  %v9549_v25 = vld [vmem:[%s13533_s5 + $0x120] sm:$0xff]  }
 0x371   : > { %4822 = vmatmul.mubr.bf16.gmra.mrb[0].mxu1 %v11995_v45  ;;  %v12458_v31 = vpop.f32.mrb[153].mxu1  ;;  %v3876_v8 = vpop.f32.mrb[92].mxu0 }
 0x372   : > { %4829 = vmatprep.mubr.bf16.mxu1 %v12094_v24  ;;  %v12462_v46 = vpop.f32.mrb[154].mxu1  ;;  %v4198_v57 = vadd.f32 %v12354_v53, %v3876_v8  ;;  %v3878_v13 = vpop.f32.mrb[93].mxu0 }
 0x373   : > { %v12464_v56 = vpop.f32.mrb[155].mxu1  ;;  %v3879_v43 = vpop.f32.mrb[94].mxu0  ;;  %5635 = vmatpush1.bf16.msra.mxu0 %v9546_v10 }
 0x374   : > { %4400 = vst [vmem:[#allocation3 + $0x110] sm:$0xff] %v4198_v57  ;;  %v4201_v6 = vadd.f32 %v12361_v59, %v3879_v43  ;;  %v3881_v4 = vpop.f32.mrb[95].mxu0  ;;  %5636 = vmatprep.subr.bf16.mxu0 %v13602_v60 }
 0x376   : > { %4401 = vst [vmem:[#allocation3 + $0x118] sm:$0xff] %v4201_v6  ;;  %9230 = vmatmul.mubr.bf16.gmra.mrb[200].mxu0 %v11894_v0 }
 0x377   : > { %9233 = vmatprep.mubr.bf16.mxu0 %v11971_v26  ;;  %5637 = vmatpush1.bf16.msra.mxu0 %v9547_v35 }
 0x378   : > { %v12476_v53 = vpop.f32.mrb[156].mxu1  ;;  %5638 = vmatprep.subr.bf16.mxu0 %v13602_v60 }
 0x379   : > { %4830 = vmatmul.mubr.bf16.gmra.mrb[4].mxu1 %v12061_v20  ;;  %v12483_v59 = vpop.f32.mrb[157].mxu1  ;;  %v3884_v6 = vpop.f32.mrb[96].mxu0 }
 0x37a   : > { %4837 = vmatprep.mubr.bf16.mxu1 %v12086_v40  ;;  %v12487_v4 = vpop.f32.mrb[158].mxu1  ;;  %v4206_v8 = vadd.f32 %v12349_v3, %v3884_v6  ;;  %v3886_v57 = vpop.f32.mrb[97].mxu0  ;;  %v9551_v3 = vld [vmem:[%s13533_s5 + $0x128] sm:$0xff]  }
 0x37b   : > { %v12489_v10 = vpop.f32.mrb[159].mxu1  ;;  %v3887_v13 = vpop.f32.mrb[98].mxu0  ;;  %5639 = vmatpush1.bf16.msra.mxu0 %v9548_v32 }
 0x37c   : > { %4402 = vst [vmem:[#allocation3 + $0x120] sm:$0xff] %v4206_v8  ;;  %v4209_v43 = vadd.f32 %v12359_v48, %v3887_v13  ;;  %v3889_v35 = vpop.f32.mrb[99].mxu0  ;;  %5640 = vmatprep.subr.bf16.mxu0 %v13602_v60 }
 0x37e   : > { %4403 = vst [vmem:[#allocation3 + $0x128] sm:$0xff] %v4209_v43  ;;  %9234 = vmatmul.mubr.bf16.gmra.mrb[204].mxu0 %v11967_v29  ;;  %v9552_v43 = vld [vmem:[%s13533_s5 + $0x130] sm:$0xff]  }
 0x37f   : > { %9237 = vmatprep.mubr.bf16.mxu0 %v12016_v52  ;;  %5641 = vmatpush1.bf16.msra.mxu0 %v9549_v25 }
 0x380   : > { %v12498_v26 = vpop.f32.mrb[160].mxu1  ;;  %5642 = vmatprep.subr.bf16.mxu0 %v13602_v60 }
 0x381   : > { %4838 = vmatmul.mubr.bf16.gmra.mrb[8].mxu1 %v12036_v34  ;;  %v12505_v32 = vpop.f32.mrb[161].mxu1  ;;  %v3892_v6 = vpop.f32.mrb[100].mxu0 }
 0x382   : > { %4845 = vmatprep.mubr.bf16.mxu1 %v12120_v63  ;;  %v12509_v48 = vpop.f32.mrb[162].mxu1  ;;  %v4214_v57 = vadd.f32 %v12377_v50, %v3892_v6  ;;  %v3894_v13 = vpop.f32.mrb[101].mxu0  ;;  %v9553_v50 = vld [vmem:[%s13533_s5 + $0x138] sm:$0xff]  }
 0x383   : > { %v12511_v8 = vpop.f32.mrb[163].mxu1  ;;  %v3895_v25 = vpop.f32.mrb[102].mxu0  ;;  %5643 = vmatpush1.bf16.msra.mxu0 %v9551_v3 }
 0x384   : > { %4404 = vst [vmem:[#allocation3 + $0x130] sm:$0xff] %v4214_v57  ;;  %v4217_v35 = vadd.f32 %v12382_v1, %v3895_v25  ;;  %v3897_v52 = vpop.f32.mrb[103].mxu0  ;;  %5644 = vmatprep.subr.bf16.mxu0 %v13602_v60 }
 0x386   : > { %4405 = vst [vmem:[#allocation3 + $0x138] sm:$0xff] %v4217_v35  ;;  %9238 = vmatmul.mubr.bf16.gmra.mrb[208].mxu0 %v11995_v45 }
 0x387   : > { %9241 = vmatprep.mubr.bf16.mxu0 %v12061_v20  ;;  %5645 = vmatpush1.bf16.msra.mxu0 %v9552_v43 }
 0x388   : > { %5646 = vmatprep.subr.bf16.mxu0 %v13602_v60 }
 0x389   : > { %4846 = vmatmul.mubr.bf16.gmra.mrb[12].mxu1 %v12094_v24  ;;  %v12525_v3 = vpop.f32.mrb[164].mxu1  ;;  %v3900_v1 = vpop.f32.mrb[104].mxu0 }
 0x38a   : > { %4853 = vmatprep.mubr.bf16.mxu1 %v12116_v51  ;;  %v12529_v52 = vpop.f32.mrb[165].mxu1  ;;  %v4222_v57 = vadd.f32 %v12374_v37, %v3900_v1  ;;  %v3902_v13 = vpop.f32.mrb[105].mxu0 }
 0x38b   : > { %v12531_v6 = vpop.f32.mrb[166].mxu1  ;;  %v3903_v43 = vpop.f32.mrb[106].mxu0  ;;  %5647 = vmatpush1.bf16.msra.mxu0 %v9553_v50 }
 0x38c   : > { %v12534_v25 = vpop.f32.mrb[167].mxu1  ;;  %4406 = vst [vmem:[#allocation3 + $0x140] sm:$0xff] %v4222_v57  ;;  %v4225_v35 = vadd.f32 %v12379_v22, %v3903_v43  ;;  %v3905_v20 = vpop.f32.mrb[107].mxu0 }
 0x38e   : > { %4407 = vst [vmem:[#allocation3 + $0x148] sm:$0xff] %v4225_v35  ;;  %9242 = vmatmul.mubr.bf16.gmra.mrb[212].mxu0 %v12036_v34 }
 0x38f   : > { %9245 = vmatprep.mubr.bf16.mxu0 %v12094_v24 }
 0x391   : > { %4854 = vmatmul.mubr.bf16.gmra.mrb[16].mxu1 %v12086_v40  ;;  %v12540_v45 = vpop.f32.mrb[168].mxu1  ;;  %v3908_v1 = vpop.f32.mrb[108].mxu0 }
 0x392   : > { %4861 = vmatprep.mubr.bf16.mxu1 %v12181_v62  ;;  %v12543_v37 = vpop.f32.mrb[169].mxu1  ;;  %v4230_v50 = vadd.f32 %v12399_v2, %v3908_v1  ;;  %v3910_v22 = vpop.f32.mrb[109].mxu0 }
 0x393   : > { %v12545_v13 = vpop.f32.mrb[170].mxu1  ;;  %v3911_v57 = vpop.f32.mrb[110].mxu0 }
 0x394   : > { %v12548_v20 = vpop.f32.mrb[171].mxu1  ;;  %4408 = vst [vmem:[#allocation3 + $0x150] sm:$0xff] %v4230_v50  ;;  %v4233_v43 = vadd.f32 %v12404_v9, %v3911_v57  ;;  %v3913_v35 = vpop.f32.mrb[111].mxu0 }
 0x396   : > { %4409 = vst [vmem:[#allocation3 + $0x158] sm:$0xff] %v4233_v43  ;;  %9246 = vmatmul.mubr.bf16.gmra.mrb[216].mxu0 %v12086_v40 }
 0x397   : > { %9249 = vmatprep.mubr.bf16.mxu0 %v12120_v63 }
 0x399   : > { %4862 = vmatmul.mubr.bf16.gmra.mrb[20].mxu1 %v12120_v63  ;;  %v3916_v24 = vpop.f32.mrb[112].mxu0 }
 0x39a   : > { %4869 = vmatprep.mubr.bf16.mxu1 %v12177_v39  ;;  %v4238_v2 = vadd.f32 %v12395_v15, %v3916_v24  ;;  %v3918_v1 = vpop.f32.mrb[113].mxu0 }
 0x39b   : > { %v3919_v34 = vpop.f32.mrb[114].mxu0 }
 0x39c   : > { %v12556_v22 = vpop.f32.mrb[172].mxu1  ;;  %4410 = vst [vmem:[#allocation3 + $0x160] sm:$0xff] %v4238_v2  ;;  %v4241_v9 = vadd.f32 %v12401_v11, %v3919_v34  ;;  %v3921_v57 = vpop.f32.mrb[115].mxu0 }
 0x39d   : > { %v12558_v50 = vpop.f32.mrb[173].mxu1 }
 0x39e   : > { %v12561_v43 = vpop.f32.mrb[174].mxu1  ;;  %4411 = vst [vmem:[#allocation3 + $0x168] sm:$0xff] %v4241_v9  ;;  %9250 = vmatmul.mubr.bf16.gmra.mrb[220].mxu0 %v12116_v51 }
 0x39f   : > { %v12563_v35 = vpop.f32.mrb[175].mxu1  ;;  %9253 = vmatprep.mubr.bf16.mxu0 %v12181_v62 }
 0x3a1   : > { %4870 = vmatmul.mubr.bf16.gmra.mrb[24].mxu1 %v12116_v51  ;;  %v3924_v24 = vpop.f32.mrb[116].mxu0 }
 0x3a2   : > { %4877 = vmatprep.mubr.bf16.mxu1 %v12197_v42  ;;  %v4246_v15 = vadd.f32 %v12421_v21, %v3924_v24  ;;  %v3926_v2 = vpop.f32.mrb[117].mxu0 }
 0x3a3   : > { %v3927_v34 = vpop.f32.mrb[118].mxu0 }
 0x3a4   : > { %v12570_v1 = vpop.f32.mrb[176].mxu1  ;;  %4412 = vst [vmem:[#allocation3 + $0x170] sm:$0xff] %v4246_v15  ;;  %v4249_v9 = vadd.f32 %v12429_v14, %v3927_v34  ;;  %v3929_v57 = vpop.f32.mrb[119].mxu0 }
 0x3a5   : > { %v12572_v11 = vpop.f32.mrb[177].mxu1 }
 0x3a6   : > { %v12575_v63 = vpop.f32.mrb[178].mxu1  ;;  %4413 = vst [vmem:[#allocation3 + $0x178] sm:$0xff] %v4249_v9  ;;  %9254 = vmatmul.mubr.bf16.gmra.mrb[224].mxu0 %v12177_v39 }
 0x3a7   : > { %v12577_v40 = vpop.f32.mrb[179].mxu1  ;;  %9257 = vmatprep.mubr.bf16.mxu0 %v12197_v42 }
 0x3a9   : > { %4878 = vmatmul.mubr.bf16.gmra.mrb[28].mxu1 %v12181_v62  ;;  %v3932_v21 = vpop.f32.mrb[120].mxu0 }
 0x3aa   : > { %4885 = vmatprep.mubr.bf16.mxu1 %v12193_v30  ;;  %v4254_v24 = vadd.f32 %v12417_v33, %v3932_v21  ;;  %v3934_v15 = vpop.f32.mrb[121].mxu0 }
 0x3ab   : > { %v3935_v14 = vpop.f32.mrb[122].mxu0 }
 0x3ac   : > { %v12584_v2 = vpop.f32.mrb[180].mxu1  ;;  %4414 = vst [vmem:[#allocation3 + $0x180] sm:$0xff] %v4254_v24  ;;  %v4257_v57 = vadd.f32 %v12423_v18, %v3935_v14  ;;  %v3937_v9 = vpop.f32.mrb[123].mxu0 }
 0x3ad   : > { %v4673_v34 = vpop.f32.mrb[181].mxu1 }
 0x3ae   : > { %v12587_v51 = vpop.f32.mrb[182].mxu1  ;;  %4415 = vst [vmem:[#allocation3 + $0x188] sm:$0xff] %v4257_v57  ;;  %9258 = vmatmul.mubr.bf16.gmra.mrb[228].mxu0 %v12193_v30 }
 0x3af   : > { %v4676_v29 = vpop.f32.mrb[183].mxu1  ;;  %9261 = vmatprep.mubr.bf16.mxu0 %v12214_v28 }
 0x3b1   : > { %4886 = vmatmul.mubr.bf16.gmra.mrb[32].mxu1 %v12177_v39  ;;  %v3940_v33 = vpop.f32.mrb[124].mxu0 }
 0x3b2   : > { %4893 = vmatprep.mubr.bf16.mxu1 %v12214_v28  ;;  %v4262_v21 = vadd.f32 %v12458_v31, %v3940_v33  ;;  %v3942_v15 = vpop.f32.mrb[125].mxu0 }
 0x3b3   : > { %v3943_v18 = vpop.f32.mrb[126].mxu0 }
 0x3b4   : > { %v12594_v24 = vpop.f32.mrb[184].mxu1  ;;  %4416 = vst [vmem:[#allocation3 + $0x190] sm:$0xff] %v4262_v21  ;;  %v4265_v29 = vadd.f32 %v12464_v56, %v3943_v18  ;;  %v3945_v34 = vpop.f32.mrb[127].mxu0 }
 0x3b5   : > { %v4681_v14 = vpop.f32.mrb[185].mxu1 }
 0x3b6   : > { %v12597_v57 = vpop.f32.mrb[186].mxu1  ;;  %4417 = vst [vmem:[#allocation3 + $0x198] sm:$0xff] %v4265_v29  ;;  %9262 = vmatmul.mubr.bf16.gmra.mrb[232].mxu0 %v12212_v7 }
 0x3b7   : > { %v4684_v9 = vpop.f32.mrb[187].mxu1  ;;  %9265 = vmatprep.mubr.bf16.mxu0 %v12232_v19 }
 0x3b9   : > { %4894 = vmatmul.mubr.bf16.gmra.mrb[36].mxu1 %v12197_v42  ;;  %v3948_v31 = vpop.f32.mrb[128].mxu0 }
 0x3ba   : > { %4901 = vmatprep.mubr.bf16.mxu1 %v12212_v7  ;;  %v4270_v33 = vadd.f32 %v12451_v49, %v3948_v31  ;;  %v3950_v15 = vpop.f32.mrb[129].mxu0 }
 0x3bb   : > { %v3951_v56 = vpop.f32.mrb[130].mxu0 }
 0x3bc   : > { %v12604_v21 = vpop.f32.mrb[188].mxu1  ;;  %4418 = vst [vmem:[#allocation3 + $0x1a0] sm:$0xff] %v4270_v33  ;;  %v4273_v14 = vadd.f32 %v12462_v46, %v3951_v56  ;;  %v3953_v29 = vpop.f32.mrb[131].mxu0 }
 0x3bd   : > { %v4689_v18 = vpop.f32.mrb[189].mxu1 }
 0x3be   : > { %v12607_v34 = vpop.f32.mrb[190].mxu1  ;;  %4419 = vst [vmem:[#allocation3 + $0x1a8] sm:$0xff] %v4273_v14  ;;  %9266 = vmatmul.mubr.bf16.gmra.mrb[236].mxu0 %v12229_v55 }
 0x3bf   : > { %v4692_v9 = vpop.f32.mrb[191].mxu1  ;;  %9269 = vmatprep.mubr.bf16.mxu0 %v12239_v17 }
 0x3c1   : > { %4902 = vmatmul.mubr.bf16.gmra.mrb[40].mxu1 %v12193_v30  ;;  %v3956_v49 = vpop.f32.mrb[132].mxu0 }
 0x3c2   : > { %4909 = vmatprep.mubr.bf16.mxu1 %v12232_v19  ;;  %v4278_v31 = vadd.f32 %v12483_v59, %v3956_v49  ;;  %v3958_v15 = vpop.f32.mrb[133].mxu0 }
 0x3c3   : > { %v3959_v46 = vpop.f32.mrb[134].mxu0 }
 0x3c4   : > { %v12614_v33 = vpop.f32.mrb[192].mxu1  ;;  %4420 = vst [vmem:[#allocation3 + $0x1b0] sm:$0xff] %v4278_v31  ;;  %v4281_v18 = vadd.f32 %v12489_v10, %v3959_v46  ;;  %v3961_v14 = vpop.f32.mrb[135].mxu0 }
 0x3c5   : > { %v4697_v56 = vpop.f32.mrb[193].mxu1 }
 0x3c6   : > { %v12617_v29 = vpop.f32.mrb[194].mxu1  ;;  %4421 = vst [vmem:[#allocation3 + $0x1b8] sm:$0xff] %v4281_v18  ;;  %9270 = vmatmul.mubr.bf16.gmra.mrb[240].mxu0 %v12236_v38 }
 0x3c7   : > { %v4700_v9 = vpop.f32.mrb[195].mxu1  ;;  %9273 = vmatprep.mubr.bf16.mxu0 %v12257_v61 }
 0x3c9   : > { %4910 = vmatmul.mubr.bf16.gmra.mrb[44].mxu1 %v12214_v28  ;;  %v3964_v59 = vpop.f32.mrb[136].mxu0 }
 0x3ca   : > { %4917 = vmatprep.mubr.bf16.mxu1 %v12229_v55  ;;  %v4286_v49 = vadd.f32 %v12476_v53, %v3964_v59  ;;  %v3966_v15 = vpop.f32.mrb[137].mxu0 }
 0x3cb   : > { %v3967_v10 = vpop.f32.mrb[138].mxu0 }
 0x3cc   : > { %v12624_v31 = vpop.f32.mrb[196].mxu1  ;;  %4422 = vst [vmem:[#allocation3 + $0x1c0] sm:$0xff] %v4286_v49  ;;  %v4289_v56 = vadd.f32 %v12487_v4, %v3967_v10  ;;  %v3969_v18 = vpop.f32.mrb[139].mxu0 }
 0x3cd   : > { %v4705_v46 = vpop.f32.mrb[197].mxu1 }
 0x3ce   : > { %v12627_v14 = vpop.f32.mrb[198].mxu1  ;;  %4423 = vst [vmem:[#allocation3 + $0x1c8] sm:$0xff] %v4289_v56  ;;  %9274 = vmatmul.mubr.bf16.gmra.mrb[244].mxu0 %v12255_v5 }
 0x3cf   : > { %v4708_v9 = vpop.f32.mrb[199].mxu1  ;;  %9277 = vmatprep.mubr.bf16.mxu0 %v13602_v60 }
 0x3d1   : > { %4918 = vmatmul.mubr.bf16.gmra.mrb[48].mxu1 %v12212_v7  ;;  %v3972_v53 = vpop.f32.mrb[140].mxu0 }
 0x3d2   : > { %4925 = vmatprep.mubr.bf16.mxu1 %v12239_v17  ;;  %v4294_v59 = vadd.f32 %v12505_v32, %v3972_v53  ;;  %v3974_v15 = vpop.f32.mrb[141].mxu0 }
 0x3d3   : > { %v3975_v4 = vpop.f32.mrb[142].mxu0 }
 0x3d4   : > { %v12634_v49 = vpop.f32.mrb[200].mxu1  ;;  %4424 = vst [vmem:[#allocation3 + $0x1d0] sm:$0xff] %v4294_v59  ;;  %v4297_v46 = vadd.f32 %v12511_v8, %v3975_v4  ;;  %v3977_v56 = vpop.f32.mrb[143].mxu0 }
 0x3d5   : > { %v4713_v10 = vpop.f32.mrb[201].mxu1 }
 0x3d6   : > { %v12637_v18 = vpop.f32.mrb[202].mxu1  ;;  %4425 = vst [vmem:[#allocation3 + $0x1d8] sm:$0xff] %v4297_v46  ;;  %9278 = vmatmul.mubr.bf16.gmra.mrb[248].mxu0 %v13602_v60 }
 0x3d7   : > { %v4716_v9 = vpop.f32.mrb[203].mxu1  ;;  %5648 = vmatprep.mubr.bf16.mxu0 %v13641_v27 }
 0x3d9   : > { %4926 = vmatmul.mubr.bf16.gmra.mrb[52].mxu1 %v12232_v19  ;;  %v3980_v32 = vpop.f32.mrb[144].mxu0 }
 0x3da   : > { %4933 = vmatprep.mubr.bf16.mxu1 %v12236_v38  ;;  %v4302_v53 = vadd.f32 %v12498_v26, %v3980_v32  ;;  %v3982_v15 = vpop.f32.mrb[145].mxu0 }
 0x3db   : > { %v3983_v8 = vpop.f32.mrb[146].mxu0 }
 0x3dc   : > { %v12644_v59 = vpop.f32.mrb[204].mxu1  ;;  %4426 = vst [vmem:[#allocation3 + $0x1e0] sm:$0xff] %v4302_v53  ;;  %v4305_v10 = vadd.f32 %v12509_v48, %v3983_v8  ;;  %v3985_v46 = vpop.f32.mrb[147].mxu0 }
 0x3dd   : > { %v4721_v4 = vpop.f32.mrb[205].mxu1 }
 0x3de   : > { %v12647_v56 = vpop.f32.mrb[206].mxu1  ;;  %4427 = vst [vmem:[#allocation3 + $0x1e8] sm:$0xff] %v4305_v10  ;;  %5649 = vmatmul.mubr.bf16.vlgmr.msra.gmra.mrb[252].mxu0 %v13602_v60 }
 0x3df   : > { %v4724_v9 = vpop.f32.mrb[207].mxu1  ;;  %5656 = vmatprep.mubr.bf16.mxu0 %v13642_v44 }
 0x3e1   : > { %4934 = vmatmul.mubr.bf16.gmra.mrb[56].mxu1 %v12229_v55  ;;  %v3988_v26 = vpop.f32.mrb[148].mxu0 }
 0x3e2   : > { %4941 = vmatprep.mubr.bf16.mxu1 %v12257_v61  ;;  %v4310_v32 = vadd.f32 %v12529_v52, %v3988_v26  ;;  %v3990_v15 = vpop.f32.mrb[149].mxu0 }
 0x3e3   : > { %v3991_v48 = vpop.f32.mrb[150].mxu0 }
 0x3e4   : > { %v12654_v53 = vpop.f32.mrb[208].mxu1  ;;  %4428 = vst [vmem:[#allocation3 + $0x1f0] sm:$0xff] %v4310_v32  ;;  %v4313_v4 = vadd.f32 %v12534_v25, %v3991_v48  ;;  %v3993_v10 = vpop.f32.mrb[151].mxu0 }
 0x3e5   : > { %v4729_v8 = vpop.f32.mrb[209].mxu1 }
 0x3e6   : > { %v12657_v46 = vpop.f32.mrb[210].mxu1  ;;  %4429 = vst [vmem:[#allocation3 + $0x1f8] sm:$0xff] %v4313_v4  ;;  %5657 = vmatmul.mubr.bf16.gmra.mrb[0].mxu0 %v13602_v60 }
 0x3e7   : > { %v4732_v9 = vpop.f32.mrb[211].mxu1  ;;  %5664 = vmatprep.mubr.bf16.mxu0 %v13643_v36 }
 0x3e9   : > { %4942 = vmatmul.mubr.bf16.gmra.mrb[60].mxu1 %v12239_v17  ;;  %v3996_v52 = vpop.f32.mrb[152].mxu0 }
 0x3ea   : > { %4949 = vmatprep.mubr.bf16.mxu1 %v12255_v5  ;;  %v4318_v26 = vadd.f32 %v12525_v3, %v3996_v52  ;;  %v3998_v15 = vpop.f32.mrb[153].mxu0 }
 0x3eb   : > { %v3999_v25 = vpop.f32.mrb[154].mxu0 }
 0x3ec   : > { %v12664_v32 = vpop.f32.mrb[212].mxu1  ;;  %4430 = vst [vmem:[#allocation3 + $0x200] sm:$0xff] %v4318_v26  ;;  %v4321_v8 = vadd.f32 %v12531_v6, %v3999_v25  ;;  %v4001_v4 = vpop.f32.mrb[155].mxu0 }
 0x3ed   : > { %v4737_v48 = vpop.f32.mrb[213].mxu1 }
 0x3ee   : > { %v12667_v10 = vpop.f32.mrb[214].mxu1  ;;  %4431 = vst [vmem:[#allocation3 + $0x208] sm:$0xff] %v4321_v8  ;;  %5665 = vmatmul.mubr.bf16.gmra.mrb[4].mxu0 %v13641_v27 }
 0x3ef   : > { %v4740_v9 = vpop.f32.mrb[215].mxu1  ;;  %5672 = vmatprep.mubr.bf16.mxu0 %v13644_v54 }
 0x3f1   : > { %4950 = vmatmul.mubr.bf16.gmra.mrb[64].mxu1 %v12236_v38  ;;  %v4004_v3 = vpop.f32.mrb[156].mxu0 }
 0x3f2   : > { %9297 = vmatprep.mubr.bf16.mxu1 %v13643_v36  ;;  %v4326_v52 = vadd.f32 %v12543_v37, %v4004_v3  ;;  %v4006_v15 = vpop.f32.mrb[157].mxu0 }
 0x3f3   : > { %v4007_v6 = vpop.f32.mrb[158].mxu0 }
 0x3f4   : > { %v12674_v26 = vpop.f32.mrb[216].mxu1  ;;  %4432 = vst [vmem:[#allocation3 + $0x210] sm:$0xff] %v4326_v52  ;;  %v4329_v48 = vadd.f32 %v12548_v20, %v4007_v6  ;;  %v4009_v8 = vpop.f32.mrb[159].mxu0 }
 0x3f5   : > { %v4745_v25 = vpop.f32.mrb[217].mxu1 }
 0x3f6   : > { %v12677_v4 = vpop.f32.mrb[218].mxu1  ;;  %4433 = vst [vmem:[#allocation3 + $0x218] sm:$0xff] %v4329_v48  ;;  %5673 = vmatmul.mubr.bf16.gmra.mrb[8].mxu0 %v13642_v44 }
 0x3f7   : > { %v4748_v27 = vpop.f32.mrb[219].mxu1  ;;  %5680 = vmatprep.mubr.bf16.mxu0 %v13645_v23 }
 0x3f9   : > { %9298 = vmatmul.mubr.bf16.vlgmr.msra.gmra.mrb[68].mxu1 %v13644_v54  ;;  %v4012_v37 = vpop.f32.mrb[160].mxu0 }
 0x3fa   : > { %9301 = vmatprep.mubr.bf16.mxu1 %v13645_v23  ;;  %v4334_v9 = vadd.f32 %v12540_v45, %v4012_v37  ;;  %v4014_v3 = vpop.f32.mrb[161].mxu0 }
 0x3fb   : > { %v4015_v20 = vpop.f32.mrb[162].mxu0 }
 0x3fc   : > { %v12684_v52 = vpop.f32.mrb[220].mxu1  ;;  %4434 = vst [vmem:[#allocation3 + $0x220] sm:$0xff] %v4334_v9  ;;  %v4337_v6 = vadd.f32 %v12545_v13, %v4015_v20  ;;  %v4017_v25 = vpop.f32.mrb[163].mxu0 }
 0x3fd   : > { %v4753_v15 = vpop.f32.mrb[221].mxu1 }
 0x3fe   : > { %v12687_v48 = vpop.f32.mrb[222].mxu1  ;;  %4435 = vst [vmem:[#allocation3 + $0x228] sm:$0xff] %v4337_v6  ;;  %5681 = vmatmul.mubr.bf16.gmra.mrb[12].mxu0 %v13643_v36 }
 0x3ff   : > { %v4756_v44 = vpop.f32.mrb[223].mxu1  ;;  %5688 = vmatprep.mubr.bf16.mxu0 %v13646_v58 }
 0x401   : > { %9302 = vmatmul.mubr.bf16.gmra.mrb[72].mxu1 %v13646_v58  ;;  %v4020_v45 = vpop.f32.mrb[164].mxu0 }
 0x402   : > { %9305 = vmatprep.mubr.bf16.mxu1 %v11751_v12  ;;  %v4342_v8 = vadd.f32 %v12558_v50, %v4020_v45  ;;  %v4022_v27 = vpop.f32.mrb[165].mxu0 }
 0x403   : > { %v4023_v13 = vpop.f32.mrb[166].mxu0 }
 0x404   : > { %v12694_v37 = vpop.f32.mrb[224].mxu1  ;;  %4436 = vst [vmem:[#allocation3 + $0x230] sm:$0xff] %v4342_v8  ;;  %v4345_v3 = vadd.f32 %v12563_v35, %v4023_v13  ;;  %v4025_v20 = vpop.f32.mrb[167].mxu0 }
 0x405   : > { %v4761_v9 = vpop.f32.mrb[225].mxu1 }
 0x406   : > { %v12697_v15 = vpop.f32.mrb[226].mxu1  ;;  %4437 = vst [vmem:[#allocation3 + $0x238] sm:$0xff] %v4345_v3  ;;  %5689 = vmatmul.mubr.bf16.gmra.mrb[16].mxu0 %v13644_v54 }
 0x407   : > { %v4764_v36 = vpop.f32.mrb[227].mxu1  ;;  %5696 = vmatprep.mubr.bf16.mxu0 %v11751_v12 }
 0x409   : > { %9306 = vmatmul.mubr.bf16.gmra.mrb[76].mxu1 %v13647_v16  ;;  %v4028_v50 = vpop.f32.mrb[168].mxu0 }
 0x40a   : > { %9309 = vmatprep.mubr.bf16.mxu1 %v13648_v47  ;;  %v4350_v6 = vadd.f32 %v12556_v22, %v4028_v50  ;;  %v4030_v25 = vpop.f32.mrb[169].mxu0  ;;  %v13651_v22 = vld [vmem:[#allocation14_spill] sm:$0xff] }
 0x40b   : > { %v4031_v35 = vpop.f32.mrb[170].mxu0 }
 0x40c   : > { %v12704_v44 = vpop.f32.mrb[228].mxu1  ;;  %4438 = vst [vmem:[#allocation3 + $0x240] sm:$0xff] %v4350_v6  ;;  %v4353_v8 = vadd.f32 %v12561_v43, %v4031_v35  ;;  %v4033_v27 = vpop.f32.mrb[171].mxu0 }
 0x40d   : > { %v4769_v45 = vpop.f32.mrb[229].mxu1 }
 0x40e   : > { %v12707_v13 = vpop.f32.mrb[230].mxu1  ;;  %4439 = vst [vmem:[#allocation3 + $0x248] sm:$0xff] %v4353_v8  ;;  %5697 = vmatmul.mubr.bf16.gmra.mrb[20].mxu0 %v13645_v23  ;;  %v13652_v45 = vld [vmem:[#allocation13_spill] sm:$0xff] }
 0x40f   : > { %v4772_v54 = vpop.f32.mrb[231].mxu1  ;;  %5704 = vmatprep.mubr.bf16.mxu0 %v13647_v16 }
 0x411   : > { %9310 = vmatmul.mubr.bf16.gmra.mrb[80].mxu1 %v13649_v41  ;;  %v4036_v9 = vpop.f32.mrb[172].mxu0 }
 0x412   : > { %9313 = vmatprep.mubr.bf16.mxu1 %v13651_v22  ;;  %v4358_v3 = vadd.f32 %v12572_v11, %v4036_v9  ;;  %v4038_v20 = vpop.f32.mrb[173].mxu0  ;;  %v13653_v11 = vld [vmem:[#allocation15_spill] sm:$0xff] }
 0x413   : > { %v4039_v43 = vpop.f32.mrb[174].mxu0 }
 0x414   : > { %v12714_v36 = vpop.f32.mrb[232].mxu1  ;;  %4440 = vst [vmem:[#allocation3 + $0x250] sm:$0xff] %v4358_v3  ;;  %v4361_v6 = vadd.f32 %v12577_v40, %v4039_v43  ;;  %v4041_v25 = vpop.f32.mrb[175].mxu0 }
 0x415   : > { %v4777_v50 = vpop.f32.mrb[233].mxu1 }
 0x416   : > { %v12717_v35 = vpop.f32.mrb[234].mxu1  ;;  %4441 = vst [vmem:[#allocation3 + $0x258] sm:$0xff] %v4361_v6  ;;  %5705 = vmatmul.mubr.bf16.gmra.mrb[24].mxu0 %v13646_v58 }
 0x417   : > { %v4780_v23 = vpop.f32.mrb[235].mxu1  ;;  %5712 = vmatprep.mubr.bf16.mxu0 %v13648_v47 }
 0x419   : > { %9314 = vmatmul.mubr.bf16.gmra.mrb[84].mxu1 %v13652_v45  ;;  %v4044_v8 = vpop.f32.mrb[176].mxu0 }
 0x41a   : > { %9317 = vmatprep.mubr.bf16.mxu1 %v13653_v11  ;;  %v4366_v27 = vadd.f32 %v12570_v1, %v4044_v8  ;;  %v4046_v54 = vpop.f32.mrb[177].mxu0  ;;  %v13654_v1 = vld [vmem:[#allocation17_spill] sm:$0xff] }
 0x41b   : > { %v4047_v40 = vpop.f32.mrb[178].mxu0 }
 0x41c   : > { %v12724_v9 = vpop.f32.mrb[236].mxu1  ;;  %4442 = vst [vmem:[#allocation3 + $0x260] sm:$0xff] %v4366_v27  ;;  %v4369_v20 = vadd.f32 %v12575_v63, %v4047_v40  ;;  %v4049_v43 = vpop.f32.mrb[179].mxu0 }
 0x41d   : > { %v4785_v3 = vpop.f32.mrb[237].mxu1 }
 0x41e   : > { %v12727_v50 = vpop.f32.mrb[238].mxu1  ;;  %4443 = vst [vmem:[#allocation3 + $0x268] sm:$0xff] %v4369_v20  ;;  %5713 = vmatmul.mubr.bf16.gmra.mrb[28].mxu0 %v11751_v12 }
 0x41f   : > { %v4788_v58 = vpop.f32.mrb[239].mxu1  ;;  %5720 = vmatprep.mubr.bf16.mxu0 %v13649_v41 }
 0x421   : > { %9318 = vmatmul.mubr.bf16.gmra.mrb[88].mxu1 %v11894_v0  ;;  %v9211_v6 = vpop.f32.mrb[180].mxu0 }
 0x422   : > { %9321 = vmatprep.mubr.bf16.mxu1 %v13654_v1  ;;  %v5001_v25 = vadd.f32 %v9211_v6, %v12594_v24  ;;  %v4992_v23 = vpop.f32.mrb[181].mxu0  ;;  %v13655_v24 = vld [vmem:[#allocation16_spill] sm:$0xff] }
 0x423   : > { %v4993_v63 = vadd.f32 %v4992_v23, %v12584_v2  ;;  %v9212_v27 = vpop.f32.mrb[182].mxu0  ;;  %v13656_v2 = vld [vmem:[#allocation19_spill] sm:$0xff] }
 0x424   : > { %v12734_v8 = vpop.f32.mrb[240].mxu1  ;;  %5281 = vst [vmem:[#allocation3 + $0x2e0] sm:$0xff] %v5001_v25  ;;  %v5004_v40 = vadd.f32 %v9212_v27, %v12597_v57  ;;  %v4995_v12 = vpop.f32.mrb[183].mxu0 }
 0x425   : > { %v4793_v54 = vpop.f32.mrb[241].mxu1  ;;  %5279 = vst [vmem:[#allocation3 + $0x2d0] sm:$0xff] %v4993_v63  ;;  %v4996_v20 = vadd.f32 %v4995_v12, %v12587_v51 }
 0x426   : > { %v12738_v3 = vpop.f32.mrb[242].mxu1  ;;  %5282 = vst [vmem:[#allocation3 + $0x2e8] sm:$0xff] %v5004_v40  ;;  %5721 = vmatmul.mubr.bf16.gmra.mrb[32].mxu0 %v13647_v16 }
 0x427   : > { %v4796_v43 = vpop.f32.mrb[243].mxu1  ;;  %5280 = vst [vmem:[#allocation3 + $0x2d8] sm:$0xff] %v4996_v20  ;;  %5728 = vmatprep.mubr.bf16.mxu0 %v13651_v22 }
 0x429   : > { %9322 = vmatmul.mubr.bf16.gmra.mrb[92].mxu1 %v13655_v24  ;;  %v9215_v58 = vpop.f32.mrb[184].mxu0 }
 0x42a   : > { %9325 = vmatprep.mubr.bf16.mxu1 %v13656_v2  ;;  %v5017_v57 = vadd.f32 %v9215_v58, %v12614_v33  ;;  %v5008_v6 = vpop.f32.mrb[185].mxu0  ;;  %v13657_v33 = vld [vmem:[#allocation18_spill] sm:$0xff] }
 0x42b   : > { %v5009_v23 = vadd.f32 %v5008_v6, %v12604_v21  ;;  %v9216_v51 = vpop.f32.mrb[186].mxu0  ;;  %v13658_v21 = vld [vmem:[#allocation21_spill] sm:$0xff] }
 0x42c   : > { %v12746_v25 = vpop.f32.mrb[244].mxu1  ;;  %5285 = vst [vmem:[#allocation3 + $0x300] sm:$0xff] %v5017_v57  ;;  %v5020_v16 = vadd.f32 %v9216_v51, %v12617_v29  ;;  %v5011_v27 = vpop.f32.mrb[187].mxu0 }
 0x42d   : > { %v4801_v63 = vpop.f32.mrb[245].mxu1  ;;  %5283 = vst [vmem:[#allocation3 + $0x2f0] sm:$0xff] %v5009_v23  ;;  %v5012_v40 = vadd.f32 %v5011_v27, %v12607_v34 }
 0x42e   : > { %v12750_v54 = vpop.f32.mrb[246].mxu1  ;;  %5286 = vst [vmem:[#allocation3 + $0x308] sm:$0xff] %v5020_v16  ;;  %5729 = vmatmul.mubr.bf16.gmra.mrb[36].mxu0 %v13648_v47 }
 0x42f   : > { %v4804_v12 = vpop.f32.mrb[247].mxu1  ;;  %5284 = vst [vmem:[#allocation3 + $0x2f8] sm:$0xff] %v5012_v40  ;;  %5736 = vmatprep.mubr.bf16.mxu0 %v13652_v45 }
 0x431   : > { %9326 = vmatmul.mubr.bf16.gmra.mrb[96].mxu1 %v13657_v33  ;;  %v9219_v20 = vpop.f32.mrb[188].mxu0 }
 0x432   : > { %9329 = vmatprep.mubr.bf16.mxu1 %v13658_v21  ;;  %v5033_v29 = vadd.f32 %v9219_v20, %v12634_v49  ;;  %v5024_v43 = vpop.f32.mrb[189].mxu0  ;;  %v13659_v49 = vld [vmem:[#allocation20_spill] sm:$0xff] }
 0x433   : > { %v5025_v57 = vadd.f32 %v5024_v43, %v12624_v31  ;;  %v9220_v34 = vpop.f32.mrb[190].mxu0  ;;  %v13660_v31 = vld [vmem:[#allocation23_spill] sm:$0xff] }
 0x434   : > { %v12758_v58 = vpop.f32.mrb[248].mxu1  ;;  %5289 = vst [vmem:[#allocation3 + $0x320] sm:$0xff] %v5033_v29  ;;  %v5036_v47 = vadd.f32 %v9220_v34, %v12637_v18  ;;  %v5027_v23 = vpop.f32.mrb[191].mxu0 }
 0x435   : > { %v4809_v6 = vpop.f32.mrb[249].mxu1  ;;  %5287 = vst [vmem:[#allocation3 + $0x310] sm:$0xff] %v5025_v57  ;;  %v5028_v63 = vadd.f32 %v5027_v23, %v12627_v14 }
 0x436   : > { %v12762_v51 = vpop.f32.mrb[250].mxu1  ;;  %5290 = vst [vmem:[#allocation3 + $0x328] sm:$0xff] %v5036_v47  ;;  %5737 = vmatmul.mubr.bf16.gmra.mrb[40].mxu0 %v13649_v41 }
 0x437   : > { %v4812_v16 = vpop.f32.mrb[251].mxu1  ;;  %5288 = vst [vmem:[#allocation3 + $0x318] sm:$0xff] %v5028_v63  ;;  %5744 = vmatprep.mubr.bf16.mxu0 %v13653_v11 }
 0x439   : > { %9330 = vmatmul.mubr.bf16.gmra.mrb[100].mxu1 %v13659_v49  ;;  %v9223_v27 = vpop.f32.mrb[192].mxu0 }
 0x43a   : > { %9333 = vmatprep.mubr.bf16.mxu1 %v13660_v31  ;;  %v5049_v18 = vadd.f32 %v9223_v27, %v12654_v53  ;;  %v5040_v40 = vpop.f32.mrb[193].mxu0  ;;  %v13661_v53 = vld [vmem:[#allocation22_spill] sm:$0xff] }
 0x43b   : > { %v5041_v20 = vadd.f32 %v5040_v40, %v12644_v59  ;;  %v9224_v14 = vpop.f32.mrb[194].mxu0  ;;  %v13662_v59 = vld [vmem:[#allocation25_spill] sm:$0xff] }
 0x43c   : > { %v12770_v12 = vpop.f32.mrb[252].mxu1  ;;  %5293 = vst [vmem:[#allocation3 + $0x340] sm:$0xff] %v5049_v18  ;;  %v5052_v41 = vadd.f32 %v9224_v14, %v12657_v46  ;;  %v5043_v43 = vpop.f32.mrb[195].mxu0 }
 0x43d   : > { %v4817_v29 = vpop.f32.mrb[253].mxu1  ;;  %5291 = vst [vmem:[#allocation3 + $0x330] sm:$0xff] %v5041_v20  ;;  %v5044_v34 = vadd.f32 %v5043_v43, %v12647_v56 }
 0x43e   : > { %v12774_v57 = vpop.f32.mrb[254].mxu1  ;;  %5294 = vst [vmem:[#allocation3 + $0x348] sm:$0xff] %v5052_v41  ;;  %5745 = vmatmul.mubr.bf16.gmra.mrb[44].mxu0 %v13651_v22 }
 0x43f   : > { %v4820_v6 = vpop.f32.mrb[255].mxu1  ;;  %5292 = vst [vmem:[#allocation3 + $0x338] sm:$0xff] %v5044_v34  ;;  %5752 = vmatprep.mubr.bf16.mxu0 %v11894_v0 }
 0x441   : > { %9334 = vmatmul.mubr.bf16.gmra.mrb[104].mxu1 %v13661_v53  ;;  %v9227_v47 = vpop.f32.mrb[196].mxu0 }
 0x442   : > { %9337 = vmatprep.mubr.bf16.mxu1 %v13662_v59  ;;  %v5065_v46 = vadd.f32 %v9227_v47, %v12674_v26  ;;  %v5056_v23 = vpop.f32.mrb[197].mxu0  ;;  %v13663_v26 = vld [vmem:[#allocation24_spill] sm:$0xff] }
 0x443   : > { %v5057_v16 = vadd.f32 %v5056_v23, %v12664_v32  ;;  %v9228_v56 = vpop.f32.mrb[198].mxu0 }
 0x444   : > { %v12782_v63 = vpop.f32.mrb[0].mxu1  ;;  %5297 = vst [vmem:[#allocation3 + $0x360] sm:$0xff] %v5065_v46  ;;  %v5068_v22 = vadd.f32 %v9228_v56, %v12677_v4  ;;  %v5059_v18 = vpop.f32.mrb[199].mxu0 }
 0x445   : > { %v4825_v27 = vpop.f32.mrb[1].mxu1  ;;  %5295 = vst [vmem:[#allocation3 + $0x350] sm:$0xff] %v5057_v16  ;;  %v5060_v20 = vadd.f32 %v5059_v18, %v12667_v10 }
 0x446   : > { %v12786_v40 = vpop.f32.mrb[2].mxu1  ;;  %5298 = vst [vmem:[#allocation3 + $0x368] sm:$0xff] %v5068_v22  ;;  %5753 = vmatmul.mubr.bf16.gmra.mrb[48].mxu0 %v13652_v45 }
 0x447   : > { %v4828_v14 = vpop.f32.mrb[3].mxu1  ;;  %5296 = vst [vmem:[#allocation3 + $0x358] sm:$0xff] %v5060_v20  ;;  %5760 = vmatprep.mubr.bf16.mxu0 %v13654_v1 }
 0x449   : > { %9338 = vmatmul.mubr.bf16.gmra.mrb[108].mxu1 %v13663_v26  ;;  %v9231_v32 = vpop.f32.mrb[200].mxu0 }
 0x44a   : > { %9341 = vmatprep.mubr.bf16.mxu1 %v12181_v62  ;;  %v5081_v4 = vadd.f32 %v9231_v32, %v12694_v37  ;;  %v5072_v29 = vpop.f32.mrb[201].mxu0 }
 0x44b   : > { %v5073_v43 = vadd.f32 %v5072_v29, %v12684_v52  ;;  %v9232_v10 = vpop.f32.mrb[202].mxu0 }
 0x44c   : > { %v12794_v41 = vpop.f32.mrb[4].mxu1  ;;  %5301 = vst [vmem:[#allocation3 + $0x380] sm:$0xff] %v5081_v4  ;;  %v5084_v45 = vadd.f32 %v9232_v10, %v12697_v15  ;;  %v5075_v6 = vpop.f32.mrb[203].mxu0 }
 0x44d   : > { %v4833_v34 = vpop.f32.mrb[5].mxu1  ;;  %5299 = vst [vmem:[#allocation3 + $0x370] sm:$0xff] %v5073_v43  ;;  %v5076_v46 = vadd.f32 %v5075_v6, %v12687_v48 }
 0x44e   : > { %v12798_v47 = vpop.f32.mrb[6].mxu1  ;;  %5302 = vst [vmem:[#allocation3 + $0x388] sm:$0xff] %v5084_v45  ;;  %5761 = vmatmul.mubr.bf16.gmra.mrb[52].mxu0 %v13653_v11 }
 0x44f   : > { %v4836_v23 = vpop.f32.mrb[7].mxu1  ;;  %5300 = vst [vmem:[#allocation3 + $0x378] sm:$0xff] %v5076_v46  ;;  %5768 = vmatprep.mubr.bf16.mxu0 %v13655_v24 }
 0x451   : > { %9342 = vmatmul.mubr.bf16.gmra.mrb[112].mxu1 %v12177_v39  ;;  %v9235_v52 = vpop.f32.mrb[204].mxu0 }
 0x452   : > { %9345 = vmatprep.mubr.bf16.mxu1 %v12197_v42  ;;  %v5097_v37 = vadd.f32 %v9235_v52, %v12714_v36  ;;  %v5088_v15 = vpop.f32.mrb[205].mxu0 }
 0x453   : > { %v5089_v56 = vadd.f32 %v5088_v15, %v12704_v44  ;;  %v9236_v48 = vpop.f32.mrb[206].mxu0 }
 0x454   : > { %v12806_v16 = vpop.f32.mrb[8].mxu1  ;;  %5305 = vst [vmem:[#allocation3 + $0x3a0] sm:$0xff] %v5097_v37  ;;  %v5100_v11 = vadd.f32 %v9236_v48, %v12717_v35  ;;  %v5091_v22 = vpop.f32.mrb[207].mxu0 }
 0x455   : > { %v4841_v27 = vpop.f32.mrb[9].mxu1  ;;  %5303 = vst [vmem:[#allocation3 + $0x390] sm:$0xff] %v5089_v56  ;;  %v5092_v20 = vadd.f32 %v5091_v22, %v12707_v13 }
 0x456   : > { %v12810_v18 = vpop.f32.mrb[10].mxu1  ;;  %5306 = vst [vmem:[#allocation3 + $0x3a8] sm:$0xff] %v5100_v11  ;;  %5769 = vmatmul.mubr.bf16.gmra.mrb[56].mxu0 %v11894_v0 }
 0x457   : > { %v4844_v14 = vpop.f32.mrb[11].mxu1  ;;  %5304 = vst [vmem:[#allocation3 + $0x398] sm:$0xff] %v5092_v20  ;;  %5776 = vmatprep.mubr.bf16.mxu0 %v13656_v2 }
 0x459   : > { %9346 = vmatmul.mubr.bf16.gmra.mrb[116].mxu1 %v12193_v30  ;;  %v9239_v44 = vpop.f32.mrb[208].mxu0 }
 0x45a   : > { %9349 = vmatprep.mubr.bf16.mxu1 %v12214_v28  ;;  %v5113_v36 = vadd.f32 %v9239_v44, %v12734_v8  ;;  %v5104_v35 = vpop.f32.mrb[209].mxu0 }
 0x45b   : > { %v5105_v4 = vadd.f32 %v5104_v35, %v12724_v9  ;;  %v9240_v13 = vpop.f32.mrb[210].mxu0 }
 0x45c   : > { %v12818_v32 = vpop.f32.mrb[12].mxu1  ;;  %5309 = vst [vmem:[#allocation3 + $0x3c0] sm:$0xff] %v5113_v36  ;;  %v5116_v0 = vadd.f32 %v9240_v13, %v12738_v3  ;;  %v5107_v43 = vpop.f32.mrb[211].mxu0 }
 0x45d   : > { %v4849_v29 = vpop.f32.mrb[13].mxu1  ;;  %5307 = vst [vmem:[#allocation3 + $0x3b0] sm:$0xff] %v5105_v4  ;;  %v5108_v34 = vadd.f32 %v5107_v43, %v12727_v50 }
 0x45e   : > { %v12822_v10 = vpop.f32.mrb[14].mxu1  ;;  %5310 = vst [vmem:[#allocation3 + $0x3c8] sm:$0xff] %v5116_v0  ;;  %5777 = vmatmul.mubr.bf16.gmra.mrb[60].mxu0 %v13654_v1 }
 0x45f   : > { %v4852_v45 = vpop.f32.mrb[15].mxu1  ;;  %5308 = vst [vmem:[#allocation3 + $0x3b8] sm:$0xff] %v5108_v34  ;;  %5784 = vmatprep.mubr.bf16.mxu0 %v13657_v33 }
 0x461   : > { %9350 = vmatmul.mubr.bf16.gmra.mrb[120].mxu1 %v12212_v7  ;;  %v9243_v9 = vpop.f32.mrb[212].mxu0 }
 0x462   : > { %9353 = vmatprep.mubr.bf16.mxu1 %v12232_v19  ;;  %v5129_v8 = vadd.f32 %v9243_v9, %v12758_v58  ;;  %v5120_v3 = vpop.f32.mrb[213].mxu0 }
 0x463   : > { %v5121_v46 = vadd.f32 %v5120_v3, %v12746_v25  ;;  %v9244_v23 = vpop.f32.mrb[214].mxu0 }
 0x464   : > { %v4855_v6 = vpop.f32.mrb[16].mxu1  ;;  %5313 = vst [vmem:[#allocation3 + $0x3e0] sm:$0xff] %v5129_v8  ;;  %v5132_v52 = vadd.f32 %v9244_v23, %v12762_v51  ;;  %v5123_v1 = vpop.f32.mrb[215].mxu0 }
 0x465   : > { %v4857_v50 = vpop.f32.mrb[17].mxu1  ;;  %5311 = vst [vmem:[#allocation3 + $0x3d0] sm:$0xff] %v5121_v46  ;;  %v5124_v15 = vadd.f32 %v5123_v1, %v12750_v54 }
 0x466   : > { %v4858_v37 = vpop.f32.mrb[18].mxu1  ;;  %5314 = vst [vmem:[#allocation3 + $0x3e8] sm:$0xff] %v5132_v52  ;;  %5785 = vmatmul.mubr.bf16.gmra.mrb[64].mxu0 %v13655_v24 }
 0x467   : > { %v4860_v56 = vpop.f32.mrb[19].mxu1  ;;  %5312 = vst [vmem:[#allocation3 + $0x3d8] sm:$0xff] %v5124_v15  ;;  %5792 = vmatprep.mubr.bf16.mxu0 %v13658_v21 }
 0x469   : > { %9354 = vmatmul.mubr.bf16.gmra.mrb[124].mxu1 %v12229_v55  ;;  %v9247_v25 = vpop.f32.mrb[216].mxu0 }
 0x46a   : > { %9357 = vmatprep.mubr.bf16.mxu1 %v12239_v17  ;;  %v5145_v58 = vadd.f32 %v9247_v25, %v12782_v63  ;;  %v5136_v51 = vpop.f32.mrb[217].mxu0 }
 0x46b   : > { %v5137_v27 = vadd.f32 %v5136_v51, %v12770_v12  ;;  %v9248_v11 = vpop.f32.mrb[218].mxu0 }
 0x46c   : > { %v4863_v48 = vpop.f32.mrb[20].mxu1  ;;  %5317 = vst [vmem:[#allocation3 + $0x400] sm:$0xff] %v5145_v58  ;;  %v5148_v22 = vadd.f32 %v9248_v11, %v12786_v40  ;;  %v5139_v24 = vpop.f32.mrb[219].mxu0 }
 0x46d   : > { %v4865_v54 = vpop.f32.mrb[21].mxu1  ;;  %5315 = vst [vmem:[#allocation3 + $0x3f0] sm:$0xff] %v5137_v27  ;;  %v5140_v14 = vadd.f32 %v5139_v24, %v12774_v57 }
 0x46e   : > { %v4866_v20 = vpop.f32.mrb[22].mxu1  ;;  %5318 = vst [vmem:[#allocation3 + $0x408] sm:$0xff] %v5148_v22  ;;  %5793 = vmatmul.mubr.bf16.gmra.mrb[68].mxu0 %v13656_v2 }
 0x46f   : > { %v4868_v44 = vpop.f32.mrb[23].mxu1  ;;  %5316 = vst [vmem:[#allocation3 + $0x3f8] sm:$0xff] %v5140_v14  ;;  %5800 = vmatprep.mubr.bf16.mxu0 %v13659_v49 }
 0x471   : > { %9358 = vmatmul.mubr.bf16.gmra.mrb[128].mxu1 %v12236_v38  ;;  %v9251_v12 = vpop.f32.mrb[220].mxu0 }
 0x472   : > { %9361 = vmatprep.mubr.bf16.mxu1 %v12257_v61  ;;  %v5161_v63 = vadd.f32 %v9251_v12, %v12806_v16  ;;  %v5152_v40 = vpop.f32.mrb[221].mxu0 }
 0x473   : > { %v5153_v35 = vadd.f32 %v5152_v40, %v12794_v41  ;;  %v9252_v4 = vpop.f32.mrb[222].mxu0 }
 0x474   : > { %v4871_v36 = vpop.f32.mrb[24].mxu1  ;;  %5321 = vst [vmem:[#allocation3 + $0x420] sm:$0xff] %v5161_v63  ;;  %v5164_v13 = vadd.f32 %v9252_v4, %v12810_v18  ;;  %v5155_v2 = vpop.f32.mrb[223].mxu0 }
 0x475   : > { %v4873_v57 = vpop.f32.mrb[25].mxu1  ;;  %5319 = vst [vmem:[#allocation3 + $0x410] sm:$0xff] %v5153_v35  ;;  %v5156_v0 = vadd.f32 %v5155_v2, %v12798_v47 }
 0x476   : > { %v4874_v29 = vpop.f32.mrb[26].mxu1  ;;  %5322 = vst [vmem:[#allocation3 + $0x428] sm:$0xff] %v5164_v13  ;;  %5801 = vmatmul.mubr.bf16.gmra.mrb[72].mxu0 %v13657_v33 }
 0x477   : > { %v4876_v43 = vpop.f32.mrb[27].mxu1  ;;  %5320 = vst [vmem:[#allocation3 + $0x418] sm:$0xff] %v5156_v0  ;;  %5808 = vmatprep.mubr.bf16.mxu0 %v13660_v31 }
 0x479   : > { %9362 = vmatmul.mubr.bf16.gmra.mrb[132].mxu1 %v12255_v5  ;;  %v9255_v41 = vpop.f32.mrb[224].mxu0 }
 0x47a   : > { %9365 = vmatprep.mubr.bf16.mxu1 %v13602_v60  ;;  %v5177_v16 = vadd.f32 %v9255_v41, %v4855_v6  ;;  %v5168_v34 = vpop.f32.mrb[225].mxu0 }
 0x47b   : > { %v5169_v45 = vadd.f32 %v5168_v34, %v12818_v32  ;;  %v9256_v9 = vpop.f32.mrb[226].mxu0 }
 0x47c   : > { %v4879_v18 = vpop.f32.mrb[28].mxu1  ;;  %5325 = vst [vmem:[#allocation3 + $0x440] sm:$0xff] %v5177_v16  ;;  %v5180_v47 = vadd.f32 %v9256_v9, %v4858_v37  ;;  %v5171_v3 = vpop.f32.mrb[227].mxu0 }
 0x47d   : > { %v4881_v8 = vpop.f32.mrb[29].mxu1  ;;  %5323 = vst [vmem:[#allocation3 + $0x430] sm:$0xff] %v5169_v45  ;;  %v5172_v33 = vadd.f32 %v5171_v3, %v12822_v10 }
 0x47e   : > { %v4882_v46 = vpop.f32.mrb[30].mxu1  ;;  %5326 = vst [vmem:[#allocation3 + $0x448] sm:$0xff] %v5180_v47  ;;  %5809 = vmatmul.mubr.bf16.gmra.mrb[76].mxu0 %v13658_v21 }
 0x47f   : > { %v4884_v23 = vpop.f32.mrb[31].mxu1  ;;  %5324 = vst [vmem:[#allocation3 + $0x438] sm:$0xff] %v5172_v33  ;;  %5816 = vmatprep.mubr.bf16.mxu0 %v13661_v53 }
 0x481   : > { %9366 = vmatmul.mubr.bf16.gmra.mrb[136].mxu1 %v13602_v60  ;;  %v9259_v6 = vpop.f32.mrb[228].mxu0 }
 0x482   : > { %v5193_v32 = vadd.f32 %v9259_v6, %v4871_v36  ;;  %v5184_v50 = vpop.f32.mrb[229].mxu0 }
 0x483   : > { %v5185_v1 = vadd.f32 %v5184_v50, %v4863_v48  ;;  %v9260_v37 = vpop.f32.mrb[230].mxu0 }
 0x484   : > { %v4887_v52 = vpop.f32.mrb[32].mxu1  ;;  %5329 = vst [vmem:[#allocation3 + $0x460] sm:$0xff] %v5193_v32  ;;  %v5196_v56 = vadd.f32 %v9260_v37, %v4874_v29  ;;  %v5187_v25 = vpop.f32.mrb[231].mxu0 }
 0x485   : > { %v4889_v15 = vpop.f32.mrb[33].mxu1  ;;  %5327 = vst [vmem:[#allocation3 + $0x450] sm:$0xff] %v5185_v1  ;;  %v5188_v58 = vadd.f32 %v5187_v25, %v4866_v20 }
 0x486   : > { %v4890_v10 = vpop.f32.mrb[34].mxu1  ;;  %5330 = vst [vmem:[#allocation3 + $0x468] sm:$0xff] %v5196_v56  ;;  %5817 = vmatmul.mubr.bf16.gmra.mrb[80].mxu0 %v13659_v49 }
 0x487   : > { %v4892_v51 = vpop.f32.mrb[35].mxu1  ;;  %5328 = vst [vmem:[#allocation3 + $0x458] sm:$0xff] %v5188_v58  ;;  %5824 = vmatprep.mubr.bf16.mxu0 %v13662_v59 }
 0x489   : > { %v9263_v60 = vpop.f32.mrb[232].mxu0 }
 0x48a   : > { %v5209_v21 = vadd.f32 %v9263_v60, %v4887_v52  ;;  %v5200_v27 = vpop.f32.mrb[233].mxu0 }
 0x48b   : > { %v5201_v48 = vadd.f32 %v5200_v27, %v4879_v18  ;;  %v9264_v54 = vpop.f32.mrb[234].mxu0 }
 0x48c   : > { %v4895_v11 = vpop.f32.mrb[36].mxu1  ;;  %5333 = vst [vmem:[#allocation3 + $0x480] sm:$0xff] %v5209_v21  ;;  %v5212_v24 = vadd.f32 %v9264_v54, %v4890_v10  ;;  %v5203_v14 = vpop.f32.mrb[235].mxu0 }
 0x48d   : > { %v4897_v22 = vpop.f32.mrb[37].mxu1  ;;  %5331 = vst [vmem:[#allocation3 + $0x470] sm:$0xff] %v5201_v48  ;;  %v5204_v20 = vadd.f32 %v5203_v14, %v4882_v46 }
 0x48e   : > { %v4898_v44 = vpop.f32.mrb[38].mxu1  ;;  %5334 = vst [vmem:[#allocation3 + $0x488] sm:$0xff] %v5212_v24  ;;  %5825 = vmatmul.mubr.bf16.gmra.mrb[84].mxu0 %v13660_v31 }
 0x48f   : > { %v4900_v12 = vpop.f32.mrb[39].mxu1  ;;  %5332 = vst [vmem:[#allocation3 + $0x478] sm:$0xff] %v5204_v20  ;;  %5832 = vmatprep.mubr.bf16.mxu0 %v13663_v26 }
 0x491   : > { %v9267_v49 = vpop.f32.mrb[236].mxu0 }
 0x492   : > { %v5216_v63 = vpop.f32.mrb[237].mxu0 }
 0x493   : > { %v5217_v36 = vadd.f32 %v5216_v63, %v4895_v11  ;;  %v9268_v35 = vpop.f32.mrb[238].mxu0 }
 0x494   : > { %v4903_v40 = vpop.f32.mrb[40].mxu1  ;;  %v5219_v13 = vpop.f32.mrb[239].mxu0 }
 0x495   : > { %v4905_v4 = vpop.f32.mrb[41].mxu1  ;;  %v5225_v57 = vadd.f32 %v9267_v49, %v4903_v40  ;;  %5335 = vst [vmem:[#allocation3 + $0x490] sm:$0xff] %v5217_v36  ;;  %v5220_v29 = vadd.f32 %v5219_v13, %v4898_v44 }
 0x496   : > { %v4906_v2 = vpop.f32.mrb[42].mxu1  ;;  %5833 = vmatmul.mubr.bf16.gmra.mrb[88].mxu0 %v13661_v53 }
 0x497   : > { %v4908_v0 = vpop.f32.mrb[43].mxu1  ;;  %5337 = vst [vmem:[#allocation3 + $0x4a0] sm:$0xff] %v5225_v57  ;;  %v5228_v43 = vadd.f32 %v9268_v35, %v4906_v2  ;;  %5336 = vst [vmem:[#allocation3 + $0x498] sm:$0xff] %v5220_v29  ;;  %5840 = vmatprep.mubr.bf16.mxu0 %v12181_v62 }
 0x499   : > { %5338 = vst [vmem:[#allocation3 + $0x4a8] sm:$0xff] %v5228_v43  ;;  %v9271_v31 = vpop.f32.mrb[240].mxu0 }
 0x49a   : > { %v5232_v41 = vpop.f32.mrb[241].mxu0 }
 0x49b   : > { %v9272_v34 = vpop.f32.mrb[242].mxu0 }
 0x49c   : > { %v4911_v16 = vpop.f32.mrb[44].mxu1  ;;  %v5235_v9 = vpop.f32.mrb[243].mxu0 }
 0x49d   : > { %v4913_v18 = vpop.f32.mrb[45].mxu1  ;;  %v5233_v45 = vadd.f32 %v5232_v41, %v4911_v16 }
 0x49e   : > { %v4914_v8 = vpop.f32.mrb[46].mxu1  ;;  %5841 = vmatmul.mubr.bf16.gmra.mrb[92].mxu0 %v13662_v59 }
 0x49f   : > { %v4916_v47 = vpop.f32.mrb[47].mxu1  ;;  %5339 = vst [vmem:[#allocation3 + $0x4b0] sm:$0xff] %v5233_v45  ;;  %v5236_v3 = vadd.f32 %v5235_v9, %v4914_v8  ;;  %5848 = vmatprep.mubr.bf16.mxu0 %v12177_v39  ;;  %v5402_v9 = vld [vmem:[#allocation3 + $0x3f] sm:$0xff]  ;;  %v5403_v8 = vld [vmem:[#allocation3 + $0x47] sm:$0xff] }
 0x4a1   : > { %5340 = vst [vmem:[#allocation3 + $0x4b8] sm:$0xff] %v5236_v3  ;;  %v9275_v53 = vpop.f32.mrb[244].mxu0  ;;  %v5400_v3 = vld [vmem:[#allocation3 + $0x2f] sm:$0xff] }
 0x4a2   : > { %v5248_v46 = vpop.f32.mrb[245].mxu0 }
 0x4a3   : > { %v9276_v23 = vpop.f32.mrb[246].mxu0 }
 0x4a4   : > { %v4919_v33 = vpop.f32.mrb[48].mxu1  ;;  %v5251_v50 = vpop.f32.mrb[247].mxu0 }
 0x4a5   : > { %v4921_v6 = vpop.f32.mrb[49].mxu1  ;;  %v5241_v32 = vadd.f32 %v9271_v31, %v4919_v33 }
 0x4a6   : > { %v4922_v52 = vpop.f32.mrb[50].mxu1  ;;  %5849 = vmatmul.mubr.bf16.gmra.mrb[96].mxu0 %v13663_v26 }
 0x4a7   : > { %v4924_v1 = vpop.f32.mrb[51].mxu1  ;;  %5341 = vst [vmem:[#allocation3 + $0x4c0] sm:$0xff] %v5241_v32  ;;  %v5244_v37 = vadd.f32 %v9272_v34, %v4922_v52  ;;  %5856 = vmatprep.mubr.bf16.mxu0 %v12197_v42  ;;  %v5401_v32 = vld [vmem:[#allocation3 + $0x37] sm:$0xff] }
 0x4a9   : > { %5342 = vst [vmem:[#allocation3 + $0x4c8] sm:$0xff] %v5244_v37  ;;  %v9279_v59 = vpop.f32.mrb[248].mxu0 }
 0x4aa   : > { %v5264_v15 = vpop.f32.mrb[249].mxu0 }
 0x4ab   : > { %v9280_v25 = vpop.f32.mrb[250].mxu0 }
 0x4ac   : > { %v4927_v56 = vpop.f32.mrb[52].mxu1  ;;  %v5267_v51 = vpop.f32.mrb[251].mxu0 }
 0x4ad   : > { %v4929_v10 = vpop.f32.mrb[53].mxu1  ;;  %v5249_v58 = vadd.f32 %v5248_v46, %v4927_v56 }
 0x4ae   : > { %v4930_v60 = vpop.f32.mrb[54].mxu1  ;;  %5857 = vmatmul.mubr.bf16.gmra.mrb[100].mxu0 %v12181_v62  ;;  %v6258_v10 = vld [vmem:[#allocation3 + $0x2d1] sm:$0xff] }
 0x4af   : > { %v4932_v21 = vpop.f32.mrb[55].mxu1  ;;  %5343 = vst [vmem:[#allocation3 + $0x4d0] sm:$0xff] %v5249_v58  ;;  %v5252_v27 = vadd.f32 %v5251_v50, %v4930_v60  ;;  %5864 = vmatprep.mubr.bf16.mxu0 %v12193_v30 }
 0x4b0   : > { %v6261_v21 = vld [vmem:[#allocation3 + $0x2e9] sm:$0xff] }
 0x4b1   : > { %5344 = vst [vmem:[#allocation3 + $0x4d8] sm:$0xff] %v5252_v27  ;;  %v5650_v26 = vpop.f32.mrb[252].mxu0 }
 0x4b2   : > { %v5652_v11 = vpop.f32.mrb[253].mxu0  ;;  %v5651_v33 = vadd.f32 %v5650_v26, %v5400_v3  ;;  %v5406_v26 = vld [vmem:[#allocation3 + $0x5f] sm:$0xff] }
 0x4b3   : > { %v5653_v54 = vpop.f32.mrb[254].mxu0 }
 0x4b4   : > { %v4935_v48 = vpop.f32.mrb[56].mxu1  ;;  %v5655_v14 = vpop.f32.mrb[255].mxu0  ;;  %v5654_v37 = vadd.f32 %v5653_v54, %v5401_v32  ;;  %v6259_v54 = vld [vmem:[#allocation3 + $0x2d9] sm:$0xff] }
 0x4b5   : > { %v5257_v22 = vadd.f32 %v9275_v53, %v4935_v48  ;;  %v4937_v24 = vpop.f32.mrb[57].mxu1 }
 0x4b6   : > { %v4938_v44 = vpop.f32.mrb[58].mxu1  ;;  %5865 = vmatmul.mubr.bf16.gmra.mrb[104].mxu0 %v12177_v39 }
 0x4b7   : > { %5345 = vst [vmem:[#allocation3 + $0x4e0] sm:$0xff] %v5257_v22  ;;  %v5260_v20 = vadd.f32 %v9276_v23, %v4938_v44  ;;  %v4940_v12 = vpop.f32.mrb[59].mxu1  ;;  %5872 = vmatprep.mubr.bf16.mxu0 %v12214_v28  ;;  %v5404_v22 = vld [vmem:[#allocation3 + $0x4f] sm:$0xff] }
 0x4b8   : > { %v5407_v12 = vld [vmem:[#allocation3 + $0x67] sm:$0xff] }
 0x4b9   : > { %5346 = vst [vmem:[#allocation3 + $0x4e8] sm:$0xff] %v5260_v20  ;;  %v5658_v62 = vpop.f32.mrb[0].mxu0 }
 0x4ba   : > { %v5660_v49 = vpop.f32.mrb[1].mxu0 }
 0x4bb   : > { %v5661_v40 = vpop.f32.mrb[2].mxu0 }
 0x4bc   : > { %v4943_v63 = vpop.f32.mrb[60].mxu1  ;;  %v5663_v4 = vpop.f32.mrb[3].mxu0  ;;  %v5662_v53 = vadd.f32 %v5661_v40, %v5403_v8  ;;  %v6262_v8 = vld [vmem:[#allocation3 + $0x2f1] sm:$0xff] }
 0x4bd   : > { %v4945_v36 = vpop.f32.mrb[61].mxu1  ;;  %v5265_v35 = vadd.f32 %v5264_v15, %v4943_v63  ;;  %v5405_v63 = vld [vmem:[#allocation3 + $0x57] sm:$0xff] }
 0x4be   : > { %v4946_v57 = vpop.f32.mrb[62].mxu1  ;;  %5873 = vmatmul.mubr.bf16.gmra.mrb[108].mxu0 %v12197_v42  ;;  %v5659_v42 = vadd.f32 %v5658_v62, %v5402_v9  ;;  %v6264_v9 = vld [vmem:[#allocation3 + $0x301] sm:$0xff] }
 0x4bf   : > { %5347 = vst [vmem:[#allocation3 + $0x4f0] sm:$0xff] %v5265_v35  ;;  %v4948_v13 = vpop.f32.mrb[63].mxu1  ;;  %v5268_v2 = vadd.f32 %v5267_v51, %v4946_v57  ;;  %5880 = vmatprep.mubr.bf16.mxu0 %v12212_v7 }
 0x4c1   : > { %5348 = vst [vmem:[#allocation3 + $0x4f8] sm:$0xff] %v5268_v2  ;;  %v5666_v39 = vpop.f32.mrb[4].mxu0 }
 0x4c2   : > { %v5668_v29 = vpop.f32.mrb[5].mxu0  ;;  %v5667_v20 = vadd.f32 %v5666_v39, %v5404_v22 }
 0x4c3   : > { %v5669_v43 = vpop.f32.mrb[6].mxu0 }
 0x4c4   : > { %v4951_v0 = vpop.f32.mrb[64].mxu1  ;;  %v5671_v16 = vpop.f32.mrb[7].mxu0  ;;  %v5670_v13 = vadd.f32 %v5669_v43, %v5405_v63 }
 0x4c5   : > { %v5273_v31 = vadd.f32 %v9279_v59, %v4951_v0  ;;  %v4953_v41 = vpop.f32.mrb[65].mxu1  ;;  %v6260_v59 = vld [vmem:[#allocation3 + $0x2e1] sm:$0xff] }
 0x4c6   : > { %v4954_v34 = vpop.f32.mrb[66].mxu1  ;;  %5881 = vmatmul.mubr.bf16.gmra.mrb[112].mxu0 %v12193_v30  ;;  %v12879_v30 = vld [vmem:[%s13534_s6] ss:$0 sm:$0xff] }
 0x4c7   : > { %5349 = vst [vmem:[#allocation3 + $0x500] sm:$0xff] %v5273_v31  ;;  %v5276_v18 = vadd.f32 %v9280_v25, %v4954_v34  ;;  %v4956_v45 = vpop.f32.mrb[67].mxu1  ;;  %5888 = vmatprep.mubr.bf16.mxu0 %v12232_v19 }
 0x4c9   : > { %5350 = vst [vmem:[#allocation3 + $0x508] sm:$0xff] %v5276_v18  ;;  %v5674_v47 = vpop.f32.mrb[8].mxu0 }
 0x4ca   : > { %v5676_v46 = vpop.f32.mrb[9].mxu0  ;;  %v5675_v24 = vadd.f32 %v5674_v47, %v5406_v26 }
 0x4cb   : > { %v5677_v6 = vpop.f32.mrb[10].mxu0 }
 0x4cc   : > { %v9299_v23 = vpop.f32.mrb[68].mxu1  ;;  %v5679_v1 = vpop.f32.mrb[11].mxu0  ;;  %v5678_v40 = vadd.f32 %v5677_v6, %v5407_v12  ;;  %v6263_v6 = vld [vmem:[#allocation3 + $0x2f9] sm:$0xff] }
 0x4cd   : > { %v5980_v50 = vadd.f32 %v9299_v23, %v5659_v42  ;;  %v5971_v52 = vpop.f32.mrb[69].mxu1  ;;  %v6265_v23 = vld [vmem:[#allocation3 + $0x309] sm:$0xff] }
 0x4ce   : > { %v5972_v15 = vadd.f32 %v5971_v52, %v5651_v33  ;;  %v9300_v56 = vpop.f32.mrb[70].mxu1  ;;  %5889 = vmatmul.mubr.bf16.gmra.mrb[116].mxu0 %v12214_v28  ;;  %v5408_v52 = vld [vmem:[#allocation3 + $0x6f] sm:$0xff] }
 0x4cf   : > { %v6332_v25 = vadd.f32 %v6260_v59, %v5980_v50  ;;  %v5983_v58 = vadd.f32 %v9300_v56, %v5662_v53  ;;  %v5974_v51 = vpop.f32.mrb[71].mxu1  ;;  %5896 = vmatprep.mubr.bf16.mxu0 %v12229_v55  ;;  %v5410_v59 = vld [vmem:[#allocation3 + $0x7f] sm:$0xff] }
 0x4d0   : > { %v6330_v60 = vadd.f32 %v6258_v10, %v5972_v15  ;;  %v5975_v27 = vadd.f32 %v5974_v51, %v5654_v37  ;;  %v5409_v10 = vld [vmem:[#allocation3 + $0x77] sm:$0xff] }
 0x4d1   : > { %v12884_v11 = vadd.f32 %v12879_v30, %v6332_v25  ;;  %v6333_v48 = vadd.f32 %v6261_v21, %v5983_v58  ;;  %v5682_v28 = vpop.f32.mrb[12].mxu0 }
 0x4d2   : > { %v12887_v14 = vadd.f32 %v12879_v30, %v6330_v60  ;;  %v6331_v44 = vadd.f32 %v6259_v54, %v5975_v27  ;;  %v5684_v36 = vpop.f32.mrb[13].mxu0 }
 0x4d3   : > { %v6483_v62 = vsub.f32 0.0, %v12884_v11  ;;  %v12891_v49 = vadd.f32 %v12879_v30, %v6333_v48  ;;  %v5685_v2 = vpop.f32.mrb[14].mxu0  ;;  %v5411_v48 = vld [vmem:[#allocation3 + $0x87] sm:$0xff] }
 0x4d4   : > { %v6481_v35 = vsub.f32 0.0, %v12887_v14  ;;  %v12895_v4 = vadd.f32 %v12879_v30, %v6331_v44  ;;  %v9303_v57 = vpop.f32.mrb[72].mxu1  ;;  %v5687_v41 = vpop.f32.mrb[15].mxu0  ;;  %v5686_v26 = vadd.f32 %v5685_v2, %v5409_v10 }
 0x4d5   : > { %v6557_v29 = vmul.f32 1.442695, %v6483_v62  ;;  %v6484_v39 = vsub.f32 0.0, %v12891_v49  ;;  %v5987_v0 = vpop.f32.mrb[73].mxu1  ;;  %v5996_v31 = vadd.f32 %v9303_v57, %v5675_v24 }
 0x4d6   : > { %v6553_v16 = vmul.f32 1.442695, %v6481_v35  ;;  %v6482_v34 = vsub.f32 0.0, %v12895_v4  ;;  %v5988_v18 = vadd.f32 %v5987_v0, %v5667_v20  ;;  %v9304_v45 = vpop.f32.mrb[74].mxu1  ;;  %5897 = vmatmul.mubr.bf16.gmra.mrb[120].mxu0 %v12212_v7  ;;  %v5683_v7 = vadd.f32 %v5682_v28, %v5408_v52  ;;  %v6268_v35 = vld [vmem:[#allocation3 + $0x321] sm:$0xff] }
 0x4d7   : > { %10134 = vpow2.f32 %v6557_v29  ;;  %v6559_v42 = vmul.f32 1.442695, %v6484_v39  ;;  %v5990_v47 = vpop.f32.mrb[75].mxu1  ;;  %v6336_v3 = vadd.f32 %v6264_v9, %v5996_v31  ;;  %v5999_v53 = vadd.f32 %v9304_v45, %v5678_v40  ;;  %5904 = vmatprep.mubr.bf16.mxu0 %v12239_v17  ;;  %v6266_v29 = vld [vmem:[#allocation3 + $0x311] sm:$0xff] }
 0x4d8   : > { %10136 = vpow2.f32 %v6553_v16  ;;  %v6555_v43 = vmul.f32 1.442695, %v6482_v34  ;;  %v6334_v46 = vadd.f32 %v6262_v8, %v5988_v18  ;;  %v5991_v33 = vadd.f32 %v5990_v47, %v5670_v13  ;;  %v6269_v16 = vld [vmem:[#allocation3 + $0x329] sm:$0xff]  ;;  %v6267_v18 = vld [vmem:[#allocation3 + $0x319] sm:$0xff] }
 0x4d9   : > { %10138 = vpow2.f32 %v6559_v42  ;;  %v12902_v32 = vadd.f32 %v12879_v30, %v6336_v3  ;;  %v6337_v50 = vadd.f32 %v6265_v23, %v5999_v53  ;;  %v5690_v15 = vpop.f32.mrb[16].mxu0  ;;  %v5412_v3 = vld [vmem:[#allocation3 + $0x8f] sm:$0xff] }
 0x4da   : > { %10140 = vpow2.f32 %v6555_v43  ;;  %v12905_v1 = vadd.f32 %v12879_v30, %v6334_v46  ;;  %v6335_v37 = vadd.f32 %v6263_v6, %v5991_v33  ;;  %v5691_v58 = vadd.f32 %v5690_v15, %v5410_v59  ;;  %v5692_v51 = vpop.f32.mrb[17].mxu0 }
 0x4db   : > { %v6487_v56 = vsub.f32 0.0, %v12902_v32  ;;  %v12909_v25 = vadd.f32 %v12879_v30, %v6337_v50  ;;  %v5693_v54 = vpop.f32.mrb[18].mxu0 }
 0x4dc   : > { %v6485_v60 = vsub.f32 0.0, %v12905_v1  ;;  %v12913_v21 = vadd.f32 %v12879_v30, %v6335_v37  ;;  %v9307_v27 = vpop.f32.mrb[76].mxu1  ;;  %v5694_v12 = vadd.f32 %v5693_v54, %v5411_v48  ;;  %v5695_v28 = vpop.f32.mrb[19].mxu0 }
 0x4dd   : > { %v6565_v22 = vmul.f32 1.442695, %v6487_v56  ;;  %v6003_v24 = vpop.f32.mrb[77].mxu1  ;;  %v6488_v44 = vsub.f32 0.0, %v12909_v25  ;;  %v6012_v20 = vadd.f32 %v9307_v27, %v5691_v58 }
 0x4de   : > { %v6561_v62 = vmul.f32 1.442695, %v6485_v60  ;;  %v6486_v63 = vsub.f32 0.0, %v12913_v21  ;;  %v9308_v40 = vpop.f32.mrb[78].mxu1  ;;  %v6004_v36 = vadd.f32 %v6003_v24, %v5683_v7  ;;  %5905 = vmatmul.mubr.bf16.gmra.mrb[124].mxu0 %v12232_v19 }
 0x4df   : > { %10142 = vpow2.f32 %v6565_v22  ;;  %v6567_v57 = vmul.f32 1.442695, %v6488_v44  ;;  %v6006_v13 = vpop.f32.mrb[79].mxu1  ;;  %v6340_v2 = vadd.f32 %v6268_v35, %v6012_v20  ;;  %v6015_v39 = vadd.f32 %v9308_v40, %v5694_v12  ;;  %5912 = vmatprep.mubr.bf16.mxu0 %v12236_v38  ;;  %v5413_v44 = vld [vmem:[#allocation3 + $0x97] sm:$0xff]  ;;  %v12941_v20 = vld [vmem:[%s10919_s29] sm:$0xff]  }
 0x4e0   : > { %10144 = vpow2.f32 %v6561_v62  ;;  %v6563_v0 = vmul.f32 1.442695, %v6486_v63  ;;  %v6338_v31 = vadd.f32 %v6266_v29, %v6004_v36  ;;  %v6007_v41 = vadd.f32 %v6006_v13, %v5686_v26  ;;  %v12935_v26 = vld [vmem:[%s10919_s29 + $0x8] sm:$0xff]   ;;  %v6270_v62 = vld [vmem:[#allocation3 + $0x331] sm:$0xff] }
 0x4e1   : > { %v10135_v34 = vpop.eup %10134  ;;  %10146 = vpow2.f32 %v6567_v57  ;;  %v12920_v45 = vadd.f32 %v12879_v30, %v6340_v2  ;;  %v6341_v9 = vadd.f32 %v6269_v16, %v6015_v39  ;;  %v5698_v53 = vpop.f32.mrb[20].mxu0  ;;  %v8286_v57 = vunpack.c.l.bf16 %v12935_v26 }
 0x4e2   : > { %v10137_v42 = vpop.eup %10136  ;;  %v6699_v8 = vadd.f32 1.0, %v10135_v34  ;;  %10148 = vpow2.f32 %v6563_v0  ;;  %v12923_v47 = vadd.f32 %v12879_v30, %v6338_v31  ;;  %v6339_v19 = vadd.f32 %v6267_v18, %v6007_v41  ;;  %v5700_v50 = vpop.f32.mrb[21].mxu0  ;;  %v6271_v31 = vld [vmem:[#allocation3 + $0x339] sm:$0xff] }
 0x4e3   : > { %v10139_v43 = vpop.eup %10138  ;;  %v6697_v46 = vadd.f32 1.0, %v10137_v42  ;;  %v6491_v33 = vsub.f32 0.0, %v12920_v45  ;;  %v12927_v23 = vadd.f32 %v12879_v30, %v6341_v9  ;;  %v5699_v6 = vadd.f32 %v5698_v53, %v5412_v3  ;;  %v5701_v56 = vpop.f32.mrb[22].mxu0 }
 0x4e4   : > { %v10141_v52 = vpop.eup %10140  ;;  %10150 = vrcp.f32 %v6699_v8  ;;  %v6700_v37 = vadd.f32 1.0, %v10139_v43  ;;  %v6489_v7 = vsub.f32 0.0, %v12923_v47  ;;  %v9311_v59 = vpop.f32.mrb[80].mxu1  ;;  %v12931_v15 = vadd.f32 %v12879_v30, %v6339_v19 }
 0x4e5   : > { %10152 = vrcp.f32 %v6697_v46  ;;  %v6698_v10 = vadd.f32 1.0, %v10141_v52  ;;  %v6019_v58 = vpop.f32.mrb[81].mxu1  ;;  %v6573_v51 = vmul.f32 1.442695, %v6491_v33  ;;  %v6492_v60 = vsub.f32 0.0, %v12927_v23  ;;  %v5703_v27 = vpop.f32.mrb[23].mxu0 }
 0x4e6   : > { %10154 = vrcp.f32 %v6700_v37  ;;  %v6569_v48 = vmul.f32 1.442695, %v6489_v7  ;;  %v6490_v54 = vsub.f32 0.0, %v12931_v15  ;;  %v12938_v22 = vpop.f32.mrb[82].mxu1  ;;  %v6020_v24 = vadd.f32 %v6019_v58, %v5699_v6  ;;  %5913 = vmatmul.mubr.bf16.gmra.mrb[128].mxu0 %v12229_v55  ;;  %v5414_v55 = vld [vmem:[#allocation3 + $0x9f] sm:$0xff]  ;;  %v12955_v46 = vld [vmem:[%s10919_s29 + $0x10] sm:$0xff]  }
 0x4e7   : > { %10156 = vrcp.f32 %v6698_v10  ;;  %v6022_v12 = vpop.f32.mrb[83].mxu1  ;;  %v6575_v28 = vmul.f32 1.442695, %v6492_v60  ;;  %v5702_v63 = vadd.f32 %v5701_v56, %v5413_v44  ;;  %5920 = vmatprep.mubr.bf16.mxu0 %v12257_v61  ;;  %v8282_v2 = vunpack.c.l.bf16 %v12941_v20  ;;  %v5415_v37 = vld [vmem:[#allocation3 + $0xa7] sm:$0xff] }
 0x4e8   : > { %10158 = vpow2.f32 %v6569_v48  ;;  %v6571_v40 = vmul.f32 1.442695, %v6490_v54  ;;  %v6342_v36 = vadd.f32 %v6270_v62, %v6020_v24  ;;  %v8287_v8 = vunpack.c.h.bf16 %v12935_v26  ;;  %v6272_v60 = vld [vmem:[#allocation3 + $0x341] sm:$0xff] }
 0x4e9   : > { %v10143_v35 = vpop.eup %10142  ;;  %10160 = vpow2.f32 %v6573_v51  ;;  %v6023_v13 = vadd.f32 %v6022_v12, %v5702_v63  ;;  %v5706_v41 = vpop.f32.mrb[24].mxu0  ;;  %v8283_v10 = vunpack.c.h.bf16 %v12941_v20  ;;  %v8290_v12 = vunpack.c.l.bf16 %v12955_v46 }
 0x4ea   : > { %v10145_v29 = vpop.eup %10144  ;;  %v6703_v39 = vadd.f32 1.0, %v10143_v35  ;;  %10162 = vpow2.f32 %v6571_v40  ;;  %v12948_v0 = vadd.f32 %v12879_v30, %v6342_v36  ;;  %v5707_v18 = vadd.f32 %v5706_v41, %v5414_v55  ;;  %v5708_v9 = vpop.f32.mrb[25].mxu0  ;;  %v5416_v41 = vld [vmem:[#allocation3 + $0xaf] sm:$0xff] }
 0x4eb   : > { %v10147_v16 = vpop.eup %10146  ;;  %v6701_v34 = vadd.f32 1.0, %v10145_v29  ;;  %10164 = vpow2.f32 %v6575_v28  ;;  %v6343_v61 = vadd.f32 %v6271_v31, %v6023_v13  ;;  %v5709_v43 = vpop.f32.mrb[26].mxu0  ;;  %v8291_v63 = vunpack.c.h.bf16 %v12955_v46 }
 0x4ec   : > { %v10149_v42 = vpop.eup %10148  ;;  %10166 = vrcp.f32 %v6703_v39  ;;  %v6704_v19 = vadd.f32 1.0, %v10147_v16  ;;  %v12951_v3 = vpop.f32.mrb[84].mxu1  ;;  %v6493_v53 = vsub.f32 0.0, %v12948_v0  ;;  %v6028_v52 = vadd.f32 %v9311_v59, %v5707_v18 }
 0x4ed   : > { %10168 = vrcp.f32 %v6701_v34  ;;  %v6702_v33 = vadd.f32 1.0, %v10149_v42  ;;  %v12957_v6 = vpop.f32.mrb[85].mxu1  ;;  %v12960_v50 = vadd.f32 %v12879_v30, %v6343_v61  ;;  %v5711_v7 = vpop.f32.mrb[27].mxu0  ;;  %v5710_v27 = vadd.f32 %v5709_v43, %v5415_v37 }
 0x4ee   : > { %v10151_v56 = vpop.eup %10150  ;;  %10170 = vrcp.f32 %v6704_v19  ;;  %v12963_v58 = vpop.f32.mrb[86].mxu1  ;;  %v6577_v51 = vmul.f32 1.442695, %v6493_v53  ;;  %v6344_v59 = vadd.f32 %v6272_v60, %v6028_v52  ;;  %5921 = vmatmul.mubr.bf16.gmra.mrb[132].mxu0 %v12239_v17  ;;  %v6273_v17 = vld [vmem:[#allocation3 + $0x349] sm:$0xff]  ;;  %v5417_v60 = vld [vmem:[#allocation3 + $0xb7] sm:$0xff] }
 0x4ef   : > { %v10153_v26 = vpop.eup %10152  ;;  %v6843_v48 = vmul.f32 %v10151_v56, %v12884_v11  ;;  %10172 = vrcp.f32 %v6702_v33  ;;  %v12966_v54 = vpop.f32.mrb[87].mxu1  ;;  %v6494_v24 = vsub.f32 0.0, %v12960_v50  ;;  %v6031_v28 = vadd.f32 %v12938_v22, %v5710_v27  ;;  %5928 = vmatprep.mubr.bf16.mxu0 %v12255_v5 }
 0x4f0   : > { %v10155_v44 = vpop.eup %10154  ;;  %v6841_v20 = vmul.f32 %v10153_v26, %v12887_v14  ;;  %10174 = vpow2.f32 %v6577_v51  ;;  %v12977_v36 = vadd.f32 %v12879_v30, %v6344_v59 }
 0x4f1   : > { %v10157_v62 = vpop.eup %10156  ;;  %v6844_v11 = vmul.f32 %v10155_v44, %v12891_v49  ;;  %v6579_v40 = vmul.f32 1.442695, %v6494_v24  ;;  %v7059_v13 = vadd.f32 %v8286_v57, %v6843_v48  ;;  %v6345_v39 = vadd.f32 %v6273_v17, %v6031_v28  ;;  %v5714_v31 = vpop.f32.mrb[28].mxu0 }
 0x4f2   : > { %v10159_v35 = vpop.eup %10158  ;;  %v7057_v14 = vadd.f32 %v8282_v2, %v6841_v20  ;;  %v6842_v29 = vmul.f32 %v10157_v62, %v12895_v4  ;;  %v6495_v49 = vsub.f32 0.0, %v12977_v36  ;;  %v5716_v16 = vpop.f32.mrb[29].mxu0  ;;  %v5715_v4 = vadd.f32 %v5714_v31, %v5416_v41 }
 0x4f3   : > { %v10161_v22 = vpop.eup %10160  ;;  %v7060_v5 = vadd.f32 %v8287_v8, %v6844_v11  ;;  %v6705_v55 = vadd.f32 1.0, %v10159_v35  ;;  %10176 = vpow2.f32 %v6579_v40  ;;  %v12984_v57 = vadd.f32 %v12879_v30, %v6345_v39  ;;  %v5717_v2 = vpop.f32.mrb[30].mxu0  ;;  %v8641_v8 = vld [vmem:[%s10919_s29 + $0x18] sm:$0xff]   ;;  %v13002_v35 = vld [vmem:[%s10919_s29 + $0x20] sm:$0xff]  }
 0x4f4   : > { %v10163_v34 = vpop.eup %10162  ;;  %v7058_v61 = vadd.f32 %v8283_v10, %v6842_v29  ;;  %v6707_v18 = vadd.f32 1.0, %v10161_v22  ;;  %v12981_v9 = vpop.f32.mrb[88].mxu1  ;;  %v6581_v33 = vmul.f32 1.442695, %v6495_v49  ;;  %v6036_v24 = vadd.f32 %v12957_v6, %v5715_v4  ;;  %v6274_v11 = vld [vmem:[#allocation3 + $0x351] sm:$0xff]  ;;  %v5418_v29 = vld [vmem:[#allocation3 + $0xbf] sm:$0xff] }
 0x4f5   : > { %v10165_v42 = vpop.eup %10164  ;;  %v8432_v19 = vpack.c.bf16 %v7060_v5, %v7059_v13  ;;  %10178 = vrcp.f32 %v6705_v55  ;;  %v6706_v53 = vadd.f32 1.0, %v10163_v34  ;;  %v12987_v43 = vpop.f32.mrb[89].mxu1  ;;  %v6496_v51 = vsub.f32 0.0, %v12984_v57  ;;  %v8643_v34 = vld [vmem:[%s10919_s29 + $0x28] sm:$0xff]  }
 0x4f6   : > { %v5719_v52 = vpop.f32.mrb[31].mxu0  ;;  %v10167_v37 = vpop.eup %10166  ;;  %v8427_v7 = vpack.c.bf16 %v7058_v61, %v7057_v14  ;;  %10180 = vrcp.f32 %v6707_v18  ;;  %v6708_v56 = vadd.f32 1.0, %v10165_v42  ;;  %v5718_v59 = vadd.f32 %v5717_v2, %v5417_v60  ;;  %5929 = vmatmul.mubr.bf16.gmra.mrb[136].mxu0 %v12236_v38 }
 0x4f7   : > { %v12989_v10 = vpop.f32.mrb[90].mxu1  ;;  %v10169_v27 = vpop.eup %10168  ;;  %8674 = vst [vmem:[%s10919_s29 + $0x8] sm:$0xff] %v8432_v19   ;;  %v6847_v26 = vmul.f32 %v10167_v37, %v12902_v32  ;;  %10182 = vrcp.f32 %v6706_v53  ;;  %v8294_v28 = vunpack.c.l.bf16 %v8641_v8  ;;  %v6583_v62 = vmul.f32 1.442695, %v6496_v51  ;;  %v6276_v37 = vld [vmem:[#allocation3 + $0x361] sm:$0xff] }
 0x4f8   : > { %v12994_v48 = vpop.f32.mrb[91].mxu1  ;;  %v10171_v44 = vpop.eup %10170  ;;  %8428 = vst [vmem:[%s10919_s29] sm:$0xff] %v8427_v7   ;;  %v6845_v20 = vmul.f32 %v10169_v27, %v12905_v1  ;;  %10184 = vrcp.f32 %v6708_v56  ;;  %v8295_v17 = vunpack.c.h.bf16 %v8641_v8  ;;  %v6346_v13 = vadd.f32 %v6274_v11, %v6036_v24  ;;  %v5419_v8 = vld [vmem:[#allocation3 + $0xc7] sm:$0xff] }
 0x4f9   : > { %v10173_v40 = vpop.eup %10172  ;;  %v6848_v32 = vmul.f32 %v10171_v44, %v12909_v25  ;;  %10186 = vpow2.f32 %v6581_v33  ;;  %v7063_v14 = vadd.f32 %v8294_v28, %v6847_v26  ;;  %v6039_v1 = vadd.f32 %v12966_v54, %v5718_v59  ;;  %v5722_v39 = vpop.f32.mrb[32].mxu0  ;;  %v6275_v25 = vld [vmem:[#allocation3 + $0x359] sm:$0xff] }
 0x4fa   : > { %v10175_v6 = vpop.eup %10174  ;;  %v6846_v38 = vmul.f32 %v10173_v40, %v12913_v21  ;;  %10188 = vpow2.f32 %v6583_v62  ;;  %v13007_v5 = vadd.f32 %v12879_v30, %v6346_v13  ;;  %v5723_v55 = vadd.f32 %v5722_v39, %v5418_v29  ;;  %v5724_v49 = vpop.f32.mrb[33].mxu0 }
 0x4fb   : > { %v7064_v31 = vadd.f32 %v8295_v17, %v6848_v32  ;;  %v6709_v22 = vadd.f32 1.0, %v10175_v6  ;;  %v7061_v41 = vadd.f32 %v8290_v12, %v6845_v20  ;;  %v8298_v16 = vunpack.c.l.bf16 %v13002_v35  ;;  %v5725_v18 = vpop.f32.mrb[34].mxu0  ;;  %v6277_v32 = vld [vmem:[#allocation3 + $0x369] sm:$0xff] }
 0x4fc   : > { %v7062_v21 = vadd.f32 %v8291_v63, %v6846_v38  ;;  %v13015_v54 = vpop.f32.mrb[92].mxu1  ;;  %v6347_v61 = vadd.f32 %v6275_v25, %v6039_v1  ;;  %v6497_v19 = vsub.f32 0.0, %v13007_v5  ;;  %v6044_v12 = vadd.f32 %v12951_v3, %v5723_v55  ;;  %v5727_v46 = vpop.f32.mrb[35].mxu0  ;;  %v5420_v38 = vld [vmem:[#allocation3 + $0xcf] sm:$0xff] }
 0x4fd   : > { %v10177_v4 = vpop.eup %10176  ;;  %v8442_v2 = vpack.c.bf16 %v7064_v31, %v7063_v14  ;;  %10190 = vrcp.f32 %v6709_v22  ;;  %v13017_v42 = vpop.f32.mrb[93].mxu1  ;;  %v5726_v7 = vadd.f32 %v5725_v18, %v5419_v8  ;;  %v8299_v51 = vunpack.c.h.bf16 %v13002_v35  ;;  %v5421_v18 = vld [vmem:[#allocation3 + $0xd7] sm:$0xff] }
 0x4fe   : > { %v8437_v63 = vpack.c.bf16 %v7062_v21, %v7061_v41  ;;  %v6710_v53 = vadd.f32 1.0, %v10177_v4  ;;  %v13021_v33 = vpop.f32.mrb[94].mxu1  ;;  %v13024_v52 = vadd.f32 %v12879_v30, %v6347_v61  ;;  %v8302_v60 = vunpack.c.l.bf16 %v8643_v34  ;;  %v6278_v8 = vld [vmem:[#allocation3 + $0x371] sm:$0xff] }
 0x4ff   : > { %v10179_v56 = vpop.eup %10178  ;;  %8676 = vst [vmem:[%s10919_s29 + $0x18] sm:$0xff] %v8442_v2   ;;  %v13028_v27 = vpop.f32.mrb[95].mxu1  ;;  %v6585_v3 = vmul.f32 1.442695, %v6497_v19  ;;  %v6348_v26 = vadd.f32 %v6276_v37, %v6044_v12  ;;  %v6047_v20 = vadd.f32 %v12963_v58, %v5726_v7  ;;  %v8303_v11 = vunpack.c.h.bf16 %v8643_v34  ;;  %v8644_v37 = vld [vmem:[%s10919_s29 + $0x30] sm:$0xff]  }
 0x500   : > { %v10181_v24 = vpop.eup %10180  ;;  %8675 = vst [vmem:[%s10919_s29 + $0x10] sm:$0xff] %v8437_v63   ;;  %v6849_v59 = vmul.f32 %v10179_v56, %v12923_v47  ;;  %10192 = vrcp.f32 %v6710_v53  ;;  %v6498_v44 = vsub.f32 0.0, %v13024_v52 }
 0x501   : > { %v10183_v28 = vpop.eup %10182  ;;  %v6851_v62 = vmul.f32 %v10181_v24, %v12920_v45  ;;  %10194 = vpow2.f32 %v6585_v3  ;;  %v13036_v40 = vadd.f32 %v12879_v30, %v6348_v26  ;;  %v6349_v47 = vadd.f32 %v6277_v32, %v6047_v20  ;;  %v5730_v14 = vpop.f32.mrb[36].mxu0  ;;  %v6279_v26 = vld [vmem:[#allocation3 + $0x379] sm:$0xff] }
 0x502   : > { %v10185_v17 = vpop.eup %10184  ;;  %v7065_v35 = vadd.f32 %v8298_v16, %v6849_v59  ;;  %v6850_v13 = vmul.f32 %v10183_v28, %v12931_v15  ;;  %v6587_v6 = vmul.f32 1.442695, %v6498_v44  ;;  %v5731_v39 = vadd.f32 %v5730_v14, %v5420_v38  ;;  %v5732_v31 = vpop.f32.mrb[37].mxu0  ;;  %v5422_v20 = vld [vmem:[#allocation3 + $0xdf] sm:$0xff]  ;;  %v5423_v38 = vld [vmem:[#allocation3 + $0xe7] sm:$0xff] }
 0x503   : > { %v10187_v1 = vpop.eup %10186  ;;  %v7067_v29 = vadd.f32 %v8302_v60, %v6851_v62  ;;  %v6852_v58 = vmul.f32 %v10185_v17, %v12927_v23  ;;  %v6499_v45 = vsub.f32 0.0, %v13036_v40  ;;  %v13044_v15 = vadd.f32 %v12879_v30, %v6349_v47  ;;  %v5733_v41 = vpop.f32.mrb[38].mxu0 }
 0x504   : > { %v10189_v22 = vpop.eup %10188  ;;  %v7066_v25 = vadd.f32 %v8299_v51, %v6850_v13  ;;  %v6711_v55 = vadd.f32 1.0, %v10187_v1  ;;  %v13041_v49 = vpop.f32.mrb[96].mxu1  ;;  %10196 = vpow2.f32 %v6587_v6  ;;  %v6052_v61 = vadd.f32 %v12987_v43, %v5731_v39 }
 0x505   : > { %v7068_v21 = vadd.f32 %v8303_v11, %v6852_v58  ;;  %v6712_v16 = vadd.f32 1.0, %v10189_v22  ;;  %v13046_v34 = vpop.f32.mrb[97].mxu1  ;;  %v6589_v23 = vmul.f32 1.442695, %v6499_v45  ;;  %v5735_v4 = vpop.f32.mrb[39].mxu0  ;;  %v6500_v12 = vsub.f32 0.0, %v13044_v15 }
 0x506   : > { %v8447_v2 = vpack.c.bf16 %v7066_v25, %v7065_v35  ;;  %10198 = vrcp.f32 %v6711_v55  ;;  %v13049_v19 = vpop.f32.mrb[98].mxu1  ;;  %v5734_v46 = vadd.f32 %v5733_v41, %v5421_v18  ;;  %v6350_v56 = vadd.f32 %v6278_v8, %v6052_v61  ;;  %v8645_v22 = vld [vmem:[%s10919_s29 + $0x38] sm:$0xff]   ;;  %v6280_v41 = vld [vmem:[#allocation3 + $0x381] sm:$0xff] }
 0x507   : > { %v10191_v63 = vpop.eup %10190  ;;  %v8452_v53 = vpack.c.bf16 %v7068_v21, %v7067_v29  ;;  %10200 = vrcp.f32 %v6712_v16  ;;  %v13053_v7 = vpop.f32.mrb[99].mxu1  ;;  %v6591_v51 = vmul.f32 1.442695, %v6500_v12  ;;  %v8306_v59 = vunpack.c.l.bf16 %v8644_v37 }
 0x508   : > { %8677 = vst [vmem:[%s10919_s29 + $0x20] sm:$0xff] %v8447_v2   ;;  %v6853_v43 = vmul.f32 %v10191_v63, %v12948_v0  ;;  %10202 = vpow2.f32 %v6589_v23  ;;  %v6055_v60 = vadd.f32 %v12994_v48, %v5734_v46  ;;  %v13060_v3 = vadd.f32 %v12879_v30, %v6350_v56  ;;  %v6281_v63 = vld [vmem:[#allocation3 + $0x389] sm:$0xff] }
 0x509   : > { %8678 = vst [vmem:[%s10919_s29 + $0x28] sm:$0xff] %v8452_v53   ;;  %10204 = vpow2.f32 %v6591_v51  ;;  %v5738_v28 = vpop.f32.mrb[40].mxu0  ;;  %v8307_v32 = vunpack.c.h.bf16 %v8644_v37  ;;  %v8310_v8 = vunpack.c.l.bf16 %v8645_v22  ;;  %v8311_v56 = vunpack.c.h.bf16 %v8645_v22  ;;  %v5424_v51 = vld [vmem:[#allocation3 + $0xef] sm:$0xff] }
 0x50a   : > { %v10193_v24 = vpop.eup %10192  ;;  %v6351_v44 = vadd.f32 %v6279_v26, %v6055_v60  ;;  %v6501_v0 = vsub.f32 0.0, %v13060_v3  ;;  %v5739_v17 = vadd.f32 %v5738_v28, %v5422_v20  ;;  %v5740_v48 = vpop.f32.mrb[41].mxu0  ;;  %v7069_v35 = vadd.f32 %v8306_v59, %v6853_v43 }
 0x50b   : > { %v10195_v62 = vpop.eup %10194  ;;  %v6854_v11 = vmul.f32 %v10193_v24, %v12960_v50  ;;  %v5741_v14 = vpop.f32.mrb[42].mxu0  ;;  %v5425_v48 = vld [vmem:[#allocation3 + $0xf7] sm:$0xff] }
 0x50c   : > { %v6713_v13 = vadd.f32 1.0, %v10195_v62  ;;  %v13064_v6 = vpop.f32.mrb[100].mxu1  ;;  %v13067_v47 = vadd.f32 %v12879_v30, %v6351_v44  ;;  %v6593_v58 = vmul.f32 1.442695, %v6501_v0  ;;  %v6060_v50 = vadd.f32 %v12981_v9, %v5739_v17  ;;  %v5743_v39 = vpop.f32.mrb[43].mxu0 }
 0x50d   : > { %v7070_v1 = vadd.f32 %v8307_v32, %v6854_v11  ;;  %v13069_v29 = vpop.f32.mrb[101].mxu1  ;;  %v5742_v45 = vadd.f32 %v5741_v14, %v5423_v38 }
 0x50e   : > { %v10197_v31 = vpop.eup %10196  ;;  %10206 = vrcp.f32 %v6713_v13  ;;  %v13073_v25 = vpop.f32.mrb[102].mxu1  ;;  %v6502_v55 = vsub.f32 0.0, %v13067_v47  ;;  %v6352_v61 = vadd.f32 %v6280_v41, %v6060_v50 }
 0x50f   : > { %v8457_v21 = vpack.c.bf16 %v7070_v1, %v7069_v35  ;;  %v6714_v16 = vadd.f32 1.0, %v10197_v31  ;;  %v13076_v23 = vpop.f32.mrb[103].mxu1  ;;  %10208 = vpow2.f32 %v6593_v58  ;;  %v6063_v9 = vadd.f32 %v12989_v10, %v5742_v45  ;;  %v6282_v1 = vld [vmem:[#allocation3 + $0x391] sm:$0xff]  ;;  %v8646_v31 = vld [vmem:[%s10919_s29 + $0x40] sm:$0xff]  }
 0x510   : > { %v10199_v18 = vpop.eup %10198  ;;  %v6595_v4 = vmul.f32 1.442695, %v6502_v55  ;;  %v13082_v46 = vadd.f32 %v12879_v30, %v6352_v61 }
 0x511   : > { %v10201_v2 = vpop.eup %10200  ;;  %8679 = vst [vmem:[%s10919_s29 + $0x30] sm:$0xff] %v8457_v21   ;;  %v6855_v12 = vmul.f32 %v10199_v18, %v12977_v36  ;;  %10210 = vrcp.f32 %v6714_v16  ;;  %v6353_v43 = vadd.f32 %v6281_v63, %v6063_v9  ;;  %v5746_v60 = vpop.f32.mrb[44].mxu0  ;;  %v6283_v21 = vld [vmem:[#allocation3 + $0x399] sm:$0xff] }
 0x512   : > { %v10203_v53 = vpop.eup %10202  ;;  %v6856_v37 = vmul.f32 %v10201_v2, %v12984_v57  ;;  %10212 = vpow2.f32 %v6595_v4  ;;  %v6503_v10 = vsub.f32 0.0, %v13082_v46  ;;  %v5747_v24 = vadd.f32 %v5746_v60, %v5424_v51  ;;  %v5748_v59 = vpop.f32.mrb[45].mxu0  ;;  %v5426_v4 = vld [vmem:[#allocation3 + $0xff] sm:$0xff]  ;;  %v5427_v51 = vld [vmem:[#allocation3 + $0x107] sm:$0xff] }
 0x513   : > { %v6715_v26 = vadd.f32 1.0, %v10203_v53  ;;  %v10205_v36 = vpop.eup %10204  ;;  %v7071_v44 = vadd.f32 %v8310_v8, %v6855_v12  ;;  %v13089_v62 = vadd.f32 %v12879_v30, %v6353_v43  ;;  %v5749_v11 = vpop.f32.mrb[46].mxu0  ;;  %v8314_v12 = vunpack.c.l.bf16 %v8646_v31 }
 0x514   : > { %v7072_v20 = vadd.f32 %v8311_v56, %v6856_v37  ;;  %v13086_v28 = vpop.f32.mrb[104].mxu1  ;;  %v6716_v57 = vadd.f32 1.0, %v10205_v36  ;;  %v6597_v0 = vmul.f32 1.442695, %v6503_v10  ;;  %v6068_v17 = vadd.f32 %v13017_v42, %v5747_v24  ;;  %v5751_v35 = vpop.f32.mrb[47].mxu0 }
 0x515   : > { %10214 = vrcp.f32 %v6715_v26  ;;  %v13091_v32 = vpop.f32.mrb[105].mxu1  ;;  %v6504_v14 = vsub.f32 0.0, %v13089_v62  ;;  %v5750_v58 = vadd.f32 %v5749_v11, %v5425_v48  ;;  %v8315_v56 = vunpack.c.h.bf16 %v8646_v31  ;;  %v8647_v48 = vld [vmem:[%s10919_s29 + $0x48] sm:$0xff]  }
 0x516   : > { %v8462_v13 = vpack.c.bf16 %v7072_v20, %v7071_v44  ;;  %v13094_v38 = vpop.f32.mrb[106].mxu1  ;;  %10216 = vrcp.f32 %v6716_v57  ;;  %v6354_v45 = vadd.f32 %v6282_v1, %v6068_v17 }
 0x517   : > { %v13097_v50 = vpop.f32.mrb[107].mxu1  ;;  %10218 = vpow2.f32 %v6597_v0  ;;  %v6599_v22 = vmul.f32 1.442695, %v6504_v14  ;;  %v6071_v42 = vadd.f32 %v13028_v27, %v5750_v58  ;;  %v6284_v0 = vld [vmem:[#allocation3 + $0x3a1] sm:$0xff] }
 0x518   : > { %v10207_v39 = vpop.eup %10206  ;;  %8680 = vst [vmem:[%s10919_s29 + $0x38] sm:$0xff] %v8462_v13   ;;  %v13103_v41 = vadd.f32 %v12879_v30, %v6354_v45  ;;  %v6285_v45 = vld [vmem:[#allocation3 + $0x3a9] sm:$0xff] }
 0x519   : > { %v10209_v55 = vpop.eup %10208  ;;  %v6857_v16 = vmul.f32 %v10207_v39, %v13007_v5  ;;  %10220 = vpow2.f32 %v6599_v22  ;;  %v6355_v18 = vadd.f32 %v6283_v21, %v6071_v42  ;;  %v5754_v9 = vpop.f32.mrb[48].mxu0 }
 0x51a   : > { %v6717_v61 = vadd.f32 1.0, %v10209_v55  ;;  %v6505_v8 = vsub.f32 0.0, %v13103_v41  ;;  %v5755_v63 = vadd.f32 %v5754_v9, %v5426_v4  ;;  %v5756_v53 = vpop.f32.mrb[49].mxu0  ;;  %v8318_v55 = vunpack.c.l.bf16 %v8647_v48 }
 0x51b   : > { %v10211_v2 = vpop.eup %10210  ;;  %v13111_v5 = vadd.f32 %v12879_v30, %v6355_v18  ;;  %v5757_v60 = vpop.f32.mrb[50].mxu0  ;;  %v7073_v20 = vadd.f32 %v8314_v12, %v6857_v16  ;;  %v8319_v16 = vunpack.c.h.bf16 %v8647_v48 }
 0x51c   : > { %v10213_v37 = vpop.eup %10212  ;;  %v6858_v27 = vmul.f32 %v10211_v2, %v13024_v52  ;;  %10222 = vrcp.f32 %v6717_v61  ;;  %v13108_v43 = vpop.f32.mrb[108].mxu1  ;;  %v6601_v24 = vmul.f32 1.442695, %v6505_v8  ;;  %v6076_v59 = vadd.f32 %v13015_v54, %v5755_v63  ;;  %v5428_v61 = vld [vmem:[#allocation3 + $0x10f] sm:$0xff] }
 0x51d   : > { %v6718_v26 = vadd.f32 1.0, %v10213_v37  ;;  %v13113_v10 = vpop.f32.mrb[109].mxu1  ;;  %v5758_v36 = vadd.f32 %v5757_v60, %v5427_v51  ;;  %v5759_v44 = vpop.f32.mrb[51].mxu0  ;;  %v6506_v57 = vsub.f32 0.0, %v13111_v5  ;;  %v5429_v37 = vld [vmem:[#allocation3 + $0x117] sm:$0xff] }
 0x51e   : > { %v7074_v52 = vadd.f32 %v8315_v56, %v6858_v27  ;;  %v13116_v11 = vpop.f32.mrb[110].mxu1  ;;  %v6356_v13 = vadd.f32 %v6284_v0, %v6076_v59  ;;  %v8648_v59 = vld [vmem:[%s10919_s29 + $0x50] sm:$0xff]  }
 0x51f   : > { %v10215_v17 = vpop.eup %10214  ;;  %10224 = vrcp.f32 %v6718_v26  ;;  %v13120_v35 = vpop.f32.mrb[111].mxu1  ;;  %v6079_v14 = vadd.f32 %v13021_v33, %v5758_v36  ;;  %v6603_v58 = vmul.f32 1.442695, %v6506_v57  ;;  %v6286_v0 = vld [vmem:[#allocation3 + $0x3b1] sm:$0xff] }
 0x520   : > { %v8467_v1 = vpack.c.bf16 %v7074_v52, %v7073_v20  ;;  %v6859_v54 = vmul.f32 %v10215_v17, %v13036_v40  ;;  %10226 = vpow2.f32 %v6601_v24  ;;  %v10217_v39 = vpop.eup %10216  ;;  %v13125_v31 = vadd.f32 %v12879_v30, %v6356_v13 }
 0x521   : > { %v6357_v22 = vadd.f32 %v6285_v45, %v6079_v14  ;;  %v10219_v42 = vpop.eup %10218  ;;  %v6860_v21 = vmul.f32 %v10217_v39, %v13044_v15  ;;  %10228 = vpow2.f32 %v6603_v58  ;;  %v5762_v33 = vpop.f32.mrb[52].mxu0  ;;  %v8323_v45 = vunpack.c.h.bf16 %v8648_v59  ;;  %v13151_v39 = vld [vmem:[%s13534_s6] ss:$0 sm:$0xff] }
 0x522   : > { %8681 = vst [vmem:[%s10919_s29 + $0x40] sm:$0xff] %v8467_v1   ;;  %v6719_v18 = vadd.f32 1.0, %v10219_v42  ;;  %v6507_v40 = vsub.f32 0.0, %v13125_v31  ;;  %v5763_v9 = vadd.f32 %v5762_v33, %v5428_v61  ;;  %v5764_v2 = vpop.f32.mrb[53].mxu0  ;;  %v7075_v8 = vadd.f32 %v8318_v55, %v6859_v54  ;;  %v6287_v54 = vld [vmem:[#allocation3 + $0x3b9] sm:$0xff] }
 0x523   : > { %v13131_v4 = vadd.f32 %v12879_v30, %v6357_v22  ;;  %v10221_v12 = vpop.eup %10220  ;;  %v7076_v63 = vadd.f32 %v8319_v16, %v6860_v21  ;;  %v5765_v15 = vpop.f32.mrb[54].mxu0  ;;  %v8322_v1 = vunpack.c.l.bf16 %v8648_v59  ;;  %v5430_v42 = vld [vmem:[#allocation3 + $0x11f] sm:$0xff]  ;;  %v5431_v2 = vld [vmem:[#allocation3 + $0x127] sm:$0xff] }
 0x524   : > { %v13133_v53 = vpop.f32.mrb[112].mxu1  ;;  %10230 = vrcp.f32 %v6719_v18  ;;  %v6720_v27 = vadd.f32 1.0, %v10221_v12  ;;  %v6605_v51 = vmul.f32 1.442695, %v6507_v40  ;;  %v5767_v30 = vpop.f32.mrb[55].mxu0  ;;  %v6084_v44 = vadd.f32 %v13046_v34, %v5763_v9 }
 0x525   : > { %v13135_v56 = vpop.f32.mrb[113].mxu1  ;;  %v6508_v60 = vsub.f32 0.0, %v13131_v4  ;;  %v8472_v24 = vpack.c.bf16 %v7076_v63, %v7075_v8  ;;  %v5766_v20 = vadd.f32 %v5765_v15, %v5429_v37 }
 0x526   : > { %v10223_v26 = vpop.eup %10222  ;;  %v13139_v36 = vpop.f32.mrb[114].mxu1  ;;  %10232 = vrcp.f32 %v6720_v27  ;;  %v6358_v48 = vadd.f32 %v6286_v0, %v6084_v44  ;;  %v8649_v44 = vld [vmem:[%s10919_s29 + $0x58] sm:$0xff]  }
 0x527   : > { %v13142_v52 = vpop.f32.mrb[115].mxu1  ;;  %v6607_v57 = vmul.f32 1.442695, %v6508_v60  ;;  %8682 = vst [vmem:[%s10919_s29 + $0x48] sm:$0xff] %v8472_v24   ;;  %v6861_v17 = vmul.f32 %v10223_v26, %v13060_v3  ;;  %10234 = vpow2.f32 %v6605_v51  ;;  %v6087_v13 = vadd.f32 %v13053_v7, %v5766_v20  ;;  %v6288_v24 = vld [vmem:[#allocation3 + $0x3c1] sm:$0xff] }
 0x528   : > { %v13154_v22 = vadd.f32 %v13151_v39, %v6358_v48  ;;  %v6289_v48 = vld [vmem:[#allocation3 + $0x3c9] sm:$0xff] }
 0x529   : > { %v10225_v14 = vpop.eup %10224  ;;  %10236 = vpow2.f32 %v6607_v57  ;;  %v6359_v3 = vadd.f32 %v6287_v54, %v6087_v13  ;;  %v5770_v55 = vpop.f32.mrb[56].mxu0  ;;  %v7077_v33 = vadd.f32 %v8322_v1, %v6861_v17 }
 0x52a   : > { %v10227_v58 = vpop.eup %10226  ;;  %v6862_v34 = vmul.f32 %v10225_v14, %v13067_v47  ;;  %v5771_v21 = vadd.f32 %v5770_v55, %v5430_v42  ;;  %v5772_v16 = vpop.f32.mrb[57].mxu0  ;;  %v6509_v47 = vsub.f32 0.0, %v13154_v22 }
 0x52b   : > { %v6721_v7 = vadd.f32 1.0, %v10227_v58  ;;  %v10229_v61 = vpop.eup %10228  ;;  %v13160_v9 = vadd.f32 %v13151_v39, %v6359_v3  ;;  %v5773_v12 = vpop.f32.mrb[58].mxu0  ;;  %v8326_v58 = vunpack.c.l.bf16 %v8649_v44  ;;  %v5432_v3 = vld [vmem:[#allocation3 + $0x12f] sm:$0xff] }
 0x52c   : > { %v7078_v18 = vadd.f32 %v8323_v45, %v6862_v34  ;;  %v13156_v40 = vpop.f32.mrb[116].mxu1  ;;  %v6722_v8 = vadd.f32 1.0, %v10229_v61  ;;  %v6092_v37 = vadd.f32 %v13041_v49, %v5771_v21  ;;  %v5774_v15 = vadd.f32 %v5773_v12, %v5431_v2  ;;  %v5775_v27 = vpop.f32.mrb[59].mxu0 }
 0x52d   : > { %10238 = vrcp.f32 %v6721_v7  ;;  %v13162_v63 = vpop.f32.mrb[117].mxu1  ;;  %v6609_v30 = vmul.f32 1.442695, %v6509_v47  ;;  %v6510_v26 = vsub.f32 0.0, %v13160_v9  ;;  %v8327_v45 = vunpack.c.h.bf16 %v8649_v44  ;;  %v8650_v44 = vld [vmem:[%s10919_s29 + $0x60] sm:$0xff]  }
 0x52e   : > { %v8477_v51 = vpack.c.bf16 %v7078_v18, %v7077_v33  ;;  %v13165_v60 = vpop.f32.mrb[118].mxu1  ;;  %v10231_v59 = vpop.eup %10230  ;;  %10240 = vrcp.f32 %v6722_v8  ;;  %v6360_v57 = vadd.f32 %v6288_v24, %v6092_v37  ;;  %v6095_v0 = vadd.f32 %v13049_v19, %v5774_v15  ;;  %v5433_v15 = vld [vmem:[#allocation3 + $0x137] sm:$0xff] }
 0x52f   : > { %v13169_v20 = vpop.f32.mrb[119].mxu1  ;;  %v6863_v49 = vmul.f32 %v10231_v59, %v13082_v46  ;;  %10242 = vpow2.f32 %v6609_v30  ;;  %v6611_v17 = vmul.f32 1.442695, %v6510_v26  ;;  %v6290_v26 = vld [vmem:[#allocation3 + $0x3d1] sm:$0xff] }
 0x530   : > { %8683 = vst [vmem:[%s10919_s29 + $0x50] sm:$0xff] %v8477_v51   ;;  %v10233_v13 = vpop.eup %10232  ;;  %v13175_v14 = vadd.f32 %v13151_v39, %v6360_v57  ;;  %v6361_v1 = vadd.f32 %v6289_v48, %v6095_v0 }
 0x531   : > { %v10235_v54 = vpop.eup %10234  ;;  %v6864_v34 = vmul.f32 %v10233_v13, %v13089_v62  ;;  %10244 = vpow2.f32 %v6611_v17  ;;  %v5778_v42 = vpop.f32.mrb[60].mxu0  ;;  %v7079_v61 = vadd.f32 %v8326_v58, %v6863_v49  ;;  %v8330_v58 = vunpack.c.l.bf16 %v8650_v44 }
 0x532   : > { %v6723_v55 = vadd.f32 1.0, %v10235_v54  ;;  %v6511_v46 = vsub.f32 0.0, %v13175_v14  ;;  %v13180_v7 = vadd.f32 %v13151_v39, %v6361_v1  ;;  %v5779_v21 = vadd.f32 %v5778_v42, %v5432_v3  ;;  %v5780_v16 = vpop.f32.mrb[61].mxu0  ;;  %v6291_v1 = vld [vmem:[#allocation3 + $0x3d9] sm:$0xff] }
 0x533   : > { %v10237_v19 = vpop.eup %10236  ;;  %v7080_v33 = vadd.f32 %v8327_v45, %v6864_v34  ;;  %v5781_v62 = vpop.f32.mrb[62].mxu0  ;;  %v8331_v45 = vunpack.c.h.bf16 %v8650_v44  ;;  %v5434_v42 = vld [vmem:[#allocation3 + $0x13f] sm:$0xff] }
 0x534   : > { %v6724_v18 = vadd.f32 1.0, %v10237_v19  ;;  %v13182_v47 = vpop.f32.mrb[120].mxu1  ;;  %10246 = vrcp.f32 %v6723_v55  ;;  %v6613_v12 = vmul.f32 1.442695, %v6511_v46  ;;  %v6512_v8 = vsub.f32 0.0, %v13180_v7  ;;  %v5783_v27 = vpop.f32.mrb[63].mxu0 }
 0x535   : > { %v13184_v2 = vpop.f32.mrb[121].mxu1  ;;  %v6100_v37 = vadd.f32 %v13069_v29, %v5779_v21  ;;  %v8482_v51 = vpack.c.bf16 %v7080_v33, %v7079_v61  ;;  %v5782_v24 = vadd.f32 %v5781_v62, %v5433_v15  ;;  %v5435_v15 = vld [vmem:[#allocation3 + $0x147] sm:$0xff] }
 0x536   : > { %10248 = vrcp.f32 %v6724_v18  ;;  %v13188_v30 = vpop.f32.mrb[122].mxu1  ;;  %v6615_v0 = vmul.f32 1.442695, %v6512_v8  ;;  %v6292_v44 = vld [vmem:[#allocation3 + $0x3e1] sm:$0xff] }
 0x537   : > { %v10239_v59 = vpop.eup %10238  ;;  %v13191_v57 = vpop.f32.mrb[123].mxu1  ;;  %10250 = vpow2.f32 %v6613_v12  ;;  %v6362_v49 = vadd.f32 %v6290_v26, %v6100_v37  ;;  %8684 = vst [vmem:[%s10919_s29 + $0x58] sm:$0xff] %v8482_v51   ;;  %v6103_v29 = vadd.f32 %v13076_v23, %v5782_v24  ;;  %v8651_v26 = vld [vmem:[%s10919_s29 + $0x68] sm:$0xff]  }
 0x538   : > { %v6865_v17 = vmul.f32 %v10239_v59, %v13103_v41  ;;  %v10241_v48 = vpop.eup %10240  ;;  %10252 = vpow2.f32 %v6615_v0 }
 0x539   : > { %v13197_v13 = vadd.f32 %v13151_v39, %v6362_v49  ;;  %v10243_v54 = vpop.eup %10242  ;;  %v6866_v34 = vmul.f32 %v10241_v48, %v13111_v5  ;;  %v6363_v3 = vadd.f32 %v6291_v1, %v6103_v29  ;;  %v5786_v19 = vpop.f32.mrb[64].mxu0 }
 0x53a   : > { %v6725_v55 = vadd.f32 1.0, %v10243_v54  ;;  %v5787_v41 = vadd.f32 %v5786_v19, %v5434_v42  ;;  %v5788_v23 = vpop.f32.mrb[65].mxu0  ;;  %v7081_v16 = vadd.f32 %v8330_v58, %v6865_v17  ;;  %v6293_v19 = vld [vmem:[#allocation3 + $0x3e9] sm:$0xff] }
 0x53b   : > { %v6513_v46 = vsub.f32 0.0, %v13197_v13  ;;  %v10245_v21 = vpop.eup %10244  ;;  %v7082_v61 = vadd.f32 %v8331_v45, %v6866_v34  ;;  %v13204_v18 = vadd.f32 %v13151_v39, %v6363_v3  ;;  %v5789_v62 = vpop.f32.mrb[66].mxu0  ;;  %v8334_v34 = vunpack.c.l.bf16 %v8651_v26 }
 0x53c   : > { %v13201_v33 = vpop.f32.mrb[124].mxu1  ;;  %10254 = vrcp.f32 %v6725_v55  ;;  %v6726_v5 = vadd.f32 1.0, %v10245_v21  ;;  %v6108_v37 = vadd.f32 %v13064_v6, %v5787_v41  ;;  %v5791_v27 = vpop.f32.mrb[67].mxu0  ;;  %v5790_v0 = vadd.f32 %v5789_v62, %v5435_v15  ;;  %v5436_v41 = vld [vmem:[#allocation3 + $0x14f] sm:$0xff] }
 0x53d   : > { %v13206_v12 = vpop.f32.mrb[125].mxu1  ;;  %v6617_v8 = vmul.f32 1.442695, %v6513_v46  ;;  %v8487_v51 = vpack.c.bf16 %v7082_v61, %v7081_v16  ;;  %v6514_v59 = vsub.f32 0.0, %v13204_v18  ;;  %v8335_v3 = vunpack.c.h.bf16 %v8651_v26 }
 0x53e   : > { %v13210_v24 = vpop.f32.mrb[126].mxu1  ;;  %v10247_v49 = vpop.eup %10246  ;;  %10256 = vrcp.f32 %v6726_v5  ;;  %v6364_v29 = vadd.f32 %v6292_v44, %v6108_v37  ;;  %v6111_v54 = vadd.f32 %v13073_v25, %v5790_v0  ;;  %v5437_v37 = vld [vmem:[#allocation3 + $0x157] sm:$0xff] }
 0x53f   : > { %v13213_v17 = vpop.f32.mrb[127].mxu1  ;;  %8685 = vst [vmem:[%s10919_s29 + $0x60] sm:$0xff] %v8487_v51   ;;  %v6867_v1 = vmul.f32 %v10247_v49, %v13125_v31  ;;  %10258 = vpow2.f32 %v6617_v8  ;;  %v6619_v6 = vmul.f32 1.442695, %v6514_v59 }
 0x540   : > { %v10249_v48 = vpop.eup %10248  ;;  %v13220_v42 = vadd.f32 %v13151_v39, %v6364_v29  ;;  %v6365_v46 = vadd.f32 %v6293_v19, %v6111_v54 }
 0x541   : > { %v10251_v58 = vpop.eup %10250  ;;  %v6868_v45 = vmul.f32 %v10249_v48, %v13131_v4  ;;  %10260 = vpow2.f32 %v6619_v6  ;;  %v5794_v23 = vpop.f32.mrb[68].mxu0  ;;  %v7083_v31 = vadd.f32 %v8334_v34, %v6867_v1  ;;  %v6294_v48 = vld [vmem:[#allocation3 + $0x3f1] sm:$0xff] }
 0x542   : > { %v6727_v55 = vadd.f32 1.0, %v10251_v58  ;;  %v10253_v21 = vpop.eup %10252  ;;  %v6515_v61 = vsub.f32 0.0, %v13220_v42  ;;  %v5795_v25 = vadd.f32 %v5794_v23, %v5436_v41  ;;  %v5796_v62 = vpop.f32.mrb[69].mxu0  ;;  %v13226_v8 = vadd.f32 %v13151_v39, %v6365_v46  ;;  %v8652_v6 = vld [vmem:[%s10919_s29 + $0x70] sm:$0xff]  }
 0x543   : > { %v7084_v16 = vadd.f32 %v8335_v3, %v6868_v45  ;;  %v6728_v5 = vadd.f32 1.0, %v10253_v21  ;;  %v5797_v15 = vpop.f32.mrb[70].mxu0  ;;  %v6295_v3 = vld [vmem:[#allocation3 + $0x3f9] sm:$0xff]  ;;  %v8338_v23 = vunpack.c.l.bf16 %v8652_v6 }
 0x544   : > { %10262 = vrcp.f32 %v6727_v55  ;;  %v13223_v4 = vpop.f32.mrb[128].mxu1  ;;  %v6621_v26 = vmul.f32 1.442695, %v6515_v61  ;;  %v6116_v59 = vadd.f32 %v13091_v32, %v5795_v25  ;;  %v5798_v44 = vadd.f32 %v5797_v15, %v5437_v37  ;;  %v5799_v0 = vpop.f32.mrb[71].mxu0 }
 0x545   : > { %v8492_v27 = vpack.c.bf16 %v7084_v16, %v7083_v31  ;;  %v13228_v51 = vpop.f32.mrb[129].mxu1  ;;  %10264 = vrcp.f32 %v6728_v5  ;;  %v6516_v29 = vsub.f32 0.0, %v13226_v8  ;;  %v8339_v31 = vunpack.c.h.bf16 %v8652_v6  ;;  %v5438_v16 = vld [vmem:[#allocation3 + $0x15f] sm:$0xff] }
 0x546   : > { %v13231_v49 = vpop.f32.mrb[130].mxu1  ;;  %v10255_v1 = vpop.eup %10254  ;;  %10266 = vpow2.f32 %v6621_v26  ;;  %v6366_v58 = vadd.f32 %v6294_v48, %v6116_v59  ;;  %v6119_v34 = vadd.f32 %v13097_v50, %v5798_v44  ;;  %v5439_v59 = vld [vmem:[#allocation3 + $0x167] sm:$0xff] }
 0x547   : > { %8686 = vst [vmem:[%s10919_s29 + $0x68] sm:$0xff] %v8492_v27   ;;  %v13236_v54 = vpop.f32.mrb[131].mxu1  ;;  %v6869_v45 = vmul.f32 %v10255_v1, %v13154_v22  ;;  %v6623_v32 = vmul.f32 1.442695, %v6516_v29 }
 0x548   : > { %v10257_v19 = vpop.eup %10256  ;;  %v13241_v55 = vadd.f32 %v13151_v39, %v6366_v58  ;;  %v6367_v46 = vadd.f32 %v6295_v3, %v6119_v34  ;;  %v8653_v34 = vld [vmem:[%s10919_s29 + $0x78] sm:$0xff]  }
 0x549   : > { %v10259_v41 = vpop.eup %10258  ;;  %v6870_v21 = vmul.f32 %v10257_v19, %v13160_v9  ;;  %10268 = vpow2.f32 %v6623_v32  ;;  %v5802_v61 = vpop.f32.mrb[72].mxu0  ;;  %v7085_v15 = vadd.f32 %v8338_v23, %v6869_v45  ;;  %v6296_v23 = vld [vmem:[#allocation3 + $0x401] sm:$0xff] }
 0x54a   : > { %v6729_v25 = vadd.f32 1.0, %v10259_v41  ;;  %v6517_v50 = vsub.f32 0.0, %v13241_v55  ;;  %v13246_v22 = vadd.f32 %v13151_v39, %v6367_v46  ;;  %v5803_v62 = vadd.f32 %v5802_v61, %v5438_v16  ;;  %v5804_v5 = vpop.f32.mrb[73].mxu0 }
 0x54b   : > { %v10261_v37 = vpop.eup %10260  ;;  %v7086_v27 = vadd.f32 %v8339_v31, %v6870_v21  ;;  %v5805_v9 = vpop.f32.mrb[74].mxu0  ;;  %v8343_v5 = vunpack.c.h.bf16 %v8653_v34 }
 0x54c   : > { %v13248_v26 = vpop.f32.mrb[132].mxu1  ;;  %10270 = vrcp.f32 %v6729_v25  ;;  %v6730_v44 = vadd.f32 1.0, %v10261_v37  ;;  %v6625_v29 = vmul.f32 1.442695, %v6517_v50  ;;  %v6518_v48 = vsub.f32 0.0, %v13246_v22  ;;  %v5807_v1 = vpop.f32.mrb[75].mxu0 }
 0x54d   : > { %v13250_v0 = vpop.f32.mrb[133].mxu1  ;;  %v8497_v58 = vpack.c.bf16 %v7086_v27, %v7085_v15  ;;  %v6124_v45 = vadd.f32 %v13086_v28, %v5803_v62  ;;  %v5806_v3 = vadd.f32 %v5805_v9, %v5439_v59  ;;  %v8342_v25 = vunpack.c.l.bf16 %v8653_v34  ;;  %v6297_v28 = vld [vmem:[#allocation3 + $0x409] sm:$0xff]  ;;  %v5441_v1 = vld [vmem:[#allocation3 + $0x177] sm:$0xff] }
 0x54e   : > { %v10263_v6 = vpop.eup %10262  ;;  %v13254_v32 = vpop.f32.mrb[134].mxu1  ;;  %10272 = vrcp.f32 %v6730_v44  ;;  %v6627_v41 = vmul.f32 1.442695, %v6518_v48  ;;  %v5440_v15 = vld [vmem:[#allocation3 + $0x16f] sm:$0xff] }
 0x54f   : > { %v6871_v19 = vmul.f32 %v10263_v6, %v13175_v14  ;;  %v13258_v46 = vpop.f32.mrb[135].mxu1  ;;  %v10265_v21 = vpop.eup %10264  ;;  %8687 = vst [vmem:[%s10919_s29 + $0x70] sm:$0xff] %v8497_v58   ;;  %10274 = vpow2.f32 %v6625_v29  ;;  %v6368_v31 = vadd.f32 %v6296_v23, %v6124_v45  ;;  %v6127_v16 = vadd.f32 %v13094_v38, %v5806_v3 }
 0x550   : > { %v10267_v61 = vpop.eup %10266  ;;  %v6872_v50 = vmul.f32 %v10265_v21, %v13180_v7  ;;  %10276 = vpow2.f32 %v6627_v41  ;;  %v6298_v21 = vld [vmem:[#allocation3 + $0x411] sm:$0xff] }
 0x551   : > { %v6731_v62 = vadd.f32 1.0, %v10267_v61  ;;  %v13264_v14 = vadd.f32 %v13151_v39, %v6368_v31  ;;  %v6369_v37 = vadd.f32 %v6297_v28, %v6127_v16  ;;  %v5810_v27 = vpop.f32.mrb[76].mxu0  ;;  %v7087_v59 = vadd.f32 %v8342_v25, %v6871_v19  ;;  %v8654_v16 = vld [vmem:[%s10919_s29 + $0x80] sm:$0xff]  }
 0x552   : > { %v7088_v9 = vadd.f32 %v8343_v5, %v6872_v50  ;;  %v5811_v44 = vadd.f32 %v5810_v27, %v5440_v15  ;;  %v5812_v29 = vpop.f32.mrb[77].mxu0  ;;  %v6299_v28 = vld [vmem:[#allocation3 + $0x419] sm:$0xff]  ;;  %v8346_v27 = vunpack.c.l.bf16 %v8654_v16 }
 0x553   : > { %v10269_v38 = vpop.eup %10268  ;;  %10278 = vrcp.f32 %v6731_v62  ;;  %v6519_v7 = vsub.f32 0.0, %v13264_v14  ;;  %v13268_v48 = vadd.f32 %v13151_v39, %v6369_v37  ;;  %v5813_v6 = vpop.f32.mrb[78].mxu0 }
 0x554   : > { %v8502_v58 = vpack.c.bf16 %v7088_v9, %v7087_v59  ;;  %v6732_v34 = vadd.f32 1.0, %v10269_v38  ;;  %v6132_v45 = vadd.f32 %v13113_v10, %v5811_v44  ;;  %v5814_v3 = vadd.f32 %v5813_v6, %v5441_v1  ;;  %v5815_v19 = vpop.f32.mrb[79].mxu0  ;;  %v5442_v44 = vld [vmem:[#allocation3 + $0x17f] sm:$0xff] }
 0x555   : > { %v6629_v41 = vmul.f32 1.442695, %v6519_v7  ;;  %v6520_v23 = vsub.f32 0.0, %v13268_v48  ;;  %v8347_v9 = vunpack.c.h.bf16 %v8654_v16 }
 0x556   : > { %v10271_v31 = vpop.eup %10270  ;;  %8688 = vst [vmem:[%s10919_s29 + $0x78] sm:$0xff] %v8502_v58   ;;  %10280 = vrcp.f32 %v6732_v34  ;;  %v6370_v61 = vadd.f32 %v6298_v21, %v6132_v45  ;;  %v6135_v25 = vadd.f32 %v13120_v35, %v5814_v3 }
 0x557   : > { %v6873_v50 = vmul.f32 %v10271_v31, %v13197_v13  ;;  %10282 = vpow2.f32 %v6629_v41  ;;  %v6631_v5 = vmul.f32 1.442695, %v6520_v23  ;;  %v5443_v23 = vld [vmem:[#allocation3 + $0x187] sm:$0xff] }
 0x558   : > { %v10273_v62 = vpop.eup %10272  ;;  %v13277_v10 = vadd.f32 %v13151_v39, %v6370_v61  ;;  %v6371_v37 = vadd.f32 %v6299_v28, %v6135_v25  ;;  %v6300_v61 = vld [vmem:[#allocation3 + $0x421] sm:$0xff] }
 0x559   : > { %v10275_v15 = vpop.eup %10274  ;;  %v6874_v59 = vmul.f32 %v10273_v62, %v13204_v18  ;;  %10284 = vpow2.f32 %v6631_v5  ;;  %v5818_v29 = vpop.f32.mrb[80].mxu0  ;;  %v7089_v58 = vadd.f32 %v8346_v27, %v6873_v50  ;;  %v8655_v5 = vld [vmem:[%s10919_s29 + $0x88] sm:$0xff]  }
 0x55a   : > { %v10277_v38 = vpop.eup %10276  ;;  %v6733_v35 = vadd.f32 1.0, %v10275_v15  ;;  %v6521_v13 = vsub.f32 0.0, %v13277_v10  ;;  %v13282_v7 = vadd.f32 %v13151_v39, %v6371_v37  ;;  %v5819_v1 = vadd.f32 %v5818_v29, %v5442_v44  ;;  %v5820_v6 = vpop.f32.mrb[81].mxu0  ;;  %v6301_v27 = vld [vmem:[#allocation3 + $0x429] sm:$0xff] }
 0x55b   : > { %v7090_v34 = vadd.f32 %v8347_v9, %v6874_v59  ;;  %v6734_v45 = vadd.f32 1.0, %v10277_v38  ;;  %v5821_v3 = vpop.f32.mrb[82].mxu0  ;;  %v8350_v9 = vunpack.c.l.bf16 %v8655_v5  ;;  %v8351_v29 = vunpack.c.h.bf16 %v8655_v5 }
 0x55c   : > { %10286 = vrcp.f32 %v6733_v35  ;;  %v6633_v18 = vmul.f32 1.442695, %v6521_v13  ;;  %v6522_v19 = vsub.f32 0.0, %v13282_v7  ;;  %v6140_v41 = vadd.f32 %v13108_v43, %v5819_v1  ;;  %v5823_v21 = vpop.f32.mrb[83].mxu0  ;;  %v5444_v35 = vld [vmem:[#allocation3 + $0x18f] sm:$0xff] }
 0x55d   : > { %v10279_v31 = vpop.eup %10278  ;;  %v8507_v16 = vpack.c.bf16 %v7090_v34, %v7089_v58  ;;  %10288 = vrcp.f32 %v6734_v45  ;;  %v5822_v25 = vadd.f32 %v5821_v3, %v5443_v23  ;;  %v5445_v23 = vld [vmem:[#allocation3 + $0x197] sm:$0xff] }
 0x55e   : > { %10290 = vpow2.f32 %v6633_v18  ;;  %v6635_v50 = vmul.f32 1.442695, %v6522_v19  ;;  %v6372_v28 = vadd.f32 %v6300_v61, %v6140_v41  ;;  %v6875_v62 = vmul.f32 %v10279_v31, %v13220_v42 }
 0x55f   : > { %8689 = vst [vmem:[%s10919_s29 + $0x80] sm:$0xff] %v8507_v16   ;;  %v6143_v37 = vadd.f32 %v13116_v11, %v5822_v25  ;;  %v8656_v16 = vld [vmem:[%s10919_s29 + $0x90] sm:$0xff]  }
 0x560   : > { %v10281_v15 = vpop.eup %10280  ;;  %10292 = vpow2.f32 %v6635_v50  ;;  %v13291_v43 = vadd.f32 %v13151_v39, %v6372_v28  ;;  %v7091_v34 = vadd.f32 %v8350_v9, %v6875_v62  ;;  %v6302_v25 = vld [vmem:[#allocation3 + $0x431] sm:$0xff]  ;;  %v13301_v62 = vpop.f32.mrb[136].mxu1 }
 0x561   : > { %v10283_v59 = vpop.eup %10282  ;;  %v6876_v44 = vmul.f32 %v10281_v15, %v13226_v8  ;;  %v6373_v38 = vadd.f32 %v6301_v27, %v6143_v37  ;;  %v5826_v13 = vpop.f32.mrb[84].mxu0 }
 0x562   : > { %v6735_v1 = vadd.f32 1.0, %v10283_v59  ;;  %v6523_v42 = vsub.f32 0.0, %v13291_v43  ;;  %v5827_v6 = vadd.f32 %v5826_v13, %v5444_v35  ;;  %v5828_v11 = vpop.f32.mrb[85].mxu0  ;;  %v13306_v59 = vpop.f32.mrb[137].mxu1  ;;  %v6303_v13 = vld [vmem:[#allocation3 + $0x439] sm:$0xff] }
 0x563   : > { %v10285_v58 = vpop.eup %10284  ;;  %v7092_v45 = vadd.f32 %v8351_v29, %v6876_v44  ;;  %v13296_v3 = vadd.f32 %v13151_v39, %v6373_v38  ;;  %v5829_v18 = vpop.f32.mrb[86].mxu0  ;;  %v8354_v44 = vunpack.c.l.bf16 %v8656_v16  ;;  %v8355_v38 = vunpack.c.h.bf16 %v8656_v16 }
 0x564   : > { %10294 = vrcp.f32 %v6735_v1  ;;  %v6736_v8 = vadd.f32 1.0, %v10285_v58  ;;  %v6637_v19 = vmul.f32 1.442695, %v6523_v42  ;;  %v6148_v41 = vadd.f32 %v13135_v56, %v5827_v6  ;;  %v5831_v21 = vpop.f32.mrb[87].mxu0  ;;  %v5446_v6 = vld [vmem:[#allocation3 + $0x19f] sm:$0xff]  ;;  %v13312_v11 = vpop.f32.mrb[138].mxu1 }
 0x565   : > { %v8512_v31 = vpack.c.bf16 %v7092_v45, %v7091_v34  ;;  %v6524_v61 = vsub.f32 0.0, %v13296_v3  ;;  %v5830_v5 = vadd.f32 %v5829_v18, %v5445_v23  ;;  %v5447_v23 = vld [vmem:[#allocation3 + $0x1a7] sm:$0xff] }
 0x566   : > { %v10287_v50 = vpop.eup %10286  ;;  %10296 = vrcp.f32 %v6736_v8  ;;  %v6374_v28 = vadd.f32 %v6302_v25, %v6148_v41 }
 0x567   : > { %v10289_v37 = vpop.eup %10288  ;;  %8690 = vst [vmem:[%s10919_s29 + $0x88] sm:$0xff] %v8512_v31   ;;  %v6877_v15 = vmul.f32 %v10287_v50, %v13241_v55  ;;  %10298 = vpow2.f32 %v6637_v19  ;;  %v6639_v27 = vmul.f32 1.442695, %v6524_v61  ;;  %v6151_v56 = vadd.f32 %v13142_v52, %v5830_v5 }
 0x568   : > { %v10291_v9 = vpop.eup %10290  ;;  %v6878_v29 = vmul.f32 %v10289_v37, %v13246_v22  ;;  %v13310_v35 = vadd.f32 %v13151_v39, %v6374_v28  ;;  %v13315_v22 = vpop.f32.mrb[139].mxu1  ;;  %v6304_v28 = vld [vmem:[#allocation3 + $0x441] sm:$0xff] }
 0x569   : > { %v6737_v1 = vadd.f32 1.0, %v10291_v9  ;;  %10300 = vpow2.f32 %v6639_v27  ;;  %v6375_v42 = vadd.f32 %v6303_v13, %v6151_v56  ;;  %v5834_v55 = vpop.f32.mrb[88].mxu0  ;;  %v7093_v52 = vadd.f32 %v8354_v44, %v6877_v15  ;;  %v8657_v15 = vld [vmem:[%s10919_s29 + $0x98] sm:$0xff]  }
 0x56a   : > { %v10293_v58 = vpop.eup %10292  ;;  %v7094_v34 = vadd.f32 %v8355_v38, %v6878_v29  ;;  %v6525_v45 = vsub.f32 0.0, %v13310_v35  ;;  %v5835_v18 = vadd.f32 %v5834_v55, %v5446_v6  ;;  %v5836_v8 = vpop.f32.mrb[89].mxu0  ;;  %v6305_v29 = vld [vmem:[#allocation3 + $0x449] sm:$0xff]  ;;  %v8359_v55 = vunpack.c.h.bf16 %v8657_v15 }
 0x56b   : > { %10302 = vrcp.f32 %v6737_v1  ;;  %v6738_v19 = vadd.f32 1.0, %v10293_v58  ;;  %v13318_v41 = vadd.f32 %v13151_v39, %v6375_v42  ;;  %v5837_v21 = vpop.f32.mrb[90].mxu0  ;;  %v8358_v42 = vunpack.c.l.bf16 %v8657_v15  ;;  %v5448_v58 = vld [vmem:[#allocation3 + $0x1af] sm:$0xff] }
 0x56c   : > { %v8517_v31 = vpack.c.bf16 %v7094_v34, %v7093_v52  ;;  %v6641_v16 = vmul.f32 1.442695, %v6525_v45  ;;  %v6156_v61 = vadd.f32 %v13133_v53, %v5835_v18  ;;  %v5838_v25 = vadd.f32 %v5837_v21, %v5447_v23  ;;  %v5839_v5 = vpop.f32.mrb[91].mxu0 }
 0x56d   : > { %10304 = vrcp.f32 %v6738_v19  ;;  %v6526_v50 = vsub.f32 0.0, %v13318_v41 }
 0x56e   : > { %v10295_v37 = vpop.eup %10294  ;;  %8691 = vst [vmem:[%s10919_s29 + $0x90] sm:$0xff] %v8517_v31   ;;  %10306 = vpow2.f32 %v6641_v16  ;;  %v6376_v27 = vadd.f32 %v6304_v28, %v6156_v61  ;;  %v6159_v56 = vadd.f32 %v13139_v36, %v5838_v25  ;;  %v5449_v61 = vld [vmem:[#allocation3 + $0x1b7] sm:$0xff]  ;;  %v8658_v28 = vld [vmem:[%s10919_s29 + $0xa0] sm:$0xff]  }
 0x56f   : > { %v6879_v9 = vmul.f32 %v10295_v37, %v13264_v14  ;;  %v6643_v44 = vmul.f32 1.442695, %v6526_v50 }
 0x570   : > { %v10297_v38 = vpop.eup %10296  ;;  %v13327_v53 = vadd.f32 %v13151_v39, %v6376_v27  ;;  %v6377_v13 = vadd.f32 %v6305_v29, %v6159_v56 }
 0x571   : > { %v10299_v1 = vpop.eup %10298  ;;  %v6880_v6 = vmul.f32 %v10297_v38, %v13268_v48  ;;  %10308 = vpow2.f32 %v6643_v44  ;;  %v5842_v52 = vpop.f32.mrb[92].mxu0  ;;  %v7095_v19 = vadd.f32 %v8358_v42, %v6879_v9  ;;  %v6306_v9 = vld [vmem:[#allocation3 + $0x451] sm:$0xff] }
 0x572   : > { %v6739_v34 = vadd.f32 1.0, %v10299_v1  ;;  %v6527_v36 = vsub.f32 0.0, %v13327_v53  ;;  %v13332_v14 = vadd.f32 %v13151_v39, %v6377_v13  ;;  %v5843_v45 = vadd.f32 %v5842_v52, %v5448_v58  ;;  %v5844_v18 = vpop.f32.mrb[93].mxu0  ;;  %v5450_v52 = vld [vmem:[#allocation3 + $0x1bf] sm:$0xff] }
 0x573   : > { %v10301_v8 = vpop.eup %10300  ;;  %v7096_v23 = vadd.f32 %v8359_v55, %v6880_v6  ;;  %v5845_v21 = vpop.f32.mrb[94].mxu0  ;;  %v8362_v1 = vunpack.c.l.bf16 %v8658_v28  ;;  %v8363_v6 = vunpack.c.h.bf16 %v8658_v28  ;;  %v6307_v55 = vld [vmem:[#allocation3 + $0x459] sm:$0xff]  ;;  %v6308_v28 = vld [vmem:[#allocation3 + $0x461] sm:$0xff] }
 0x574   : > { %10310 = vrcp.f32 %v6739_v34  ;;  %v6740_v48 = vadd.f32 1.0, %v10301_v8  ;;  %v6645_v31 = vmul.f32 1.442695, %v6527_v36  ;;  %v6528_v16 = vsub.f32 0.0, %v13332_v14  ;;  %v5847_v25 = vpop.f32.mrb[95].mxu0 }
 0x575   : > { %v10303_v5 = vpop.eup %10302  ;;  %v8522_v50 = vpack.c.bf16 %v7096_v23, %v7095_v19  ;;  %v6164_v37 = vadd.f32 %v13162_v63, %v5843_v45  ;;  %v5846_v15 = vadd.f32 %v5845_v21, %v5449_v61  ;;  %v5451_v23 = vld [vmem:[#allocation3 + $0x1c7] sm:$0xff] }
 0x576   : > { %v6881_v27 = vmul.f32 %v10303_v5, %v13277_v10  ;;  %10312 = vrcp.f32 %v6740_v48  ;;  %v6647_v56 = vmul.f32 1.442695, %v6528_v16 }
 0x577   : > { %v10305_v44 = vpop.eup %10304  ;;  %8692 = vst [vmem:[%s10919_s29 + $0x98] sm:$0xff] %v8522_v50   ;;  %10314 = vpow2.f32 %v6645_v31  ;;  %v6378_v29 = vadd.f32 %v6306_v9, %v6164_v37  ;;  %v6167_v38 = vadd.f32 %v13169_v20, %v5846_v15  ;;  %v8659_v15 = vld [vmem:[%s10919_s29 + $0xa8] sm:$0xff]  }
 0x578   : > { %v10307_v13 = vpop.eup %10306  ;;  %v6882_v42 = vmul.f32 %v10305_v44, %v13282_v7  ;;  %10316 = vpow2.f32 %v6647_v56  ;;  %v7097_v36 = vadd.f32 %v8362_v1, %v6881_v27 }
 0x579   : > { %v6741_v63 = vadd.f32 1.0, %v10307_v13  ;;  %v13342_v58 = vadd.f32 %v13151_v39, %v6378_v29  ;;  %v6379_v10 = vadd.f32 %v6307_v55, %v6167_v38  ;;  %v5850_v34 = vpop.f32.mrb[96].mxu0  ;;  %v6309_v29 = vld [vmem:[#allocation3 + $0x469] sm:$0xff]  ;;  %v8367_v55 = vunpack.c.h.bf16 %v8659_v15 }
 0x57a   : > { %v7098_v45 = vadd.f32 %v8363_v6, %v6882_v42  ;;  %v5851_v18 = vadd.f32 %v5850_v34, %v5450_v52  ;;  %v5852_v8 = vpop.f32.mrb[97].mxu0  ;;  %v8366_v42 = vunpack.c.l.bf16 %v8659_v15 }
 0x57b   : > { %v10309_v20 = vpop.eup %10308  ;;  %10318 = vrcp.f32 %v6741_v63  ;;  %v6529_v7 = vsub.f32 0.0, %v13342_v58  ;;  %v13346_v19 = vadd.f32 %v13151_v39, %v6379_v10  ;;  %v5853_v21 = vpop.f32.mrb[98].mxu0  ;;  %v5452_v63 = vld [vmem:[#allocation3 + $0x1cf] sm:$0xff] }
 0x57c   : > { %v8527_v48 = vpack.c.bf16 %v7098_v45, %v7097_v36  ;;  %v6742_v31 = vadd.f32 1.0, %v10309_v20  ;;  %v6172_v16 = vadd.f32 %v13156_v40, %v5851_v18  ;;  %v5854_v61 = vadd.f32 %v5853_v21, %v5451_v23  ;;  %v5855_v25 = vpop.f32.mrb[99].mxu0 }
 0x57d   : > { %v6649_v5 = vmul.f32 1.442695, %v6529_v7  ;;  %v6530_v50 = vsub.f32 0.0, %v13346_v19  ;;  %v6310_v25 = vld [vmem:[#allocation3 + $0x471] sm:$0xff] }
 0x57e   : > { %v10311_v37 = vpop.eup %10310  ;;  %8693 = vst [vmem:[%s10919_s29 + $0xa0] sm:$0xff] %v8527_v48   ;;  %10320 = vrcp.f32 %v6742_v31  ;;  %v6380_v27 = vadd.f32 %v6308_v28, %v6172_v16  ;;  %v6175_v56 = vadd.f32 %v13165_v60, %v5854_v61  ;;  %v5453_v48 = vld [vmem:[#allocation3 + $0x1d7] sm:$0xff] }
 0x57f   : > { %v6883_v9 = vmul.f32 %v10311_v37, %v13291_v43  ;;  %10322 = vpow2.f32 %v6649_v5  ;;  %v6651_v44 = vmul.f32 1.442695, %v6530_v50  ;;  %v8660_v50 = vld [vmem:[%s10919_s29 + $0xb0] sm:$0xff]  }
 0x580   : > { %v10313_v38 = vpop.eup %10312  ;;  %v13355_v40 = vadd.f32 %v13151_v39, %v6380_v27  ;;  %v6381_v13 = vadd.f32 %v6309_v29, %v6175_v56  ;;  %v8370_v29 = vunpack.c.l.bf16 %v8660_v50 }
 0x581   : > { %v10315_v1 = vpop.eup %10314  ;;  %v6884_v6 = vmul.f32 %v10313_v38, %v13296_v3  ;;  %10324 = vpow2.f32 %v6651_v44  ;;  %v5858_v10 = vpop.f32.mrb[100].mxu0  ;;  %v7099_v18 = vadd.f32 %v8366_v42, %v6883_v9  ;;  %v6311_v9 = vld [vmem:[#allocation3 + $0x479] sm:$0xff] }
 0x582   : > { %v10317_v52 = vpop.eup %10316  ;;  %v6743_v60 = vadd.f32 1.0, %v10315_v1  ;;  %v6531_v43 = vsub.f32 0.0, %v13355_v40  ;;  %v13360_v34 = vadd.f32 %v13151_v39, %v6381_v13  ;;  %v5859_v36 = vadd.f32 %v5858_v10, %v5452_v63  ;;  %v5860_v45 = vpop.f32.mrb[101].mxu0  ;;  %v5454_v42 = vld [vmem:[#allocation3 + $0x1df] sm:$0xff] }
 0x583   : > { %v7100_v8 = vadd.f32 %v8367_v55, %v6884_v6  ;;  %v6744_v20 = vadd.f32 1.0, %v10317_v52  ;;  %v5861_v7 = vpop.f32.mrb[102].mxu0  ;;  %v8371_v13 = vunpack.c.h.bf16 %v8660_v50 }
 0x584   : > { %10326 = vrcp.f32 %v6743_v60  ;;  %v6653_v3 = vmul.f32 1.442695, %v6531_v43  ;;  %v6532_v23 = vsub.f32 0.0, %v13360_v34  ;;  %v6180_v21 = vadd.f32 %v13184_v2, %v5859_v36  ;;  %v5863_v31 = vpop.f32.mrb[103].mxu0 }
 0x585   : > { %v10319_v16 = vpop.eup %10318  ;;  %v8532_v61 = vpack.c.bf16 %v7100_v8, %v7099_v18  ;;  %10328 = vrcp.f32 %v6744_v20  ;;  %v5862_v5 = vadd.f32 %v5861_v7, %v5453_v48  ;;  %v5455_v8 = vld [vmem:[#allocation3 + $0x1e7] sm:$0xff] }
 0x586   : > { %10330 = vpow2.f32 %v6653_v3  ;;  %v6655_v28 = vmul.f32 1.442695, %v6532_v23  ;;  %v6382_v37 = vadd.f32 %v6310_v25, %v6180_v21  ;;  %v6885_v15 = vmul.f32 %v10319_v16, %v13310_v35  ;;  %v8661_v3 = vld [vmem:[%s10919_s29 + $0xb8] sm:$0xff]   ;;  %v6312_v21 = vld [vmem:[#allocation3 + $0x481] sm:$0xff] }
 0x587   : > { %8694 = vst [vmem:[%s10919_s29 + $0xa8] sm:$0xff] %v8532_v61   ;;  %v6183_v27 = vadd.f32 %v13191_v57, %v5862_v5  ;;  %v8374_v50 = vunpack.c.l.bf16 %v8661_v3 }
 0x588   : > { %v10321_v56 = vpop.eup %10320  ;;  %10332 = vpow2.f32 %v6655_v28  ;;  %v13369_v2 = vadd.f32 %v13151_v39, %v6382_v37  ;;  %v7101_v52 = vadd.f32 %v8370_v29, %v6885_v15  ;;  %v8375_v37 = vunpack.c.h.bf16 %v8661_v3  ;;  %v13386_v15 = vld [vmem:[%s13534_s6] ss:$0 sm:$0xff] }
 0x589   : > { %v10323_v44 = vpop.eup %10322  ;;  %v6886_v38 = vmul.f32 %v10321_v56, %v13318_v41  ;;  %v6383_v1 = vadd.f32 %v6311_v9, %v6183_v27  ;;  %v5866_v6 = vpop.f32.mrb[104].mxu0  ;;  %v6313_v56 = vld [vmem:[#allocation3 + $0x489] sm:$0xff] }
 0x58a   : > { %v6745_v55 = vadd.f32 1.0, %v10323_v44  ;;  %v6533_v35 = vsub.f32 0.0, %v13369_v2  ;;  %v5867_v63 = vadd.f32 %v5866_v6, %v5454_v42  ;;  %v5868_v57 = vpop.f32.mrb[105].mxu0  ;;  %v5456_v44 = vld [vmem:[#allocation3 + $0x1ef] sm:$0xff] }
 0x58b   : > { %v10325_v10 = vpop.eup %10324  ;;  %v7102_v60 = vadd.f32 %v8371_v13, %v6886_v38  ;;  %v13374_v43 = vadd.f32 %v13151_v39, %v6383_v1  ;;  %v5869_v36 = vpop.f32.mrb[106].mxu0 }
 0x58c   : > { %10334 = vrcp.f32 %v6745_v55  ;;  %v6746_v41 = vadd.f32 1.0, %v10325_v10  ;;  %v6657_v45 = vmul.f32 1.442695, %v6533_v35  ;;  %v6188_v18 = vadd.f32 %v13182_v47, %v5867_v63  ;;  %v5871_v20 = vpop.f32.mrb[107].mxu0  ;;  %v5457_v35 = vld [vmem:[#allocation3 + $0x1f7] sm:$0xff] }
 0x58d   : > { %v8537_v7 = vpack.c.bf16 %v7102_v60, %v7101_v52  ;;  %v6534_v23 = vsub.f32 0.0, %v13374_v43  ;;  %v5870_v48 = vadd.f32 %v5869_v36, %v5455_v8  ;;  %v8662_v8 = vld [vmem:[%s10919_s29 + $0xc0] sm:$0xff]  }
 0x58e   : > { %v10327_v31 = vpop.eup %10326  ;;  %10336 = vrcp.f32 %v6746_v41  ;;  %v6384_v16 = vadd.f32 %v6312_v21, %v6188_v18  ;;  %v6315_v21 = vld [vmem:[#allocation3 + $0x499] sm:$0xff] }
 0x58f   : > { %v10329_v39 = vpop.eup %10328  ;;  %8695 = vst [vmem:[%s10919_s29 + $0xb0] sm:$0xff] %v8537_v7   ;;  %v6887_v61 = vmul.f32 %v10327_v31, %v13327_v53  ;;  %10338 = vpow2.f32 %v6657_v45  ;;  %v6659_v25 = vmul.f32 1.442695, %v6534_v23  ;;  %v6191_v5 = vadd.f32 %v13188_v30, %v5870_v48  ;;  %v6314_v45 = vld [vmem:[#allocation3 + $0x491] sm:$0xff] }
 0x590   : > { %v10331_v47 = vpop.eup %10330  ;;  %v6888_v28 = vmul.f32 %v10329_v39, %v13332_v14  ;;  %v13389_v27 = vadd.f32 %v13386_v15, %v6384_v16  ;;  %v8378_v39 = vunpack.c.l.bf16 %v8662_v8 }
 0x591   : > { %v6747_v9 = vadd.f32 1.0, %v10331_v47  ;;  %10340 = vpow2.f32 %v6659_v25  ;;  %v6385_v53 = vadd.f32 %v6313_v56, %v6191_v5  ;;  %v5874_v29 = vpop.f32.mrb[108].mxu0  ;;  %v7103_v38 = vadd.f32 %v8374_v50, %v6887_v61  ;;  %v5458_v5 = vld [vmem:[#allocation3 + $0x1ff] sm:$0xff] }
 0x592   : > { %v10333_v30 = vpop.eup %10332  ;;  %v7104_v13 = vadd.f32 %v8375_v37, %v6888_v28  ;;  %v6535_v14 = vsub.f32 0.0, %v13389_v27  ;;  %v5875_v1 = vadd.f32 %v5874_v29, %v5456_v44  ;;  %v5876_v42 = vpop.f32.mrb[109].mxu0  ;;  %v8379_v25 = vunpack.c.h.bf16 %v8662_v8 }
 0x593   : > { %10342 = vrcp.f32 %v6747_v9  ;;  %v6748_v6 = vadd.f32 1.0, %v10333_v30  ;;  %v13393_v55 = vadd.f32 %v13386_v15, %v6385_v53  ;;  %v5877_v63 = vpop.f32.mrb[110].mxu0  ;;  %v8663_v42 = vld [vmem:[%s10919_s29 + $0xc8] sm:$0xff]  }
 0x594   : > { %v8542_v57 = vpack.c.bf16 %v7104_v13, %v7103_v38  ;;  %v6661_v10 = vmul.f32 1.442695, %v6535_v14  ;;  %v6196_v52 = vadd.f32 %v13206_v12, %v5875_v1  ;;  %v5878_v60 = vadd.f32 %v5877_v63, %v5457_v35  ;;  %v5879_v36 = vpop.f32.mrb[111].mxu0  ;;  %v5459_v38 = vld [vmem:[#allocation3 + $0x207] sm:$0xff] }
 0x595   : > { %10344 = vrcp.f32 %v6748_v6  ;;  %v6536_v41 = vsub.f32 0.0, %v13393_v55  ;;  %v8383_v8 = vunpack.c.h.bf16 %v8663_v42 }
 0x596   : > { %v10335_v18 = vpop.eup %10334  ;;  %8696 = vst [vmem:[%s10919_s29 + $0xb8] sm:$0xff] %v8542_v57   ;;  %10346 = vpow2.f32 %v6661_v10  ;;  %v6386_v20 = vadd.f32 %v6314_v45, %v6196_v52  ;;  %v6199_v7 = vadd.f32 %v13213_v17, %v5878_v60  ;;  %v6316_v10 = vld [vmem:[#allocation3 + $0x4a1] sm:$0xff]  ;;  %v8382_v45 = vunpack.c.l.bf16 %v8663_v42 }
 0x597   : > { %v6889_v3 = vmul.f32 %v10335_v18, %v13342_v58  ;;  %v6663_v23 = vmul.f32 1.442695, %v6536_v41 }
 0x598   : > { %v10337_v48 = vpop.eup %10336  ;;  %v13402_v12 = vadd.f32 %v13386_v15, %v6386_v20  ;;  %v6387_v31 = vadd.f32 %v6315_v21, %v6199_v7  ;;  %v6317_v20 = vld [vmem:[#allocation3 + $0x4a9] sm:$0xff] }
 0x599   : > { %v10339_v16 = vpop.eup %10338  ;;  %v6890_v61 = vmul.f32 %v10337_v48, %v13346_v19  ;;  %10348 = vpow2.f32 %v6663_v23  ;;  %v5882_v47 = vpop.f32.mrb[112].mxu0  ;;  %v7105_v9 = vadd.f32 %v8378_v39, %v6889_v3  ;;  %v5460_v3 = vld [vmem:[#allocation3 + $0x20f] sm:$0xff] }
 0x59a   : > { %v6749_v50 = vadd.f32 1.0, %v10339_v16  ;;  %v6537_v17 = vsub.f32 0.0, %v13402_v12  ;;  %v13407_v58 = vadd.f32 %v13386_v15, %v6387_v31  ;;  %v5883_v28 = vadd.f32 %v5882_v47, %v5458_v5  ;;  %v5884_v37 = vpop.f32.mrb[113].mxu0 }
 0x59b   : > { %v10341_v56 = vpop.eup %10340  ;;  %v7106_v53 = vadd.f32 %v8379_v25, %v6890_v61  ;;  %v5885_v44 = vpop.f32.mrb[114].mxu0  ;;  %v5461_v61 = vld [vmem:[#allocation3 + $0x217] sm:$0xff] }
 0x59c   : > { %10350 = vrcp.f32 %v6749_v50  ;;  %v6750_v19 = vadd.f32 1.0, %v10341_v56  ;;  %v6665_v29 = vmul.f32 1.442695, %v6537_v17  ;;  %v6538_v30 = vsub.f32 0.0, %v13407_v58  ;;  %v5887_v13 = vpop.f32.mrb[115].mxu0 }
 0x59d   : > { %v10343_v14 = vpop.eup %10342  ;;  %v8547_v1 = vpack.c.bf16 %v7106_v53, %v7105_v9  ;;  %v6204_v6 = vadd.f32 %v13201_v33, %v5883_v28  ;;  %v5886_v35 = vadd.f32 %v5885_v44, %v5459_v38  ;;  %v6318_v9 = vld [vmem:[#allocation3 + $0x4b1] sm:$0xff]  ;;  %v6319_v13 = vld [vmem:[#allocation3 + $0x4b9] sm:$0xff] }
 0x59e   : > { %v6891_v63 = vmul.f32 %v10343_v14, %v13355_v40  ;;  %10352 = vrcp.f32 %v6750_v19  ;;  %v6667_v57 = vmul.f32 1.442695, %v6538_v30  ;;  %v8664_v44 = vld [vmem:[%s10919_s29 + $0xd0] sm:$0xff]  }
 0x59f   : > { %v10345_v52 = vpop.eup %10344  ;;  %8697 = vst [vmem:[%s10919_s29 + $0xc0] sm:$0xff] %v8547_v1   ;;  %10354 = vpow2.f32 %v6665_v29  ;;  %v6388_v60 = vadd.f32 %v6316_v10, %v6204_v6  ;;  %v6207_v36 = vadd.f32 %v13210_v24, %v5886_v35  ;;  %v8386_v6 = vunpack.c.l.bf16 %v8664_v44 }
 0x5a0   : > { %v10347_v41 = vpop.eup %10346  ;;  %v6892_v18 = vmul.f32 %v10345_v52, %v13360_v34  ;;  %10356 = vpow2.f32 %v6667_v57  ;;  %v7107_v21 = vadd.f32 %v8382_v45, %v6891_v63  ;;  %v8387_v63 = vunpack.c.h.bf16 %v8664_v44  ;;  %v5462_v57 = vld [vmem:[#allocation3 + $0x21f] sm:$0xff] }
 0x5a1   : > { %v6751_v33 = vadd.f32 1.0, %v10347_v41  ;;  %v13417_v7 = vadd.f32 %v13386_v15, %v6388_v60  ;;  %v6389_v40 = vadd.f32 %v6317_v20, %v6207_v36  ;;  %v5890_v23 = vpop.f32.mrb[116].mxu0 }
 0x5a2   : > { %v7108_v48 = vadd.f32 %v8383_v8, %v6892_v18  ;;  %v5891_v31 = vadd.f32 %v5890_v23, %v5460_v3  ;;  %v5892_v16 = vpop.f32.mrb[117].mxu0  ;;  %v5463_v3 = vld [vmem:[#allocation3 + $0x227] sm:$0xff] }
 0x5a3   : > { %v10349_v24 = vpop.eup %10348  ;;  %10358 = vrcp.f32 %v6751_v33  ;;  %v6539_v34 = vsub.f32 0.0, %v13417_v7  ;;  %v13421_v39 = vadd.f32 %v13386_v15, %v6389_v40  ;;  %v5893_v25 = vpop.f32.mrb[118].mxu0 }
 0x5a4   : > { %v8552_v5 = vpack.c.bf16 %v7108_v48, %v7107_v21  ;;  %v6752_v47 = vadd.f32 1.0, %v10349_v24  ;;  %v6212_v50 = vadd.f32 %v13228_v51, %v5891_v31  ;;  %v5894_v17 = vadd.f32 %v5893_v25, %v5461_v61  ;;  %v5895_v28 = vpop.f32.mrb[119].mxu0  ;;  %v6320_v31 = vld [vmem:[#allocation3 + $0x4c1] sm:$0xff]  ;;  %v8665_v24 = vld [vmem:[%s10919_s29 + $0xd8] sm:$0xff]  }
 0x5a5   : > { %v6669_v37 = vmul.f32 1.442695, %v6539_v34  ;;  %v6540_v56 = vsub.f32 0.0, %v13421_v39  ;;  %v8390_v28 = vunpack.c.l.bf16 %v8665_v24 }
 0x5a6   : > { %v10351_v53 = vpop.eup %10350  ;;  %8698 = vst [vmem:[%s10919_s29 + $0xc8] sm:$0xff] %v8552_v5   ;;  %10360 = vrcp.f32 %v6752_v47  ;;  %v6390_v19 = vadd.f32 %v6318_v9, %v6212_v50  ;;  %v6215_v29 = vadd.f32 %v13236_v54, %v5894_v17  ;;  %v6321_v50 = vld [vmem:[#allocation3 + $0x4c9] sm:$0xff] }
 0x5a7   : > { %v6893_v30 = vmul.f32 %v10351_v53, %v13369_v2  ;;  %10362 = vpow2.f32 %v6669_v37  ;;  %v6671_v38 = vmul.f32 1.442695, %v6540_v56  ;;  %v8391_v56 = vunpack.c.h.bf16 %v8665_v24  ;;  %v5464_v53 = vld [vmem:[#allocation3 + $0x22f] sm:$0xff] }
 0x5a8   : > { %v10353_v14 = vpop.eup %10352  ;;  %v13430_v51 = vadd.f32 %v13386_v15, %v6390_v19  ;;  %v6391_v1 = vadd.f32 %v6319_v13, %v6215_v29 }
 0x5a9   : > { %v10355_v42 = vpop.eup %10354  ;;  %v6894_v35 = vmul.f32 %v10353_v14, %v13374_v43  ;;  %10364 = vpow2.f32 %v6671_v38  ;;  %v5898_v10 = vpop.f32.mrb[120].mxu0  ;;  %v7109_v45 = vadd.f32 %v8386_v6, %v6893_v30 }
 0x5aa   : > { %v10357_v52 = vpop.eup %10356  ;;  %v6753_v54 = vadd.f32 1.0, %v10355_v42  ;;  %v6541_v2 = vsub.f32 0.0, %v13430_v51  ;;  %v13435_v60 = vadd.f32 %v13386_v15, %v6391_v1  ;;  %v5899_v36 = vadd.f32 %v5898_v10, %v5462_v57  ;;  %v5900_v41 = vpop.f32.mrb[121].mxu0  ;;  %v8666_v10 = vld [vmem:[%s10919_s29 + $0xe0] sm:$0xff]  }
 0x5ab   : > { %v7110_v18 = vadd.f32 %v8387_v63, %v6894_v35  ;;  %v6754_v8 = vadd.f32 1.0, %v10357_v52  ;;  %v5901_v20 = vpop.f32.mrb[122].mxu0  ;;  %v5465_v35 = vld [vmem:[#allocation3 + $0x237] sm:$0xff] }
 0x5ac   : > { %10366 = vrcp.f32 %v6753_v54  ;;  %v6673_v43 = vmul.f32 1.442695, %v6541_v2  ;;  %v6542_v33 = vsub.f32 0.0, %v13435_v60  ;;  %v6220_v40 = vadd.f32 %v13223_v4, %v5899_v36  ;;  %v5903_v23 = vpop.f32.mrb[123].mxu0  ;;  %v6322_v54 = vld [vmem:[#allocation3 + $0x4d1] sm:$0xff] }
 0x5ad   : > { %v10359_v21 = vpop.eup %10358  ;;  %v8557_v48 = vpack.c.bf16 %v7110_v18, %v7109_v45  ;;  %10368 = vrcp.f32 %v6754_v8  ;;  %v5902_v16 = vadd.f32 %v5901_v20, %v5463_v3  ;;  %v6323_v23 = vld [vmem:[#allocation3 + $0x4d9] sm:$0xff] }
 0x5ae   : > { %10370 = vpow2.f32 %v6673_v43  ;;  %v6675_v34 = vmul.f32 1.442695, %v6542_v33  ;;  %v6392_v61 = vadd.f32 %v6320_v31, %v6220_v40  ;;  %v6895_v25 = vmul.f32 %v10359_v21, %v13389_v27  ;;  %v5466_v31 = vld [vmem:[#allocation3 + $0x23f] sm:$0xff] }
 0x5af   : > { %8699 = vst [vmem:[%s10919_s29 + $0xd0] sm:$0xff] %v8557_v48   ;;  %v6223_v5 = vadd.f32 %v13231_v49, %v5902_v16  ;;  %v8394_v43 = vunpack.c.l.bf16 %v8666_v10  ;;  %v8395_v40 = vunpack.c.h.bf16 %v8666_v10 }
 0x5b0   : > { %v10361_v47 = vpop.eup %10360  ;;  %10372 = vpow2.f32 %v6675_v34  ;;  %v13444_v4 = vadd.f32 %v13386_v15, %v6392_v61  ;;  %v7111_v38 = vadd.f32 %v8390_v28, %v6895_v25 }
 0x5b1   : > { %v10363_v17 = vpop.eup %10362  ;;  %v6896_v37 = vmul.f32 %v10361_v47, %v13393_v55  ;;  %v6393_v9 = vadd.f32 %v6321_v50, %v6223_v5  ;;  %v5906_v44 = vpop.f32.mrb[124].mxu0  ;;  %v5467_v47 = vld [vmem:[#allocation3 + $0x247] sm:$0xff] }
 0x5b2   : > { %v6755_v19 = vadd.f32 1.0, %v10363_v17  ;;  %v6543_v27 = vsub.f32 0.0, %v13444_v4  ;;  %v5907_v29 = vadd.f32 %v5906_v44, %v5464_v53  ;;  %v5908_v49 = vpop.f32.mrb[125].mxu0  ;;  %v6324_v44 = vld [vmem:[#allocation3 + $0x4e1] sm:$0xff] }
 0x5b3   : > { %v10365_v30 = vpop.eup %10364  ;;  %v7112_v13 = vadd.f32 %v8391_v56, %v6896_v37  ;;  %v13449_v14 = vadd.f32 %v13386_v15, %v6393_v9  ;;  %v5909_v1 = vpop.f32.mrb[126].mxu0 }
 0x5b4   : > { %10374 = vrcp.f32 %v6755_v19  ;;  %v6756_v55 = vadd.f32 1.0, %v10365_v30  ;;  %v6677_v42 = vmul.f32 1.442695, %v6543_v27  ;;  %v6228_v6 = vadd.f32 %v13250_v0, %v5907_v29  ;;  %v5911_v63 = vpop.f32.mrb[127].mxu0  ;;  %v8667_v27 = vld [vmem:[%s10919_s29 + $0xe8] sm:$0xff]  }
 0x5b5   : > { %v8562_v57 = vpack.c.bf16 %v7112_v13, %v7111_v38  ;;  %v6544_v52 = vsub.f32 0.0, %v13449_v14  ;;  %v5910_v2 = vadd.f32 %v5909_v1, %v5465_v35  ;;  %v6325_v13 = vld [vmem:[#allocation3 + $0x4e9] sm:$0xff]  ;;  %v8399_v63 = vunpack.c.h.bf16 %v8667_v27 }
 0x5b6   : > { %v10367_v36 = vpop.eup %10366  ;;  %10376 = vrcp.f32 %v6756_v55  ;;  %v6394_v41 = vadd.f32 %v6322_v54, %v6228_v6  ;;  %v8398_v6 = vunpack.c.l.bf16 %v8667_v27  ;;  %v5471_v27 = vld [vmem:[#allocation3 + $0x267] sm:$0xff] }
 0x5b7   : > { %v10369_v45 = vpop.eup %10368  ;;  %8700 = vst [vmem:[%s10919_s29 + $0xd8] sm:$0xff] %v8562_v57   ;;  %v6897_v18 = vmul.f32 %v10367_v36, %v13402_v12  ;;  %10378 = vpow2.f32 %v6677_v42  ;;  %v6679_v8 = vmul.f32 1.442695, %v6544_v52  ;;  %v6231_v20 = vadd.f32 %v13258_v46, %v5910_v2  ;;  %v5468_v57 = vld [vmem:[#allocation3 + $0x24f] sm:$0xff] }
 0x5b8   : > { %v10371_v0 = vpop.eup %10370  ;;  %v6898_v33 = vmul.f32 %v10369_v45, %v13407_v58  ;;  %v13459_v3 = vadd.f32 %v13386_v15, %v6394_v41 }
 0x5b9   : > { %v6757_v21 = vadd.f32 1.0, %v10371_v0  ;;  %10380 = vpow2.f32 %v6679_v8  ;;  %v6395_v48 = vadd.f32 %v6323_v23, %v6231_v20  ;;  %v5914_v16 = vpop.f32.mrb[128].mxu0  ;;  %v7113_v12 = vadd.f32 %v8394_v43, %v6897_v18  ;;  %v5469_v0 = vld [vmem:[#allocation3 + $0x257] sm:$0xff] }
 0x5ba   : > { %v10373_v24 = vpop.eup %10372  ;;  %v7114_v34 = vadd.f32 %v8395_v40, %v6898_v33  ;;  %v6545_v61 = vsub.f32 0.0, %v13459_v3  ;;  %v5915_v46 = vadd.f32 %v5914_v16, %v5466_v31  ;;  %v5916_v25 = vpop.f32.mrb[129].mxu0  ;;  %v8668_v23 = vld [vmem:[%s10919_s29 + $0xf0] sm:$0xff]  }
 0x5bb   : > { %10382 = vrcp.f32 %v6757_v21  ;;  %v6758_v58 = vadd.f32 1.0, %v10373_v24  ;;  %v13463_v5 = vadd.f32 %v13386_v15, %v6395_v48  ;;  %v5917_v50 = vpop.f32.mrb[130].mxu0  ;;  %v6326_v24 = vld [vmem:[#allocation3 + $0x4f1] sm:$0xff]  ;;  %v8402_v25 = vunpack.c.l.bf16 %v8668_v23 }
 0x5bc   : > { %v8567_v17 = vpack.c.bf16 %v7114_v34, %v7113_v12  ;;  %v6681_v28 = vmul.f32 1.442695, %v6545_v61  ;;  %v6236_v37 = vadd.f32 %v13248_v26, %v5915_v46  ;;  %v5918_v56 = vadd.f32 %v5917_v50, %v5467_v47  ;;  %v5919_v9 = vpop.f32.mrb[131].mxu0  ;;  %v6327_v50 = vld [vmem:[#allocation3 + $0x4f9] sm:$0xff] }
 0x5bd   : > { %10384 = vrcp.f32 %v6758_v58  ;;  %v6546_v53 = vsub.f32 0.0, %v13463_v5  ;;  %v8403_v47 = vunpack.c.h.bf16 %v8668_v23 }
 0x5be   : > { %v10375_v19 = vpop.eup %10374  ;;  %8701 = vst [vmem:[%s10919_s29 + $0xe0] sm:$0xff] %v8567_v17   ;;  %10386 = vpow2.f32 %v6681_v28  ;;  %v6396_v29 = vadd.f32 %v6324_v44, %v6236_v37  ;;  %v6239_v49 = vadd.f32 %v13254_v32, %v5918_v56  ;;  %v5470_v28 = vld [vmem:[#allocation3 + $0x25f] sm:$0xff] }
 0x5bf   : > { %v6899_v30 = vmul.f32 %v10375_v19, %v13417_v7  ;;  %v6683_v38 = vmul.f32 1.442695, %v6546_v53 }
 0x5c0   : > { %v10377_v1 = vpop.eup %10376  ;;  %v13472_v26 = vadd.f32 %v13386_v15, %v6396_v29  ;;  %v6397_v55 = vadd.f32 %v6325_v13, %v6239_v49 }
 0x5c1   : > { %v10379_v42 = vpop.eup %10378  ;;  %v6900_v35 = vmul.f32 %v10377_v1, %v13421_v39  ;;  %10388 = vpow2.f32 %v6683_v38  ;;  %v5922_v10 = vpop.f32.mrb[132].mxu0  ;;  %v7115_v41 = vadd.f32 %v8398_v6, %v6899_v30  ;;  %v6328_v6 = vld [vmem:[#allocation3 + $0x501] sm:$0xff] }
 0x5c2   : > { %v6759_v52 = vadd.f32 1.0, %v10379_v42  ;;  %v6547_v32 = vsub.f32 0.0, %v13472_v26  ;;  %v13477_v7 = vadd.f32 %v13386_v15, %v6397_v55  ;;  %v5923_v54 = vadd.f32 %v5922_v10, %v5468_v57  ;;  %v5924_v2 = vpop.f32.mrb[133].mxu0 }
 0x5c3   : > { %v10381_v36 = vpop.eup %10380  ;;  %v7116_v45 = vadd.f32 %v8399_v63, %v6900_v35  ;;  %v5925_v18 = vpop.f32.mrb[134].mxu0  ;;  %v8669_v63 = vld [vmem:[%s10919_s29 + $0xf8] sm:$0xff]  }
 0x5c4   : > { %10390 = vrcp.f32 %v6759_v52  ;;  %v6760_v39 = vadd.f32 1.0, %v10381_v36  ;;  %v6685_v8 = vmul.f32 1.442695, %v6547_v32  ;;  %v6548_v20 = vsub.f32 0.0, %v13477_v7  ;;  %v5927_v43 = vpop.f32.mrb[135].mxu0 }
 0x5c5   : > { %v10383_v33 = vpop.eup %10382  ;;  %v8572_v40 = vpack.c.bf16 %v7116_v45, %v7115_v41  ;;  %v5926_v21 = vadd.f32 %v5925_v18, %v5469_v0  ;;  %v6244_v48 = vadd.f32 %v13306_v59, %v5923_v54  ;;  %v6329_v54 = vld [vmem:[#allocation3 + $0x509] sm:$0xff]  ;;  %v8406_v45 = vunpack.c.l.bf16 %v8669_v63 }
 0x5c6   : > { %v6901_v31 = vmul.f32 %v10383_v33, %v13430_v51  ;;  %10392 = vrcp.f32 %v6760_v39  ;;  %v6687_v16 = vmul.f32 1.442695, %v6548_v20  ;;  %v8407_v39 = vunpack.c.h.bf16 %v8669_v63 }
 0x5c7   : > { %v10385_v12 = vpop.eup %10384  ;;  %8702 = vst [vmem:[%s10919_s29 + $0xe8] sm:$0xff] %v8572_v40   ;;  %10394 = vpow2.f32 %v6685_v8  ;;  %v6398_v34 = vadd.f32 %v6326_v24, %v6244_v48  ;;  %v6247_v61 = vadd.f32 %v13315_v22, %v5926_v21  ;;  %v8670_v48 = vld [vmem:[%s10919_s29 + $0x100] sm:$0xff]  }
 0x5c8   : > { %v10387_v46 = vpop.eup %10386  ;;  %v6902_v58 = vmul.f32 %v10385_v12, %v13435_v60  ;;  %10396 = vpow2.f32 %v6687_v16  ;;  %v7117_v56 = vadd.f32 %v8402_v25, %v6901_v31  ;;  %v8410_v12 = vunpack.c.l.bf16 %v8670_v48 }
 0x5c9   : > { %v6761_v17 = vadd.f32 1.0, %v10387_v46  ;;  %v13487_v59 = vadd.f32 %v13386_v15, %v6398_v34  ;;  %v6399_v51 = vadd.f32 %v6327_v50, %v6247_v61  ;;  %v5930_v37 = vpop.f32.mrb[136].mxu0  ;;  %v8411_v61 = vunpack.c.h.bf16 %v8670_v48 }
 0x5ca   : > { %v7118_v9 = vadd.f32 %v8403_v47, %v6902_v58  ;;  %v5931_v53 = vadd.f32 %v5930_v37, %v5470_v28  ;;  %v5932_v44 = vpop.f32.mrb[137].mxu0 }
 0x5cb   : > { %v10389_v22 = vpop.eup %10388  ;;  %10398 = vrcp.f32 %v6761_v17  ;;  %v6549_v60 = vsub.f32 0.0, %v13487_v59  ;;  %v13491_v19 = vadd.f32 %v13386_v15, %v6399_v51  ;;  %v5933_v29 = vpop.f32.mrb[138].mxu0  ;;  %v8671_v51 = vld [vmem:[%s10919_s29 + $0x108] sm:$0xff]  }
 0x5cc   : > { %v8577_v49 = vpack.c.bf16 %v7118_v9, %v7117_v56  ;;  %v6762_v30 = vadd.f32 1.0, %v10389_v22  ;;  %v6252_v38 = vadd.f32 %v13301_v62, %v5931_v53  ;;  %v5934_v13 = vadd.f32 %v5933_v29, %v5471_v27  ;;  %v5935_v1 = vpop.f32.mrb[139].mxu0 }
 0x5cd   : > { %v6689_v55 = vmul.f32 1.442695, %v6549_v60  ;;  %v6550_v42 = vsub.f32 0.0, %v13491_v19  ;;  %v8414_v9 = vunpack.c.l.bf16 %v8671_v51  ;;  %v8415_v53 = vunpack.c.h.bf16 %v8671_v51 }
 0x5ce   : > { %v10391_v35 = vpop.eup %10390  ;;  %8703 = vst [vmem:[%s10919_s29 + $0xf0] sm:$0xff] %v8577_v49   ;;  %10400 = vrcp.f32 %v6762_v30  ;;  %v6400_v57 = vadd.f32 %v6328_v6, %v6252_v38  ;;  %v6255_v10 = vadd.f32 %v13312_v11, %v5934_v13  ;;  %v8672_v38 = vld [vmem:[%s10919_s29 + $0x110] sm:$0xff]  }
 0x5cf   : > { %v6903_v52 = vmul.f32 %v10391_v35, %v13444_v4  ;;  %10402 = vpow2.f32 %v6689_v55  ;;  %v6691_v32 = vmul.f32 1.442695, %v6550_v42  ;;  %v8418_v1 = vunpack.c.l.bf16 %v8672_v38 }
 0x5d0   : > { %v10393_v2 = vpop.eup %10392  ;;  %v13500_v62 = vadd.f32 %v13386_v15, %v6400_v57  ;;  %v6401_v36 = vadd.f32 %v6329_v54, %v6255_v10  ;;  %v8419_v55 = vunpack.c.h.bf16 %v8672_v38  ;;  %v8673_v57 = vld [vmem:[%s10919_s29 + $0x118] sm:$0xff]  }
 0x5d1   : > { %v10395_v41 = vpop.eup %10394  ;;  %v6904_v18 = vmul.f32 %v10393_v2, %v13449_v14  ;;  %10404 = vpow2.f32 %v6691_v32  ;;  %v7119_v0 = vadd.f32 %v8406_v45, %v6903_v52  ;;  %v8422_v32 = vunpack.c.l.bf16 %v8673_v57 }
 0x5d2   : > { %v10397_v8 = vpop.eup %10396  ;;  %v6763_v11 = vadd.f32 1.0, %v10395_v41  ;;  %v6551_v4 = vsub.f32 0.0, %v13500_v62  ;;  %v13505_v20 = vadd.f32 %v13386_v15, %v6401_v36  ;;  %v8423_v2 = vunpack.c.h.bf16 %v8673_v57 }
 0x5d3   : > { %v7120_v43 = vadd.f32 %v8407_v39, %v6904_v18  ;;  %v6764_v33 = vadd.f32 1.0, %v10397_v8 }
 0x5d4   : > { %10406 = vrcp.f32 %v6763_v11  ;;  %v6693_v40 = vmul.f32 1.442695, %v6551_v4  ;;  %v6552_v23 = vsub.f32 0.0, %v13505_v20 }
 0x5d5   : > { %v10399_v21 = vpop.eup %10398  ;;  %v8582_v14 = vpack.c.bf16 %v7120_v43, %v7119_v0  ;;  %10408 = vrcp.f32 %v6764_v33 }
 0x5d6   : > { %10410 = vpow2.f32 %v6693_v40  ;;  %v6695_v31 = vmul.f32 1.442695, %v6552_v23  ;;  %v6905_v16 = vmul.f32 %v10399_v21, %v13459_v3 }
 0x5d7   : > { %8704 = vst [vmem:[%s10919_s29 + $0xf8] sm:$0xff] %v8582_v14  }
 0x5d8   : > { %v10401_v24 = vpop.eup %10400  ;;  %10412 = vpow2.f32 %v6695_v31  ;;  %v7121_v58 = vadd.f32 %v8410_v12, %v6905_v16 }
 0x5d9   : > { %v10403_v15 = vpop.eup %10402  ;;  %v6906_v34 = vmul.f32 %v10401_v24, %v13463_v5 }
 0x5da   : > { %v6765_v46 = vadd.f32 1.0, %v10403_v15 }
 0x5db   : > { %v10405_v25 = vpop.eup %10404  ;;  %v7122_v47 = vadd.f32 %v8411_v61, %v6906_v34 }
 0x5dc   : > { %10414 = vrcp.f32 %v6765_v46  ;;  %v6766_v50 = vadd.f32 1.0, %v10405_v25 }
 0x5dd   : > { %v8587_v17 = vpack.c.bf16 %v7122_v47, %v7121_v58 }
 0x5de   : > { %v10407_v28 = vpop.eup %10406  ;;  %10416 = vrcp.f32 %v6766_v50 }
 0x5df   : > { %v10409_v37 = vpop.eup %10408  ;;  %8705 = vst [vmem:[%s10919_s29 + $0x100] sm:$0xff] %v8587_v17   ;;  %v6907_v3 = vmul.f32 %v10407_v28, %v13472_v26 }
 0x5e0   : > { %v10411_v56 = vpop.eup %10410  ;;  %v6908_v5 = vmul.f32 %v10409_v37, %v13477_v7 }
 0x5e1   : > { %v6767_v44 = vadd.f32 1.0, %v10411_v56  ;;  %v7123_v60 = vadd.f32 %v8414_v9, %v6907_v3 }
 0x5e2   : > { %v10413_v22 = vpop.eup %10412  ;;  %v7124_v27 = vadd.f32 %v8415_v53, %v6908_v5 }
 0x5e3   : > { %10418 = vrcp.f32 %v6767_v44  ;;  %v6768_v29 = vadd.f32 1.0, %v10413_v22 }
 0x5e4   : > { %v8592_v49 = vpack.c.bf16 %v7124_v27, %v7123_v60 }
 0x5e5   : > { %10420 = vrcp.f32 %v6768_v29 }
 0x5e6   : > { %v10415_v30 = vpop.eup %10414  ;;  %8706 = vst [vmem:[%s10919_s29 + $0x108] sm:$0xff] %v8592_v49  }
 0x5e7   : > { %v6909_v26 = vmul.f32 %v10415_v30, %v13487_v59 }
 0x5e8   : > { %v10417_v13 = vpop.eup %10416 }
 0x5e9   : > { %v6910_v7 = vmul.f32 %v10417_v13, %v13491_v19  ;;  %v7125_v42 = vadd.f32 %v8418_v1, %v6909_v26 }
 0x5eb   : > { %v7126_v6 = vadd.f32 %v8419_v55, %v6910_v7 }
 0x5ed   : > { %v10419_v35 = vpop.eup %10418  ;;  %v8597_v63 = vpack.c.bf16 %v7126_v6, %v7125_v42 }
 0x5ee   : > { %v6911_v10 = vmul.f32 %v10419_v35, %v13500_v62 }
 0x5ef   : > { %v10421_v52 = vpop.eup %10420  ;;  %8707 = vst [vmem:[%s10919_s29 + $0x110] sm:$0xff] %v8597_v63  }
 0x5f0   : > { %v6912_v54 = vmul.f32 %v10421_v52, %v13505_v20  ;;  %v7127_v59 = vadd.f32 %v8422_v32, %v6911_v10 }
 0x5f2   : > { %v7128_v36 = vadd.f32 %v8423_v2, %v6912_v54 }
 0x5f4   : > { %v8602_v41 = vpack.c.bf16 %v7128_v36, %v7127_v59 }
 0x5f6   : > { %8708 = vst [vmem:[%s10919_s29 + $0x118] sm:$0xff] %v8602_v41  }
 0x5f7 PF: > { %s18_s27 = sadd.s32 1, %s10432_s27  }
 0x5f8   : > { %p15_p4 = scmp.ge.s32.totalorder %s18_s27, 4  }
 0x5fa   :  { %17 = sbr.rel (!%p15_p4) target bundleno = 1 (0x1), region = 85 }

</bundles_post_ra>
